<compile_context>
chip_gen: v6e
topology: v6e:2x2x1
jax: 0.10.0
libtpu: 0.0.40
codegen_flags: <defaults>
</compile_context>

<pallas_src>
import functools

import jax
import jax.numpy as jnp
from jax.experimental import pallas as pl
from jax.experimental.pallas import tpu as pltpu

# ----------------------------------- configuration -----------------------------------
IMG = 28                 # spatial size implied by feature.view(-1, 50*4*4)
KSIZE = 5
C1_OUT = 64              # f_conv1 out channels
C2_OUT = 50              # f_conv2 out channels
HIDDEN = 100             # classifier hidden width
N_CLASSES = 2
BN_EPS = 1e-5

C_PAD = 128              # lane-dense channel padding
HID_PAD = 128
NCLS_PAD = 128

CONV1_HW = IMG - KSIZE + 1          # 24
POOL1_HW = CONV1_HW // 2            # 12
CONV2_HW = POOL1_HW - KSIZE + 1     # 8
POOL2_HW = CONV2_HW // 2            # 4
FEAT_REAL = C2_OUT * POOL2_HW * POOL2_HW        # 800 == 50*4*4
FEAT_PAD = C_PAD * POOL2_HW * POOL2_HW          # 2048 (channel-padded NHWC flatten)


def _round_up(x, m):
    return (x + m - 1) // m * m


# =================================== Pallas kernels ===================================

def _conv_tap_kernel(x_ref, w_ref, shift_ref, o_ref, *, ow, m, kh):
    """Fused conv (as kh row-tap matmuls over a resident patch slab) + folded-BN shift.

    x_ref:     (H*OW, Kp)   bf16  per-batch kw-wide patch slab (resident in VMEM)
    w_ref:     (kh, Kp, N)  bf16  per-row-tap weight matrices (BN scale folded in)
    shift_ref: (1, N)       f32   folded BN shift (+ conv bias)
    o_ref:     (m, N)       bf16  m = OH*OW
    """
    n = o_ref.shape[-1]
    acc = jnp.zeros((m, n), jnp.float32)
    for r in range(kh):                               # static unroll over row taps
        a = x_ref[pl.ds(r * ow, m), :]                # static, 8-aligned offset
        acc = acc + jnp.dot(a, w_ref[r], preferred_element_type=jnp.float32)
    o_ref[...] = (acc + shift_ref[...]).astype(o_ref.dtype)


def _maxpool_relu_kernel(x_ref, o_ref):
    """x_ref: (4, M, C) stacked non-overlapping 2x2 windows -> max over windows + ReLU."""
    m = jnp.max(x_ref[...], axis=0)
    o_ref[...] = jnp.maximum(m, jnp.zeros_like(m))


def _masked_log_softmax(x, n_valid):
    """Log-softmax over the first n_valid lanes of x (padded lanes produce garbage)."""
    col = jax.lax.broadcasted_iota(jnp.int32, x.shape, 1)
    xm = jnp.where(col < n_valid, x, -3.0e38)
    mx = jnp.max(xm, axis=-1, keepdims=True)
    e = jnp.exp(xm - mx)                              # padded lanes underflow to 0
    lse = jnp.log(jnp.sum(e, axis=-1, keepdims=True))
    return x - mx - lse


def _head_kernel(f_ref, w1_ref, s1_ref, wc2_ref, sc2_ref, wc3_ref, bc3_ref,
                 wd2_ref, bd2_ref, co_ref, do_ref, *, n_cls):
    """Entire classifier head in one kernel:
       fused (c_fc1|d_fc1)+BN+ReLU -> class: fc2+BN+ReLU, fc3 -> log-softmax
                                      domain: fc2          -> log-softmax
    """
    h = jnp.dot(f_ref[...], w1_ref[...], preferred_element_type=jnp.float32)
    h = jnp.maximum(h + s1_ref[...], 0.0)             # (rows, 2*HID_PAD) f32
    hc = h[:, :HID_PAD].astype(jnp.bfloat16)          # class branch hidden
    hd = h[:, HID_PAD:].astype(jnp.bfloat16)          # domain branch hidden
    # c_drop1: nn.Dropout() — identity at inference.
    h2 = jnp.dot(hc, wc2_ref[...], preferred_element_type=jnp.float32) + sc2_ref[...]
    h2 = jnp.maximum(h2, 0.0).astype(jnp.bfloat16)
    lc = jnp.dot(h2, wc3_ref[...], preferred_element_type=jnp.float32) + bc3_ref[...]
    ld = jnp.dot(hd, wd2_ref[...], preferred_element_type=jnp.float32) + bd2_ref[...]
    co_ref[...] = _masked_log_softmax(lc, n_cls)
    do_ref[...] = _masked_log_softmax(ld, n_cls)


# ================================ Pallas call wrappers =================================

def _row_patches(x, kw, kp):
    """x: (B, H, W, C) -> (B, H*OW, kp) kw-wide patch slab, K padded to kp (bf16)."""
    B, H, W, C = x.shape
    OW = W - kw + 1
    cols = [x[:, :, j:j + OW, :] for j in range(kw)]
    p = jnp.concatenate(cols, axis=-1)                        # (B, H, OW, kw*C)
    p = jnp.pad(p, ((0, 0), (0, 0), (0, 0), (0, kp - kw * C)))
    return p.reshape(B, H * OW, kp)


def conv_bn(x, w_taps, shift):
    """Conv2d (+bias) + folded eval-mode BatchNorm2d.  NHWC in / NHWC (C padded) out."""
    B, H, W, _ = x.shape
    kh, kp, n = w_taps.shape
    OH, OW = H - kh + 1, W - kh + 1
    m = OH * OW
    patches = _row_patches(x.astype(jnp.bfloat16), kh, kp)    # (B, H*OW, kp)
    out = pl.pallas_call(
        functools.partial(_conv_tap_kernel, ow=OW, m=m, kh=kh),
        out_shape=jax.ShapeDtypeStruct((B, m, n), jnp.bfloat16),
        grid=(B,),
        in_specs=[
            pl.BlockSpec((None, H * OW, kp), lambda b: (b, 0, 0)),
            pl.BlockSpec((kh, kp, n), lambda b: (0, 0, 0)),
            pl.BlockSpec((1, n), lambda b: (0, 0)),
        ],
        out_specs=pl.BlockSpec((None, m, n), lambda b: (b, 0, 0)),
        compiler_params=pltpu.CompilerParams(dimension_semantics=("parallel",)),
    )(patches, w_taps, shift)
    return out.reshape(B, OH, OW, n)


def maxpool2_relu(x):
    """MaxPool2d(2) + ReLU (order-equivalent: relu∘max == max∘relu).  NHWC."""
    B, H, W, C = x.shape
    OH, OW = H // 2, W // 2
    wins = jnp.stack([x[:, 0::2, 0::2, :], x[:, 0::2, 1::2, :],
                      x[:, 1::2, 0::2, :], x[:, 1::2, 1::2, :]], axis=0)
    wins = wins.reshape(4, B * OH * OW, C)                    # non-overlapping: no inflation
    out = pl.pallas_call(
        _maxpool_relu_kernel,
        out_shape=jax.ShapeDtypeStruct((B * OH * OW, C), x.dtype),
    )(wins)
    return out.reshape(B, OH, OW, C)


def fused_heads(feat, prep):
    """Both classifier heads in a single pallas_call.  feat: (B, FEAT_PAD) bf16."""
    B = feat.shape[0]
    rows = _round_up(B, 8)
    featp = jnp.pad(feat.astype(jnp.bfloat16), ((0, rows - B), (0, 0)))
    co, do = pl.pallas_call(
        functools.partial(_head_kernel, n_cls=N_CLASSES),
        out_shape=(jax.ShapeDtypeStruct((rows, NCLS_PAD), jnp.float32),
                   jax.ShapeDtypeStruct((rows, NCLS_PAD), jnp.float32)),
    )(featp, prep["w_fc1"], prep["t_fc1"],
      prep["w_cfc2"], prep["t_cfc2"], prep["w_cfc3"], prep["t_cfc3"],
      prep["w_dfc2"], prep["t_dfc2"])
    return co[:B, :N_CLASSES], do[:B, :N_CLASSES]


# ============================ parameters (torch-like) & prep ============================

class _Rng:
    def __init__(self, key):
        self._key = key

    def __call__(self):
        self._key, sub = jax.random.split(self._key)
        return sub


def conv_init(rng, cout, cin, k):
    return {"w": 0.05 * jax.random.normal(rng(), (cout, cin, k, k), jnp.float32),
            "b": 0.05 * jax.random.normal(rng(), (cout,), jnp.float32)}


def linear_init(rng, cout, cin):
    return {"w": 0.05 * jax.random.normal(rng(), (cout, cin), jnp.float32),
            "b": 0.05 * jax.random.normal(rng(), (cout,), jnp.float32)}


def bn_init(rng, c):
    return {"gamma": 1.0 + 0.1 * jax.random.normal(rng(), (c,), jnp.float32),
            "beta": 0.1 * jax.random.normal(rng(), (c,), jnp.float32),
            "mean": 0.1 * jax.random.normal(rng(), (c,), jnp.float32),
            "var": 0.5 + jax.random.uniform(rng(), (c,), jnp.float32)}


def init_params(key):
    rng = _Rng(key)
    return {
        "f_conv1": conv_init(rng, C1_OUT, 3, KSIZE), "f_bn1": bn_init(rng, C1_OUT),
        "f_conv2": conv_init(rng, C2_OUT, C1_OUT, KSIZE), "f_bn2": bn_init(rng, C2_OUT),
        "c_fc1": linear_init(rng, HIDDEN, FEAT_REAL), "c_bn1": bn_init(rng, HIDDEN),
        "c_fc2": linear_init(rng, HIDDEN, HIDDEN), "c_bn2": bn_init(rng, HIDDEN),
        "c_fc3": linear_init(rng, N_CLASSES, HIDDEN),
        "d_fc1": linear_init(rng, HIDDEN, FEAT_REAL), "d_bn1": bn_init(rng, HIDDEN),
        "d_fc2": linear_init(rng, N_CLASSES, HIDDEN),
    }


def fold_bn(bn):
    # TODO(synk): eval-mode (running-stat) BN only; train-mode batch statistics not done.
    s = bn["gamma"] * jax.lax.rsqrt(bn["var"] + BN_EPS)
    t = bn["beta"] - bn["mean"] * s
    return s, t


def prep_conv_bn(conv, bn, cin_in_patches, cout_pad):
    """(Cout,Cin,kh,kw) torch conv + BN -> (kh, Kp, Cout_pad) bf16 row-tap mats + shift."""
    w, b = conv["w"], conv["b"]
    cout, cin, kh, kw = w.shape
    s, t = fold_bn(bn)
    shift = b * s + t
    w = w * s[:, None, None, None]                       # fold BN scale into weights
    w = jnp.transpose(w, (2, 3, 1, 0))                   # (kh, kw, Cin, Cout)
    w = jnp.pad(w, ((0, 0), (0, 0), (0, cin_in_patches - cin), (0, 0)))
    w = w.reshape(kh, kw * cin_in_patches, cout)
    kp = _round_up(kw * cin_in_patches, 128)
    w = jnp.pad(w, ((0, 0), (0, kp - kw * cin_in_patches), (0, cout_pad - cout)))
    shift = jnp.pad(shift, (0, cout_pad - cout)).reshape(1, cout_pad)
    return w.astype(jnp.bfloat16), shift.astype(jnp.float32)


def _fc1_remap(lin, bn):
    """Linear(800->100)+BN, remapped from torch (c,h,w) flatten to our padded (h,w,c)."""
    w, b = lin["w"], lin["b"]                            # (HIDDEN, 800)
    s, t = fold_bn(bn)
    shift = b * s + t
    w = w * s[:, None]
    w = w.reshape(HIDDEN, C2_OUT, POOL2_HW, POOL2_HW)    # (out, c, h, w)
    w = jnp.transpose(w, (0, 2, 3, 1))                   # (out, h, w, c)
    w = jnp.pad(w, ((0, 0), (0, 0), (0, 0), (0, C_PAD - C2_OUT)))
    w = w.reshape(HIDDEN, FEAT_PAD).T                    # (FEAT_PAD, out)
    w = jnp.pad(w, ((0, 0), (0, HID_PAD - HIDDEN)))
    shift = jnp.pad(shift, (0, HID_PAD - HIDDEN))
    return w, shift


def prep_linear_bn(lin, bn, in_pad, out_pad):
    w, b = lin["w"], lin["b"]                            # (out, in)
    out_dim, in_dim = w.shape
    if bn is not None:
        s, t = fold_bn(bn)
        shift = b * s + t
        w = w * s[:, None]
    else:
        shift = b
    wk = jnp.pad(w.T, ((0, in_pad - in_dim), (0, out_pad - out_dim)))
    shift = jnp.pad(shift, (0, out_pad - out_dim)).reshape(1, out_pad)
    return wk.astype(jnp.bfloat16), shift.astype(jnp.float32)


def prepare_params(p):
    """One-time prep: fold BN, permute/pad layouts, fuse c_fc1|d_fc1, cast to bf16."""
    prep = {}
    prep["w1"], prep["t1"] = prep_conv_bn(p["f_conv1"], p["f_bn1"],
                                          cin_in_patches=3, cout_pad=C_PAD)
    prep["w2"], prep["t2"] = prep_conv_bn(p["f_conv2"], p["f_bn2"],
                                          cin_in_patches=C_PAD, cout_pad=C_PAD)
    wc1, sc1 = _fc1_remap(p["c_fc1"], p["c_bn1"])
    wd1, sd1 = _fc1_remap(p["d_fc1"], p["d_bn1"])
    prep["w_fc1"] = jnp.concatenate([wc1, wd1], axis=1).astype(jnp.bfloat16)
    prep["t_fc1"] = jnp.concatenate([sc1, sd1]).reshape(1, 2 * HID_PAD).astype(jnp.float32)
    prep["w_cfc2"], prep["t_cfc2"] = prep_linear_bn(p["c_fc2"], p["c_bn2"], HID_PAD, HID_PAD)
    prep["w_cfc3"], prep["t_cfc3"] = prep_linear_bn(p["c_fc3"], None, HID_PAD, NCLS_PAD)
    prep["w_dfc2"], prep["t_dfc2"] = prep_linear_bn(p["d_fc2"], None, HID_PAD, NCLS_PAD)
    return prep


# ====================================== forward =========================================

def forward(prep, input_data, alpha):
    B = input_data.shape[0]
    # input_data.expand(B, 3, H, W); NCHW -> NHWC internal layout.
    x = jnp.broadcast_to(input_data.astype(jnp.float32), (B, 3, IMG, IMG))
    x = jnp.transpose(x, (0, 2, 3, 1))
    # f_conv1 + f_bn1 (folded) ; f_pool1 + f_relu1 (fused, relu/max commute)
    x = conv_bn(x, prep["w1"], prep["t1"])               # (B, 24, 24, 128)
    x = maxpool2_relu(x)                                 # (B, 12, 12, 128)
    # f_conv2 + f_bn2 (folded) ; f_drop1 = Dropout2d -> identity at inference
    # TODO(synk): training-mode Dropout2d mask not implemented.
    x = conv_bn(x, prep["w2"], prep["t2"])               # (B, 8, 8, 128)
    x = maxpool2_relu(x)                                 # (B, 4, 4, 128)
    feat = x.reshape(B, FEAT_PAD)                        # == feature.view(-1, 50*4*4)
    # ReverseLayerF: identity in forward; alpha only scales the (absent) backward grad.
    class_output, domain_output = fused_heads(feat, prep)
    return class_output, domain_output


# ======================================== main ==========================================

if __name__ == "__main__":
    key = jax.random.PRNGKey(0)
    pkey, xkey = jax.random.split(key)
    params = init_params(pkey)
    prep = prepare_params(params)                        # one-time weight prep
    # single-channel input, expanded to 3 channels by forward() like the module's .expand
    input_data = jax.random.normal(xkey, (2, 1, IMG, IMG), jnp.float32)
    alpha = 0.5

    fwd = jax.jit(forward)
    class_out, domain_out = fwd(prep, input_data, alpha)
    jax.block_until_ready((class_out, domain_out))

    assert class_out.shape == (2, N_CLASSES) and domain_out.shape == (2, N_CLASSES)
    assert bool(jnp.all(jnp.isfinite(class_out))) and bool(jnp.all(jnp.isfinite(domain_out)))
    # log-softmax rows must exp-sum to 1
    assert bool(jnp.allclose(jnp.exp(class_out).sum(-1), 1.0, atol=1e-4))
    assert bool(jnp.allclose(jnp.exp(domain_out).sum(-1), 1.0, atol=1e-4))
    print("KERNEL_OK")
</pallas_src>

<mosaic_0001>
module attributes {stable_mosaic.version = 11 : i64} {
  func.func @_conv_tap_kernel(%arg0: i32, %arg1: memref<1x672x128xbf16, #tpu.memory_space<vmem>>, %arg2: memref<5x128x128xbf16, #tpu.memory_space<vmem>>, %arg3: memref<1x128xf32, #tpu.memory_space<vmem>>, %arg4: memref<1x576x128xbf16, #tpu.memory_space<vmem>>) attributes {dimension_semantics = [#tpu.dimension_semantics<parallel>], iteration_bounds = array<i64: 2>, scalar_prefetch = 0 : i64, scratch_operands = 0 : i64, tpu.core_type = #tpu.core_type<tc>, window_params = [{transform_indices = @transform_0, window_bounds = array<i64: 1, 672, 128>}, {pipeline_mode = #tpu.pipeline_mode<synchronous>, transform_indices = @transform_1, window_bounds = array<i64: 5, 128, 128>}, {pipeline_mode = #tpu.pipeline_mode<synchronous>, transform_indices = @transform_2, window_bounds = array<i64: 1, 128>}, {transform_indices = @transform_3, window_bounds = array<i64: 1, 576, 128>}]} {
    %cst = arith.constant 0.000000e+00 : f32
    %0 = vector.broadcast %cst : f32 to vector<576x128xf32>
    %c0 = arith.constant 0 : index
    %c0_0 = arith.constant 0 : index
    %c0_1 = arith.constant 0 : index
    %1 = vector.load %arg1[%c0, %c0_0, %c0_1] : memref<1x672x128xbf16, #tpu.memory_space<vmem>>, vector<1x576x128xbf16>
    %2 = vector.shape_cast %1 : vector<1x576x128xbf16> to vector<576x128xbf16>
    %c0_2 = arith.constant 0 : index
    %c0_3 = arith.constant 0 : index
    %c0_4 = arith.constant 0 : index
    %3 = vector.load %arg2[%c0_2, %c0_3, %c0_4] : memref<5x128x128xbf16, #tpu.memory_space<vmem>>, vector<1x128x128xbf16>
    %4 = vector.shape_cast %3 : vector<1x128x128xbf16> to vector<128x128xbf16>
    %cst_5 = arith.constant dense<0.000000e+00> : vector<576x128xf32>
    %5 = tpu.matmul %2, %4, %cst_5 {dimension_numbers = #tpu.dot_dimension_numbers<[1], [0], [0], [1], [0, 0, 1, 1], [], []>} : vector<576x128xbf16>, vector<128x128xbf16>, vector<576x128xf32> -> vector<576x128xf32>
    %6 = arith.addf %0, %5 : vector<576x128xf32>
    %c0_6 = arith.constant 0 : index
    %c24 = arith.constant 24 : index
    %c0_7 = arith.constant 0 : index
    %7 = vector.load %arg1[%c0_6, %c24, %c0_7] : memref<1x672x128xbf16, #tpu.memory_space<vmem>>, vector<1x576x128xbf16>
    %8 = vector.shape_cast %7 : vector<1x576x128xbf16> to vector<576x128xbf16>
    %c1 = arith.constant 1 : index
    %c0_8 = arith.constant 0 : index
    %c0_9 = arith.constant 0 : index
    %9 = vector.load %arg2[%c1, %c0_8, %c0_9] : memref<5x128x128xbf16, #tpu.memory_space<vmem>>, vector<1x128x128xbf16>
    %10 = vector.shape_cast %9 : vector<1x128x128xbf16> to vector<128x128xbf16>
    %cst_10 = arith.constant dense<0.000000e+00> : vector<576x128xf32>
    %11 = tpu.matmul %8, %10, %cst_10 {dimension_numbers = #tpu.dot_dimension_numbers<[1], [0], [0], [1], [0, 0, 1, 1], [], []>} : vector<576x128xbf16>, vector<128x128xbf16>, vector<576x128xf32> -> vector<576x128xf32>
    %12 = arith.addf %6, %11 : vector<576x128xf32>
    %c0_11 = arith.constant 0 : index
    %c48 = arith.constant 48 : index
    %c0_12 = arith.constant 0 : index
    %13 = vector.load %arg1[%c0_11, %c48, %c0_12] : memref<1x672x128xbf16, #tpu.memory_space<vmem>>, vector<1x576x128xbf16>
    %14 = vector.shape_cast %13 : vector<1x576x128xbf16> to vector<576x128xbf16>
    %c2 = arith.constant 2 : index
    %c0_13 = arith.constant 0 : index
    %c0_14 = arith.constant 0 : index
    %15 = vector.load %arg2[%c2, %c0_13, %c0_14] : memref<5x128x128xbf16, #tpu.memory_space<vmem>>, vector<1x128x128xbf16>
    %16 = vector.shape_cast %15 : vector<1x128x128xbf16> to vector<128x128xbf16>
    %cst_15 = arith.constant dense<0.000000e+00> : vector<576x128xf32>
    %17 = tpu.matmul %14, %16, %cst_15 {dimension_numbers = #tpu.dot_dimension_numbers<[1], [0], [0], [1], [0, 0, 1, 1], [], []>} : vector<576x128xbf16>, vector<128x128xbf16>, vector<576x128xf32> -> vector<576x128xf32>
    %18 = arith.addf %12, %17 : vector<576x128xf32>
    %c0_16 = arith.constant 0 : index
    %c72 = arith.constant 72 : index
    %c0_17 = arith.constant 0 : index
    %19 = vector.load %arg1[%c0_16, %c72, %c0_17] : memref<1x672x128xbf16, #tpu.memory_space<vmem>>, vector<1x576x128xbf16>
    %20 = vector.shape_cast %19 : vector<1x576x128xbf16> to vector<576x128xbf16>
    %c3 = arith.constant 3 : index
    %c0_18 = arith.constant 0 : index
    %c0_19 = arith.constant 0 : index
    %21 = vector.load %arg2[%c3, %c0_18, %c0_19] : memref<5x128x128xbf16, #tpu.memory_space<vmem>>, vector<1x128x128xbf16>
    %22 = vector.shape_cast %21 : vector<1x128x128xbf16> to vector<128x128xbf16>
    %cst_20 = arith.constant dense<0.000000e+00> : vector<576x128xf32>
    %23 = tpu.matmul %20, %22, %cst_20 {dimension_numbers = #tpu.dot_dimension_numbers<[1], [0], [0], [1], [0, 0, 1, 1], [], []>} : vector<576x128xbf16>, vector<128x128xbf16>, vector<576x128xf32> -> vector<576x128xf32>
    %24 = arith.addf %18, %23 : vector<576x128xf32>
    %c0_21 = arith.constant 0 : index
    %c96 = arith.constant 96 : index
    %c0_22 = arith.constant 0 : index
    %25 = vector.load %arg1[%c0_21, %c96, %c0_22] : memref<1x672x128xbf16, #tpu.memory_space<vmem>>, vector<1x576x128xbf16>
    %26 = vector.shape_cast %25 : vector<1x576x128xbf16> to vector<576x128xbf16>
    %c4 = arith.constant 4 : index
    %c0_23 = arith.constant 0 : index
    %c0_24 = arith.constant 0 : index
    %27 = vector.load %arg2[%c4, %c0_23, %c0_24] : memref<5x128x128xbf16, #tpu.memory_space<vmem>>, vector<1x128x128xbf16>
    %28 = vector.shape_cast %27 : vector<1x128x128xbf16> to vector<128x128xbf16>
    %cst_25 = arith.constant dense<0.000000e+00> : vector<576x128xf32>
    %29 = tpu.matmul %26, %28, %cst_25 {dimension_numbers = #tpu.dot_dimension_numbers<[1], [0], [0], [1], [0, 0, 1, 1], [], []>} : vector<576x128xbf16>, vector<128x128xbf16>, vector<576x128xf32> -> vector<576x128xf32>
    %30 = arith.addf %24, %29 : vector<576x128xf32>
    %c0_26 = arith.constant 0 : index
    %c0_27 = arith.constant 0 : index
    %31 = vector.load %arg3[%c0_26, %c0_27] : memref<1x128xf32, #tpu.memory_space<vmem>>, vector<1x128xf32>
    %32 = vector.broadcast %31 : vector<1x128xf32> to vector<576x128xf32>
    %33 = arith.addf %30, %32 : vector<576x128xf32>
    %34 = arith.truncf %33 : vector<576x128xf32> to vector<576x128xbf16>
    %c0_28 = arith.constant 0 : index
    %c0_29 = arith.constant 0 : index
    %c0_30 = arith.constant 0 : index
    %35 = vector.load %arg4[%c0_28, %c0_29, %c0_30] : memref<1x576x128xbf16, #tpu.memory_space<vmem>>, vector<1x576x128xbf16>
    %36 = vector.shape_cast %35 : vector<1x576x128xbf16> to vector<576x128xbf16>
    %37 = vector.shape_cast %34 : vector<576x128xbf16> to vector<1x576x128xbf16>
    tpu.vector_store %arg4[%c0_28, %c0_29, %c0_30], %37 {strides = array<i32>} : memref<1x576x128xbf16, #tpu.memory_space<vmem>>, vector<1x576x128xbf16>,
    return
  }
  func.func @transform_0(%arg0: i32) -> (i32, i32, i32) {
    %c0_i32 = arith.constant 0 : i32
    %c0_i32_0 = arith.constant 0 : i32
    %c0_i32_1 = arith.constant 0 : i32
    return %arg0, %c0_i32, %c0_i32_0 : i32, i32, i32
  }
  func.func @transform_1(%arg0: i32) -> (i32, i32, i32) {
    %c0_i32 = arith.constant 0 : i32
    %c0_i32_0 = arith.constant 0 : i32
    %c0_i32_1 = arith.constant 0 : i32
    %c0_i32_2 = arith.constant 0 : i32
    return %c0_i32, %c0_i32_0, %c0_i32_1 : i32, i32, i32
  }
  func.func @transform_2(%arg0: i32) -> (i32, i32) {
    %c0_i32 = arith.constant 0 : i32
    %c0_i32_0 = arith.constant 0 : i32
    %c0_i32_1 = arith.constant 0 : i32
    return %c0_i32, %c0_i32_0 : i32, i32
  }
  func.func @transform_3(%arg0: i32) -> (i32, i32, i32) {
    %c0_i32 = arith.constant 0 : i32
    %c0_i32_0 = arith.constant 0 : i32
    %c0_i32_1 = arith.constant 0 : i32
    return %arg0, %c0_i32, %c0_i32_0 : i32, i32, i32
  }
}

module attributes {stable_mosaic.version = 11 : i64} {
  func.func @_maxpool_relu_kernel(%arg0: memref<4x288x128xbf16, #tpu.memory_space<vmem>>, %arg1: memref<288x128xbf16, #tpu.memory_space<vmem>>) attributes {dimension_semantics = [], scalar_prefetch = 0 : i64, scratch_operands = 0 : i64, tpu.core_type = #tpu.core_type<tc>} {
    %c0 = arith.constant 0 : index
    %c0_0 = arith.constant 0 : index
    %c0_1 = arith.constant 0 : index
    %0 = vector.load %arg0[%c0, %c0_0, %c0_1] : memref<4x288x128xbf16, #tpu.memory_space<vmem>>, vector<4x288x128xbf16>
    %cst = arith.constant dense<0xFF80> : vector<288x128xbf16>
    %1 = vector.multi_reduction <maximumf>, %0, %cst [0] : vector<4x288x128xbf16> to vector<288x128xbf16>
    %cst_2 = arith.constant 0.000000e+00 : bf16
    %2 = vector.broadcast %cst_2 : bf16 to vector<288x128xbf16>
    %3 = arith.maximumf %1, %2 : vector<288x128xbf16>
    %c0_3 = arith.constant 0 : index
    %c0_4 = arith.constant 0 : index
    %4 = vector.load %arg1[%c0_3, %c0_4] : memref<288x128xbf16, #tpu.memory_space<vmem>>, vector<288x128xbf16>
    tpu.vector_store %arg1[%c0_3, %c0_4], %3 {strides = array<i32>} : memref<288x128xbf16, #tpu.memory_space<vmem>>, vector<288x128xbf16>,
    return
  }
}

module attributes {stable_mosaic.version = 11 : i64} {
  func.func @_conv_tap_kernel(%arg0: i32, %arg1: memref<1x96x640xbf16, #tpu.memory_space<vmem>>, %arg2: memref<5x640x128xbf16, #tpu.memory_space<vmem>>, %arg3: memref<1x128xf32, #tpu.memory_space<vmem>>, %arg4: memref<1x64x128xbf16, #tpu.memory_space<vmem>>) attributes {dimension_semantics = [#tpu.dimension_semantics<parallel>], iteration_bounds = array<i64: 2>, scalar_prefetch = 0 : i64, scratch_operands = 0 : i64, tpu.core_type = #tpu.core_type<tc>, window_params = [{transform_indices = @transform_0, window_bounds = array<i64: 1, 96, 640>}, {pipeline_mode = #tpu.pipeline_mode<synchronous>, transform_indices = @transform_1, window_bounds = array<i64: 5, 640, 128>}, {pipeline_mode = #tpu.pipeline_mode<synchronous>, transform_indices = @transform_2, window_bounds = array<i64: 1, 128>}, {transform_indices = @transform_3, window_bounds = array<i64: 1, 64, 128>}]} {
    %cst = arith.constant 0.000000e+00 : f32
    %0 = vector.broadcast %cst : f32 to vector<64x128xf32>
    %c0 = arith.constant 0 : index
    %c0_0 = arith.constant 0 : index
    %c0_1 = arith.constant 0 : index
    %1 = vector.load %arg1[%c0, %c0_0, %c0_1] : memref<1x96x640xbf16, #tpu.memory_space<vmem>>, vector<1x64x640xbf16>
    %2 = vector.shape_cast %1 : vector<1x64x640xbf16> to vector<64x640xbf16>
    %c0_2 = arith.constant 0 : index
    %c0_3 = arith.constant 0 : index
    %c0_4 = arith.constant 0 : index
    %3 = vector.load %arg2[%c0_2, %c0_3, %c0_4] : memref<5x640x128xbf16, #tpu.memory_space<vmem>>, vector<1x640x128xbf16>
    %4 = vector.shape_cast %3 : vector<1x640x128xbf16> to vector<640x128xbf16>
    %cst_5 = arith.constant dense<0.000000e+00> : vector<64x128xf32>
    %5 = tpu.matmul %2, %4, %cst_5 {dimension_numbers = #tpu.dot_dimension_numbers<[1], [0], [0], [1], [0, 0, 1, 1], [], []>} : vector<64x640xbf16>, vector<640x128xbf16>, vector<64x128xf32> -> vector<64x128xf32>
    %6 = arith.addf %0, %5 : vector<64x128xf32>
    %c0_6 = arith.constant 0 : index
    %c8 = arith.constant 8 : index
    %c0_7 = arith.constant 0 : index
    %7 = vector.load %arg1[%c0_6, %c8, %c0_7] : memref<1x96x640xbf16, #tpu.memory_space<vmem>>, vector<1x64x640xbf16>
    %8 = vector.shape_cast %7 : vector<1x64x640xbf16> to vector<64x640xbf16>
    %c1 = arith.constant 1 : index
    %c0_8 = arith.constant 0 : index
    %c0_9 = arith.constant 0 : index
    %9 = vector.load %arg2[%c1, %c0_8, %c0_9] : memref<5x640x128xbf16, #tpu.memory_space<vmem>>, vector<1x640x128xbf16>
    %10 = vector.shape_cast %9 : vector<1x640x128xbf16> to vector<640x128xbf16>
    %cst_10 = arith.constant dense<0.000000e+00> : vector<64x128xf32>
    %11 = tpu.matmul %8, %10, %cst_10 {dimension_numbers = #tpu.dot_dimension_numbers<[1], [0], [0], [1], [0, 0, 1, 1], [], []>} : vector<64x640xbf16>, vector<640x128xbf16>, vector<64x128xf32> -> vector<64x128xf32>
    %12 = arith.addf %6, %11 : vector<64x128xf32>
    %c0_11 = arith.constant 0 : index
    %c16 = arith.constant 16 : index
    %c0_12 = arith.constant 0 : index
    %13 = vector.load %arg1[%c0_11, %c16, %c0_12] : memref<1x96x640xbf16, #tpu.memory_space<vmem>>, vector<1x64x640xbf16>
    %14 = vector.shape_cast %13 : vector<1x64x640xbf16> to vector<64x640xbf16>
    %c2 = arith.constant 2 : index
    %c0_13 = arith.constant 0 : index
    %c0_14 = arith.constant 0 : index
    %15 = vector.load %arg2[%c2, %c0_13, %c0_14] : memref<5x640x128xbf16, #tpu.memory_space<vmem>>, vector<1x640x128xbf16>
    %16 = vector.shape_cast %15 : vector<1x640x128xbf16> to vector<640x128xbf16>
    %cst_15 = arith.constant dense<0.000000e+00> : vector<64x128xf32>
    %17 = tpu.matmul %14, %16, %cst_15 {dimension_numbers = #tpu.dot_dimension_numbers<[1], [0], [0], [1], [0, 0, 1, 1], [], []>} : vector<64x640xbf16>, vector<640x128xbf16>, vector<64x128xf32> -> vector<64x128xf32>
    %18 = arith.addf %12, %17 : vector<64x128xf32>
    %c0_16 = arith.constant 0 : index
    %c24 = arith.constant 24 : index
    %c0_17 = arith.constant 0 : index
    %19 = vector.load %arg1[%c0_16, %c24, %c0_17] : memref<1x96x640xbf16, #tpu.memory_space<vmem>>, vector<1x64x640xbf16>
    %20 = vector.shape_cast %19 : vector<1x64x640xbf16> to vector<64x640xbf16>
    %c3 = arith.constant 3 : index
    %c0_18 = arith.constant 0 : index
    %c0_19 = arith.constant 0 : index
    %21 = vector.load %arg2[%c3, %c0_18, %c0_19] : memref<5x640x128xbf16, #tpu.memory_space<vmem>>, vector<1x640x128xbf16>
    %22 = vector.shape_cast %21 : vector<1x640x128xbf16> to vector<640x128xbf16>
    %cst_20 = arith.constant dense<0.000000e+00> : vector<64x128xf32>
    %23 = tpu.matmul %20, %22, %cst_20 {dimension_numbers = #tpu.dot_dimension_numbers<[1], [0], [0], [1], [0, 0, 1, 1], [], []>} : vector<64x640xbf16>, vector<640x128xbf16>, vector<64x128xf32> -> vector<64x128xf32>
    %24 = arith.addf %18, %23 : vector<64x128xf32>
    %c0_21 = arith.constant 0 : index
    %c32 = arith.constant 32 : index
    %c0_22 = arith.constant 0 : index
    %25 = vector.load %arg1[%c0_21, %c32, %c0_22] : memref<1x96x640xbf16, #tpu.memory_space<vmem>>, vector<1x64x640xbf16>
    %26 = vector.shape_cast %25 : vector<1x64x640xbf16> to vector<64x640xbf16>
    %c4 = arith.constant 4 : index
    %c0_23 = arith.constant 0 : index
    %c0_24 = arith.constant 0 : index
    %27 = vector.load %arg2[%c4, %c0_23, %c0_24] : memref<5x640x128xbf16, #tpu.memory_space<vmem>>, vector<1x640x128xbf16>
    %28 = vector.shape_cast %27 : vector<1x640x128xbf16> to vector<640x128xbf16>
    %cst_25 = arith.constant dense<0.000000e+00> : vector<64x128xf32>
    %29 = tpu.matmul %26, %28, %cst_25 {dimension_numbers = #tpu.dot_dimension_numbers<[1], [0], [0], [1], [0, 0, 1, 1], [], []>} : vector<64x640xbf16>, vector<640x128xbf16>, vector<64x128xf32> -> vector<64x128xf32>
    %30 = arith.addf %24, %29 : vector<64x128xf32>
    %c0_26 = arith.constant 0 : index
    %c0_27 = arith.constant 0 : index
    %31 = vector.load %arg3[%c0_26, %c0_27] : memref<1x128xf32, #tpu.memory_space<vmem>>, vector<1x128xf32>
    %32 = vector.broadcast %31 : vector<1x128xf32> to vector<64x128xf32>
    %33 = arith.addf %30, %32 : vector<64x128xf32>
    %34 = arith.truncf %33 : vector<64x128xf32> to vector<64x128xbf16>
    %c0_28 = arith.constant 0 : index
    %c0_29 = arith.constant 0 : index
    %c0_30 = arith.constant 0 : index
    %35 = vector.load %arg4[%c0_28, %c0_29, %c0_30] : memref<1x64x128xbf16, #tpu.memory_space<vmem>>, vector<1x64x128xbf16>
    %36 = vector.shape_cast %35 : vector<1x64x128xbf16> to vector<64x128xbf16>
    %37 = vector.shape_cast %34 : vector<64x128xbf16> to vector<1x64x128xbf16>
    tpu.vector_store %arg4[%c0_28, %c0_29, %c0_30], %37 {strides = array<i32>} : memref<1x64x128xbf16, #tpu.memory_space<vmem>>, vector<1x64x128xbf16>,
    return
  }
  func.func @transform_0(%arg0: i32) -> (i32, i32, i32) {
    %c0_i32 = arith.constant 0 : i32
    %c0_i32_0 = arith.constant 0 : i32
    %c0_i32_1 = arith.constant 0 : i32
    return %arg0, %c0_i32, %c0_i32_0 : i32, i32, i32
  }
  func.func @transform_1(%arg0: i32) -> (i32, i32, i32) {
    %c0_i32 = arith.constant 0 : i32
    %c0_i32_0 = arith.constant 0 : i32
    %c0_i32_1 = arith.constant 0 : i32
    %c0_i32_2 = arith.constant 0 : i32
    return %c0_i32, %c0_i32_0, %c0_i32_1 : i32, i32, i32
  }
  func.func @transform_2(%arg0: i32) -> (i32, i32) {
    %c0_i32 = arith.constant 0 : i32
    %c0_i32_0 = arith.constant 0 : i32
    %c0_i32_1 = arith.constant 0 : i32
    return %c0_i32, %c0_i32_0 : i32, i32
  }
  func.func @transform_3(%arg0: i32) -> (i32, i32, i32) {
    %c0_i32 = arith.constant 0 : i32
    %c0_i32_0 = arith.constant 0 : i32
    %c0_i32_1 = arith.constant 0 : i32
    return %arg0, %c0_i32, %c0_i32_0 : i32, i32, i32
  }
}

module attributes {stable_mosaic.version = 11 : i64} {
  func.func @_maxpool_relu_kernel(%arg0: memref<4x32x128xbf16, #tpu.memory_space<vmem>>, %arg1: memref<32x128xbf16, #tpu.memory_space<vmem>>) attributes {dimension_semantics = [], scalar_prefetch = 0 : i64, scratch_operands = 0 : i64, tpu.core_type = #tpu.core_type<tc>} {
    %c0 = arith.constant 0 : index
    %c0_0 = arith.constant 0 : index
    %c0_1 = arith.constant 0 : index
    %0 = vector.load %arg0[%c0, %c0_0, %c0_1] : memref<4x32x128xbf16, #tpu.memory_space<vmem>>, vector<4x32x128xbf16>
    %cst = arith.constant dense<0xFF80> : vector<32x128xbf16>
    %1 = vector.multi_reduction <maximumf>, %0, %cst [0] : vector<4x32x128xbf16> to vector<32x128xbf16>
    %cst_2 = arith.constant 0.000000e+00 : bf16
    %2 = vector.broadcast %cst_2 : bf16 to vector<32x128xbf16>
    %3 = arith.maximumf %1, %2 : vector<32x128xbf16>
    %c0_3 = arith.constant 0 : index
    %c0_4 = arith.constant 0 : index
    %4 = vector.load %arg1[%c0_3, %c0_4] : memref<32x128xbf16, #tpu.memory_space<vmem>>, vector<32x128xbf16>
    tpu.vector_store %arg1[%c0_3, %c0_4], %3 {strides = array<i32>} : memref<32x128xbf16, #tpu.memory_space<vmem>>, vector<32x128xbf16>,
    return
  }
}

module attributes {stable_mosaic.version = 11 : i64} {
  func.func @_head_kernel(%arg0: memref<8x2048xbf16, #tpu.memory_space<vmem>>, %arg1: memref<2048x256xbf16, #tpu.memory_space<vmem>>, %arg2: memref<1x256xf32, #tpu.memory_space<vmem>>, %arg3: memref<128x128xbf16, #tpu.memory_space<vmem>>, %arg4: memref<1x128xf32, #tpu.memory_space<vmem>>, %arg5: memref<128x128xbf16, #tpu.memory_space<vmem>>, %arg6: memref<1x128xf32, #tpu.memory_space<vmem>>, %arg7: memref<128x128xbf16, #tpu.memory_space<vmem>>, %arg8: memref<1x128xf32, #tpu.memory_space<vmem>>, %arg9: memref<8x128xf32, #tpu.memory_space<vmem>>, %arg10: memref<8x128xf32, #tpu.memory_space<vmem>>) attributes {dimension_semantics = [], scalar_prefetch = 0 : i64, scratch_operands = 0 : i64, tpu.core_type = #tpu.core_type<tc>} {
    %c0 = arith.constant 0 : index
    %c0_0 = arith.constant 0 : index
    %0 = vector.load %arg0[%c0, %c0_0] : memref<8x2048xbf16, #tpu.memory_space<vmem>>, vector<8x2048xbf16>
    %c0_1 = arith.constant 0 : index
    %c0_2 = arith.constant 0 : index
    %1 = vector.load %arg1[%c0_1, %c0_2] : memref<2048x256xbf16, #tpu.memory_space<vmem>>, vector<2048x256xbf16>
    %cst = arith.constant dense<0.000000e+00> : vector<8x256xf32>
    %2 = tpu.matmul %0, %1, %cst {dimension_numbers = #tpu.dot_dimension_numbers<[1], [0], [0], [1], [0, 0, 1, 1], [], []>} : vector<8x2048xbf16>, vector<2048x256xbf16>, vector<8x256xf32> -> vector<8x256xf32>
    %c0_3 = arith.constant 0 : index
    %c0_4 = arith.constant 0 : index
    %3 = vector.load %arg2[%c0_3, %c0_4] : memref<1x256xf32, #tpu.memory_space<vmem>>, vector<1x256xf32>
    %4 = vector.broadcast %3 : vector<1x256xf32> to vector<8x256xf32>
    %5 = arith.addf %2, %4 : vector<8x256xf32>
    %cst_5 = arith.constant 0.000000e+00 : f32
    %6 = vector.broadcast %cst_5 : f32 to vector<8x256xf32>
    %7 = arith.maximumf %5, %6 : vector<8x256xf32>
    %8 = vector.extract_strided_slice %7 {offsets = [0, 0], sizes = [8, 128], strides = [1, 1]} : vector<8x256xf32> to vector<8x128xf32>
    %9 = arith.truncf %8 : vector<8x128xf32> to vector<8x128xbf16>
    %10 = vector.extract_strided_slice %7 {offsets = [0, 128], sizes = [8, 128], strides = [1, 1]} : vector<8x256xf32> to vector<8x128xf32>
    %11 = arith.truncf %10 : vector<8x128xf32> to vector<8x128xbf16>
    %c0_6 = arith.constant 0 : index
    %c0_7 = arith.constant 0 : index
    %12 = vector.load %arg3[%c0_6, %c0_7] : memref<128x128xbf16, #tpu.memory_space<vmem>>, vector<128x128xbf16>
    %cst_8 = arith.constant dense<0.000000e+00> : vector<8x128xf32>
    %13 = tpu.matmul %9, %12, %cst_8 {dimension_numbers = #tpu.dot_dimension_numbers<[1], [0], [0], [1], [0, 0, 1, 1], [], []>} : vector<8x128xbf16>, vector<128x128xbf16>, vector<8x128xf32> -> vector<8x128xf32>
    %c0_9 = arith.constant 0 : index
    %c0_10 = arith.constant 0 : index
    %14 = vector.load %arg4[%c0_9, %c0_10] : memref<1x128xf32, #tpu.memory_space<vmem>>, vector<1x128xf32>
    %15 = vector.broadcast %14 : vector<1x128xf32> to vector<8x128xf32>
    %16 = arith.addf %13, %15 : vector<8x128xf32>
    %cst_11 = arith.constant 0.000000e+00 : f32
    %17 = vector.broadcast %cst_11 : f32 to vector<8x128xf32>
    %18 = arith.maximumf %16, %17 : vector<8x128xf32>
    %19 = arith.truncf %18 : vector<8x128xf32> to vector<8x128xbf16>
    %c0_12 = arith.constant 0 : index
    %c0_13 = arith.constant 0 : index
    %20 = vector.load %arg5[%c0_12, %c0_13] : memref<128x128xbf16, #tpu.memory_space<vmem>>, vector<128x128xbf16>
    %cst_14 = arith.constant dense<0.000000e+00> : vector<8x128xf32>
    %21 = tpu.matmul %19, %20, %cst_14 {dimension_numbers = #tpu.dot_dimension_numbers<[1], [0], [0], [1], [0, 0, 1, 1], [], []>} : vector<8x128xbf16>, vector<128x128xbf16>, vector<8x128xf32> -> vector<8x128xf32>
    %c0_15 = arith.constant 0 : index
    %c0_16 = arith.constant 0 : index
    %22 = vector.load %arg6[%c0_15, %c0_16] : memref<1x128xf32, #tpu.memory_space<vmem>>, vector<1x128xf32>
    %23 = vector.broadcast %22 : vector<1x128xf32> to vector<8x128xf32>
    %24 = arith.addf %21, %23 : vector<8x128xf32>
    %c0_17 = arith.constant 0 : index
    %c0_18 = arith.constant 0 : index
    %25 = vector.load %arg7[%c0_17, %c0_18] : memref<128x128xbf16, #tpu.memory_space<vmem>>, vector<128x128xbf16>
    %cst_19 = arith.constant dense<0.000000e+00> : vector<8x128xf32>
    %26 = tpu.matmul %11, %25, %cst_19 {dimension_numbers = #tpu.dot_dimension_numbers<[1], [0], [0], [1], [0, 0, 1, 1], [], []>} : vector<8x128xbf16>, vector<128x128xbf16>, vector<8x128xf32> -> vector<8x128xf32>
    %c0_20 = arith.constant 0 : index
    %c0_21 = arith.constant 0 : index
    %27 = vector.load %arg8[%c0_20, %c0_21] : memref<1x128xf32, #tpu.memory_space<vmem>>, vector<1x128xf32>
    %28 = vector.broadcast %27 : vector<1x128xf32> to vector<8x128xf32>
    %29 = arith.addf %26, %28 : vector<8x128xf32>
    %30 = tpu.iota {dimensions = array<i32: 1>} : vector<8x128xi32>
    %c2_i32 = arith.constant 2 : i32
    %31 = vector.broadcast %c2_i32 : i32 to vector<8x128xi32>
    %32 = arith.cmpi slt, %30, %31 : vector<8x128xi32>
    %cst_22 = arith.constant -3.000000e+38 : f32
    %33 = vector.broadcast %cst_22 : f32 to vector<8x128xf32>
    %34 = arith.select %32, %24, %33 : vector<8x128xi1>, vector<8x128xf32>
    %cst_23 = arith.constant dense<0xFF800000> : vector<8xf32>
    %35 = vector.multi_reduction <maximumf>, %34, %cst_23 [1] : vector<8x128xf32> to vector<8xf32>
    %36 = vector.shape_cast %35 : vector<8xf32> to vector<8x1xf32>
    %37 = vector.broadcast %36 : vector<8x1xf32> to vector<8x128xf32>
    %38 = arith.subf %34, %37 : vector<8x128xf32>
    %39 = math.exp %38 : vector<8x128xf32>
    %cst_24 = arith.constant dense<0.000000e+00> : vector<8xf32>
    %40 = vector.multi_reduction <add>, %39, %cst_24 [1] : vector<8x128xf32> to vector<8xf32>
    %41 = vector.shape_cast %40 : vector<8xf32> to vector<8x1xf32>
    %42 = math.log %41 : vector<8x1xf32>
    %43 = vector.broadcast %36 : vector<8x1xf32> to vector<8x128xf32>
    %44 = arith.subf %24, %43 : vector<8x128xf32>
    %45 = vector.broadcast %42 : vector<8x1xf32> to vector<8x128xf32>
    %46 = arith.subf %44, %45 : vector<8x128xf32>
    %c0_25 = arith.constant 0 : index
    %c0_26 = arith.constant 0 : index
    %47 = vector.load %arg9[%c0_25, %c0_26] : memref<8x128xf32, #tpu.memory_space<vmem>>, vector<8x128xf32>
    tpu.vector_store %arg9[%c0_25, %c0_26], %46 {strides = array<i32>} : memref<8x128xf32, #tpu.memory_space<vmem>>, vector<8x128xf32>,
    %48 = tpu.iota {dimensions = array<i32: 1>} : vector<8x128xi32>
    %c2_i32_27 = arith.constant 2 : i32
    %49 = vector.broadcast %c2_i32_27 : i32 to vector<8x128xi32>
    %50 = arith.cmpi slt, %48, %49 : vector<8x128xi32>
    %cst_28 = arith.constant -3.000000e+38 : f32
    %51 = vector.broadcast %cst_28 : f32 to vector<8x128xf32>
    %52 = arith.select %50, %29, %51 : vector<8x128xi1>, vector<8x128xf32>
    %cst_29 = arith.constant dense<0xFF800000> : vector<8xf32>
    %53 = vector.multi_reduction <maximumf>, %52, %cst_29 [1] : vector<8x128xf32> to vector<8xf32>
    %54 = vector.shape_cast %53 : vector<8xf32> to vector<8x1xf32>
    %55 = vector.broadcast %54 : vector<8x1xf32> to vector<8x128xf32>
    %56 = arith.subf %52, %55 : vector<8x128xf32>
    %57 = math.exp %56 : vector<8x128xf32>
    %cst_30 = arith.constant dense<0.000000e+00> : vector<8xf32>
    %58 = vector.multi_reduction <add>, %57, %cst_30 [1] : vector<8x128xf32> to vector<8xf32>
    %59 = vector.shape_cast %58 : vector<8xf32> to vector<8x1xf32>
    %60 = math.log %59 : vector<8x1xf32>
    %61 = vector.broadcast %54 : vector<8x1xf32> to vector<8x128xf32>
    %62 = arith.subf %29, %61 : vector<8x128xf32>
    %63 = vector.broadcast %60 : vector<8x1xf32> to vector<8x128xf32>
    %64 = arith.subf %62, %63 : vector<8x128xf32>
    %c0_31 = arith.constant 0 : index
    %c0_32 = arith.constant 0 : index
    %65 = vector.load %arg10[%c0_31, %c0_32] : memref<8x128xf32, #tpu.memory_space<vmem>>, vector<8x128xf32>
    tpu.vector_store %arg10[%c0_31, %c0_32], %64 {strides = array<i32>} : memref<8x128xf32, #tpu.memory_space<vmem>>, vector<8x128xf32>,
    return
  }
}

</mosaic_0001>

<bundles_post_ra>
// kernel: forward.6
= control target key start
LH: loop header
LB: loop body
LE: loop exit
PB: predicated region body
PF: predicated region fallthrough
CT: control target
= control target key end

     0   :  { %vm154_vm0 = vcmask 1043456   ;;  %v898_v36 = vmov 0   ;;  %s1575_s0 = inlined_call_operand.vmem [shape: bf16[4,288,128], index: 0, kind: input, shape index: {}]   ;;  %s1576_s1 = inlined_call_operand.vmem [shape: bf16[288,128], index: 1, kind: output, shape index: {}]  }
   0x1   :  { %v10_v0 = vld [vmem:[%s1575_s0] sm:$0xf]  ;;  %v11_v1 = vld [vmem:[%s1575_s0 + $0x4] sm:$0xf]  ;;  %v46_v2 = vld [vmem:[%s1575_s0 + $0x90] sm:$0xf] }
   0x2   :  { %v47_v3 = vld [vmem:[%s1575_s0 + $0x94] sm:$0xf]  ;;  %v82_v4 = vld [vmem:[%s1575_s0 + $0x120] sm:$0xf]  ;;  %v83_v5 = vld [vmem:[%s1575_s0 + $0x124] sm:$0xf] }
   0x3   :  { %v118_v6 = vld [vmem:[%s1575_s0 + $0x1b0] sm:$0xf]  ;;  %v119_v7 = vld [vmem:[%s1575_s0 + $0x1b4] sm:$0xf]  ;;  %v157_v8 = vsel %vm154_vm0, %v10_v0, 4286644096 }
   0x4   :  { %v160_v9 = vsel %vm154_vm0, %v46_v2, 4286644096  ;;  %v164_v10 = vsel %vm154_vm0, %v82_v4, 4286644096  ;;  %v168_v11 = vsel %vm154_vm0, %v118_v6, 4286644096 }
   0x5   :  { %v162_v12 = vmax.bf16 %v160_v9, %v157_v8  ;;  %v172_v13 = vsel %vm154_vm0, %v11_v1, 4286644096  ;;  %v175_v14 = vsel %vm154_vm0, %v47_v3, 4286644096  ;;  %v179_v15 = vsel %vm154_vm0, %v83_v5, 4286644096 }
   0x6   :  { %v177_v16 = vmax.bf16 %v175_v14, %v172_v13  ;;  %v183_v17 = vsel %vm154_vm0, %v119_v7, 4286644096  ;;  %v12_v18 = vld [vmem:[%s1575_s0 + $0x8] sm:$0xf]  ;;  %v13_v19 = vld [vmem:[%s1575_s0 + $0xc] sm:$0xf] }
   0x7   :  { %v166_v20 = vmax.bf16 %v164_v10, %v162_v12  ;;  %v48_v21 = vld [vmem:[%s1575_s0 + $0x98] sm:$0xf]  ;;  %v49_v22 = vld [vmem:[%s1575_s0 + $0x9c] sm:$0xf]  ;;  %v84_v23 = vld [vmem:[%s1575_s0 + $0x128] sm:$0xf] }
   0x8   :  { %v181_v24 = vmax.bf16 %v179_v15, %v177_v16  ;;  %v85_v25 = vld [vmem:[%s1575_s0 + $0x12c] sm:$0xf]  ;;  %v120_v26 = vld [vmem:[%s1575_s0 + $0x1b8] sm:$0xf]  ;;  %v121_v27 = vld [vmem:[%s1575_s0 + $0x1bc] sm:$0xf] }
   0x9   :  { %v170_v28 = vmax.bf16 %v168_v11, %v166_v20  ;;  %v187_v29 = vsel %vm154_vm0, %v12_v18, 4286644096  ;;  %v190_v30 = vsel %vm154_vm0, %v48_v21, 4286644096  ;;  %v194_v31 = vsel %vm154_vm0, %v84_v23, 4286644096 }
   0xa   :  { %v185_v32 = vmax.bf16 %v183_v17, %v181_v24  ;;  %v192_v33 = vmax.bf16 %v190_v30, %v187_v29  ;;  %v198_v34 = vsel %vm154_vm0, %v120_v26, 4286644096  ;;  %v202_v35 = vsel %vm154_vm0, %v13_v19, 4286644096  ;;  %v14_v40 = vld [vmem:[%s1575_s0 + $0x10] sm:$0xf] }
   0xb   :  { %v696_v37 = vmax.bf16 %v898_v36, %v170_v28  ;;  %v205_v38 = vsel %vm154_vm0, %v49_v22, 4286644096  ;;  %v209_v39 = vsel %vm154_vm0, %v85_v25, 4286644096  ;;  %v213_v44 = vsel %vm154_vm0, %v121_v27, 4286644096 }
   0xc   :  { %v697_v41 = vmax.bf16 %v898_v36, %v185_v32  ;;  %v196_v42 = vmax.bf16 %v194_v31, %v192_v33  ;;  %v207_v43 = vmax.bf16 %v205_v38, %v202_v35  ;;  %v15_v45 = vld [vmem:[%s1575_s0 + $0x14] sm:$0xf]  ;;  %v50_v46 = vld [vmem:[%s1575_s0 + $0xa0] sm:$0xf]  ;;  %v51_v47 = vld [vmem:[%s1575_s0 + $0xa4] sm:$0xf] }
   0xd   :  { %v86_v48 = vld [vmem:[%s1575_s0 + $0x130] sm:$0xf]  ;;  %v122_v49 = vld [vmem:[%s1575_s0 + $0x1c0] sm:$0xf]  ;;  %v87_v53 = vld [vmem:[%s1575_s0 + $0x134] sm:$0xf] }
   0xe   :  { %v862_v50 = vcombine.low %v696_v37, %v697_v41  ;;  %v200_v51 = vmax.bf16 %v198_v34, %v196_v42  ;;  %v211_v52 = vmax.bf16 %v209_v39, %v207_v43  ;;  %v123_v54 = vld [vmem:[%s1575_s0 + $0x1c4] sm:$0xf]  ;;  %v217_v55 = vsel %vm154_vm0, %v14_v40, 4286644096  ;;  %v16_v63 = vld [vmem:[%s1575_s0 + $0x18] sm:$0xf] }
   0xf   :  { %v220_v56 = vsel %vm154_vm0, %v50_v46, 4286644096  ;;  %v224_v57 = vsel %vm154_vm0, %v86_v48, 4286644096  ;;  %v228_v58 = vsel %vm154_vm0, %v122_v49, 4286644096 }
  0x10   :  { %776 = vst [vmem:[%s1576_s1] sm:$0xff] %v862_v50   ;;  %v215_v59 = vmax.bf16 %v213_v44, %v211_v52  ;;  %v698_v60 = vmax.bf16 %v898_v36, %v200_v51  ;;  %v222_v61 = vmax.bf16 %v220_v56, %v217_v55  ;;  %v232_v62 = vsel %vm154_vm0, %v15_v45, 4286644096  ;;  %v17_v0 = vld [vmem:[%s1575_s0 + $0x1c] sm:$0xf]  ;;  %v52_v3 = vld [vmem:[%s1575_s0 + $0xa8] sm:$0xf] }
  0x11   :  { %v235_v1 = vsel %vm154_vm0, %v51_v47, 4286644096  ;;  %v239_v2 = vsel %vm154_vm0, %v87_v53, 4286644096  ;;  %v243_v7 = vsel %vm154_vm0, %v123_v54, 4286644096 }
  0x12   :  { %v699_v4 = vmax.bf16 %v898_v36, %v215_v59  ;;  %v226_v5 = vmax.bf16 %v224_v57, %v222_v61  ;;  %v237_v6 = vmax.bf16 %v235_v1, %v232_v62  ;;  %v53_v8 = vld [vmem:[%s1575_s0 + $0xac] sm:$0xf]  ;;  %v88_v9 = vld [vmem:[%s1575_s0 + $0x138] sm:$0xf]  ;;  %v89_v10 = vld [vmem:[%s1575_s0 + $0x13c] sm:$0xf] }
  0x13   :  { %v124_v11 = vld [vmem:[%s1575_s0 + $0x1c8] sm:$0xf]  ;;  %v247_v12 = vsel %vm154_vm0, %v16_v63, 4286644096  ;;  %v125_v16 = vld [vmem:[%s1575_s0 + $0x1cc] sm:$0xf] }
  0x14   :  { %v863_v13 = vcombine.low %v698_v60, %v699_v4  ;;  %v230_v14 = vmax.bf16 %v228_v58, %v226_v5  ;;  %v241_v15 = vmax.bf16 %v239_v2, %v237_v6  ;;  %v250_v17 = vsel %vm154_vm0, %v52_v3, 4286644096  ;;  %v18_v18 = vld [vmem:[%s1575_s0 + $0x20] sm:$0xf]  ;;  %v54_v27 = vld [vmem:[%s1575_s0 + $0xb0] sm:$0xf] }
  0x15   :  { %v252_v19 = vmax.bf16 %v250_v17, %v247_v12  ;;  %v254_v20 = vsel %vm154_vm0, %v88_v9, 4286644096  ;;  %v258_v21 = vsel %vm154_vm0, %v124_v11, 4286644096  ;;  %v262_v22 = vsel %vm154_vm0, %v17_v0, 4286644096 }
  0x16   :  { %864 = vst [vmem:[%s1576_s1 + $0x8] sm:$0xff] %v863_v13   ;;  %v245_v23 = vmax.bf16 %v243_v7, %v241_v15  ;;  %v700_v24 = vmax.bf16 %v898_v36, %v230_v14  ;;  %v265_v25 = vsel %vm154_vm0, %v53_v8, 4286644096  ;;  %v269_v26 = vsel %vm154_vm0, %v89_v10, 4286644096 }
  0x17   :  { %v256_v28 = vmax.bf16 %v254_v20, %v252_v19  ;;  %v267_v29 = vmax.bf16 %v265_v25, %v262_v22  ;;  %v273_v30 = vsel %vm154_vm0, %v125_v16, 4286644096  ;;  %v19_v31 = vld [vmem:[%s1575_s0 + $0x24] sm:$0xf]  ;;  %v90_v32 = vld [vmem:[%s1575_s0 + $0x140] sm:$0xf] }
  0x18   :  { %v701_v33 = vmax.bf16 %v898_v36, %v245_v23  ;;  %v55_v34 = vld [vmem:[%s1575_s0 + $0xb4] sm:$0xf]  ;;  %v91_v35 = vld [vmem:[%s1575_s0 + $0x144] sm:$0xf]  ;;  %v126_v37 = vld [vmem:[%s1575_s0 + $0x1d0] sm:$0xf] }
  0x19   :  { %v260_v38 = vmax.bf16 %v258_v21, %v256_v28  ;;  %v271_v39 = vmax.bf16 %v269_v26, %v267_v29  ;;  %v127_v40 = vld [vmem:[%s1575_s0 + $0x1d4] sm:$0xf]  ;;  %v277_v41 = vsel %vm154_vm0, %v18_v18, 4286644096  ;;  %v280_v42 = vsel %vm154_vm0, %v54_v27, 4286644096 }
  0x1a   :  { %v865_v43 = vcombine.low %v700_v24, %v701_v33  ;;  %v282_v44 = vmax.bf16 %v280_v42, %v277_v41  ;;  %v284_v45 = vsel %vm154_vm0, %v90_v32, 4286644096  ;;  %v288_v46 = vsel %vm154_vm0, %v126_v37, 4286644096  ;;  %v20_v47 = vld [vmem:[%s1575_s0 + $0x28] sm:$0xf] }
  0x1b   :  { %v275_v48 = vmax.bf16 %v273_v30, %v271_v39  ;;  %v702_v49 = vmax.bf16 %v898_v36, %v260_v38  ;;  %v292_v50 = vsel %vm154_vm0, %v19_v31, 4286644096  ;;  %v295_v51 = vsel %vm154_vm0, %v55_v34, 4286644096  ;;  %v56_v52 = vld [vmem:[%s1575_s0 + $0xb8] sm:$0xf] }
  0x1c   :  { %866 = vst [vmem:[%s1576_s1 + $0x10] sm:$0xff] %v865_v43   ;;  %v286_v53 = vmax.bf16 %v284_v45, %v282_v44  ;;  %v297_v54 = vmax.bf16 %v295_v51, %v292_v50  ;;  %v299_v55 = vsel %vm154_vm0, %v91_v35, 4286644096  ;;  %v303_v56 = vsel %vm154_vm0, %v127_v40, 4286644096 }
  0x1d   :  { %v21_v57 = vld [vmem:[%s1575_s0 + $0x2c] sm:$0xf]  ;;  %v703_v58 = vmax.bf16 %v898_v36, %v275_v48  ;;  %v57_v59 = vld [vmem:[%s1575_s0 + $0xbc] sm:$0xf]  ;;  %v92_v60 = vld [vmem:[%s1575_s0 + $0x148] sm:$0xf] }
  0x1e   :  { %v128_v61 = vld [vmem:[%s1575_s0 + $0x1d8] sm:$0xf]  ;;  %v290_v62 = vmax.bf16 %v288_v46, %v286_v53  ;;  %v301_v63 = vmax.bf16 %v299_v55, %v297_v54  ;;  %v93_v0 = vld [vmem:[%s1575_s0 + $0x14c] sm:$0xf]  ;;  %v307_v1 = vsel %vm154_vm0, %v20_v47, 4286644096 }
  0x1f   :  { %v310_v2 = vsel %vm154_vm0, %v56_v52, 4286644096  ;;  %v867_v3 = vcombine.low %v702_v49, %v703_v58  ;;  %v129_v4 = vld [vmem:[%s1575_s0 + $0x1dc] sm:$0xf]  ;;  %v314_v6 = vsel %vm154_vm0, %v92_v60, 4286644096 }
  0x20   :  { %v312_v5 = vmax.bf16 %v310_v2, %v307_v1  ;;  %v318_v7 = vsel %vm154_vm0, %v128_v61, 4286644096  ;;  %v305_v8 = vmax.bf16 %v303_v56, %v301_v63  ;;  %v704_v9 = vmax.bf16 %v898_v36, %v290_v62  ;;  %v22_v12 = vld [vmem:[%s1575_s0 + $0x30] sm:$0xf]  ;;  %v23_v16 = vld [vmem:[%s1575_s0 + $0x34] sm:$0xf] }
  0x21   :  { %v322_v10 = vsel %vm154_vm0, %v21_v57, 4286644096  ;;  %v325_v11 = vsel %vm154_vm0, %v57_v59, 4286644096  ;;  %868 = vst [vmem:[%s1576_s1 + $0x18] sm:$0xff] %v867_v3  }
  0x22   :  { %v316_v13 = vmax.bf16 %v314_v6, %v312_v5  ;;  %v327_v14 = vmax.bf16 %v325_v11, %v322_v10  ;;  %v329_v15 = vsel %vm154_vm0, %v93_v0, 4286644096  ;;  %v58_v17 = vld [vmem:[%s1575_s0 + $0xc0] sm:$0xf]  ;;  %v705_v18 = vmax.bf16 %v898_v36, %v305_v8  ;;  %v59_v20 = vld [vmem:[%s1575_s0 + $0xc4] sm:$0xf] }
  0x23   :  { %v333_v19 = vsel %vm154_vm0, %v129_v4, 4286644096  ;;  %v94_v21 = vld [vmem:[%s1575_s0 + $0x150] sm:$0xf]  ;;  %v95_v24 = vld [vmem:[%s1575_s0 + $0x154] sm:$0xf] }
  0x24   :  { %v320_v22 = vmax.bf16 %v318_v7, %v316_v13  ;;  %v331_v23 = vmax.bf16 %v329_v15, %v327_v14  ;;  %v130_v25 = vld [vmem:[%s1575_s0 + $0x1e0] sm:$0xf]  ;;  %v337_v26 = vsel %vm154_vm0, %v22_v12, 4286644096  ;;  %v869_v27 = vcombine.low %v704_v9, %v705_v18  ;;  %v131_v33 = vld [vmem:[%s1575_s0 + $0x1e4] sm:$0xf] }
  0x25   :  { %v340_v28 = vsel %vm154_vm0, %v58_v17, 4286644096  ;;  %v344_v29 = vsel %vm154_vm0, %v94_v21, 4286644096  ;;  %v348_v30 = vsel %vm154_vm0, %v130_v25, 4286644096 }
  0x26   :  { %v335_v31 = vmax.bf16 %v333_v19, %v331_v23  ;;  %v706_v32 = vmax.bf16 %v898_v36, %v320_v22  ;;  %v342_v34 = vmax.bf16 %v340_v28, %v337_v26  ;;  %v352_v35 = vsel %vm154_vm0, %v23_v16, 4286644096  ;;  %870 = vst [vmem:[%s1576_s1 + $0x20] sm:$0xff] %v869_v27   ;;  %v24_v39 = vld [vmem:[%s1575_s0 + $0x38] sm:$0xf] }
  0x27   :  { %v355_v37 = vsel %vm154_vm0, %v59_v20, 4286644096  ;;  %v359_v38 = vsel %vm154_vm0, %v95_v24, 4286644096  ;;  %v25_v43 = vld [vmem:[%s1575_s0 + $0x3c] sm:$0xf] }
  0x28   :  { %v707_v40 = vmax.bf16 %v898_v36, %v335_v31  ;;  %v346_v41 = vmax.bf16 %v344_v29, %v342_v34  ;;  %v357_v42 = vmax.bf16 %v355_v37, %v352_v35  ;;  %v60_v44 = vld [vmem:[%s1575_s0 + $0xc8] sm:$0xf]  ;;  %v96_v45 = vld [vmem:[%s1575_s0 + $0x158] sm:$0xf]  ;;  %v363_v46 = vsel %vm154_vm0, %v131_v33, 4286644096 }
  0x29   :  { %v61_v47 = vld [vmem:[%s1575_s0 + $0xcc] sm:$0xf]  ;;  %v97_v48 = vld [vmem:[%s1575_s0 + $0x15c] sm:$0xf]  ;;  %v132_v52 = vld [vmem:[%s1575_s0 + $0x1e8] sm:$0xf] }
  0x2a   :  { %v871_v49 = vcombine.low %v706_v32, %v707_v40  ;;  %v350_v50 = vmax.bf16 %v348_v30, %v346_v41  ;;  %v361_v51 = vmax.bf16 %v359_v38, %v357_v42  ;;  %v133_v53 = vld [vmem:[%s1575_s0 + $0x1ec] sm:$0xf]  ;;  %v367_v54 = vsel %vm154_vm0, %v24_v39, 4286644096  ;;  %v26_v57 = vld [vmem:[%s1575_s0 + $0x40] sm:$0xf] }
  0x2b   :  { %v370_v55 = vsel %vm154_vm0, %v60_v44, 4286644096  ;;  %v374_v56 = vsel %vm154_vm0, %v96_v45, 4286644096  ;;  %v382_v61 = vsel %vm154_vm0, %v25_v43, 4286644096 }
  0x2c   :  { %872 = vst [vmem:[%s1576_s1 + $0x28] sm:$0xff] %v871_v49   ;;  %v365_v58 = vmax.bf16 %v363_v46, %v361_v51  ;;  %v708_v59 = vmax.bf16 %v898_v36, %v350_v50  ;;  %v372_v60 = vmax.bf16 %v370_v55, %v367_v54  ;;  %v27_v62 = vld [vmem:[%s1575_s0 + $0x44] sm:$0xf]  ;;  %v62_v63 = vld [vmem:[%s1575_s0 + $0xd0] sm:$0xf] }
  0x2d   :  { %v378_v0 = vsel %vm154_vm0, %v132_v52, 4286644096  ;;  %v385_v1 = vsel %vm154_vm0, %v61_v47, 4286644096  ;;  %v389_v2 = vsel %vm154_vm0, %v97_v48, 4286644096 }
  0x2e   :  { %v709_v3 = vmax.bf16 %v898_v36, %v365_v58  ;;  %v376_v4 = vmax.bf16 %v374_v56, %v372_v60  ;;  %v387_v5 = vmax.bf16 %v385_v1, %v382_v61  ;;  %v63_v6 = vld [vmem:[%s1575_s0 + $0xd4] sm:$0xf]  ;;  %v98_v7 = vld [vmem:[%s1575_s0 + $0x160] sm:$0xf]  ;;  %v134_v8 = vld [vmem:[%s1575_s0 + $0x1f0] sm:$0xf] }
  0x2f   :  { %v393_v9 = vsel %vm154_vm0, %v133_v53, 4286644096  ;;  %v397_v10 = vsel %vm154_vm0, %v26_v57, 4286644096  ;;  %v400_v11 = vsel %vm154_vm0, %v62_v63, 4286644096 }
  0x30   :  { %v873_v12 = vcombine.low %v708_v59, %v709_v3  ;;  %v380_v13 = vmax.bf16 %v378_v0, %v376_v4  ;;  %v391_v14 = vmax.bf16 %v389_v2, %v387_v5  ;;  %v99_v15 = vld [vmem:[%s1575_s0 + $0x164] sm:$0xf]  ;;  %v135_v16 = vld [vmem:[%s1575_s0 + $0x1f4] sm:$0xf]  ;;  %v402_v17 = vmax.bf16 %v400_v11, %v397_v10  ;;  %v28_v18 = vld [vmem:[%s1575_s0 + $0x48] sm:$0xf] }
  0x31   :  { %v404_v19 = vsel %vm154_vm0, %v98_v7, 4286644096  ;;  %v408_v20 = vsel %vm154_vm0, %v134_v8, 4286644096  ;;  %v412_v21 = vsel %vm154_vm0, %v27_v62, 4286644096 }
  0x32   :  { %v29_v22 = vld [vmem:[%s1575_s0 + $0x4c] sm:$0xf]  ;;  %874 = vst [vmem:[%s1576_s1 + $0x30] sm:$0xff] %v873_v12   ;;  %v395_v23 = vmax.bf16 %v393_v9, %v391_v14  ;;  %v710_v24 = vmax.bf16 %v898_v36, %v380_v13  ;;  %v406_v25 = vmax.bf16 %v404_v19, %v402_v17  ;;  %v415_v26 = vsel %vm154_vm0, %v63_v6, 4286644096 }
  0x33   :  { %v64_v27 = vld [vmem:[%s1575_s0 + $0xd8] sm:$0xf]  ;;  %v100_v28 = vld [vmem:[%s1575_s0 + $0x168] sm:$0xf]  ;;  %v417_v29 = vmax.bf16 %v415_v26, %v412_v21  ;;  %v419_v30 = vsel %vm154_vm0, %v99_v15, 4286644096 }
  0x34   :  { %v423_v31 = vsel %vm154_vm0, %v135_v16, 4286644096  ;;  %v65_v32 = vld [vmem:[%s1575_s0 + $0xdc] sm:$0xf]  ;;  %v711_v33 = vmax.bf16 %v898_v36, %v395_v23  ;;  %v410_v34 = vmax.bf16 %v408_v20, %v406_v25  ;;  %v101_v35 = vld [vmem:[%s1575_s0 + $0x16c] sm:$0xf] }
  0x35   :  { %v136_v37 = vld [vmem:[%s1575_s0 + $0x1f8] sm:$0xf]  ;;  %v427_v38 = vsel %vm154_vm0, %v28_v18, 4286644096  ;;  %v421_v39 = vmax.bf16 %v419_v30, %v417_v29  ;;  %v137_v40 = vld [vmem:[%s1575_s0 + $0x1fc] sm:$0xf] }
  0x36   :  { %v430_v41 = vsel %vm154_vm0, %v64_v27, 4286644096  ;;  %v434_v42 = vsel %vm154_vm0, %v100_v28, 4286644096  ;;  %v875_v43 = vcombine.low %v710_v24, %v711_v33  ;;  %v438_v45 = vsel %vm154_vm0, %v136_v37, 4286644096 }
  0x37   :  { %v432_v44 = vmax.bf16 %v430_v41, %v427_v38  ;;  %v442_v46 = vsel %vm154_vm0, %v29_v22, 4286644096  ;;  %v30_v47 = vld [vmem:[%s1575_s0 + $0x50] sm:$0xf]  ;;  %v425_v48 = vmax.bf16 %v423_v31, %v421_v39  ;;  %v712_v49 = vmax.bf16 %v898_v36, %v410_v34  ;;  %v31_v52 = vld [vmem:[%s1575_s0 + $0x54] sm:$0xf] }
  0x38   :  { %v445_v50 = vsel %vm154_vm0, %v65_v32, 4286644096  ;;  %v449_v51 = vsel %vm154_vm0, %v101_v35, 4286644096  ;;  %876 = vst [vmem:[%s1576_s1 + $0x38] sm:$0xff] %v875_v43  }
  0x39   :  { %v436_v53 = vmax.bf16 %v434_v42, %v432_v44  ;;  %v447_v54 = vmax.bf16 %v445_v50, %v442_v46  ;;  %v453_v55 = vsel %vm154_vm0, %v137_v40, 4286644096  ;;  %v66_v56 = vld [vmem:[%s1575_s0 + $0xe0] sm:$0xf]  ;;  %v102_v57 = vld [vmem:[%s1575_s0 + $0x170] sm:$0xf]  ;;  %v713_v58 = vmax.bf16 %v898_v36, %v425_v48 }
  0x3a   :  { %v67_v59 = vld [vmem:[%s1575_s0 + $0xe4] sm:$0xf]  ;;  %v103_v60 = vld [vmem:[%s1575_s0 + $0x174] sm:$0xf]  ;;  %v138_v61 = vld [vmem:[%s1575_s0 + $0x200] sm:$0xf] }
  0x3b   :  { %v440_v62 = vmax.bf16 %v438_v45, %v436_v53  ;;  %v451_v63 = vmax.bf16 %v449_v51, %v447_v54  ;;  %v139_v0 = vld [vmem:[%s1575_s0 + $0x204] sm:$0xf]  ;;  %v457_v1 = vsel %vm154_vm0, %v30_v47, 4286644096  ;;  %v460_v2 = vsel %vm154_vm0, %v66_v56, 4286644096 }
  0x3c   :  { %v877_v3 = vcombine.low %v712_v49, %v713_v58  ;;  %v462_v4 = vmax.bf16 %v460_v2, %v457_v1  ;;  %v464_v5 = vsel %vm154_vm0, %v102_v57, 4286644096  ;;  %v468_v6 = vsel %vm154_vm0, %v138_v61, 4286644096  ;;  %v32_v7 = vld [vmem:[%s1575_s0 + $0x58] sm:$0xf] }
  0x3d   :  { %v455_v8 = vmax.bf16 %v453_v55, %v451_v63  ;;  %v714_v9 = vmax.bf16 %v898_v36, %v440_v62  ;;  %v472_v10 = vsel %vm154_vm0, %v31_v52, 4286644096  ;;  %v475_v11 = vsel %vm154_vm0, %v67_v59, 4286644096  ;;  %v68_v12 = vld [vmem:[%s1575_s0 + $0xe8] sm:$0xf] }
  0x3e   :  { %878 = vst [vmem:[%s1576_s1 + $0x40] sm:$0xff] %v877_v3   ;;  %v466_v13 = vmax.bf16 %v464_v5, %v462_v4  ;;  %v477_v14 = vmax.bf16 %v475_v11, %v472_v10  ;;  %v479_v15 = vsel %vm154_vm0, %v103_v60, 4286644096  ;;  %v483_v16 = vsel %vm154_vm0, %v139_v0, 4286644096 }
  0x3f   :  { %v33_v17 = vld [vmem:[%s1575_s0 + $0x5c] sm:$0xf]  ;;  %v715_v18 = vmax.bf16 %v898_v36, %v455_v8  ;;  %v69_v19 = vld [vmem:[%s1575_s0 + $0xec] sm:$0xf]  ;;  %v104_v20 = vld [vmem:[%s1575_s0 + $0x178] sm:$0xf] }
  0x40   :  { %v140_v21 = vld [vmem:[%s1575_s0 + $0x208] sm:$0xf]  ;;  %v470_v22 = vmax.bf16 %v468_v6, %v466_v13  ;;  %v481_v23 = vmax.bf16 %v479_v15, %v477_v14  ;;  %v105_v24 = vld [vmem:[%s1575_s0 + $0x17c] sm:$0xf]  ;;  %v487_v25 = vsel %vm154_vm0, %v32_v7, 4286644096 }
  0x41   :  { %v490_v26 = vsel %vm154_vm0, %v68_v12, 4286644096  ;;  %v879_v27 = vcombine.low %v714_v9, %v715_v18  ;;  %v141_v28 = vld [vmem:[%s1575_s0 + $0x20c] sm:$0xf]  ;;  %v494_v30 = vsel %vm154_vm0, %v104_v20, 4286644096 }
  0x42   :  { %v492_v29 = vmax.bf16 %v490_v26, %v487_v25  ;;  %v498_v31 = vsel %vm154_vm0, %v140_v21, 4286644096  ;;  %v485_v32 = vmax.bf16 %v483_v16, %v481_v23  ;;  %v716_v33 = vmax.bf16 %v898_v36, %v470_v22  ;;  %v34_v37 = vld [vmem:[%s1575_s0 + $0x60] sm:$0xf]  ;;  %v35_v41 = vld [vmem:[%s1575_s0 + $0x64] sm:$0xf] }
  0x43   :  { %v502_v34 = vsel %vm154_vm0, %v33_v17, 4286644096  ;;  %v505_v35 = vsel %vm154_vm0, %v69_v19, 4286644096  ;;  %880 = vst [vmem:[%s1576_s1 + $0x48] sm:$0xff] %v879_v27  }
  0x44   :  { %v496_v38 = vmax.bf16 %v494_v30, %v492_v29  ;;  %v507_v39 = vmax.bf16 %v505_v35, %v502_v34  ;;  %v509_v40 = vsel %vm154_vm0, %v105_v24, 4286644096  ;;  %v70_v42 = vld [vmem:[%s1575_s0 + $0xf0] sm:$0xf]  ;;  %v717_v43 = vmax.bf16 %v898_v36, %v485_v32  ;;  %v71_v45 = vld [vmem:[%s1575_s0 + $0xf4] sm:$0xf] }
  0x45   :  { %v513_v44 = vsel %vm154_vm0, %v141_v28, 4286644096  ;;  %v106_v46 = vld [vmem:[%s1575_s0 + $0x180] sm:$0xf]  ;;  %v107_v49 = vld [vmem:[%s1575_s0 + $0x184] sm:$0xf] }
  0x46   :  { %v500_v47 = vmax.bf16 %v498_v31, %v496_v38  ;;  %v511_v48 = vmax.bf16 %v509_v40, %v507_v39  ;;  %v142_v50 = vld [vmem:[%s1575_s0 + $0x210] sm:$0xf]  ;;  %v517_v51 = vsel %vm154_vm0, %v34_v37, 4286644096  ;;  %v881_v52 = vcombine.low %v716_v33, %v717_v43  ;;  %v143_v58 = vld [vmem:[%s1575_s0 + $0x214] sm:$0xf] }
  0x47   :  { %v520_v53 = vsel %vm154_vm0, %v70_v42, 4286644096  ;;  %v524_v54 = vsel %vm154_vm0, %v106_v46, 4286644096  ;;  %v528_v55 = vsel %vm154_vm0, %v142_v50, 4286644096 }
  0x48   :  { %v515_v56 = vmax.bf16 %v513_v44, %v511_v48  ;;  %v718_v57 = vmax.bf16 %v898_v36, %v500_v47  ;;  %v522_v59 = vmax.bf16 %v520_v53, %v517_v51  ;;  %v532_v60 = vsel %vm154_vm0, %v35_v41, 4286644096  ;;  %882 = vst [vmem:[%s1576_s1 + $0x50] sm:$0xff] %v881_v52   ;;  %v36_v63 = vld [vmem:[%s1575_s0 + $0x68] sm:$0xf] }
  0x49   :  { %v535_v61 = vsel %vm154_vm0, %v71_v45, 4286644096  ;;  %v539_v62 = vsel %vm154_vm0, %v107_v49, 4286644096  ;;  %v37_v3 = vld [vmem:[%s1575_s0 + $0x6c] sm:$0xf] }
  0x4a   :  { %v719_v0 = vmax.bf16 %v898_v36, %v515_v56  ;;  %v526_v1 = vmax.bf16 %v524_v54, %v522_v59  ;;  %v537_v2 = vmax.bf16 %v535_v61, %v532_v60  ;;  %v72_v4 = vld [vmem:[%s1575_s0 + $0xf8] sm:$0xf]  ;;  %v108_v5 = vld [vmem:[%s1575_s0 + $0x188] sm:$0xf]  ;;  %v543_v6 = vsel %vm154_vm0, %v143_v58, 4286644096 }
  0x4b   :  { %v73_v7 = vld [vmem:[%s1575_s0 + $0xfc] sm:$0xf]  ;;  %v109_v8 = vld [vmem:[%s1575_s0 + $0x18c] sm:$0xf]  ;;  %v144_v12 = vld [vmem:[%s1575_s0 + $0x218] sm:$0xf] }
  0x4c   :  { %v883_v9 = vcombine.low %v718_v57, %v719_v0  ;;  %v530_v10 = vmax.bf16 %v528_v55, %v526_v1  ;;  %v541_v11 = vmax.bf16 %v539_v62, %v537_v2  ;;  %v145_v13 = vld [vmem:[%s1575_s0 + $0x21c] sm:$0xf]  ;;  %v547_v14 = vsel %vm154_vm0, %v36_v63, 4286644096  ;;  %v38_v17 = vld [vmem:[%s1575_s0 + $0x70] sm:$0xf] }
  0x4d   :  { %v550_v15 = vsel %vm154_vm0, %v72_v4, 4286644096  ;;  %v554_v16 = vsel %vm154_vm0, %v108_v5, 4286644096  ;;  %v562_v21 = vsel %vm154_vm0, %v37_v3, 4286644096 }
  0x4e   :  { %884 = vst [vmem:[%s1576_s1 + $0x58] sm:$0xff] %v883_v9   ;;  %v545_v18 = vmax.bf16 %v543_v6, %v541_v11  ;;  %v720_v19 = vmax.bf16 %v898_v36, %v530_v10  ;;  %v552_v20 = vmax.bf16 %v550_v15, %v547_v14  ;;  %v39_v22 = vld [vmem:[%s1575_s0 + $0x74] sm:$0xf]  ;;  %v74_v23 = vld [vmem:[%s1575_s0 + $0x100] sm:$0xf] }
  0x4f   :  { %v558_v24 = vsel %vm154_vm0, %v144_v12, 4286644096  ;;  %v565_v25 = vsel %vm154_vm0, %v73_v7, 4286644096  ;;  %v569_v26 = vsel %vm154_vm0, %v109_v8, 4286644096 }
  0x50   :  { %v721_v27 = vmax.bf16 %v898_v36, %v545_v18  ;;  %v556_v28 = vmax.bf16 %v554_v16, %v552_v20  ;;  %v567_v29 = vmax.bf16 %v565_v25, %v562_v21  ;;  %v75_v30 = vld [vmem:[%s1575_s0 + $0x104] sm:$0xf]  ;;  %v110_v31 = vld [vmem:[%s1575_s0 + $0x190] sm:$0xf]  ;;  %v146_v32 = vld [vmem:[%s1575_s0 + $0x220] sm:$0xf] }
  0x51   :  { %v573_v33 = vsel %vm154_vm0, %v145_v13, 4286644096  ;;  %v577_v34 = vsel %vm154_vm0, %v38_v17, 4286644096  ;;  %v580_v35 = vsel %vm154_vm0, %v74_v23, 4286644096 }
  0x52   :  { %v885_v37 = vcombine.low %v720_v19, %v721_v27  ;;  %v560_v38 = vmax.bf16 %v558_v24, %v556_v28  ;;  %v571_v39 = vmax.bf16 %v569_v26, %v567_v29  ;;  %v111_v40 = vld [vmem:[%s1575_s0 + $0x194] sm:$0xf]  ;;  %v147_v41 = vld [vmem:[%s1575_s0 + $0x224] sm:$0xf]  ;;  %v582_v42 = vmax.bf16 %v580_v35, %v577_v34  ;;  %v40_v43 = vld [vmem:[%s1575_s0 + $0x78] sm:$0xf] }
  0x53   :  { %v584_v44 = vsel %vm154_vm0, %v110_v31, 4286644096  ;;  %v588_v45 = vsel %vm154_vm0, %v146_v32, 4286644096  ;;  %v592_v46 = vsel %vm154_vm0, %v39_v22, 4286644096 }
  0x54   :  { %v41_v47 = vld [vmem:[%s1575_s0 + $0x7c] sm:$0xf]  ;;  %886 = vst [vmem:[%s1576_s1 + $0x60] sm:$0xff] %v885_v37   ;;  %v575_v48 = vmax.bf16 %v573_v33, %v571_v39  ;;  %v722_v49 = vmax.bf16 %v898_v36, %v560_v38  ;;  %v586_v50 = vmax.bf16 %v584_v44, %v582_v42  ;;  %v595_v51 = vsel %vm154_vm0, %v75_v30, 4286644096 }
  0x55   :  { %v76_v52 = vld [vmem:[%s1575_s0 + $0x108] sm:$0xf]  ;;  %v112_v53 = vld [vmem:[%s1575_s0 + $0x198] sm:$0xf]  ;;  %v597_v54 = vmax.bf16 %v595_v51, %v592_v46  ;;  %v599_v55 = vsel %vm154_vm0, %v111_v40, 4286644096 }
  0x56   :  { %v603_v56 = vsel %vm154_vm0, %v147_v41, 4286644096  ;;  %v77_v57 = vld [vmem:[%s1575_s0 + $0x10c] sm:$0xf]  ;;  %v723_v58 = vmax.bf16 %v898_v36, %v575_v48  ;;  %v590_v59 = vmax.bf16 %v588_v45, %v586_v50  ;;  %v113_v60 = vld [vmem:[%s1575_s0 + $0x19c] sm:$0xf] }
  0x57   :  { %v148_v61 = vld [vmem:[%s1575_s0 + $0x228] sm:$0xf]  ;;  %v607_v62 = vsel %vm154_vm0, %v40_v43, 4286644096  ;;  %v601_v63 = vmax.bf16 %v599_v55, %v597_v54  ;;  %v149_v0 = vld [vmem:[%s1575_s0 + $0x22c] sm:$0xf] }
  0x58   :  { %v610_v1 = vsel %vm154_vm0, %v76_v52, 4286644096  ;;  %v614_v2 = vsel %vm154_vm0, %v112_v53, 4286644096  ;;  %v887_v3 = vcombine.low %v722_v49, %v723_v58  ;;  %v618_v5 = vsel %vm154_vm0, %v148_v61, 4286644096 }
  0x59   :  { %v612_v4 = vmax.bf16 %v610_v1, %v607_v62  ;;  %v622_v6 = vsel %vm154_vm0, %v41_v47, 4286644096  ;;  %v42_v7 = vld [vmem:[%s1575_s0 + $0x80] sm:$0xf]  ;;  %v605_v8 = vmax.bf16 %v603_v56, %v601_v63  ;;  %v724_v9 = vmax.bf16 %v898_v36, %v590_v59  ;;  %v43_v12 = vld [vmem:[%s1575_s0 + $0x84] sm:$0xf] }
  0x5a   :  { %v625_v10 = vsel %vm154_vm0, %v77_v57, 4286644096  ;;  %v629_v11 = vsel %vm154_vm0, %v113_v60, 4286644096  ;;  %888 = vst [vmem:[%s1576_s1 + $0x68] sm:$0xff] %v887_v3  }
  0x5b   :  { %v616_v13 = vmax.bf16 %v614_v2, %v612_v4  ;;  %v627_v14 = vmax.bf16 %v625_v10, %v622_v6  ;;  %v633_v15 = vsel %vm154_vm0, %v149_v0, 4286644096  ;;  %v78_v16 = vld [vmem:[%s1575_s0 + $0x110] sm:$0xf]  ;;  %v114_v17 = vld [vmem:[%s1575_s0 + $0x1a0] sm:$0xf]  ;;  %v725_v18 = vmax.bf16 %v898_v36, %v605_v8 }
  0x5c   :  { %v79_v19 = vld [vmem:[%s1575_s0 + $0x114] sm:$0xf]  ;;  %v115_v20 = vld [vmem:[%s1575_s0 + $0x1a4] sm:$0xf]  ;;  %v150_v21 = vld [vmem:[%s1575_s0 + $0x230] sm:$0xf] }
  0x5d   :  { %v620_v22 = vmax.bf16 %v618_v5, %v616_v13  ;;  %v631_v23 = vmax.bf16 %v629_v11, %v627_v14  ;;  %v151_v24 = vld [vmem:[%s1575_s0 + $0x234] sm:$0xf]  ;;  %v637_v25 = vsel %vm154_vm0, %v42_v7, 4286644096  ;;  %v640_v26 = vsel %vm154_vm0, %v78_v16, 4286644096 }
  0x5e   :  { %v889_v27 = vcombine.low %v724_v9, %v725_v18  ;;  %v642_v28 = vmax.bf16 %v640_v26, %v637_v25  ;;  %v644_v29 = vsel %vm154_vm0, %v114_v17, 4286644096  ;;  %v648_v30 = vsel %vm154_vm0, %v150_v21, 4286644096  ;;  %v44_v31 = vld [vmem:[%s1575_s0 + $0x88] sm:$0xf] }
  0x5f   :  { %v635_v32 = vmax.bf16 %v633_v15, %v631_v23  ;;  %v726_v33 = vmax.bf16 %v898_v36, %v620_v22  ;;  %v652_v34 = vsel %vm154_vm0, %v43_v12, 4286644096  ;;  %v655_v35 = vsel %vm154_vm0, %v79_v19, 4286644096  ;;  %v80_v37 = vld [vmem:[%s1575_s0 + $0x118] sm:$0xf] }
  0x60   :  { %890 = vst [vmem:[%s1576_s1 + $0x70] sm:$0xff] %v889_v27   ;;  %v646_v38 = vmax.bf16 %v644_v29, %v642_v28  ;;  %v657_v39 = vmax.bf16 %v655_v35, %v652_v34  ;;  %v659_v40 = vsel %vm154_vm0, %v115_v20, 4286644096  ;;  %v663_v41 = vsel %vm154_vm0, %v151_v24, 4286644096 }
  0x61   :  { %v45_v42 = vld [vmem:[%s1575_s0 + $0x8c] sm:$0xf]  ;;  %v727_v43 = vmax.bf16 %v898_v36, %v635_v32  ;;  %v81_v44 = vld [vmem:[%s1575_s0 + $0x11c] sm:$0xf]  ;;  %v116_v45 = vld [vmem:[%s1575_s0 + $0x1a8] sm:$0xf] }
  0x62   :  { %v152_v46 = vld [vmem:[%s1575_s0 + $0x238] sm:$0xf]  ;;  %v650_v47 = vmax.bf16 %v648_v30, %v646_v38  ;;  %v661_v48 = vmax.bf16 %v659_v40, %v657_v39  ;;  %v117_v49 = vld [vmem:[%s1575_s0 + $0x1ac] sm:$0xf]  ;;  %v667_v50 = vsel %vm154_vm0, %v44_v31, 4286644096 }
  0x63   :  { %v670_v51 = vsel %vm154_vm0, %v80_v37, 4286644096  ;;  %v891_v52 = vcombine.low %v726_v33, %v727_v43  ;;  %v153_v53 = vld [vmem:[%s1575_s0 + $0x23c] sm:$0xf]  ;;  %v674_v55 = vsel %vm154_vm0, %v116_v45, 4286644096 }
  0x64   :  { %v672_v54 = vmax.bf16 %v670_v51, %v667_v50  ;;  %v678_v56 = vsel %vm154_vm0, %v152_v46, 4286644096  ;;  %v665_v57 = vmax.bf16 %v663_v41, %v661_v48  ;;  %v728_v58 = vmax.bf16 %v898_v36, %v650_v47 }
  0x65   :  { %v682_v59 = vsel %vm154_vm0, %v45_v42, 4286644096  ;;  %v685_v60 = vsel %vm154_vm0, %v81_v44, 4286644096  ;;  %892 = vst [vmem:[%s1576_s1 + $0x78] sm:$0xff] %v891_v52  }
  0x66   :  { %v676_v61 = vmax.bf16 %v674_v55, %v672_v54  ;;  %v687_v62 = vmax.bf16 %v685_v60, %v682_v59  ;;  %v689_v63 = vsel %vm154_vm0, %v117_v49, 4286644096  ;;  %v729_v0 = vmax.bf16 %v898_v36, %v665_v57 }
  0x67   :  { %v693_v1 = vsel %vm154_vm0, %v153_v53, 4286644096 }
  0x68   :  { %v680_v2 = vmax.bf16 %v678_v56, %v676_v61  ;;  %v691_v3 = vmax.bf16 %v689_v63, %v687_v62  ;;  %v893_v4 = vcombine.low %v728_v58, %v729_v0 }
  0x6a   :  { %v695_v5 = vmax.bf16 %v693_v1, %v691_v3  ;;  %v730_v6 = vmax.bf16 %v898_v36, %v680_v2  ;;  %894 = vst [vmem:[%s1576_s1 + $0x80] sm:$0xff] %v893_v4  }
  0x6c   :  { %v731_v7 = vmax.bf16 %v898_v36, %v695_v5 }
  0x6e   :  { %v895_v8 = vcombine.low %v730_v6, %v731_v7 }
  0x70   :  { %896 = vst [vmem:[%s1576_s1 + $0x88] sm:$0xff] %v895_v8  }

// kernel: forward.8
= control target key start
LH: loop header
LB: loop body
LE: loop exit
PB: predicated region body
PF: predicated region fallthrough
CT: control target
= control target key end

     0   :  { %vm26_vm0 = vcmask 1043456   ;;  %v114_v35 = vmov 0   ;;  %s195_s0 = inlined_call_operand.vmem [shape: bf16[4,32,128], index: 0, kind: input, shape index: {}]   ;;  %s196_s1 = inlined_call_operand.vmem [shape: bf16[32,128], index: 1, kind: output, shape index: {}]  }
   0x1   :  { %v10_v0 = vld [vmem:[%s195_s0] sm:$0xf]  ;;  %v11_v1 = vld [vmem:[%s195_s0 + $0x4] sm:$0xf]  ;;  %v14_v2 = vld [vmem:[%s195_s0 + $0x10] sm:$0xf] }
   0x2   :  { %v15_v3 = vld [vmem:[%s195_s0 + $0x14] sm:$0xf]  ;;  %v18_v4 = vld [vmem:[%s195_s0 + $0x20] sm:$0xf]  ;;  %v19_v5 = vld [vmem:[%s195_s0 + $0x24] sm:$0xf] }
   0x3   :  { %v22_v6 = vld [vmem:[%s195_s0 + $0x30] sm:$0xf]  ;;  %v23_v7 = vld [vmem:[%s195_s0 + $0x34] sm:$0xf]  ;;  %v29_v8 = vsel %vm26_vm0, %v10_v0, 4286644096 }
   0x4   :  { %v32_v9 = vsel %vm26_vm0, %v14_v2, 4286644096  ;;  %v36_v10 = vsel %vm26_vm0, %v18_v4, 4286644096  ;;  %v44_v12 = vsel %vm26_vm0, %v11_v1, 4286644096 }
   0x5   :  { %v34_v11 = vmax.bf16 %v32_v9, %v29_v8  ;;  %v47_v13 = vsel %vm26_vm0, %v15_v3, 4286644096  ;;  %v51_v14 = vsel %vm26_vm0, %v19_v5, 4286644096  ;;  %v40_v15 = vsel %vm26_vm0, %v22_v6, 4286644096 }
   0x6   :  { %v49_v16 = vmax.bf16 %v47_v13, %v44_v12  ;;  %v55_v17 = vsel %vm26_vm0, %v23_v7, 4286644096  ;;  %v12_v18 = vld [vmem:[%s195_s0 + $0x8] sm:$0xf]  ;;  %v13_v20 = vld [vmem:[%s195_s0 + $0xc] sm:$0xf] }
   0x7   :  { %v38_v19 = vmax.bf16 %v36_v10, %v34_v11  ;;  %v16_v21 = vld [vmem:[%s195_s0 + $0x18] sm:$0xf]  ;;  %v20_v22 = vld [vmem:[%s195_s0 + $0x28] sm:$0xf]  ;;  %v17_v24 = vld [vmem:[%s195_s0 + $0x1c] sm:$0xf] }
   0x8   :  { %v53_v23 = vmax.bf16 %v51_v14, %v49_v16  ;;  %v21_v25 = vld [vmem:[%s195_s0 + $0x2c] sm:$0xf]  ;;  %v24_v26 = vld [vmem:[%s195_s0 + $0x38] sm:$0xf]  ;;  %v59_v28 = vsel %vm26_vm0, %v12_v18, 4286644096 }
   0x9   :  { %v42_v27 = vmax.bf16 %v40_v15, %v38_v19  ;;  %v62_v29 = vsel %vm26_vm0, %v16_v21, 4286644096  ;;  %v66_v30 = vsel %vm26_vm0, %v20_v22, 4286644096  ;;  %v25_v32 = vld [vmem:[%s195_s0 + $0x3c] sm:$0xf] }
   0xa   :  { %v57_v31 = vmax.bf16 %v55_v17, %v53_v23  ;;  %v64_v33 = vmax.bf16 %v62_v29, %v59_v28  ;;  %v74_v34 = vsel %vm26_vm0, %v13_v20, 4286644096  ;;  %v70_v37 = vsel %vm26_vm0, %v24_v26, 4286644096 }
   0xb   :  { %v88_v36 = vmax.bf16 %v114_v35, %v42_v27  ;;  %v77_v38 = vsel %vm26_vm0, %v17_v24, 4286644096  ;;  %v81_v39 = vsel %vm26_vm0, %v21_v25, 4286644096  ;;  %v85_v43 = vsel %vm26_vm0, %v25_v32, 4286644096 }
   0xc   :  { %v89_v40 = vmax.bf16 %v114_v35, %v57_v31  ;;  %v68_v41 = vmax.bf16 %v66_v30, %v64_v33  ;;  %v79_v42 = vmax.bf16 %v77_v38, %v74_v34 }
   0xe   :  { %v110_v44 = vcombine.low %v88_v36, %v89_v40  ;;  %v72_v45 = vmax.bf16 %v70_v37, %v68_v41  ;;  %v83_v46 = vmax.bf16 %v81_v39, %v79_v42 }
  0x10   :  { %104 = vst [vmem:[%s196_s1] sm:$0xff] %v110_v44   ;;  %v87_v47 = vmax.bf16 %v85_v43, %v83_v46  ;;  %v90_v48 = vmax.bf16 %v114_v35, %v72_v45 }
  0x12   :  { %v91_v49 = vmax.bf16 %v114_v35, %v87_v47 }
  0x14   :  { %v111_v50 = vcombine.low %v90_v48, %v91_v49 }
  0x16   :  { %112 = vst [vmem:[%s196_s1 + $0x8] sm:$0xff] %v111_v50  }

// kernel: forward.5
= control target key start
LH: loop header
LB: loop body
LE: loop exit
PB: predicated region body
PF: predicated region fallthrough
CT: control target
= control target key end

     0   :  { %s5631_s12 = smov 0   ;;  %s6879_s0 = inlined_call_operand.vmem [shape: bf16[2,672,128], index: 0, kind: input, shape index: {}]   ;;  %s6880_s1 = inlined_call_operand.vmem [shape: bf16[5,128,128], index: 1, kind: input, shape index: {}]   ;;  %s6881_s2 = inlined_call_operand.vmem [shape: f32[1,128], index: 2, kind: input, shape index: {}]   ;;  %s6882_s3 = inlined_call_operand.vmem [shape: bf16[2,576,128], index: 3, kind: output, shape index: {}]  }
   0x1 LB: > { %s4044_s13 = sadd.s32 4294967295, %s5609_s12   ;;  %p4048_p0 = scmp.ge.s32.totalorder %s5609_s12, 1  ;;  %s5609_s12 = sphi %s5631_s12, %s13_s12  }
   0x2   : > { %p137_p1 = scmp.lt.s32.totalorder %s5609_s12, 3 }
   0x4   : > { %p138_p2 = pnand %p4048_p0, %p137_p1 }
   0x6   : > { %141 = sbr.rel (%p138_p2) target bundleno = 604 (0x25c), region = 32 }
   0xb   : > { %v5383_v0 = vld [vmem:[%s6880_s1 + $0x78] sm:$0xff]   ;;  %p161_p3 = scmp.lt.s32.totalorder %s4044_s13, 1  ;;  %v5384_v1 = vld [vmem:[%s6880_s1 + $0x70] sm:$0xff]   ;;  %v5385_v2 = vld [vmem:[%s6880_s1 + $0x68] sm:$0xff]  }
   0xc   : > { %4917 = vmatprep.subr.bf16.mxu0 %v5383_v0  ;;  %5357 = vmatprep.subr.bf16.mxu1 %v5383_v0  ;;  %v5386_v3 = vld [vmem:[%s6880_s1 + $0x60] sm:$0xff]   ;;  %v5387_v16 = vld [vmem:[%s6880_s1 + $0x58] sm:$0xff]   ;;  %v5388_v23 = vld [vmem:[%s6880_s1 + $0x50] sm:$0xff]  }
   0xd   : > { %s7071_s13 = smov (!%p161_p3, %s4044_s13), 1  ;;  %4918 = vmatpush3.bf16.msra.mxu0 %v5383_v0  ;;  %5365 = vmatpush3.bf16.msra.mxu1 %v5383_v0  ;;  %v5389_v29 = vld [vmem:[%s6880_s1 + $0x48] sm:$0xff]   ;;  %v5390_v34 = vld [vmem:[%s6880_s1 + $0x40] sm:$0xff]   ;;  %v5399_v39 = vld [vmem:[%s6880_s1 + $0x38] sm:$0xff]  }
   0xe   : > { %4919 = vmatprep.subr.bf16.mxu0 %v5384_v1  ;;  %5358 = vmatprep.subr.bf16.mxu1 %v5384_v1  ;;  %s5373_s20 = smul.u32 336, %s7071_s13  ;;  %v5400_v42 = vld [vmem:[%s6880_s1 + $0xb8] sm:$0xff]   ;;  %v5405_v53 = vld [vmem:[%s6880_s1 + $0x30] sm:$0xff]  }
   0xf   : > { %v5406_v57 = vld [vmem:[%s6880_s1 + $0xb0] sm:$0xff]   ;;  %s5374_s27 = smul.u32 288, %s7071_s13 }
  0x10   : > { %s5654_s23 = scalar_lea.vmem %s6879_s0, %s5373_s20  ;;  %v5429_v30 = vld [vmem:[%s6880_s1 + $0x10] sm:$0xff]  }
  0x11   : > { %4920 = vmatpush3.bf16.msra.mxu0 %v5384_v1  ;;  %5366 = vmatpush3.bf16.msra.mxu1 %v5384_v1  ;;  %v5660_v4 = vld [vmem:[%s5654_s23 + $0xc] sm:$0xf]  ;;  %v5663_v5 = vld [vmem:[%s5654_s23 + $0x10] sm:$0xf]  ;;  %v5666_v6 = vld [vmem:[%s5654_s23 + $0x14] sm:$0xf]  ;;  %s6701_s30 = scalar_lea.vmem %s6882_s3, %s5374_s27 }
  0x12   : > { %4921 = vmatprep.subr.bf16.mxu0 %v5385_v2  ;;  %5359 = vmatprep.subr.bf16.mxu1 %v5385_v2  ;;  %v4067_v7 = vcombine.low %v5660_v4, %v5663_v5  ;;  %v5671_v8 = vld [vmem:[%s5654_s23 + $0x98] sm:$0xf]  ;;  %v5674_v9 = vld [vmem:[%s5654_s23 + $0x9c] sm:$0xf]  ;;  %v5679_v11 = vld [vmem:[%s5654_s23 + $0xa0] sm:$0xf] }
  0x13   : > { %6902 = vst [vmem:[#allocation2_spill] sm:$0xff] %v5679_v11  ;;  %v5682_v12 = vld [vmem:[%s5654_s23 + $0xa4] sm:$0xf]  ;;  %v4085_v14 = vcombine.low %v5674_v9, %v5679_v11  ;;  %v5694_v17 = vld [vmem:[%s5654_s23 + $0x18] sm:$0xf]  ;;  %v5432_v21 = vld [vmem:[%s6880_s1 + $0x90] sm:$0xff]  }
  0x14   : > { %6903 = vst [vmem:[#allocation3_spill] sm:$0xff] %v5682_v12  ;;  %4933 = vmatprep.mubr.bf16.mxu0 %v4067_v7  ;;  %v5697_v18 = vld [vmem:[%s5654_s23 + $0x1c] sm:$0xf]  ;;  %v5700_v19 = vld [vmem:[%s5654_s23 + $0x20] sm:$0xf]  ;;  %v4068_v49 = vcombine.low %v5666_v6, %v5694_v17  ;;  %v5412_v7 = vld [vmem:[%s6880_s1 + $0xa8] sm:$0xff]  }
  0x15   : > { %4922 = vmatpush3.bf16.msra.mxu0 %v5385_v2  ;;  %5367 = vmatpush3.bf16.msra.mxu1 %v5385_v2  ;;  %v5703_v20 = vld [vmem:[%s5654_s23 + $0x24] sm:$0xf]  ;;  %v5713_v24 = vld [vmem:[%s5654_s23 + $0x28] sm:$0xf]  ;;  %v5716_v25 = vld [vmem:[%s5654_s23 + $0x2c] sm:$0xf]  ;;  %v4069_v51 = vcombine.low %v5697_v18, %v5700_v19 }
  0x16   : > { %4923 = vmatprep.subr.bf16.mxu0 %v5386_v3  ;;  %5360 = vmatprep.subr.bf16.mxu1 %v5386_v3  ;;  %v5719_v26 = vld [vmem:[%s5654_s23 + $0x30] sm:$0xf]  ;;  %v5722_v27 = vld [vmem:[%s5654_s23 + $0x34] sm:$0xf]  ;;  %v5732_v31 = vld [vmem:[%s5654_s23 + $0x38] sm:$0xf] }
  0x17   : > { %4969 = vmatprep.mubr.bf16.mxu1 %v4085_v14  ;;  %v5735_v32 = vld [vmem:[%s5654_s23 + $0x3c] sm:$0xf]  ;;  %v5743_v35 = vld [vmem:[%s5654_s23 + $0x40] sm:$0xf]  ;;  %v5746_v36 = vld [vmem:[%s5654_s23 + $0x44] sm:$0xf] }
  0x18   : > { %v5751_v38 = vld [vmem:[%s5654_s23 + $0xa8] sm:$0xf]  ;;  %v5760_v41 = vld [vmem:[%s5654_s23 + $0x4c] sm:$0xf]  ;;  %v5766_v43 = vld [vmem:[%s5654_s23 + $0x50] sm:$0xf]  ;;  %v4073_v37 = vcombine.low %v5735_v32, %v5743_v35 }
  0x19   : > { %4924 = vmatpush3.bf16.msra.mxu0 %v5386_v3  ;;  %5368 = vmatpush3.bf16.msra.mxu1 %v5386_v3  ;;  %6904 = vst [vmem:[#allocation4_spill] sm:$0xff] %v5751_v38  ;;  %v5757_v40 = vld [vmem:[%s5654_s23 + $0x48] sm:$0xf]  ;;  %v5769_v44 = vld [vmem:[%s5654_s23 + $0x54] sm:$0xf]  ;;  %v4086_v50 = vcombine.low %v5682_v12, %v5751_v38  ;;  %v5446_v38 = vld [vmem:[%s6880_s1 + $0x80] sm:$0xff]  }
  0x1a   : > { %4925 = vmatprep.subr.bf16.mxu0 %v5387_v16  ;;  %5361 = vmatprep.subr.bf16.mxu1 %v5387_v16  ;;  %v5774_v46 = vld [vmem:[%s5654_s23 + $0xac] sm:$0xf]  ;;  %v5777_v47 = vld [vmem:[%s5654_s23 + $0xb0] sm:$0xf]  ;;  %v5793_v54 = vld [vmem:[%s5654_s23 + $0x58] sm:$0xf] }
  0x1b   : > { %6905 = vst [vmem:[#allocation5_spill] sm:$0xff] %v5774_v46  ;;  %v4087_v52 = vcombine.low %v5774_v46, %v5777_v47  ;;  %v5796_v55 = vld [vmem:[%s5654_s23 + $0x5c] sm:$0xf]  ;;  %v5799_v56 = vld [vmem:[%s5654_s23 + $0xb4] sm:$0xf]  ;;  %v5411_v3 = vld [vmem:[%s6880_s1 + $0x28] sm:$0xff]  }
  0x1c   : > { %v5805_v58 = vld [vmem:[%s5654_s23 + $0x60] sm:$0xf]  ;;  %v5808_v59 = vld [vmem:[%s5654_s23 + $0x64] sm:$0xf]  ;;  %v5813_v61 = vld [vmem:[%s5654_s23 + $0xb8] sm:$0xf] }
  0x1d   : > { %4926 = vmatpush3.bf16.msra.mxu0 %v5387_v16  ;;  %5369 = vmatpush3.bf16.msra.mxu1 %v5387_v16  ;;  %6906 = vst [vmem:[#allocation6_spill] sm:$0xff] %v5813_v61  ;;  %v5816_v62 = vld [vmem:[%s5654_s23 + $0xbc] sm:$0xf]  ;;  %v5821_v0 = vld [vmem:[%s5654_s23 + $0x68] sm:$0xf]  ;;  %v4070_v16 = vcombine.low %v5703_v20, %v5713_v24 }
  0x1e   : > { %4927 = vmatprep.subr.bf16.mxu0 %v5388_v23  ;;  %5362 = vmatprep.subr.bf16.mxu1 %v5388_v23  ;;  %6907 = vst [vmem:[#allocation7_spill] sm:$0xff] %v5816_v62  ;;  %v5824_v1 = vld [vmem:[%s5654_s23 + $0x6c] sm:$0xf]  ;;  %v5827_v2 = vld [vmem:[%s5654_s23 + $0xc0] sm:$0xf] }
  0x1f   : > { %v5869_v15 = vld [vmem:[%s5654_s23 + $0x84] sm:$0xf]  ;;  %v5877_v14 = vld [vmem:[%s5654_s23 + $0xc8] sm:$0xf]  ;;  %v5880_v63 = vld [vmem:[%s5654_s23 + $0xcc] sm:$0xf] }
  0x20   : > { %6909 = vst [vmem:[#allocation9_spill] sm:$0xff] %v5877_v14  ;;  %6910 = vst [vmem:[#allocation10_spill] sm:$0xff] %v5880_v63  ;;  %v5885_v48 = vld [vmem:[%s5654_s23 + $0xd0] sm:$0xf]  ;;  %v5894_v13 = vld [vmem:[%s5654_s23 + $0x8c] sm:$0xf] }
  0x21   : > { %4928 = vmatpush3.bf16.msra.mxu0 %v5388_v23  ;;  %5370 = vmatpush3.bf16.msra.mxu1 %v5388_v23  ;;  %v4088_v23 = vcombine.low %v5799_v56, %v5813_v61  ;;  %v5906_v60 = vld [vmem:[%s5654_s23 + $0x90] sm:$0xf]  ;;  %v5909_v45 = vld [vmem:[%s5654_s23 + $0x94] sm:$0xf]  ;;  %v4091_v33 = vcombine.low %v5880_v63, %v5885_v48  ;;  %v5924_v22 = vld [vmem:[%s5654_s23 + $0xd8] sm:$0xf] }
  0x22   : > { %4929 = vmatprep.subr.bf16.mxu0 %v5389_v29  ;;  %5363 = vmatprep.subr.bf16.mxu1 %v5389_v29  ;;  %v5921_v28 = vld [vmem:[%s5654_s23 + $0xd4] sm:$0xf]  ;;  %v5930_v10 = vld [vmem:[%s5654_s23 + $0xdc] sm:$0xf]  ;;  %v5958_v46 = vld [vmem:[%s5654_s23 + $0xe8] sm:$0xf] }
  0x23   : > { %6911 = vst [vmem:[#allocation11_spill] sm:$0xff] %v5921_v28  ;;  %6912 = vst [vmem:[#allocation12_spill] sm:$0xff] %v5930_v10  ;;  %v5964_v12 = vld [vmem:[%s5654_s23 + $0xec] sm:$0xf]  ;;  %v5992_v11 = vld [vmem:[%s5654_s23 + $0xf4] sm:$0xf] }
  0x24   : > { %6914 = vst [vmem:[#allocation14_spill] sm:$0xff] %v5958_v46  ;;  %6915 = vst [vmem:[#allocation15_spill] sm:$0xff] %v5964_v12  ;;  %v6007_v61 = vld [vmem:[%s5654_s23 + $0x100] sm:$0xf] }
  0x25   : > { %4930 = vmatpush3.bf16.msra.mxu0 %v5389_v29  ;;  %5371 = vmatpush3.bf16.msra.mxu1 %v5389_v29  ;;  %v5842_v29 = vld [vmem:[%s5654_s23 + $0x70] sm:$0xf]  ;;  %6916 = vst [vmem:[#allocation16_spill] sm:$0xff] %v6007_v61 }
  0x26   : > { %4931 = vmatprep.subr.bf16.mxu0 %v5390_v34  ;;  %5364 = vmatprep.subr.bf16.mxu1 %v5390_v34 }
  0x29   : > { %4932 = vmatpush3.bf16.msra.mxu0 %v5390_v34  ;;  %5372 = vmatpush3.bf16.msra.mxu1 %v5390_v34  ;;  %v5845_v34 = vld [vmem:[%s5654_s23 + $0x74] sm:$0xf] }
  0x2a   : > { %5005 = vmatprep.subr.bf16.mxu1 %v5399_v39  ;;  %5093 = vmatprep.subr.bf16.mxu0 %v5400_v42 }
  0x2c   : > { %4934 = vmatmul.mubr.bf16.vlgmr.msra.gmra.mxu0 %v4068_v49  ;;  %4970 = vmatmul.mubr.bf16.vlgmr.msra.gmra.mxu1 %v4086_v50  ;;  %v5417_v50 = vld [vmem:[%s6880_s1 + $0x20] sm:$0xff]  }
  0x2d   : > { %5006 = vmatpush3.bf16.msra.mxu1 %v5399_v39  ;;  %5094 = vmatpush3.bf16.msra.mxu0 %v5400_v42  ;;  %v4071_v39 = vcombine.low %v5716_v25, %v5719_v26  ;;  %v4089_v42 = vcombine.low %v5816_v62, %v5827_v2  ;;  %v5874_v49 = vld [vmem:[%s5654_s23 + $0xc4] sm:$0xf]  ;;  %v4079_v62 = vcombine.low %v5824_v1, %v5842_v29 }
  0x2e   : > { %4937 = vmatprep.mubr.bf16.mxu0 %v4069_v51  ;;  %4973 = vmatprep.mubr.bf16.mxu1 %v4087_v52  ;;  %v5857_v51 = vld [vmem:[%s5654_s23 + $0x78] sm:$0xf]  ;;  %v5860_v52 = vld [vmem:[%s5654_s23 + $0x7c] sm:$0xf]  ;;  %6908 = vst [vmem:[#allocation8_spill] sm:$0xff] %v5874_v49 }
  0x2f   : > { %5007 = vmatprep.subr.bf16.mxu1 %v5405_v53  ;;  %5095 = vmatprep.subr.bf16.mxu0 %v5406_v57 }
  0x31   : > { %5008 = vmatpush3.bf16.msra.mxu1 %v5405_v53  ;;  %5096 = vmatpush3.bf16.msra.mxu0 %v5406_v57  ;;  %v5418_v53 = vld [vmem:[%s6880_s1 + $0xa0] sm:$0xff]  }
  0x32   : > { %5009 = vmatprep.subr.bf16.mxu1 %v5411_v3  ;;  %5097 = vmatprep.subr.bf16.mxu0 %v5412_v7  ;;  %v5866_v57 = vld [vmem:[%s5654_s23 + $0x80] sm:$0xf] }
  0x33   : > { %v4081_v63 = vcombine.low %v5860_v52, %v5866_v57 }
  0x34   : > { %4938 = vmatmul.mubr.bf16.gmra.mxu0 %v4070_v16  ;;  %4974 = vmatmul.mubr.bf16.gmra.mxu1 %v4088_v23  ;;  %v5423_v16 = vld [vmem:[%s6880_s1 + $0x18] sm:$0xff]   ;;  %v5891_v23 = vld [vmem:[%s5654_s23 + $0x88] sm:$0xf] }
  0x35   : > { %4941 = vmatprep.mubr.bf16.mxu0 %v4071_v39  ;;  %4977 = vmatprep.mubr.bf16.mxu1 %v4089_v42  ;;  %v5424_v39 = vld [vmem:[%s6880_s1 + $0x98] sm:$0xff]   ;;  %v4090_v42 = vcombine.low %v5874_v49, %v5877_v14  ;;  %v6026_v14 = vld [vmem:[%s5654_s23 + $0x10c] sm:$0xf]  ;;  %v4083_v49 = vcombine.low %v5894_v13, %v5906_v60 }
  0x36   : > { %5010 = vmatpush3.bf16.msra.mxu1 %v5411_v3  ;;  %5098 = vmatpush3.bf16.msra.mxu0 %v5412_v7  ;;  %v4072_v7 = vcombine.low %v5722_v27, %v5732_v31  ;;  %v5435_v3 = vld [vmem:[%s6880_s1 + $0x8] sm:$0xff]  }
  0x37   : > { %5011 = vmatprep.subr.bf16.mxu1 %v5417_v50  ;;  %5099 = vmatprep.subr.bf16.mxu0 %v5418_v53 }
  0x3a   : > { %5012 = vmatpush3.bf16.msra.mxu1 %v5417_v50  ;;  %5100 = vmatpush3.bf16.msra.mxu0 %v5418_v53  ;;  %v5933_v50 = vld [vmem:[%s5654_s23 + $0xe0] sm:$0xf]  ;;  %v5955_v53 = vld [vmem:[%s5654_s23 + $0xe4] sm:$0xf] }
  0x3b   : > { %5013 = vmatprep.subr.bf16.mxu1 %v5423_v16  ;;  %5101 = vmatprep.subr.bf16.mxu0 %v5424_v39  ;;  %6913 = vst [vmem:[#allocation13_spill] sm:$0xff] %v5955_v53 }
  0x3c   : > { %4942 = vmatmul.mubr.bf16.gmra.mxu0 %v4072_v7  ;;  %4978 = vmatmul.mubr.bf16.gmra.mxu1 %v4090_v42  ;;  %v4092_v7 = vcombine.low %v5921_v28, %v5924_v22  ;;  %v5443_v42 = vld [vmem:[%s6880_s1] sm:$0xff]   ;;  %v6045_v28 = vld [vmem:[%s5654_s23 + $0x118] sm:$0xf] }
  0x3d   : > { %4945 = vmatprep.mubr.bf16.mxu0 %v4073_v37  ;;  %4981 = vmatprep.mubr.bf16.mxu1 %v4091_v33  ;;  %v5440_v33 = vld [vmem:[%s6880_s1 + $0x88] sm:$0xff]   ;;  %v4074_v37 = vcombine.low %v5746_v36, %v5757_v40  ;;  %6920 = vst [vmem:[#allocation20_spill] sm:$0xff] %v6045_v28 }
  0x3e   : > { %5014 = vmatpush3.bf16.msra.mxu1 %v5423_v16  ;;  %5102 = vmatpush3.bf16.msra.mxu0 %v5424_v39  ;;  %v4075_v16 = vcombine.low %v5760_v41, %v5766_v43  ;;  %v4093_v39 = vcombine.low %v5930_v10, %v5933_v50  ;;  %v5445_v10 = vld [vmem:[%s5654_s23 + $0x124] sm:$0xff]  }
  0x3f   : > { %5015 = vmatprep.subr.bf16.mxu1 %v5429_v30  ;;  %5103 = vmatprep.subr.bf16.mxu0 %v5432_v21 }
  0x42   : > { %5016 = vmatpush3.bf16.msra.mxu1 %v5429_v30  ;;  %5104 = vmatpush3.bf16.msra.mxu0 %v5432_v21  ;;  %v5969_v30 = vld [vmem:[%s5654_s23 + $0xf0] sm:$0xf]  ;;  %v5997_v21 = vld [vmem:[%s5654_s23 + $0xf8] sm:$0xf] }
  0x43   : > { %5017 = vmatprep.subr.bf16.mxu1 %v5435_v3  ;;  %5105 = vmatprep.subr.bf16.mxu0 %v5440_v33 }
  0x44   : > { %4946 = vmatmul.mubr.bf16.gmra.mxu0 %v4074_v37  ;;  %4982 = vmatmul.mubr.bf16.gmra.mxu1 %v4092_v7  ;;  %v5976_v37 = vld [vmem:[%s6880_s1 + $0xf8] sm:$0xff]  }
  0x45   : > { %4949 = vmatprep.mubr.bf16.mxu0 %v4075_v16  ;;  %4985 = vmatprep.mubr.bf16.mxu1 %v4093_v39  ;;  %v5981_v7 = vld [vmem:[%s6880_s1 + $0x138] sm:$0xff]   ;;  %v4076_v16 = vcombine.low %v5769_v44, %v5793_v54  ;;  %v4095_v39 = vcombine.low %v5964_v12, %v5969_v30  ;;  %v5447_v12 = vld [vmem:[%s5654_s23] sm:$0xff]  }
  0x46   : > { %5018 = vmatpush3.bf16.msra.mxu1 %v5435_v3  ;;  %5106 = vmatpush3.bf16.msra.mxu0 %v5440_v33  ;;  %v4094_v3 = vcombine.low %v5955_v53, %v5958_v46  ;;  %v4077_v33 = vcombine.low %v5796_v55, %v5805_v58  ;;  %v4084_v46 = vcombine.low %v5909_v45, %v5671_v8  ;;  %v174_v53 = vld [vmem:[%s5654_s23 + $0x8] sm:$0xf] }
  0x47   : > { %5019 = vmatprep.subr.bf16.mxu1 %v5443_v42  ;;  %5107 = vmatprep.subr.bf16.mxu0 %v5446_v38 }
  0x4a   : > { %5020 = vmatpush3.bf16.msra.mxu1 %v5443_v42  ;;  %5108 = vmatpush3.bf16.msra.mxu0 %v5446_v38  ;;  %v6002_v42 = vld [vmem:[%s5654_s23 + $0xfc] sm:$0xf]  ;;  %v6021_v38 = vld [vmem:[%s5654_s23 + $0x108] sm:$0xf] }
  0x4b   : > { %5181 = vmatprep.subr.bf16.mxu1 %v5976_v37  ;;  %5269 = vmatprep.subr.bf16.mxu0 %v5981_v7 }
  0x4c   : > { %4950 = vmatmul.mubr.bf16.gmra.mxu0 %v4076_v16  ;;  %4986 = vmatmul.mubr.bf16.gmra.mxu1 %v4094_v3  ;;  %v4078_v16 = vcombine.low %v5808_v59, %v5821_v0  ;;  %v4096_v3 = vcombine.low %v5992_v11, %v5997_v21 }
  0x4d   : > { %4953 = vmatprep.mubr.bf16.mxu0 %v4077_v33  ;;  %4989 = vmatprep.mubr.bf16.mxu1 %v4095_v39  ;;  %v4097_v33 = vcombine.low %v6002_v42, %v6007_v61  ;;  %v6018_v39 = vld [vmem:[%s5654_s23 + $0x104] sm:$0xf]  ;;  %v6031_v61 = vld [vmem:[%s5654_s23 + $0x110] sm:$0xf] }
  0x4e   : > { %6917 = vst [vmem:[#allocation17_spill] sm:$0xff] %v6018_v39  ;;  %6918 = vst [vmem:[#allocation18_spill] sm:$0xff] %v6031_v61 }
  0x54   : > { %4954 = vmatmul.mubr.bf16.gmra.mxu0 %v4078_v16  ;;  %4990 = vmatmul.mubr.bf16.gmra.mxu1 %v4096_v3  ;;  %v4080_v16 = vcombine.low %v5845_v34, %v5857_v51  ;;  %v4098_v3 = vcombine.low %v6018_v39, %v6021_v38  ;;  %v6050_v39 = vld [vmem:[%s5654_s23 + $0x11c] sm:$0xf] }
  0x55   : > { %4957 = vmatprep.mubr.bf16.mxu0 %v4079_v62  ;;  %4993 = vmatprep.mubr.bf16.mxu1 %v4097_v33  ;;  %v4099_v62 = vcombine.low %v6026_v14, %v6031_v61  ;;  %v6042_v33 = vld [vmem:[%s5654_s23 + $0x114] sm:$0xf]  ;;  %v260_v61 = vld [vmem:[%s5654_s23 + $0x120] sm:$0xf] }
  0x56   : > { %6919 = vst [vmem:[#allocation19_spill] sm:$0xff] %v6042_v33 }
  0x5c   : > { %4958 = vmatmul.mubr.bf16.gmra.mxu0 %v4080_v16  ;;  %4994 = vmatmul.mubr.bf16.gmra.mxu1 %v4098_v3  ;;  %v4082_v16 = vcombine.low %v5869_v15, %v5891_v23  ;;  %v4100_v3 = vcombine.low %v6042_v33, %v6045_v28  ;;  %v5448_v28 = vld [vmem:[%s5654_s23 + $0x18] sm:$0xff]   ;;  %v4142_v33 = vcombine.low %v5997_v21, %v6002_v42 }
  0x5d   : > { %4961 = vmatprep.mubr.bf16.mxu0 %v4081_v63  ;;  %4997 = vmatprep.mubr.bf16.mxu1 %v4099_v62  ;;  %v4101_v63 = vcombine.low %v6050_v39, %v260_v61  ;;  %v4141_v62 = vcombine.low %v5969_v30, %v5992_v11  ;;  %v5449_v61 = vld [vmem:[%s5654_s23 + $0x20] sm:$0xff]  }
  0x64   : > { %4962 = vmatmul.mubr.bf16.gmra.mxu0 %v4082_v16  ;;  %4998 = vmatmul.mubr.bf16.gmra.mxu1 %v4100_v3  ;;  %v5452_v16 = vld [vmem:[%s5654_s23 + $0x28] sm:$0xff]   ;;  %v5459_v3 = vld [vmem:[%s6880_s1 + $0xf0] sm:$0xff]  }
  0x65   : > { %4965 = vmatprep.mubr.bf16.mxu0 %v4083_v49  ;;  %5001 = vmatprep.mubr.bf16.mxu1 %v4101_v63  ;;  %v4112_v49 = vcombine.low %v174_v53, %v5660_v4  ;;  %v5460_v63 = vld [vmem:[%s6880_s1 + $0x130] sm:$0xff]   ;;  %v5470_v4 = vld [vmem:[%s6880_s1 + $0x128] sm:$0xff]   ;;  %v5456_v53 = vld [vmem:[%s5654_s23 + $0x38] sm:$0xff]  }
  0x6c   : > { %4966 = vmatmul.mubr.bf16.gmra.mxu0 %v4084_v46  ;;  %5002 = vmatmul.mubr.bf16.gmra.mxu1 %v5445_v10  ;;  %v4144_v46 = vcombine.low %v6021_v38, %v6026_v14  ;;  %v5469_v10 = vld [vmem:[%s6880_s1 + $0xe8] sm:$0xff]   ;;  %v5532_v14 = vld [vmem:[%s5654_s23 + $0x30] sm:$0xff]  }
  0x6d   : > { %5021 = vmatprep.mubr.bf16.mxu1 %v5447_v12  ;;  %5109 = vmatprep.mubr.bf16.mxu0 %v5448_v28  ;;  %v6921_v12 = vcombine.low %v5663_v5, %v5666_v6  ;;  %v5454_v28 = vld [vmem:[%s5654_s23 + $0x30] sm:$0xff]   ;;  %v5484_v5 = vld [vmem:[%s6880_s1 + $0x120] sm:$0xff]   ;;  %v6922_v6 = vcombine.low %v5694_v17, %v5697_v18  ;;  %v5462_v17 = vld [vmem:[%s5654_s23 + $0x48] sm:$0xff]  }
  0x6e   : > { %v5501_v18 = vld [vmem:[%s6880_s1 + $0xd0] sm:$0xff]  }
  0x74   : > { %5022 = vmatmul.mubr.bf16.vlgmr.msra.gmra.mxu1 %v4112_v49  ;;  %5110 = vmatmul.mubr.bf16.vlgmr.msra.gmra.mxu0 %v5449_v61  ;;  %v5479_v61 = vld [vmem:[%s6880_s1 + $0xe0] sm:$0xff]   ;;  %v5493_v49 = vld [vmem:[%s6880_s1 + $0x118] sm:$0xff]  }
  0x75   : > { %5182 = vmatpush3.bf16.msra.mxu1 %v5976_v37  ;;  %5270 = vmatpush3.bf16.msra.mxu0 %v5981_v7  ;;  %v6923_v37 = vcombine.low %v5700_v19, %v5703_v20  ;;  %v5492_v7 = vld [vmem:[%s6880_s1 + $0xd8] sm:$0xff]   ;;  %v5502_v19 = vld [vmem:[%s6880_s1 + $0x110] sm:$0xff]   ;;  %v6924_v20 = vcombine.low %v5713_v24, %v5716_v25  ;;  %v5521_v25 = vld [vmem:[%s6880_s1 + $0xc0] sm:$0xff]  }
  0x76   : > { %5025 = vmatprep.mubr.bf16.mxu1 %v6921_v12  ;;  %5113 = vmatprep.mubr.bf16.mxu0 %v5452_v16  ;;  %v5458_v16 = vld [vmem:[%s5654_s23 + $0x40] sm:$0xff]   ;;  %v5466_v24 = vld [vmem:[%s5654_s23 + $0x58] sm:$0xff]   ;;  %v6927_v12 = vcombine.low %v5743_v35, %v5746_v36  ;;  %v5474_v35 = vld [vmem:[%s5654_s23 + $0x70] sm:$0xff]  }
  0x77   : > { %5183 = vmatprep.subr.bf16.mxu1 %v5459_v3  ;;  %5271 = vmatprep.subr.bf16.mxu0 %v5460_v63  ;;  %v5476_v36 = vld [vmem:[%s5654_s23 + $0x78] sm:$0xff]  }
  0x79   : > { %5184 = vmatpush3.bf16.msra.mxu1 %v5459_v3  ;;  %5272 = vmatpush3.bf16.msra.mxu0 %v5460_v63  ;;  %v6925_v3 = vcombine.low %v5719_v26, %v5722_v27  ;;  %v5511_v63 = vld [vmem:[%s6880_s1 + $0xc8] sm:$0xff]   ;;  %v5526_v26 = vld [vmem:[%s6880_s1 + $0x100] sm:$0xff]   ;;  %v6926_v27 = vcombine.low %v5732_v31, %v5735_v32  ;;  %v6928_v31 = vcombine.low %v5757_v40, %v5760_v41 }
  0x7a   : > { %5185 = vmatprep.subr.bf16.mxu1 %v5469_v10  ;;  %5273 = vmatprep.subr.bf16.mxu0 %v5470_v4  ;;  %v6929_v32 = vcombine.low %v5766_v43, %v5769_v44  ;;  %v6931_v40 = vcombine.low %v5805_v58, %v5808_v59  ;;  %v5478_v41 = vld [vmem:[%s5654_s23 + $0x80] sm:$0xff]   ;;  %v6932_v43 = vcombine.low %v5821_v0, %v5824_v1  ;;  %v5490_v1 = vld [vmem:[%s5654_s23 + $0xa8] sm:$0xff]  }
  0x7b   : > { %v6933_v44 = vcombine.low %v5842_v29, %v5845_v34  ;;  %v6934_v58 = vcombine.low %v5857_v51, %v5860_v52  ;;  %v6935_v59 = vcombine.low %v5866_v57, %v5869_v15  ;;  %v5488_v0 = vld [vmem:[%s5654_s23 + $0xa0] sm:$0xff]   ;;  %v6936_v29 = vcombine.low %v5891_v23, %v5894_v13  ;;  %v5491_v51 = vld [vmem:[%s5654_s23 + $0xb0] sm:$0xff]   ;;  %v5494_v52 = vld [vmem:[%s5654_s23 + $0xb8] sm:$0xff]  }
  0x7c   : > { %5026 = vmatmul.mubr.bf16.gmra.mxu1 %v6922_v6  ;;  %5114 = vmatmul.mubr.bf16.gmra.mxu0 %v5454_v28  ;;  %v5468_v28 = vld [vmem:[%s5654_s23 + $0x60] sm:$0xff]   ;;  %v6937_v34 = vcombine.low %v5906_v60, %v5909_v45  ;;  %v6938_v15 = vcombine.low %v5671_v8, %v5674_v9  ;;  %v6940_v6 = vld [vmem:[#allocation3_spill] sm:$0xff]  ;;  %v6942_v45 = vld [vmem:[#allocation4_spill] sm:$0xff]  ;;  %v6945_v8 = vcombine.low %v5777_v47, %v5799_v56 }
  0x7d   : > { %5029 = vmatprep.mubr.bf16.mxu1 %v6923_v37  ;;  %5117 = vmatprep.mubr.bf16.mxu0 %v5456_v53  ;;  %v5472_v53 = vld [vmem:[%s5654_s23 + $0x68] sm:$0xff]   ;;  %v6939_v57 = vld [vmem:[#allocation2_spill] sm:$0xff]  ;;  %v6943_v60 = vld [vmem:[#allocation5_spill] sm:$0xff] }
  0x7e   : > { %5186 = vmatpush3.bf16.msra.mxu1 %v5469_v10  ;;  %5274 = vmatpush3.bf16.msra.mxu0 %v5470_v4  ;;  %v5512_v10 = vld [vmem:[%s6880_s1 + $0x108] sm:$0xff]   ;;  %v5464_v4 = vld [vmem:[%s5654_s23 + $0x50] sm:$0xff]   ;;  %v6941_v13 = vcombine.low %v6939_v57, %v6940_v6  ;;  %v5496_v23 = vld [vmem:[%s5654_s23 + $0xc0] sm:$0xff]  }
  0x7f   : > { %5187 = vmatprep.subr.bf16.mxu1 %v5479_v61  ;;  %5275 = vmatprep.subr.bf16.mxu0 %v5484_v5  ;;  %v5498_v37 = vld [vmem:[%s5654_s23 + $0xc8] sm:$0xff]   ;;  %v5500_v9 = vld [vmem:[%s5654_s23 + $0xd0] sm:$0xff]   ;;  %v6951_v47 = vld [vmem:[#allocation9_spill] sm:$0xff] }
  0x80   : > { %v6952_v56 = vld [vmem:[#allocation10_spill] sm:$0xff]  ;;  %v5530_v57 = vld [vmem:[%s5654_s23 + $0x130] sm:$0xff]  }
  0x81   : > { %v5531_v6 = vld [vmem:[%s5654_s23 + $0x24] sm:$0xff]  }
  0x82   : > { %5188 = vmatpush3.bf16.msra.mxu1 %v5479_v61  ;;  %5276 = vmatpush3.bf16.msra.mxu0 %v5484_v5  ;;  %v6930_v61 = vcombine.low %v5793_v54, %v5796_v55  ;;  %v5481_v5 = vld [vmem:[%s5654_s23 + $0x88] sm:$0xff]   ;;  %v5483_v54 = vld [vmem:[%s5654_s23 + $0x90] sm:$0xff]   ;;  %v5486_v55 = vld [vmem:[%s5654_s23 + $0x98] sm:$0xff]  }
  0x83   : > { %5189 = vmatprep.subr.bf16.mxu1 %v5492_v7  ;;  %5277 = vmatprep.subr.bf16.mxu0 %v5493_v49 }
  0x84   : > { %5030 = vmatmul.mubr.bf16.gmra.mxu1 %v6924_v20  ;;  %5118 = vmatmul.mubr.bf16.gmra.mxu0 %v5458_v16  ;;  %v6946_v16 = vld [vmem:[#allocation6_spill] sm:$0xff] }
  0x85   : > { %5033 = vmatprep.mubr.bf16.mxu1 %v6925_v3  ;;  %5121 = vmatprep.mubr.bf16.mxu0 %v5462_v17  ;;  %v6947_v17 = vld [vmem:[#allocation7_spill] sm:$0xff]  ;;  %v5506_v3 = vld [vmem:[%s5654_s23 + $0xe0] sm:$0xff]  }
  0x86   : > { %5190 = vmatpush3.bf16.msra.mxu1 %v5492_v7  ;;  %5278 = vmatpush3.bf16.msra.mxu0 %v5493_v49  ;;  %v6944_v7 = vcombine.low %v6942_v45, %v6943_v60  ;;  %v5504_v49 = vld [vmem:[%s5654_s23 + $0xd8] sm:$0xff]  }
  0x87   : > { %5191 = vmatprep.subr.bf16.mxu1 %v5501_v18  ;;  %5279 = vmatprep.subr.bf16.mxu0 %v5502_v19 }
  0x8a   : > { %5192 = vmatpush3.bf16.msra.mxu1 %v5501_v18  ;;  %5280 = vmatpush3.bf16.msra.mxu0 %v5502_v19  ;;  %v6948_v18 = vcombine.low %v6946_v16, %v6947_v17  ;;  %v6949_v19 = vld [vmem:[#allocation8_spill] sm:$0xff] }
  0x8b   : > { %5193 = vmatprep.subr.bf16.mxu1 %v5511_v63  ;;  %5281 = vmatprep.subr.bf16.mxu0 %v5512_v10  ;;  %v6950_v20 = vcombine.low %v5827_v2, %v6949_v19  ;;  %v6956_v2 = vld [vmem:[#allocation12_spill] sm:$0xff] }
  0x8c   : > { %5034 = vmatmul.mubr.bf16.gmra.mxu1 %v6926_v27  ;;  %5122 = vmatmul.mubr.bf16.gmra.mxu0 %v5464_v4  ;;  %v6954_v4 = vld [vmem:[#allocation11_spill] sm:$0xff]  ;;  %v6957_v27 = vcombine.low %v5924_v22, %v6956_v2  ;;  %v5520_v22 = vld [vmem:[%s5654_s23 + $0x110] sm:$0xff]  }
  0x8d   : > { %5037 = vmatprep.mubr.bf16.mxu1 %v6927_v12  ;;  %5125 = vmatprep.mubr.bf16.mxu0 %v5466_v24  ;;  %v6955_v24 = vcombine.low %v5885_v48, %v6954_v4  ;;  %v6958_v12 = vld [vmem:[#allocation13_spill] sm:$0xff]  ;;  %v5539_v4 = vld [vmem:[%s5654_s23 + $0x44] sm:$0xff]  }
  0x8e   : > { %5194 = vmatpush3.bf16.msra.mxu1 %v5511_v63  ;;  %5282 = vmatpush3.bf16.msra.mxu0 %v5512_v10  ;;  %v5508_v63 = vld [vmem:[%s5654_s23 + $0xe8] sm:$0xff]   ;;  %v6953_v10 = vcombine.low %v6951_v47, %v6952_v56  ;;  %v5537_v56 = vld [vmem:[%s5654_s23 + $0x3c] sm:$0xff]  }
  0x8f   : > { %5195 = vmatprep.subr.bf16.mxu1 %v5521_v25  ;;  %5283 = vmatprep.subr.bf16.mxu0 %v5526_v26 }
  0x92   : > { %5196 = vmatpush3.bf16.msra.mxu1 %v5521_v25  ;;  %5284 = vmatpush3.bf16.msra.mxu0 %v5526_v26  ;;  %v5510_v25 = vld [vmem:[%s5654_s23 + $0xf0] sm:$0xff]   ;;  %v5514_v26 = vld [vmem:[%s5654_s23 + $0xf8] sm:$0xff]  }
  0x94   : > { %5038 = vmatmul.mubr.bf16.gmra.mxu1 %v6928_v31  ;;  %5126 = vmatmul.mubr.bf16.gmra.mxu0 %v5468_v28  ;;  %v6959_v28 = vcombine.low %v5933_v50, %v6958_v12  ;;  %v5518_v31 = vld [vmem:[%s5654_s23 + $0x108] sm:$0xff]  }
  0x95   : > { %5041 = vmatprep.mubr.bf16.mxu1 %v6929_v32  ;;  %5129 = vmatprep.mubr.bf16.mxu0 %v5472_v53  ;;  %v5516_v53 = vld [vmem:[%s5654_s23 + $0x100] sm:$0xff]  }
  0x96   : > { %v6960_v32 = vld [vmem:[#allocation14_spill] sm:$0xff] }
  0x9c   : > { %5042 = vmatmul.mubr.bf16.gmra.mxu1 %v6930_v61  ;;  %5130 = vmatmul.mubr.bf16.gmra.mxu0 %v5474_v35  ;;  %v6961_v35 = vld [vmem:[#allocation15_spill] sm:$0xff]  ;;  %v6964_v61 = vld [vmem:[#allocation16_spill] sm:$0xff] }
  0x9d   : > { %5045 = vmatprep.mubr.bf16.mxu1 %v6931_v40  ;;  %5133 = vmatprep.mubr.bf16.mxu0 %v5476_v36  ;;  %v6962_v48 = vcombine.low %v6960_v32, %v6961_v35  ;;  %v6963_v36 = vld [vmem:[#allocation17_spill] sm:$0xff]  ;;  %v5541_v32 = vld [vmem:[%s5654_s23 + $0x4c] sm:$0xff]  }
  0x9e   : > { %v4143_v50 = vcombine.low %v6964_v61, %v6963_v36  ;;  %v5523_v40 = vld [vmem:[%s5654_s23 + $0x118] sm:$0xff]  }
  0x9f   : > { %v5542_v35 = vld [vmem:[%s5654_s23 + $0x58] sm:$0xff]  }
  0xa4   : > { %5046 = vmatmul.mubr.bf16.gmra.mxu1 %v6932_v43  ;;  %5134 = vmatmul.mubr.bf16.gmra.mxu0 %v5478_v41 }
  0xa5   : > { %5049 = vmatprep.mubr.bf16.mxu1 %v6933_v44  ;;  %5137 = vmatprep.mubr.bf16.mxu0 %v5481_v5  ;;  %v5525_v44 = vld [vmem:[%s5654_s23 + $0x120] sm:$0xff]  }
  0xac   : > { %5050 = vmatmul.mubr.bf16.gmra.mxu1 %v6934_v58  ;;  %5138 = vmatmul.mubr.bf16.gmra.mxu0 %v5483_v54  ;;  %v6965_v54 = vld [vmem:[#allocation19_spill] sm:$0xff] }
  0xad   : > { %5053 = vmatprep.mubr.bf16.mxu1 %v6935_v59  ;;  %5141 = vmatprep.mubr.bf16.mxu0 %v5486_v55  ;;  %v6966_v55 = vld [vmem:[#allocation18_spill] sm:$0xff]  ;;  %v5528_v59 = vld [vmem:[%s5654_s23 + $0x128] sm:$0xff]  }
  0xae   : > { %v4145_v58 = vcombine.low %v6966_v55, %v6965_v54 }
  0xb4   : > { %5054 = vmatmul.mubr.bf16.gmra.mxu1 %v6936_v29  ;;  %5142 = vmatmul.mubr.bf16.gmra.mxu0 %v5488_v0 }
  0xb5   : > { %5057 = vmatprep.mubr.bf16.mxu1 %v6937_v34  ;;  %5145 = vmatprep.mubr.bf16.mxu0 %v5490_v1 }
  0xbc   : > { %5058 = vmatmul.mubr.bf16.gmra.mxu1 %v6938_v15  ;;  %5146 = vmatmul.mubr.bf16.gmra.mxu0 %v5491_v51 }
  0xbd   : > { %5061 = vmatprep.mubr.bf16.mxu1 %v6941_v13  ;;  %5149 = vmatprep.mubr.bf16.mxu0 %v5494_v52  ;;  %v6967_v52 = vld [vmem:[#allocation20_spill] sm:$0xff] }
  0xbe   : > { %v4146_v15 = vcombine.low %v6967_v52, %v6050_v39  ;;  %v5546_v52 = vld [vmem:[%s5654_s23 + $0x68] sm:$0xff]  }
  0xc4   : > { %5062 = vmatmul.mubr.bf16.gmra.mxu1 %v6944_v7  ;;  %5150 = vmatmul.mubr.bf16.gmra.mxu0 %v5496_v23  ;;  %v5533_v7 = vld [vmem:[%s5654_s23 + $0x2c] sm:$0xff]  }
  0xc5   : > { %5065 = vmatprep.mubr.bf16.mxu1 %v6945_v8  ;;  %5153 = vmatprep.mubr.bf16.mxu0 %v5498_v37  ;;  %v5534_v8 = vld [vmem:[%s5654_s23 + $0x38] sm:$0xff]  }
  0xcc   : > { %5066 = vmatmul.mubr.bf16.gmra.mxu1 %v6948_v18  ;;  %5154 = vmatmul.mubr.bf16.gmra.mxu0 %v5500_v9  ;;  %v5535_v9 = vld [vmem:[%s5654_s23 + $0x34] sm:$0xff]  }
  0xcd   : > { %5069 = vmatprep.mubr.bf16.mxu1 %v6950_v20  ;;  %5157 = vmatprep.mubr.bf16.mxu0 %v5504_v49  ;;  %v5536_v49 = vld [vmem:[%s5654_s23 + $0x40] sm:$0xff]  }
  0xd4   : > { %5070 = vmatmul.mubr.bf16.gmra.mxu1 %v6953_v10  ;;  %5158 = vmatmul.mubr.bf16.gmra.mxu0 %v5506_v3  ;;  %v5538_v10 = vld [vmem:[%s5654_s23 + $0x48] sm:$0xff]  }
  0xd5   : > { %5073 = vmatprep.mubr.bf16.mxu1 %v6955_v24  ;;  %5161 = vmatprep.mubr.bf16.mxu0 %v5508_v63  ;;  %v5540_v24 = vld [vmem:[%s5654_s23 + $0x50] sm:$0xff]  }
  0xdc   : > { %5074 = vmatmul.mubr.bf16.gmra.mxu1 %v6957_v27  ;;  %5162 = vmatmul.mubr.bf16.gmra.mxu0 %v5510_v25 }
  0xdd   : > { %5077 = vmatprep.mubr.bf16.mxu1 %v6959_v28  ;;  %5165 = vmatprep.mubr.bf16.mxu0 %v5514_v26 }
  0xe4   : > { %5078 = vmatmul.mubr.bf16.gmra.mxu1 %v6962_v48  ;;  %5166 = vmatmul.mubr.bf16.gmra.mxu0 %v5516_v53  ;;  %v5543_v48 = vld [vmem:[%s5654_s23 + $0x54] sm:$0xff]  }
  0xe5   : > { %5081 = vmatprep.mubr.bf16.mxu1 %v4141_v62  ;;  %5169 = vmatprep.mubr.bf16.mxu0 %v5518_v31 }
  0xec   : > { %v6240_v41 = vpop.f32.mrf.mxu0  ;;  %v6242_v5 = vpop.f32.mrf.mxu1  ;;  %5082 = vmatmul.mubr.bf16.gmra.mxu1 %v4142_v33  ;;  %5170 = vmatmul.mubr.bf16.gmra.mxu0 %v5520_v22  ;;  %v5544_v22 = vld [vmem:[%s5654_s23 + $0x60] sm:$0xff]  }
  0xed   : > { %5085 = vmatprep.mubr.bf16.mxu1 %v4143_v50  ;;  %5173 = vmatprep.mubr.bf16.mxu0 %v5523_v40 }
  0xee   : > { %v6247_v11 = vpop.f32.mrf.mxu0  ;;  %v6249_v30 = vpop.f32.mrf.mxu1 }
  0xf0   : > { %v6251_v62 = vpop.f32.mrf.mxu0  ;;  %v6253_v43 = vpop.f32.mrf.mxu1 }
  0xf2   : > { %v6259_v21 = vpop.f32.mrf.mxu0  ;;  %v6261_v42 = vpop.f32.mrf.mxu1 }
  0xf4   : > { %v6263_v33 = vpop.f32.mrf.mxu0  ;;  %v6265_v0 = vpop.f32.mrf.mxu1  ;;  %5086 = vmatmul.mubr.bf16.gmra.mxu1 %v4144_v46  ;;  %5174 = vmatmul.mubr.bf16.gmra.mxu0 %v5525_v44 }
  0xf5   : > { %5089 = vmatprep.mubr.bf16.mxu1 %v4145_v58  ;;  %5177 = vmatprep.mubr.bf16.mxu0 %v5528_v59  ;;  %v5545_v59 = vld [vmem:[%s5654_s23 + $0x5c] sm:$0xff]  }
  0xf6   : > { %v6270_v1 = vpop.f32.mrf.mxu0  ;;  %v6272_v29 = vpop.f32.mrf.mxu1 }
  0xf8   : > { %v6274_v34 = vpop.f32.mrf.mxu0  ;;  %v6276_v51 = vpop.f32.mrf.mxu1 }
  0xfa   : > { %v6283_v38 = vpop.f32.mrf.mxu0  ;;  %v6285_v46 = vpop.f32.mrf.mxu1 }
  0xfc   : > { %v6287_v13 = vpop.f32.mrf.mxu0  ;;  %v6289_v23 = vpop.f32.mrf.mxu1  ;;  %5090 = vmatmul.mubr.bf16.gmra.mxu1 %v4146_v15  ;;  %5178 = vmatmul.mubr.bf16.gmra.mxu0 %v5530_v57  ;;  %v5547_v15 = vld [vmem:[%s5654_s23 + $0x64] sm:$0xff]   ;;  %v5548_v57 = vld [vmem:[%s5654_s23 + $0x70] sm:$0xff]  }
  0xfd   : > { %5197 = vmatprep.mubr.bf16.mxu1 %v5531_v6  ;;  %5285 = vmatprep.mubr.bf16.mxu0 %v5532_v14 }
  0xfe   : > { %v6291_v39 = vpop.f32.mrf.mxu0  ;;  %v6293_v37 = vpop.f32.mrf.mxu1 }
 0x100   : > { %v6295_v45 = vpop.f32.mrf.mxu0  ;;  %v6297_v60 = vpop.f32.mrf.mxu1 }
 0x101   : > { %6968 = vst [vmem:[#allocation2_spill] sm:$0xff] %v6297_v60 }
 0x102   : > { %v6303_v16 = vpop.f32.mrf.mxu0  ;;  %v6305_v17 = vpop.f32.mrf.mxu1 }
 0x103   : > { %6969 = vst [vmem:[#allocation3_spill] sm:$0xff] %v6305_v17  ;;  %v5563_v17 = vld [vmem:[%s5654_s23 + $0xa4] sm:$0xff]  }
 0x104   : > { %v6307_v18 = vpop.f32.mrf.mxu0  ;;  %v6309_v19 = vpop.f32.mrf.mxu1  ;;  %5198 = vmatmul.mubr.bf16.vlgmr.msra.gmra.mxu1 %v5533_v7  ;;  %5286 = vmatmul.mubr.bf16.vlgmr.msra.gmra.mxu0 %v5534_v8 }
 0x105   : > { %6970 = vst [vmem:[#allocation4_spill] sm:$0xff] %v6309_v19  ;;  %5201 = vmatprep.mubr.bf16.mxu1 %v5535_v9  ;;  %5289 = vmatprep.mubr.bf16.mxu0 %v5536_v49 }
 0x106   : > { %v6311_v20 = vpop.f32.mrf.mxu0  ;;  %v6313_v3 = vpop.f32.mrf.mxu1 }
 0x107   : > { %6971 = vst [vmem:[#allocation5_spill] sm:$0xff] %v6313_v3  ;;  %v5561_v3 = vld [vmem:[%s5654_s23 + $0x9c] sm:$0xff]  }
 0x108   : > { %v6315_v63 = vpop.f32.mrf.mxu0  ;;  %v6317_v47 = vpop.f32.mrf.mxu1 }
 0x109   : > { %6972 = vst [vmem:[#allocation6_spill] sm:$0xff] %v6317_v47 }
 0x10a   : > { %v6323_v25 = vpop.f32.mrf.mxu0  ;;  %v6325_v26 = vpop.f32.mrf.mxu1 }
 0x10b   : > { %6973 = vst [vmem:[#allocation7_spill] sm:$0xff] %v6325_v26 }
 0x10c   : > { %v6327_v2 = vpop.f32.mrf.mxu0  ;;  %v6329_v27 = vpop.f32.mrf.mxu1  ;;  %5202 = vmatmul.mubr.bf16.gmra.mxu1 %v5537_v56  ;;  %5290 = vmatmul.mubr.bf16.gmra.mxu0 %v5538_v10 }
 0x10d   : > { %6974 = vst [vmem:[#allocation8_spill] sm:$0xff] %v6329_v27  ;;  %5205 = vmatprep.mubr.bf16.mxu1 %v5539_v4  ;;  %5293 = vmatprep.mubr.bf16.mxu0 %v5540_v24  ;;  %v5549_v4 = vld [vmem:[%s5654_s23 + $0x6c] sm:$0xff]   ;;  %v5550_v24 = vld [vmem:[%s5654_s23 + $0x78] sm:$0xff]  }
 0x10e   : > { %v6331_v12 = vpop.f32.mrf.mxu0  ;;  %v6333_v28 = vpop.f32.mrf.mxu1 }
 0x10f   : > { %6975 = vst [vmem:[#allocation9_spill] sm:$0xff] %v6333_v28 }
 0x110   : > { %v6335_v53 = vpop.f32.mrf.mxu0  ;;  %v6337_v31 = vpop.f32.mrf.mxu1 }
 0x111   : > { %6976 = vst [vmem:[#allocation10_spill] sm:$0xff] %v6337_v31  ;;  %v5559_v31 = vld [vmem:[%s5654_s23 + $0x94] sm:$0xff]  }
 0x112   : > { %v6343_v36 = vpop.f32.mrf.mxu0  ;;  %v6345_v61 = vpop.f32.mrf.mxu1 }
 0x113   : > { %6977 = vst [vmem:[#allocation11_spill] sm:$0xff] %v6345_v61  ;;  %v5558_v61 = vld [vmem:[%s5654_s23 + $0x98] sm:$0xff]  }
 0x114   : > { %v6347_v50 = vpop.f32.mrf.mxu0  ;;  %v6349_v40 = vpop.f32.mrf.mxu1  ;;  %5206 = vmatmul.mubr.bf16.gmra.mxu1 %v5541_v32  ;;  %5294 = vmatmul.mubr.bf16.gmra.mxu0 %v5542_v35  ;;  %v5551_v32 = vld [vmem:[%s5654_s23 + $0x74] sm:$0xff]   ;;  %v5552_v35 = vld [vmem:[%s5654_s23 + $0x80] sm:$0xff]  }
 0x115   : > { %6978 = vst [vmem:[#allocation12_spill] sm:$0xff] %v6349_v40  ;;  %5209 = vmatprep.mubr.bf16.mxu1 %v5543_v48  ;;  %5297 = vmatprep.mubr.bf16.mxu0 %v5544_v22  ;;  %v5557_v40 = vld [vmem:[%s5654_s23 + $0x8c] sm:$0xff]  }
 0x116   : > { %v6351_v44 = vpop.f32.mrf.mxu0  ;;  %v6353_v54 = vpop.f32.mrf.mxu1 }
 0x117   : > { %6979 = vst [vmem:[#allocation13_spill] sm:$0xff] %v6353_v54 }
 0x118   : > { %v6355_v55 = vpop.f32.mrf.mxu0  ;;  %v6357_v58 = vpop.f32.mrf.mxu1 }
 0x119   : > { %6980 = vst [vmem:[#allocation14_spill] sm:$0xff] %v6357_v58  ;;  %v5556_v58 = vld [vmem:[%s5654_s23 + $0x90] sm:$0xff]  }
 0x11a   : > { %v6363_v6 = vpop.f32.mrf.mxu0  ;;  %v6365_v14 = vpop.f32.mrf.mxu1 }
 0x11b   : > { %6981 = vst [vmem:[#allocation15_spill] sm:$0xff] %v6365_v14  ;;  %v5554_v14 = vld [vmem:[%s5654_s23 + $0x88] sm:$0xff]  }
 0x11c   : > { %v6367_v7 = vpop.f32.mrf.mxu0  ;;  %v6369_v8 = vpop.f32.mrf.mxu1  ;;  %5210 = vmatmul.mubr.bf16.gmra.mxu1 %v5545_v59  ;;  %5298 = vmatmul.mubr.bf16.gmra.mxu0 %v5546_v52 }
 0x11d   : > { %6982 = vst [vmem:[#allocation17_spill] sm:$0xff] %v6369_v8  ;;  %5213 = vmatprep.mubr.bf16.mxu1 %v5547_v15  ;;  %5301 = vmatprep.mubr.bf16.mxu0 %v5548_v57  ;;  %v5553_v8 = vld [vmem:[%s5654_s23 + $0x7c] sm:$0xff]  }
 0x11e   : > { %v6371_v9 = vpop.f32.mrf.mxu0  ;;  %v6373_v49 = vpop.f32.mrf.mxu1 }
 0x11f   : > { %6983 = vst [vmem:[#allocation16_spill] sm:$0xff] %v6373_v49 }
 0x120   : > { %v6375_v56 = vpop.f32.mrf.mxu0  ;;  %v6377_v10 = vpop.f32.mrf.mxu1 }
 0x121   : > { %6984 = vst [vmem:[#allocation19_spill] sm:$0xff] %v6377_v10 }
 0x122   : > { %v6383_v48 = vpop.f32.mrf.mxu0  ;;  %v6385_v22 = vpop.f32.mrf.mxu1 }
 0x123   : > { %6985 = vst [vmem:[#allocation18_spill] sm:$0xff] %v6385_v22  ;;  %v5555_v22 = vld [vmem:[%s5654_s23 + $0x84] sm:$0xff]  }
 0x124   : > { %v6387_v59 = vpop.f32.mrf.mxu0  ;;  %v6389_v52 = vpop.f32.mrf.mxu1  ;;  %5214 = vmatmul.mubr.bf16.gmra.mxu1 %v5549_v4  ;;  %5302 = vmatmul.mubr.bf16.gmra.mxu0 %v5550_v24 }
 0x125   : > { %6986 = vst [vmem:[#allocation20_spill] sm:$0xff] %v6389_v52  ;;  %5217 = vmatprep.mubr.bf16.mxu1 %v5551_v32  ;;  %5305 = vmatprep.mubr.bf16.mxu0 %v5552_v35 }
 0x126   : > { %v6391_v15 = vpop.f32.mrf.mxu0  ;;  %v6393_v57 = vpop.f32.mrf.mxu1 }
 0x127   : > { %6987 = vst [vmem:[#allocation21_spill] sm:$0xff] %v6393_v57 }
 0x128   : > { %v6395_v10 = vpop.f32.mrf.mxu0  ;;  %v6397_v49 = vpop.f32.mrf.mxu1 }
 0x129   : > { %6988 = vst [vmem:[#allocation22_spill] sm:$0xff] %v6397_v49 }
 0x12a   : > { %v6403_v4 = vpop.f32.mrf.mxu0  ;;  %v6405_v24 = vpop.f32.mrf.mxu1 }
 0x12b   : > { %6989 = vst [vmem:[#allocation23_spill] sm:$0xff] %v6405_v24  ;;  %v5560_v24 = vld [vmem:[%s5654_s23 + $0xa0] sm:$0xff]  }
 0x12c   : > { %v6407_v32 = vpop.f32.mrf.mxu0  ;;  %v6409_v35 = vpop.f32.mrf.mxu1  ;;  %5218 = vmatmul.mubr.bf16.gmra.mxu1 %v5553_v8  ;;  %5306 = vmatmul.mubr.bf16.gmra.mxu0 %v5554_v14 }
 0x12d   : > { %6990 = vst [vmem:[#allocation24_spill] sm:$0xff] %v6409_v35  ;;  %5221 = vmatprep.mubr.bf16.mxu1 %v5555_v22  ;;  %5309 = vmatprep.mubr.bf16.mxu0 %v5556_v58 }
 0x12e   : > { %v6411_v49 = vpop.f32.mrf.mxu0  ;;  %v6413_v57 = vpop.f32.mrf.mxu1 }
 0x12f   : > { %6991 = vst [vmem:[#allocation25_spill] sm:$0xff] %v6413_v57 }
 0x130   : > { %v6415_v52 = vpop.f32.mrf.mxu0  ;;  %v6417_v54 = vpop.f32.mrf.mxu1 }
 0x131   : > { %6992 = vst [vmem:[#allocation26_spill] sm:$0xff] %v6417_v54 }
 0x132   : > { %v6423_v28 = vpop.f32.mrf.mxu0  ;;  %v6425_v8 = vpop.f32.mrf.mxu1 }
 0x133   : > { %6993 = vst [vmem:[#allocation27_spill] sm:$0xff] %v6425_v8  ;;  %v5562_v8 = vld [vmem:[%s5654_s23 + $0xa8] sm:$0xff]  }
 0x134   : > { %v5023_v14 = vpop.f32.mrf.mxu1  ;;  %v5111_v58 = vpop.f32.mrf.mxu0  ;;  %5222 = vmatmul.mubr.bf16.gmra.mxu1 %v5557_v40  ;;  %5310 = vmatmul.mubr.bf16.gmra.mxu0 %v5558_v61  ;;  %v5564_v61 = vld [vmem:[%s5654_s23 + $0xb0] sm:$0xff]  }
 0x135   : > { %v1034_v22 = vadd.f32 %v5023_v14, %v6240_v41  ;;  %5225 = vmatprep.mubr.bf16.mxu1 %v5559_v31  ;;  %5313 = vmatprep.mubr.bf16.mxu0 %v5560_v24 }
 0x136   : > { %v1025_v54 = vpop.f32.mrf.mxu1  ;;  %v1699_v57 = vpop.f32.mrf.mxu0 }
 0x137   : > { %v6428_v35 = vadd.f32 %v5111_v58, %v1034_v22  ;;  %v1026_v27 = vadd.f32 %v1025_v54, %v6247_v11  ;;  %v5565_v58 = vld [vmem:[%s5654_s23 + $0xac] sm:$0xff]   ;;  %v5566_v22 = vld [vmem:[%s5654_s23 + $0xb8] sm:$0xff]  }
 0x138   : > { %v5024_v26 = vpop.f32.mrf.mxu1  ;;  %v5112_v47 = vpop.f32.mrf.mxu0 }
 0x139   : > { %v6433_v19 = vadd.f32 %v1699_v57, %v1026_v27  ;;  %v1037_v40 = vadd.f32 %v5024_v26, %v6251_v62 }
 0x13a   : > { %v1028_v60 = vpop.f32.mrf.mxu1  ;;  %v1702_v41 = vpop.f32.mrf.mxu0 }
 0x13b   : > { %v6438_v31 = vadd.f32 %v5112_v47, %v1037_v40  ;;  %v1029_v24 = vadd.f32 %v1028_v60, %v6259_v21  ;;  %v5567_v40 = vld [vmem:[%s5654_s23 + $0xb4] sm:$0xff]  }
 0x13c   : > { %v5027_v14 = vpop.f32.mrf.mxu1  ;;  %v5115_v11 = vpop.f32.mrf.mxu0  ;;  %5226 = vmatmul.mubr.bf16.gmra.mxu1 %v5561_v3  ;;  %5314 = vmatmul.mubr.bf16.gmra.mxu0 %v5562_v8 }
 0x13d   : > { %v6441_v27 = vadd.f32 %v1702_v41, %v1029_v24  ;;  %v1050_v62 = vadd.f32 %v5027_v14, %v6263_v33  ;;  %5229 = vmatprep.mubr.bf16.mxu1 %v5563_v17  ;;  %5317 = vmatprep.mubr.bf16.mxu0 %v5564_v61  ;;  %v5568_v41 = vld [vmem:[%s5654_s23 + $0xc0] sm:$0xff]  }
 0x13e   : > { %v1041_v26 = vpop.f32.mrf.mxu1  ;;  %v1715_v54 = vpop.f32.mrf.mxu0 }
 0x13f   : > { %v6444_v47 = vadd.f32 %v5115_v11, %v1050_v62  ;;  %v1042_v57 = vadd.f32 %v1041_v26, %v6270_v1 }
 0x140   : > { %v5028_v21 = vpop.f32.mrf.mxu1  ;;  %v5116_v60 = vpop.f32.mrf.mxu0 }
 0x141   : > { %v6449_v3 = vadd.f32 %v1715_v54, %v1042_v57  ;;  %v1053_v8 = vadd.f32 %v5028_v21, %v6274_v34 }
 0x142   : > { %v1044_v24 = vpop.f32.mrf.mxu1  ;;  %v1718_v33 = vpop.f32.mrf.mxu0 }
 0x143   : > { %v6454_v17 = vadd.f32 %v5116_v60, %v1053_v8  ;;  %v1045_v61 = vadd.f32 %v1044_v24, %v6283_v38  ;;  %v5569_v60 = vld [vmem:[%s5654_s23 + $0xbc] sm:$0xff]   ;;  %v5570_v8 = vld [vmem:[%s5654_s23 + $0xc8] sm:$0xff]  }
 0x144   : > { %v5031_v14 = vpop.f32.mrf.mxu1  ;;  %v5119_v1 = vpop.f32.mrf.mxu0  ;;  %5230 = vmatmul.mubr.bf16.gmra.mxu1 %v5565_v58  ;;  %5318 = vmatmul.mubr.bf16.gmra.mxu0 %v5566_v22  ;;  %v5571_v24 = vld [vmem:[%s5654_s23 + $0xc4] sm:$0xff]  }
 0x145   : > { %v6457_v11 = vadd.f32 %v1718_v33, %v1045_v61  ;;  %v1066_v34 = vadd.f32 %v5031_v14, %v6287_v13  ;;  %5233 = vmatprep.mubr.bf16.mxu1 %v5567_v40  ;;  %5321 = vmatprep.mubr.bf16.mxu0 %v5568_v41  ;;  %v5572_v33 = vld [vmem:[%s5654_s23 + $0xd0] sm:$0xff]  }
 0x146   : > { %v1057_v62 = vpop.f32.mrf.mxu1  ;;  %v1731_v26 = vpop.f32.mrf.mxu0 }
 0x147   : > { %v6460_v54 = vadd.f32 %v5119_v1, %v1066_v34  ;;  %v1058_v57 = vadd.f32 %v1057_v62, %v6291_v39 }
 0x148   : > { %v5032_v38 = vpop.f32.mrf.mxu1  ;;  %v5120_v21 = vpop.f32.mrf.mxu0 }
 0x149   : > { %v6465_v58 = vadd.f32 %v1731_v26, %v1058_v57  ;;  %v1069_v22 = vadd.f32 %v5032_v38, %v6295_v45 }
 0x14a   : > { %v1060_v61 = vpop.f32.mrf.mxu1  ;;  %v1734_v13 = vpop.f32.mrf.mxu0 }
 0x14b   : > { %v6470_v40 = vadd.f32 %v5120_v21, %v1069_v22  ;;  %v1061_v41 = vadd.f32 %v1060_v61, %v6303_v16  ;;  %v5573_v21 = vld [vmem:[%s5654_s23 + $0xcc] sm:$0xff]   ;;  %v5574_v22 = vld [vmem:[%s5654_s23 + $0xd8] sm:$0xff]  }
 0x14c   : > { %v5035_v14 = vpop.f32.mrf.mxu1  ;;  %v5123_v39 = vpop.f32.mrf.mxu0  ;;  %5234 = vmatmul.mubr.bf16.gmra.mxu1 %v5569_v60  ;;  %5322 = vmatmul.mubr.bf16.gmra.mxu0 %v5570_v8  ;;  %v5575_v61 = vld [vmem:[%s5654_s23 + $0xd4] sm:$0xff]  }
 0x14d   : > { %v6473_v1 = vadd.f32 %v1734_v13, %v1061_v41  ;;  %v1082_v45 = vadd.f32 %v5035_v14, %v6307_v18  ;;  %5237 = vmatprep.mubr.bf16.mxu1 %v5571_v24  ;;  %5325 = vmatprep.mubr.bf16.mxu0 %v5572_v33  ;;  %v5576_v13 = vld [vmem:[%s5654_s23 + $0xe0] sm:$0xff]  }
 0x14e   : > { %v1073_v34 = vpop.f32.mrf.mxu1  ;;  %v1747_v62 = vpop.f32.mrf.mxu0 }
 0x14f   : > { %v6476_v26 = vadd.f32 %v5123_v39, %v1082_v45  ;;  %v1074_v57 = vadd.f32 %v1073_v34, %v6311_v20 }
 0x150   : > { %v5036_v16 = vpop.f32.mrf.mxu1  ;;  %v5124_v38 = vpop.f32.mrf.mxu0 }
 0x151   : > { %v6481_v60 = vadd.f32 %v1747_v62, %v1074_v57  ;;  %v1085_v8 = vadd.f32 %v5036_v16, %v6315_v63 }
 0x152   : > { %v1076_v41 = vpop.f32.mrf.mxu1  ;;  %v1750_v18 = vpop.f32.mrf.mxu0 }
 0x153   : > { %v6486_v24 = vadd.f32 %v5124_v38, %v1085_v8  ;;  %v1077_v33 = vadd.f32 %v1076_v41, %v6323_v25  ;;  %v5577_v38 = vld [vmem:[%s5654_s23 + $0xdc] sm:$0xff]   ;;  %v5578_v8 = vld [vmem:[%s5654_s23 + $0xe8] sm:$0xff]  }
 0x154   : > { %v5039_v14 = vpop.f32.mrf.mxu1  ;;  %v5127_v20 = vpop.f32.mrf.mxu0  ;;  %5238 = vmatmul.mubr.bf16.gmra.mxu1 %v5573_v21  ;;  %5326 = vmatmul.mubr.bf16.gmra.mxu0 %v5574_v22  ;;  %v5579_v41 = vld [vmem:[%s5654_s23 + $0xe4] sm:$0xff]  }
 0x155   : > { %v6489_v39 = vadd.f32 %v1750_v18, %v1077_v33  ;;  %v1098_v63 = vadd.f32 %v5039_v14, %v6327_v2  ;;  %5241 = vmatprep.mubr.bf16.mxu1 %v5575_v61  ;;  %5329 = vmatprep.mubr.bf16.mxu0 %v5576_v13  ;;  %v5580_v18 = vld [vmem:[%s5654_s23 + $0xf0] sm:$0xff]  }
 0x156   : > { %v1089_v45 = vpop.f32.mrf.mxu1  ;;  %v1763_v34 = vpop.f32.mrf.mxu0 }
 0x157   : > { %v6492_v62 = vadd.f32 %v5127_v20, %v1098_v63  ;;  %v1090_v57 = vadd.f32 %v1089_v45, %v6331_v12 }
 0x158   : > { %v5040_v25 = vpop.f32.mrf.mxu1  ;;  %v5128_v16 = vpop.f32.mrf.mxu0 }
 0x159   : > { %v6497_v21 = vadd.f32 %v1763_v34, %v1090_v57  ;;  %v1101_v22 = vadd.f32 %v5040_v25, %v6335_v53 }
 0x15a   : > { %v1092_v33 = vpop.f32.mrf.mxu1  ;;  %v1766_v2 = vpop.f32.mrf.mxu0 }
 0x15b   : > { %v6502_v61 = vadd.f32 %v5128_v16, %v1101_v22  ;;  %v1093_v13 = vadd.f32 %v1092_v33, %v6343_v36  ;;  %v5581_v16 = vld [vmem:[%s5654_s23 + $0xec] sm:$0xff]   ;;  %v5582_v22 = vld [vmem:[%s5654_s23 + $0xf8] sm:$0xff]  }
 0x15c   : > { %v5043_v14 = vpop.f32.mrf.mxu1  ;;  %v5131_v12 = vpop.f32.mrf.mxu0  ;;  %5242 = vmatmul.mubr.bf16.gmra.mxu1 %v5577_v38  ;;  %5330 = vmatmul.mubr.bf16.gmra.mxu0 %v5578_v8  ;;  %v5583_v33 = vld [vmem:[%s5654_s23 + $0xf4] sm:$0xff]  }
 0x15d   : > { %v6505_v20 = vadd.f32 %v1766_v2, %v1093_v13  ;;  %v1114_v53 = vadd.f32 %v5043_v14, %v6347_v50  ;;  %5245 = vmatprep.mubr.bf16.mxu1 %v5579_v41  ;;  %5333 = vmatprep.mubr.bf16.mxu0 %v5580_v18  ;;  %v5584_v2 = vld [vmem:[%s5654_s23 + $0x100] sm:$0xff]  }
 0x15e   : > { %v1105_v63 = vpop.f32.mrf.mxu1  ;;  %v1779_v45 = vpop.f32.mrf.mxu0 }
 0x15f   : > { %v6508_v34 = vadd.f32 %v5131_v12, %v1114_v53  ;;  %v1106_v57 = vadd.f32 %v1105_v63, %v6351_v44 }
 0x160   : > { %v5044_v36 = vpop.f32.mrf.mxu1  ;;  %v5132_v25 = vpop.f32.mrf.mxu0 }
 0x161   : > { %v6513_v38 = vadd.f32 %v1779_v45, %v1106_v57  ;;  %v1117_v8 = vadd.f32 %v5044_v36, %v6355_v55 }
 0x162   : > { %v1108_v13 = vpop.f32.mrf.mxu1  ;;  %v1782_v50 = vpop.f32.mrf.mxu0 }
 0x163   : > { %v6518_v41 = vadd.f32 %v5132_v25, %v1117_v8  ;;  %v1109_v18 = vadd.f32 %v1108_v13, %v6363_v6  ;;  %v5585_v25 = vld [vmem:[%s5654_s23 + $0xfc] sm:$0xff]   ;;  %v5586_v8 = vld [vmem:[%s5654_s23 + $0x108] sm:$0xff]  }
 0x164   : > { %v5047_v14 = vpop.f32.mrf.mxu1  ;;  %v5135_v44 = vpop.f32.mrf.mxu0  ;;  %5246 = vmatmul.mubr.bf16.gmra.mxu1 %v5581_v16  ;;  %5334 = vmatmul.mubr.bf16.gmra.mxu0 %v5582_v22  ;;  %v5587_v13 = vld [vmem:[%s5654_s23 + $0x104] sm:$0xff]  }
 0x165   : > { %v6521_v12 = vadd.f32 %v1782_v50, %v1109_v18  ;;  %v1130_v55 = vadd.f32 %v5047_v14, %v6367_v7  ;;  %5249 = vmatprep.mubr.bf16.mxu1 %v5583_v33  ;;  %5337 = vmatprep.mubr.bf16.mxu0 %v5584_v2  ;;  %v5588_v50 = vld [vmem:[%s5654_s23 + $0x110] sm:$0xff]  }
 0x166   : > { %v1121_v53 = vpop.f32.mrf.mxu1  ;;  %v1795_v63 = vpop.f32.mrf.mxu0 }
 0x167   : > { %v6524_v45 = vadd.f32 %v5135_v44, %v1130_v55  ;;  %v1122_v57 = vadd.f32 %v1121_v53, %v6371_v9 }
 0x168   : > { %v5048_v6 = vpop.f32.mrf.mxu1  ;;  %v5136_v36 = vpop.f32.mrf.mxu0 }
 0x169   : > { %v6529_v16 = vadd.f32 %v1795_v63, %v1122_v57  ;;  %v1133_v22 = vadd.f32 %v5048_v6, %v6375_v56 }
 0x16a   : > { %v1124_v18 = vpop.f32.mrf.mxu1  ;;  %v1798_v7 = vpop.f32.mrf.mxu0 }
 0x16b   : > { %v6534_v33 = vadd.f32 %v5136_v36, %v1133_v22  ;;  %v1125_v2 = vadd.f32 %v1124_v18, %v6383_v48  ;;  %v5589_v36 = vld [vmem:[%s5654_s23 + $0x10c] sm:$0xff]   ;;  %v5590_v22 = vld [vmem:[%s5654_s23 + $0x118] sm:$0xff]  }
 0x16c   : > { %v5051_v14 = vpop.f32.mrf.mxu1  ;;  %v5139_v9 = vpop.f32.mrf.mxu0  ;;  %5250 = vmatmul.mubr.bf16.gmra.mxu1 %v5585_v25  ;;  %5338 = vmatmul.mubr.bf16.gmra.mxu0 %v5586_v8  ;;  %v5591_v18 = vld [vmem:[%s5654_s23 + $0x114] sm:$0xff]  }
 0x16d   : > { %v6537_v44 = vadd.f32 %v1798_v7, %v1125_v2  ;;  %v1146_v56 = vadd.f32 %v5051_v14, %v6387_v59  ;;  %5253 = vmatprep.mubr.bf16.mxu1 %v5587_v13  ;;  %5341 = vmatprep.mubr.bf16.mxu0 %v5588_v50  ;;  %v5592_v7 = vld [vmem:[%s5654_s23 + $0x120] sm:$0xff]  }
 0x16e   : > { %v1137_v55 = vpop.f32.mrf.mxu1  ;;  %v1811_v53 = vpop.f32.mrf.mxu0 }
 0x16f   : > { %v6540_v63 = vadd.f32 %v5139_v9, %v1146_v56  ;;  %v1138_v57 = vadd.f32 %v1137_v55, %v6391_v15 }
 0x170   : > { %v5052_v48 = vpop.f32.mrf.mxu1  ;;  %v5140_v6 = vpop.f32.mrf.mxu0 }
 0x171   : > { %v6545_v25 = vadd.f32 %v1811_v53, %v1138_v57  ;;  %v1149_v8 = vadd.f32 %v5052_v48, %v6395_v10 }
 0x172   : > { %v1140_v2 = vpop.f32.mrf.mxu1  ;;  %v1814_v59 = vpop.f32.mrf.mxu0 }
 0x173   : > { %v6550_v13 = vadd.f32 %v5140_v6, %v1149_v8  ;;  %v1141_v50 = vadd.f32 %v1140_v2, %v6403_v4  ;;  %v5593_v6 = vld [vmem:[%s5654_s23 + $0x11c] sm:$0xff]   ;;  %v5594_v8 = vld [vmem:[%s5654_s23 + $0x128] sm:$0xff]  }
 0x174   : > { %v5055_v14 = vpop.f32.mrf.mxu1  ;;  %v5143_v15 = vpop.f32.mrf.mxu0  ;;  %5254 = vmatmul.mubr.bf16.gmra.mxu1 %v5589_v36  ;;  %5342 = vmatmul.mubr.bf16.gmra.mxu0 %v5590_v22  ;;  %v5595_v2 = vld [vmem:[%s5654_s23 + $0x124] sm:$0xff]  }
 0x175   : > { %v6553_v9 = vadd.f32 %v1814_v59, %v1141_v50  ;;  %v1162_v10 = vadd.f32 %v5055_v14, %v6407_v32  ;;  %5257 = vmatprep.mubr.bf16.mxu1 %v5591_v18  ;;  %5345 = vmatprep.mubr.bf16.mxu0 %v5592_v7  ;;  %v5596_v59 = vld [vmem:[%s5654_s23 + $0x130] sm:$0xff]  }
 0x176   : > { %v1153_v56 = vpop.f32.mrf.mxu1  ;;  %v1827_v55 = vpop.f32.mrf.mxu0 }
 0x177   : > { %v6556_v53 = vadd.f32 %v5143_v15, %v1162_v10  ;;  %v1154_v57 = vadd.f32 %v1153_v56, %v6411_v49 }
 0x178   : > { %v5056_v4 = vpop.f32.mrf.mxu1  ;;  %v5144_v48 = vpop.f32.mrf.mxu0 }
 0x179   : > { %v6561_v36 = vadd.f32 %v1827_v55, %v1154_v57  ;;  %v1165_v22 = vadd.f32 %v5056_v4, %v6415_v52 }
 0x17a   : > { %v1156_v50 = vpop.f32.mrf.mxu1  ;;  %v1830_v32 = vpop.f32.mrf.mxu0 }
 0x17b   : > { %v6566_v18 = vadd.f32 %v5144_v48, %v1165_v22  ;;  %v1157_v7 = vadd.f32 %v1156_v50, %v6423_v28  ;;  %v5597_v48 = vld [vmem:[%s5654_s23 + $0x12c] sm:$0xff]   ;;  %v5598_v22 = vld [vmem:[%s5654_s23 + $0x138] sm:$0xff]  }
 0x17c   : > { %v5059_v14 = vpop.f32.mrf.mxu1  ;;  %v5147_v49 = vpop.f32.mrf.mxu0  ;;  %5258 = vmatmul.mubr.bf16.gmra.mxu1 %v5593_v6  ;;  %5346 = vmatmul.mubr.bf16.gmra.mxu0 %v5594_v8  ;;  %v5599_v50 = vld [vmem:[%s5654_s23 + $0x134] sm:$0xff]  }
 0x17d   : > { %v6569_v15 = vadd.f32 %v1830_v32, %v1157_v7  ;;  %v1178_v52 = vadd.f32 %v5059_v14, %v6242_v5  ;;  %5261 = vmatprep.mubr.bf16.mxu1 %v5595_v2  ;;  %5349 = vmatprep.mubr.bf16.mxu0 %v5596_v59  ;;  %v5600_v32 = vld [vmem:[%s5654_s23 + $0x140] sm:$0xff]  }
 0x17e   : > { %v1169_v10 = vpop.f32.mrf.mxu1  ;;  %v1843_v56 = vpop.f32.mrf.mxu0 }
 0x17f   : > { %v6572_v55 = vadd.f32 %v5147_v49, %v1178_v52  ;;  %v1170_v57 = vadd.f32 %v1169_v10, %v6249_v30 }
 0x180   : > { %v5060_v28 = vpop.f32.mrf.mxu1  ;;  %v5148_v4 = vpop.f32.mrf.mxu0 }
 0x181   : > { %v6577_v6 = vadd.f32 %v1843_v56, %v1170_v57  ;;  %v1181_v8 = vadd.f32 %v5060_v28, %v6253_v43 }
 0x182   : > { %v1172_v7 = vpop.f32.mrf.mxu1  ;;  %v1846_v5 = vpop.f32.mrf.mxu0 }
 0x183   : > { %v6582_v2 = vadd.f32 %v5148_v4, %v1181_v8  ;;  %v1173_v59 = vadd.f32 %v1172_v7, %v6261_v42  ;;  %v5601_v42 = vld [vmem:[%s5654_s23 + $0x13c] sm:$0xff]   ;;  %v5602_v8 = vld [vmem:[%s5654_s23 + $0x148] sm:$0xff]  }
 0x184   : > { %v5063_v14 = vpop.f32.mrf.mxu1  ;;  %v5151_v30 = vpop.f32.mrf.mxu0  ;;  %5262 = vmatmul.mubr.bf16.gmra.mxu1 %v5597_v48  ;;  %5350 = vmatmul.mubr.bf16.gmra.mxu0 %v5598_v22 }
 0x185   : > { %v6585_v49 = vadd.f32 %v1846_v5, %v1173_v59  ;;  %v1194_v52 = vadd.f32 %v5063_v14, %v6265_v0  ;;  %5265 = vmatprep.mubr.bf16.mxu1 %v5599_v50  ;;  %5353 = vmatprep.mubr.bf16.mxu0 %v5600_v32 }
 0x186   : > { %v1185_v43 = vpop.f32.mrf.mxu1  ;;  %v1859_v10 = vpop.f32.mrf.mxu0 }
 0x187   : > { %v6588_v56 = vadd.f32 %v5151_v30, %v1194_v52  ;;  %v1186_v57 = vadd.f32 %v1185_v43, %v6272_v29 }
 0x188   : > { %v5064_v28 = vpop.f32.mrf.mxu1  ;;  %v5152_v4 = vpop.f32.mrf.mxu0 }
 0x189   : > { %v6593_v7 = vadd.f32 %v1859_v10, %v1186_v57  ;;  %v1197_v48 = vadd.f32 %v5064_v28, %v6276_v51 }
 0x18a   : > { %v1188_v22 = vpop.f32.mrf.mxu1  ;;  %v1862_v5 = vpop.f32.mrf.mxu0 }
 0x18b   : > { %v6596_v59 = vadd.f32 %v5152_v4, %v1197_v48  ;;  %v1189_v0 = vadd.f32 %v1188_v22, %v6285_v46  ;;  %v6996_v4 = vld [vmem:[#allocation2_spill] sm:$0xff] }
 0x18c   : > { %v5067_v50 = vpop.f32.mrf.mxu1  ;;  %v5155_v32 = vpop.f32.mrf.mxu0  ;;  %5266 = vmatmul.mubr.bf16.gmra.mxu1 %v5601_v42  ;;  %5354 = vmatmul.mubr.bf16.gmra.mxu0 %v5602_v8  ;;  %v6998_v8 = vld [vmem:[#allocation3_spill] sm:$0xff] }
 0x18d   : > { %v6599_v14 = vadd.f32 %v1862_v5, %v1189_v0  ;;  %v1210_v29 = vadd.f32 %v5067_v50, %v6289_v23 }
 0x18e   : > { %v1201_v30 = vpop.f32.mrf.mxu1  ;;  %v1875_v52 = vpop.f32.mrf.mxu0 }
 0x18f   : > { %v6602_v43 = vadd.f32 %v5155_v32, %v1210_v29  ;;  %v1202_v51 = vadd.f32 %v1201_v30, %v6293_v37  ;;  %v7000_v32 = vld [vmem:[#allocation4_spill] sm:$0xff] }
 0x190   : > { %v5068_v10 = vpop.f32.mrf.mxu1  ;;  %v5156_v57 = vpop.f32.mrf.mxu0 }
 0x191   : > { %6994 = vst [vmem:[#allocation28_spill] sm:$0xff] %v6602_v43  ;;  %v6605_v28 = vadd.f32 %v1875_v52, %v1202_v51  ;;  %v1213_v46 = vadd.f32 %v5068_v10, %v6996_v4  ;;  %v7002_v52 = vld [vmem:[#allocation5_spill] sm:$0xff] }
 0x192   : > { %v1204_v48 = vpop.f32.mrf.mxu1  ;;  %v1878_v22 = vpop.f32.mrf.mxu0 }
 0x193   : > { %6995 = vst [vmem:[#allocation29_spill] sm:$0xff] %v6605_v28  ;;  %v6608_v42 = vadd.f32 %v5156_v57, %v1213_v46  ;;  %v1205_v5 = vadd.f32 %v1204_v48, %v6998_v8  ;;  %v7004_v57 = vld [vmem:[#allocation6_spill] sm:$0xff] }
 0x194   : > { %v5071_v0 = vpop.f32.mrf.mxu1  ;;  %v5159_v23 = vpop.f32.mrf.mxu0 }
 0x195   : > { %6997 = vst [vmem:[#allocation2_spill] sm:$0xff] %v6608_v42  ;;  %v6611_v50 = vadd.f32 %v1878_v22, %v1205_v5  ;;  %v1226_v29 = vadd.f32 %v5071_v0, %v7000_v32  ;;  %v7006_v22 = vld [vmem:[#allocation7_spill] sm:$0xff] }
 0x196   : > { %v1217_v43 = vpop.f32.mrf.mxu1  ;;  %v1891_v37 = vpop.f32.mrf.mxu0 }
 0x197   : > { %6999 = vst [vmem:[#allocation3_spill] sm:$0xff] %v6611_v50  ;;  %v6614_v30 = vadd.f32 %v5159_v23, %v1226_v29  ;;  %v1218_v51 = vadd.f32 %v1217_v43, %v7002_v52  ;;  %v7008_v23 = vld [vmem:[#allocation8_spill] sm:$0xff] }
 0x198   : > { %v5072_v28 = vpop.f32.mrf.mxu1  ;;  %v5160_v10 = vpop.f32.mrf.mxu0 }
 0x199   : > { %7001 = vst [vmem:[#allocation4_spill] sm:$0xff] %v6614_v30  ;;  %v6617_v4 = vadd.f32 %v1891_v37, %v1218_v51  ;;  %v1229_v46 = vadd.f32 %v5072_v28, %v7004_v57  ;;  %v7010_v37 = vld [vmem:[#allocation9_spill] sm:$0xff] }
 0x19a   : > { %v1220_v42 = vpop.f32.mrf.mxu1  ;;  %v1894_v48 = vpop.f32.mrf.mxu0 }
 0x19b   : > { %7003 = vst [vmem:[#allocation5_spill] sm:$0xff] %v6617_v4  ;;  %v6620_v8 = vadd.f32 %v5160_v10, %v1229_v46  ;;  %v1221_v5 = vadd.f32 %v1220_v42, %v7006_v22  ;;  %v7012_v10 = vld [vmem:[#allocation10_spill] sm:$0xff] }
 0x19c   : > { %v5075_v50 = vpop.f32.mrf.mxu1  ;;  %v5163_v0 = vpop.f32.mrf.mxu0 }
 0x19d   : > { %7005 = vst [vmem:[#allocation6_spill] sm:$0xff] %v6620_v8  ;;  %v6623_v32 = vadd.f32 %v1894_v48, %v1221_v5  ;;  %v1242_v29 = vadd.f32 %v5075_v50, %v7008_v23  ;;  %v7014_v48 = vld [vmem:[#allocation11_spill] sm:$0xff] }
 0x19e   : > { %v1233_v30 = vpop.f32.mrf.mxu1  ;;  %v1907_v43 = vpop.f32.mrf.mxu0 }
 0x19f   : > { %7007 = vst [vmem:[#allocation7_spill] sm:$0xff] %v6623_v32  ;;  %v6626_v52 = vadd.f32 %v5163_v0, %v1242_v29  ;;  %v1234_v51 = vadd.f32 %v1233_v30, %v7010_v37  ;;  %v7016_v0 = vld [vmem:[#allocation12_spill] sm:$0xff] }
 0x1a0   : > { %v5076_v4 = vpop.f32.mrf.mxu1  ;;  %v5164_v28 = vpop.f32.mrf.mxu0 }
 0x1a1   : > { %7009 = vst [vmem:[#allocation8_spill] sm:$0xff] %v6626_v52  ;;  %v6629_v57 = vadd.f32 %v1907_v43, %v1234_v51  ;;  %v1245_v46 = vadd.f32 %v5076_v4, %v7012_v10  ;;  %v7018_v43 = vld [vmem:[#allocation13_spill] sm:$0xff] }
 0x1a2   : > { %v1236_v8 = vpop.f32.mrf.mxu1  ;;  %v1910_v42 = vpop.f32.mrf.mxu0 }
 0x1a3   : > { %7011 = vst [vmem:[#allocation9_spill] sm:$0xff] %v6629_v57  ;;  %v6632_v22 = vadd.f32 %v5164_v28, %v1245_v46  ;;  %v1237_v5 = vadd.f32 %v1236_v8, %v7014_v48  ;;  %v7020_v28 = vld [vmem:[#allocation14_spill] sm:$0xff] }
 0x1a4   : > { %v5079_v32 = vpop.f32.mrf.mxu1  ;;  %v5167_v50 = vpop.f32.mrf.mxu0 }
 0x1a5   : > { %7013 = vst [vmem:[#allocation10_spill] sm:$0xff] %v6632_v22  ;;  %v6635_v23 = vadd.f32 %v1910_v42, %v1237_v5  ;;  %v1258_v29 = vadd.f32 %v5079_v32, %v7016_v0  ;;  %v7022_v42 = vld [vmem:[#allocation15_spill] sm:$0xff] }
 0x1a6   : > { %v1249_v52 = vpop.f32.mrf.mxu1  ;;  %v1923_v30 = vpop.f32.mrf.mxu0 }
 0x1a7   : > { %7015 = vst [vmem:[#allocation11_spill] sm:$0xff] %v6635_v23  ;;  %v6638_v37 = vadd.f32 %v5167_v50, %v1258_v29  ;;  %v1250_v51 = vadd.f32 %v1249_v52, %v7018_v43  ;;  %v7024_v50 = vld [vmem:[#allocation17_spill] sm:$0xff] }
 0x1a8   : > { %v5080_v57 = vpop.f32.mrf.mxu1  ;;  %v5168_v4 = vpop.f32.mrf.mxu0 }
 0x1a9   : > { %7017 = vst [vmem:[#allocation12_spill] sm:$0xff] %v6638_v37  ;;  %v6641_v10 = vadd.f32 %v1923_v30, %v1250_v51  ;;  %v1261_v46 = vadd.f32 %v5080_v57, %v7020_v28  ;;  %v7026_v30 = vld [vmem:[#allocation16_spill] sm:$0xff] }
 0x1aa   : > { %v1252_v22 = vpop.f32.mrf.mxu1  ;;  %v1926_v8 = vpop.f32.mrf.mxu0 }
 0x1ab   : > { %7019 = vst [vmem:[#allocation13_spill] sm:$0xff] %v6641_v10  ;;  %v6644_v48 = vadd.f32 %v5168_v4, %v1261_v46  ;;  %v1253_v5 = vadd.f32 %v1252_v22, %v7022_v42  ;;  %v7028_v4 = vld [vmem:[#allocation19_spill] sm:$0xff] }
 0x1ac   : > { %v5083_v23 = vpop.f32.mrf.mxu1  ;;  %v5171_v32 = vpop.f32.mrf.mxu0 }
 0x1ad   : > { %7021 = vst [vmem:[#allocation14_spill] sm:$0xff] %v6644_v48  ;;  %v6647_v0 = vadd.f32 %v1926_v8, %v1253_v5  ;;  %v1274_v29 = vadd.f32 %v5083_v23, %v7024_v50  ;;  %v7030_v8 = vld [vmem:[#allocation18_spill] sm:$0xff] }
 0x1ae   : > { %v1265_v37 = vpop.f32.mrf.mxu1  ;;  %v1939_v52 = vpop.f32.mrf.mxu0 }
 0x1af   : > { %7023 = vst [vmem:[#allocation15_spill] sm:$0xff] %v6647_v0  ;;  %v6650_v43 = vadd.f32 %v5171_v32, %v1274_v29  ;;  %v1266_v51 = vadd.f32 %v1265_v37, %v7026_v30  ;;  %v7032_v32 = vld [vmem:[#allocation20_spill] sm:$0xff] }
 0x1b0   : > { %v5084_v10 = vpop.f32.mrf.mxu1  ;;  %v5172_v57 = vpop.f32.mrf.mxu0 }
 0x1b1   : > { %7025 = vst [vmem:[#allocation17_spill] sm:$0xff] %v6650_v43  ;;  %v6653_v28 = vadd.f32 %v1939_v52, %v1266_v51  ;;  %v1277_v46 = vadd.f32 %v5084_v10, %v7028_v4  ;;  %v7034_v52 = vld [vmem:[#allocation21_spill] sm:$0xff] }
 0x1b2   : > { %v1268_v48 = vpop.f32.mrf.mxu1  ;;  %v1942_v22 = vpop.f32.mrf.mxu0 }
 0x1b3   : > { %7027 = vst [vmem:[#allocation16_spill] sm:$0xff] %v6653_v28  ;;  %v6656_v42 = vadd.f32 %v5172_v57, %v1277_v46  ;;  %v1269_v5 = vadd.f32 %v1268_v48, %v7030_v8  ;;  %v7036_v57 = vld [vmem:[#allocation22_spill] sm:$0xff] }
 0x1b4   : > { %v5087_v0 = vpop.f32.mrf.mxu1  ;;  %v5175_v23 = vpop.f32.mrf.mxu0 }
 0x1b5   : > { %7029 = vst [vmem:[#allocation19_spill] sm:$0xff] %v6656_v42  ;;  %v6659_v50 = vadd.f32 %v1942_v22, %v1269_v5  ;;  %v1290_v29 = vadd.f32 %v5087_v0, %v7032_v32  ;;  %v7038_v22 = vld [vmem:[#allocation23_spill] sm:$0xff] }
 0x1b6   : > { %v1281_v43 = vpop.f32.mrf.mxu1  ;;  %v1955_v37 = vpop.f32.mrf.mxu0 }
 0x1b7   : > { %7031 = vst [vmem:[#allocation18_spill] sm:$0xff] %v6659_v50  ;;  %v6662_v30 = vadd.f32 %v5175_v23, %v1290_v29  ;;  %v1282_v51 = vadd.f32 %v1281_v43, %v7034_v52  ;;  %v7040_v23 = vld [vmem:[#allocation24_spill] sm:$0xff] }
 0x1b8   : > { %v5088_v28 = vpop.f32.mrf.mxu1  ;;  %v5176_v10 = vpop.f32.mrf.mxu0 }
 0x1b9   : > { %7033 = vst [vmem:[#allocation20_spill] sm:$0xff] %v6662_v30  ;;  %v6665_v4 = vadd.f32 %v1955_v37, %v1282_v51  ;;  %v1293_v46 = vadd.f32 %v5088_v28, %v7036_v57  ;;  %v7041_v37 = vld [vmem:[#allocation25_spill] sm:$0xff] }
 0x1ba   : > { %v1284_v42 = vpop.f32.mrf.mxu1  ;;  %v1958_v48 = vpop.f32.mrf.mxu0 }
 0x1bb   : > { %7035 = vst [vmem:[#allocation21_spill] sm:$0xff] %v6665_v4  ;;  %v6668_v8 = vadd.f32 %v5176_v10, %v1293_v46  ;;  %v1285_v5 = vadd.f32 %v1284_v42, %v7038_v22  ;;  %v7042_v10 = vld [vmem:[#allocation26_spill] sm:$0xff] }
 0x1bc   : > { %v5091_v50 = vpop.f32.mrf.mxu1  ;;  %v5179_v0 = vpop.f32.mrf.mxu0 }
 0x1bd   : > { %7037 = vst [vmem:[#allocation22_spill] sm:$0xff] %v6668_v8  ;;  %v6671_v32 = vadd.f32 %v1958_v48, %v1285_v5  ;;  %v1306_v29 = vadd.f32 %v5091_v50, %v7040_v23  ;;  %v7043_v48 = vld [vmem:[#allocation27_spill] sm:$0xff] }
 0x1be   : > { %v1297_v30 = vpop.f32.mrf.mxu1  ;;  %v1971_v43 = vpop.f32.mrf.mxu0 }
 0x1bf   : > { %7039 = vst [vmem:[#allocation23_spill] sm:$0xff] %v6671_v32  ;;  %v6674_v52 = vadd.f32 %v5179_v0, %v1306_v29  ;;  %v1298_v51 = vadd.f32 %v1297_v30, %v7041_v37 }
 0x1c0   : > { %v5092_v4 = vpop.f32.mrf.mxu1  ;;  %v5180_v28 = vpop.f32.mrf.mxu0 }
 0x1c1   : > { %v6677_v57 = vadd.f32 %v1971_v43, %v1298_v51  ;;  %v1309_v46 = vadd.f32 %v5092_v4, %v7042_v10 }
 0x1c2   : > { %v1300_v8 = vpop.f32.mrf.mxu1  ;;  %v1974_v42 = vpop.f32.mrf.mxu0 }
 0x1c3   : > { %v6680_v22 = vadd.f32 %v5180_v28, %v1309_v46  ;;  %v1301_v5 = vadd.f32 %v1300_v8, %v7043_v48  ;;  %v6691_v28 = vld [vmem:[%s6881_s2] ss:$0 sm:$0xff] }
 0x1c4   : > { %v5199_v50 = vpop.f32.mrf.mxu1  ;;  %v5287_v23 = vpop.f32.mrf.mxu0 }
 0x1c5   : > { %v6683_v32 = vadd.f32 %v1974_v42, %v1301_v5  ;;  %v2734_v0 = vadd.f32 %v5199_v50, %v6428_v35 }
 0x1c6   : > { %v2445_v30 = vpop.f32.mrf.mxu1  ;;  %v3191_v29 = vpop.f32.mrf.mxu0 }
 0x1c7   : > { %7044 = vst [vmem:[#allocation24_spill] sm:$0xff] %v6683_v32  ;;  %v2732_v43 = vadd.f32 %v2445_v30, %v6433_v19  ;;  %v3480_v4 = vadd.f32 %v5287_v23, %v2734_v0 }
 0x1c8   : > { %v5200_v37 = vpop.f32.mrf.mxu1  ;;  %v5288_v51 = vpop.f32.mrf.mxu0 }
 0x1c9   : > { %v2735_v10 = vadd.f32 %v5200_v37, %v6438_v31  ;;  %v3478_v42 = vadd.f32 %v3191_v29, %v2732_v43  ;;  %v3559_v19 = vadd.f32 %v6691_v28, %v3480_v4 }
 0x1ca   : > { %v2448_v8 = vpop.f32.mrf.mxu1  ;;  %v3194_v46 = vpop.f32.mrf.mxu0 }
 0x1cb   : > { %v3481_v48 = vadd.f32 %v5288_v51, %v2735_v10  ;;  %v2733_v35 = vadd.f32 %v2448_v8, %v6441_v27  ;;  %v3557_v27 = vadd.f32 %v6691_v28, %v3478_v42 }
 0x1cc   : > { %v5203_v5 = vpop.f32.mrf.mxu1  ;;  %v5291_v50 = vpop.f32.mrf.mxu0 }
 0x1cd   : > { %v3560_v23 = vadd.f32 %v6691_v28, %v3481_v48  ;;  %v3479_v0 = vadd.f32 %v3194_v46, %v2733_v35  ;;  %v2738_v31 = vadd.f32 %v5203_v5, %v6444_v47 }
 0x1ce   : > { %v2461_v30 = vpop.f32.mrf.mxu1  ;;  %v3207_v29 = vpop.f32.mrf.mxu0 }
 0x1cf   : > { %v4490_v43 = vpack.c.bf16 %v3560_v23, %v3559_v19  ;;  %v3558_v37 = vadd.f32 %v6691_v28, %v3479_v0  ;;  %v2736_v51 = vadd.f32 %v2461_v30, %v6449_v3  ;;  %v3484_v8 = vadd.f32 %v5291_v50, %v2738_v31 }
 0x1d0   : > { %v5204_v4 = vpop.f32.mrf.mxu1  ;;  %v5292_v10 = vpop.f32.mrf.mxu0 }
 0x1d1   : > { %4662 = vst [vmem:[%s6701_s30 + $0x8] sm:$0xff] %v4490_v43   ;;  %v4485_v47 = vpack.c.bf16 %v3558_v37, %v3557_v27  ;;  %v2739_v46 = vadd.f32 %v5204_v4, %v6454_v17  ;;  %v3482_v5 = vadd.f32 %v3207_v29, %v2736_v51  ;;  %v3563_v0 = vadd.f32 %v6691_v28, %v3484_v8 }
 0x1d2   : > { %v2464_v48 = vpop.f32.mrf.mxu1  ;;  %v3210_v35 = vpop.f32.mrf.mxu0 }
 0x1d3   : > { %4486 = vst [vmem:[%s6701_s30] sm:$0xff] %v4485_v47   ;;  %v3485_v32 = vadd.f32 %v5292_v10, %v2739_v46  ;;  %v2737_v42 = vadd.f32 %v2464_v48, %v6457_v11  ;;  %v3561_v27 = vadd.f32 %v6691_v28, %v3482_v5 }
 0x1d4   : > { %v5207_v19 = vpop.f32.mrf.mxu1  ;;  %v5295_v23 = vpop.f32.mrf.mxu0 }
 0x1d5   : > { %v3564_v3 = vadd.f32 %v6691_v28, %v3485_v32  ;;  %v3483_v30 = vadd.f32 %v3210_v35, %v2737_v42  ;;  %v2742_v50 = vadd.f32 %v5207_v19, %v6460_v54 }
 0x1d6   : > { %v2477_v31 = vpop.f32.mrf.mxu1  ;;  %v3223_v17 = vpop.f32.mrf.mxu0 }
 0x1d7   : > { %v4500_v43 = vpack.c.bf16 %v3564_v3, %v3563_v0  ;;  %v3562_v29 = vadd.f32 %v6691_v28, %v3483_v30  ;;  %v2740_v37 = vadd.f32 %v2477_v31, %v6465_v58  ;;  %v3488_v10 = vadd.f32 %v5295_v23, %v2742_v50 }
 0x1d8   : > { %v5208_v11 = vpop.f32.mrf.mxu1  ;;  %v5296_v51 = vpop.f32.mrf.mxu0 }
 0x1d9   : > { %4664 = vst [vmem:[%s6701_s30 + $0x18] sm:$0xff] %v4500_v43   ;;  %v4495_v4 = vpack.c.bf16 %v3562_v29, %v3561_v27  ;;  %v2743_v32 = vadd.f32 %v5208_v11, %v6470_v40  ;;  %v3486_v54 = vadd.f32 %v3223_v17, %v2740_v37  ;;  %v3567_v42 = vadd.f32 %v6691_v28, %v3488_v10 }
 0x1da   : > { %v2480_v47 = vpop.f32.mrf.mxu1  ;;  %v3226_v8 = vpop.f32.mrf.mxu0 }
 0x1db   : > { %4663 = vst [vmem:[%s6701_s30 + $0x10] sm:$0xff] %v4495_v4   ;;  %v3489_v46 = vadd.f32 %v5296_v51, %v2743_v32  ;;  %v2741_v48 = vadd.f32 %v2480_v47, %v6473_v1  ;;  %v3565_v3 = vadd.f32 %v6691_v28, %v3486_v54 }
 0x1dc   : > { %v5211_v35 = vpop.f32.mrf.mxu1  ;;  %v5299_v5 = vpop.f32.mrf.mxu0 }
 0x1dd   : > { %v3568_v58 = vadd.f32 %v6691_v28, %v3489_v46  ;;  %v3487_v19 = vadd.f32 %v3226_v8, %v2741_v48  ;;  %v2746_v23 = vadd.f32 %v5211_v35, %v6476_v26 }
 0x1de   : > { %v2493_v0 = vpop.f32.mrf.mxu1  ;;  %v3239_v40 = vpop.f32.mrf.mxu0 }
 0x1df   : > { %v4510_v30 = vpack.c.bf16 %v3568_v58, %v3567_v42  ;;  %v3566_v50 = vadd.f32 %v6691_v28, %v3487_v19  ;;  %v2744_v31 = vadd.f32 %v2493_v0, %v6481_v60  ;;  %v3492_v43 = vadd.f32 %v5299_v5, %v2746_v23 }
 0x1e0   : > { %v5212_v1 = vpop.f32.mrf.mxu1  ;;  %v5300_v17 = vpop.f32.mrf.mxu0 }
 0x1e1   : > { %4666 = vst [vmem:[%s6701_s30 + $0x28] sm:$0xff] %v4510_v30   ;;  %v4505_v27 = vpack.c.bf16 %v3566_v50, %v3565_v3  ;;  %v2747_v29 = vadd.f32 %v5212_v1, %v6486_v24  ;;  %v3490_v26 = vadd.f32 %v3239_v40, %v2744_v31  ;;  %v3571_v47 = vadd.f32 %v6691_v28, %v3492_v43 }
 0x1e2   : > { %v2496_v37 = vpop.f32.mrf.mxu1  ;;  %v3242_v11 = vpop.f32.mrf.mxu0 }
 0x1e3   : > { %4665 = vst [vmem:[%s6701_s30 + $0x20] sm:$0xff] %v4505_v27   ;;  %v3493_v51 = vadd.f32 %v5300_v17, %v2747_v29  ;;  %v2745_v4 = vadd.f32 %v2496_v37, %v6489_v39  ;;  %v3569_v48 = vadd.f32 %v6691_v28, %v3490_v26 }
 0x1e4   : > { %v5215_v10 = vpop.f32.mrf.mxu1  ;;  %v5303_v32 = vpop.f32.mrf.mxu0 }
 0x1e5   : > { %v3572_v60 = vadd.f32 %v6691_v28, %v3493_v51  ;;  %v3491_v8 = vadd.f32 %v3242_v11, %v2745_v4  ;;  %v2750_v54 = vadd.f32 %v5215_v10, %v6492_v62 }
 0x1e6   : > { %v2509_v46 = vpop.f32.mrf.mxu1  ;;  %v3255_v24 = vpop.f32.mrf.mxu0 }
 0x1e7   : > { %v4520_v35 = vpack.c.bf16 %v3572_v60, %v3571_v47  ;;  %v3570_v5 = vadd.f32 %v6691_v28, %v3491_v8  ;;  %v2748_v42 = vadd.f32 %v2509_v46, %v6497_v21  ;;  %v3496_v23 = vadd.f32 %v5303_v32, %v2750_v54 }
 0x1e8   : > { %v5216_v39 = vpop.f32.mrf.mxu1  ;;  %v5304_v58 = vpop.f32.mrf.mxu0 }
 0x1e9   : > { %4668 = vst [vmem:[%s6701_s30 + $0x38] sm:$0xff] %v4520_v35   ;;  %v4515_v19 = vpack.c.bf16 %v3570_v5, %v3569_v48  ;;  %v2751_v0 = vadd.f32 %v5216_v39, %v6502_v61  ;;  %v3494_v62 = vadd.f32 %v3255_v24, %v2748_v42  ;;  %v3575_v17 = vadd.f32 %v6691_v28, %v3496_v23 }
 0x1ea   : > { %v2512_v40 = vpop.f32.mrf.mxu1  ;;  %v3258_v3 = vpop.f32.mrf.mxu0 }
 0x1eb   : > { %4667 = vst [vmem:[%s6701_s30 + $0x30] sm:$0xff] %v4515_v19   ;;  %v3497_v30 = vadd.f32 %v5304_v58, %v2751_v0  ;;  %v2749_v50 = vadd.f32 %v2512_v40, %v6505_v20  ;;  %v3573_v37 = vadd.f32 %v6691_v28, %v3494_v62 }
 0x1ec   : > { %v5219_v31 = vpop.f32.mrf.mxu1  ;;  %v5307_v1 = vpop.f32.mrf.mxu0 }
 0x1ed   : > { %v3576_v21 = vadd.f32 %v6691_v28, %v3497_v30  ;;  %v3495_v27 = vadd.f32 %v3258_v3, %v2749_v50  ;;  %v2754_v43 = vadd.f32 %v5219_v31, %v6508_v34 }
 0x1ee   : > { %v2525_v29 = vpop.f32.mrf.mxu1  ;;  %v3271_v61 = vpop.f32.mrf.mxu0 }
 0x1ef   : > { %v4530_v11 = vpack.c.bf16 %v3576_v21, %v3575_v17  ;;  %v3574_v26 = vadd.f32 %v6691_v28, %v3495_v27  ;;  %v2752_v51 = vadd.f32 %v2525_v29, %v6513_v38  ;;  %v3500_v32 = vadd.f32 %v5307_v1, %v2754_v43 }
 0x1f0   : > { %v5220_v20 = vpop.f32.mrf.mxu1  ;;  %v5308_v4 = vpop.f32.mrf.mxu0 }
 0x1f1   : > { %4670 = vst [vmem:[%s6701_s30 + $0x48] sm:$0xff] %v4530_v11   ;;  %v4525_v10 = vpack.c.bf16 %v3574_v26, %v3573_v37  ;;  %v2755_v47 = vadd.f32 %v5220_v20, %v6518_v41  ;;  %v3498_v34 = vadd.f32 %v3271_v61, %v2752_v51  ;;  %v3579_v35 = vadd.f32 %v6691_v28, %v3500_v32 }
 0x1f2   : > { %v2528_v60 = vpop.f32.mrf.mxu1  ;;  %v3274_v8 = vpop.f32.mrf.mxu0 }
 0x1f3   : > { %4669 = vst [vmem:[%s6701_s30 + $0x40] sm:$0xff] %v4525_v10   ;;  %v3501_v54 = vadd.f32 %v5308_v4, %v2755_v47  ;;  %v2753_v46 = vadd.f32 %v2528_v60, %v6521_v12  ;;  %v3577_v58 = vadd.f32 %v6691_v28, %v3498_v34 }
 0x1f4   : > { %v5223_v24 = vpop.f32.mrf.mxu1  ;;  %v5311_v48 = vpop.f32.mrf.mxu0 }
 0x1f5   : > { %v3580_v38 = vadd.f32 %v6691_v28, %v3501_v54  ;;  %v3499_v5 = vadd.f32 %v3274_v8, %v2753_v46  ;;  %v2758_v42 = vadd.f32 %v5223_v24, %v6524_v45 }
 0x1f6   : > { %v2541_v39 = vpop.f32.mrf.mxu1  ;;  %v3287_v41 = vpop.f32.mrf.mxu0 }
 0x1f7   : > { %v4540_v19 = vpack.c.bf16 %v3580_v38, %v3579_v35  ;;  %v3578_v23 = vadd.f32 %v6691_v28, %v3499_v5  ;;  %v2756_v0 = vadd.f32 %v2541_v39, %v6529_v16  ;;  %v3504_v62 = vadd.f32 %v5311_v48, %v2758_v42 }
 0x1f8   : > { %v5224_v12 = vpop.f32.mrf.mxu1  ;;  %v5312_v40 = vpop.f32.mrf.mxu0 }
 0x1f9   : > { %4672 = vst [vmem:[%s6701_s30 + $0x58] sm:$0xff] %v4540_v19   ;;  %v4535_v3 = vpack.c.bf16 %v3578_v23, %v3577_v58  ;;  %v2759_v30 = vadd.f32 %v5224_v12, %v6534_v33  ;;  %v3502_v45 = vadd.f32 %v3287_v41, %v2756_v0  ;;  %v3583_v43 = vadd.f32 %v6691_v28, %v3504_v62 }
 0x1fa   : > { %v2544_v50 = vpop.f32.mrf.mxu1  ;;  %v3290_v31 = vpop.f32.mrf.mxu0 }
 0x1fb   : > { %4671 = vst [vmem:[%s6701_s30 + $0x50] sm:$0xff] %v4535_v3   ;;  %v3505_v1 = vadd.f32 %v5312_v40, %v2759_v30  ;;  %v2757_v17 = vadd.f32 %v2544_v50, %v6537_v44  ;;  %v3581_v11 = vadd.f32 %v6691_v28, %v3502_v45 }
 0x1fc   : > { %v5227_v21 = vpop.f32.mrf.mxu1  ;;  %v5315_v27 = vpop.f32.mrf.mxu0 }
 0x1fd   : > { %v3584_v16 = vadd.f32 %v6691_v28, %v3505_v1  ;;  %v3503_v29 = vadd.f32 %v3290_v31, %v2757_v17  ;;  %v2762_v61 = vadd.f32 %v5227_v21, %v6540_v63 }
 0x1fe   : > { %v2557_v37 = vpop.f32.mrf.mxu1  ;;  %v3303_v33 = vpop.f32.mrf.mxu0 }
 0x1ff   : > { %v4550_v26 = vpack.c.bf16 %v3584_v16, %v3583_v43  ;;  %v3582_v51 = vadd.f32 %v6691_v28, %v3503_v29  ;;  %v2760_v20 = vadd.f32 %v2557_v37, %v6545_v25  ;;  %v3508_v32 = vadd.f32 %v5315_v27, %v2762_v61 }
 0x200   : > { %v5228_v44 = vpop.f32.mrf.mxu1  ;;  %v5316_v4 = vpop.f32.mrf.mxu0 }
 0x201   : > { %4674 = vst [vmem:[%s6701_s30 + $0x68] sm:$0xff] %v4550_v26   ;;  %v4545_v10 = vpack.c.bf16 %v3582_v51, %v3581_v11  ;;  %v2763_v47 = vadd.f32 %v5228_v44, %v6550_v13  ;;  %v3506_v63 = vadd.f32 %v3303_v33, %v2760_v20  ;;  %v3587_v48 = vadd.f32 %v6691_v28, %v3508_v32 }
 0x202   : > { %v2560_v60 = vpop.f32.mrf.mxu1  ;;  %v3306_v8 = vpop.f32.mrf.mxu0 }
 0x203   : > { %4673 = vst [vmem:[%s6701_s30 + $0x60] sm:$0xff] %v4545_v10   ;;  %v3509_v34 = vadd.f32 %v5316_v4, %v2763_v47  ;;  %v2761_v54 = vadd.f32 %v2560_v60, %v6553_v9  ;;  %v3585_v42 = vadd.f32 %v6691_v28, %v3506_v63 }
 0x204   : > { %v5231_v46 = vpop.f32.mrf.mxu1  ;;  %v5319_v24 = vpop.f32.mrf.mxu0 }
 0x205   : > { %v3588_v25 = vadd.f32 %v6691_v28, %v3509_v34  ;;  %v3507_v35 = vadd.f32 %v3306_v8, %v2761_v54  ;;  %v2766_v38 = vadd.f32 %v5231_v46, %v6556_v53 }
 0x206   : > { %v2573_v5 = vpop.f32.mrf.mxu1  ;;  %v3319_v13 = vpop.f32.mrf.mxu0 }
 0x207   : > { %v4560_v39 = vpack.c.bf16 %v3588_v25, %v3587_v48  ;;  %v3586_v41 = vadd.f32 %v6691_v28, %v3507_v35  ;;  %v2764_v58 = vadd.f32 %v2573_v5, %v6561_v36  ;;  %v3512_v0 = vadd.f32 %v5319_v24, %v2766_v38 }
 0x208   : > { %v5232_v9 = vpop.f32.mrf.mxu1  ;;  %v5320_v19 = vpop.f32.mrf.mxu0 }
 0x209   : > { %4676 = vst [vmem:[%s6701_s30 + $0x78] sm:$0xff] %v4560_v39   ;;  %v4555_v23 = vpack.c.bf16 %v3586_v41, %v3585_v42  ;;  %v2767_v12 = vadd.f32 %v5232_v9, %v6566_v18  ;;  %v3510_v53 = vadd.f32 %v3319_v13, %v2764_v58  ;;  %v3591_v45 = vadd.f32 %v6691_v28, %v3512_v0 }
 0x20a   : > { %v2576_v40 = vpop.f32.mrf.mxu1  ;;  %v3322_v3 = vpop.f32.mrf.mxu0 }
 0x20b   : > { %4675 = vst [vmem:[%s6701_s30 + $0x70] sm:$0xff] %v4555_v23   ;;  %v3513_v62 = vadd.f32 %v5320_v19, %v2767_v12  ;;  %v2765_v30 = vadd.f32 %v2576_v40, %v6569_v15  ;;  %v3589_v27 = vadd.f32 %v6691_v28, %v3510_v53  ;;  %v7045_v19 = vld [vmem:[#allocation28_spill] sm:$0xff]  ;;  %v7046_v53 = vld [vmem:[#allocation29_spill] sm:$0xff] }
 0x20c   : > { %v5235_v50 = vpop.f32.mrf.mxu1  ;;  %v5323_v31 = vpop.f32.mrf.mxu0 }
 0x20d   : > { %v3592_v36 = vadd.f32 %v6691_v28, %v3513_v62  ;;  %v3511_v1 = vadd.f32 %v3322_v3, %v2765_v30  ;;  %v2770_v17 = vadd.f32 %v5235_v50, %v6572_v55 }
 0x20e   : > { %v2589_v21 = vpop.f32.mrf.mxu1  ;;  %v3335_v18 = vpop.f32.mrf.mxu0 }
 0x20f   : > { %v4570_v43 = vpack.c.bf16 %v3592_v36, %v3591_v45  ;;  %v3590_v16 = vadd.f32 %v6691_v28, %v3511_v1  ;;  %v2768_v29 = vadd.f32 %v2589_v21, %v6577_v6  ;;  %v3516_v33 = vadd.f32 %v5323_v31, %v2770_v17  ;;  %v7047_v45 = vld [vmem:[#allocation2_spill] sm:$0xff] }
 0x210   : > { %v5236_v15 = vpop.f32.mrf.mxu1  ;;  %v5324_v61 = vpop.f32.mrf.mxu0 }
 0x211   : > { %4678 = vst [vmem:[%s6701_s30 + $0x88] sm:$0xff] %v4570_v43   ;;  %v4565_v37 = vpack.c.bf16 %v3590_v16, %v3589_v27  ;;  %v2771_v11 = vadd.f32 %v5236_v15, %v6582_v2  ;;  %v3514_v55 = vadd.f32 %v3335_v18, %v2768_v29  ;;  %v3595_v32 = vadd.f32 %v6691_v28, %v3516_v33  ;;  %v7048_v27 = vld [vmem:[#allocation3_spill] sm:$0xff]  ;;  %v7049_v33 = vld [vmem:[#allocation4_spill] sm:$0xff] }
 0x212   : > { %v2592_v26 = vpop.f32.mrf.mxu1  ;;  %v3338_v51 = vpop.f32.mrf.mxu0 }
 0x213   : > { %4677 = vst [vmem:[%s6701_s30 + $0x80] sm:$0xff] %v4565_v37   ;;  %v3517_v20 = vadd.f32 %v5324_v61, %v2771_v11  ;;  %v2769_v44 = vadd.f32 %v2592_v26, %v6585_v49  ;;  %v3593_v63 = vadd.f32 %v6691_v28, %v3514_v55 }
 0x214   : > { %v5239_v4 = vpop.f32.mrf.mxu1  ;;  %v5327_v10 = vpop.f32.mrf.mxu0 }
 0x215   : > { %v3596_v6 = vadd.f32 %v6691_v28, %v3517_v20  ;;  %v3515_v47 = vadd.f32 %v3338_v51, %v2769_v44  ;;  %v2774_v60 = vadd.f32 %v5239_v4, %v6588_v56  ;;  %v7050_v4 = vld [vmem:[#allocation5_spill] sm:$0xff] }
 0x216   : > { %v2605_v8 = vpop.f32.mrf.mxu1  ;;  %v3351_v2 = vpop.f32.mrf.mxu0 }
 0x217   : > { %v4580_v34 = vpack.c.bf16 %v3596_v6, %v3595_v32  ;;  %v3594_v54 = vadd.f32 %v6691_v28, %v3515_v47  ;;  %v2772_v46 = vadd.f32 %v2605_v8, %v6593_v7  ;;  %v3520_v25 = vadd.f32 %v5327_v10, %v2774_v60  ;;  %v7051_v8 = vld [vmem:[#allocation6_spill] sm:$0xff] }
 0x218   : > { %v5240_v49 = vpop.f32.mrf.mxu1  ;;  %v5328_v24 = vpop.f32.mrf.mxu0 }
 0x219   : > { %4680 = vst [vmem:[%s6701_s30 + $0x98] sm:$0xff] %v4580_v34   ;;  %v4575_v48 = vpack.c.bf16 %v3594_v54, %v3593_v63  ;;  %v2775_v35 = vadd.f32 %v5240_v49, %v6596_v59  ;;  %v3518_v56 = vadd.f32 %v3351_v2, %v2772_v46  ;;  %v3599_v58 = vadd.f32 %v6691_v28, %v3520_v25  ;;  %v7052_v49 = vld [vmem:[#allocation7_spill] sm:$0xff] }
 0x21a   : > { %v2608_v38 = vpop.f32.mrf.mxu1  ;;  %v3354_v5 = vpop.f32.mrf.mxu0 }
 0x21b   : > { %4679 = vst [vmem:[%s6701_s30 + $0x90] sm:$0xff] %v4575_v48   ;;  %v3521_v13 = vadd.f32 %v5328_v24, %v2775_v35  ;;  %v2773_v42 = vadd.f32 %v2608_v38, %v6599_v14  ;;  %v3597_v12 = vadd.f32 %v6691_v28, %v3518_v56  ;;  %v7053_v56 = vld [vmem:[#allocation8_spill] sm:$0xff] }
 0x21c   : > { %v5243_v39 = vpop.f32.mrf.mxu1  ;;  %v5331_v41 = vpop.f32.mrf.mxu0 }
 0x21d   : > { %v3600_v7 = vadd.f32 %v6691_v28, %v3521_v13  ;;  %v3519_v9 = vadd.f32 %v3354_v5, %v2773_v42  ;;  %v2778_v23 = vadd.f32 %v5243_v39, %v7045_v19 }
 0x21e   : > { %v2621_v0 = vpop.f32.mrf.mxu1  ;;  %v3367_v59 = vpop.f32.mrf.mxu0 }
 0x21f   : > { %v4590_v40 = vpack.c.bf16 %v3600_v7, %v3599_v58  ;;  %v3598_v3 = vadd.f32 %v6691_v28, %v3519_v9  ;;  %v2776_v62 = vadd.f32 %v2621_v0, %v7046_v53  ;;  %v3524_v31 = vadd.f32 %v5331_v41, %v2778_v23  ;;  %v7054_v9 = vld [vmem:[#allocation9_spill] sm:$0xff] }
 0x220   : > { %v5244_v14 = vpop.f32.mrf.mxu1  ;;  %v5332_v30 = vpop.f32.mrf.mxu0 }
 0x221   : > { %4682 = vst [vmem:[%s6701_s30 + $0xa8] sm:$0xff] %v4590_v40   ;;  %v4585_v50 = vpack.c.bf16 %v3598_v3, %v3597_v12  ;;  %v2779_v36 = vadd.f32 %v5244_v14, %v7047_v45  ;;  %v3522_v21 = vadd.f32 %v3367_v59, %v2776_v62  ;;  %v3603_v15 = vadd.f32 %v6691_v28, %v3524_v31  ;;  %v7055_v40 = vld [vmem:[#allocation10_spill] sm:$0xff] }
 0x222   : > { %v2624_v1 = vpop.f32.mrf.mxu1  ;;  %v3370_v17 = vpop.f32.mrf.mxu0 }
 0x223   : > { %4681 = vst [vmem:[%s6701_s30 + $0xa0] sm:$0xff] %v4585_v50   ;;  %v3525_v18 = vadd.f32 %v5332_v30, %v2779_v36  ;;  %v2777_v43 = vadd.f32 %v2624_v1, %v7048_v27  ;;  %v3601_v55 = vadd.f32 %v6691_v28, %v3522_v21  ;;  %v7056_v50 = vld [vmem:[#allocation11_spill] sm:$0xff] }
 0x224   : > { %v5247_v16 = vpop.f32.mrf.mxu1  ;;  %v5335_v29 = vpop.f32.mrf.mxu0 }
 0x225   : > { %v3604_v61 = vadd.f32 %v6691_v28, %v3525_v18  ;;  %v3523_v37 = vadd.f32 %v3370_v17, %v2777_v43  ;;  %v2782_v11 = vadd.f32 %v5247_v16, %v7049_v33  ;;  %v7057_v18 = vld [vmem:[#allocation12_spill] sm:$0xff] }
 0x226   : > { %v2637_v26 = vpop.f32.mrf.mxu1  ;;  %v3383_v51 = vpop.f32.mrf.mxu0 }
 0x227   : > { %v4600_v20 = vpack.c.bf16 %v3604_v61, %v3603_v15  ;;  %v3602_v44 = vadd.f32 %v6691_v28, %v3523_v37  ;;  %v2780_v10 = vadd.f32 %v2637_v26, %v7050_v4  ;;  %v3528_v60 = vadd.f32 %v5335_v29, %v2782_v11  ;;  %v7058_v37 = vld [vmem:[#allocation13_spill] sm:$0xff] }
 0x228   : > { %v5248_v32 = vpop.f32.mrf.mxu1  ;;  %v5336_v6 = vpop.f32.mrf.mxu0 }
 0x229   : > { %4684 = vst [vmem:[%s6701_s30 + $0xb8] sm:$0xff] %v4600_v20   ;;  %v4595_v47 = vpack.c.bf16 %v3602_v44, %v3601_v55  ;;  %v2783_v2 = vadd.f32 %v5248_v32, %v7051_v8  ;;  %v3526_v54 = vadd.f32 %v3383_v51, %v2780_v10  ;;  %v3607_v35 = vadd.f32 %v6691_v28, %v3528_v60  ;;  %v7059_v20 = vld [vmem:[#allocation14_spill] sm:$0xff] }
 0x22a   : > { %v2640_v63 = vpop.f32.mrf.mxu1  ;;  %v3386_v34 = vpop.f32.mrf.mxu0 }
 0x22b   : > { %4683 = vst [vmem:[%s6701_s30 + $0xb0] sm:$0xff] %v4595_v47   ;;  %v3529_v46 = vadd.f32 %v5336_v6, %v2783_v2  ;;  %v2781_v24 = vadd.f32 %v2640_v63, %v7052_v49  ;;  %v3605_v41 = vadd.f32 %v6691_v28, %v3526_v54  ;;  %v7060_v47 = vld [vmem:[#allocation15_spill] sm:$0xff] }
 0x22c   : > { %v5251_v48 = vpop.f32.mrf.mxu1  ;;  %v5339_v25 = vpop.f32.mrf.mxu0 }
 0x22d   : > { %v3608_v38 = vadd.f32 %v6691_v28, %v3529_v46  ;;  %v3527_v5 = vadd.f32 %v3386_v34, %v2781_v24  ;;  %v2786_v13 = vadd.f32 %v5251_v48, %v7053_v56  ;;  %v7061_v46 = vld [vmem:[#allocation17_spill] sm:$0xff] }
 0x22e   : > { %v2653_v42 = vpop.f32.mrf.mxu1  ;;  %v3399_v39 = vpop.f32.mrf.mxu0 }
 0x22f   : > { %v4610_v58 = vpack.c.bf16 %v3608_v38, %v3607_v35  ;;  %v3606_v7 = vadd.f32 %v6691_v28, %v3527_v5  ;;  %v2784_v19 = vadd.f32 %v2653_v42, %v7054_v9  ;;  %v3532_v12 = vadd.f32 %v5339_v25, %v2786_v13  ;;  %v7062_v5 = vld [vmem:[#allocation16_spill] sm:$0xff] }
 0x230   : > { %v5252_v23 = vpop.f32.mrf.mxu1  ;;  %v5340_v0 = vpop.f32.mrf.mxu0 }
 0x231   : > { %4686 = vst [vmem:[%s6701_s30 + $0xc8] sm:$0xff] %v4610_v58   ;;  %v4605_v59 = vpack.c.bf16 %v3606_v7, %v3605_v41  ;;  %v2787_v3 = vadd.f32 %v5252_v23, %v7055_v40  ;;  %v3530_v14 = vadd.f32 %v3399_v39, %v2784_v19  ;;  %v3611_v1 = vadd.f32 %v6691_v28, %v3532_v12  ;;  %v7063_v58 = vld [vmem:[#allocation19_spill] sm:$0xff] }
 0x232   : > { %v2656_v53 = vpop.f32.mrf.mxu1  ;;  %v3402_v62 = vpop.f32.mrf.mxu0 }
 0x233   : > { %4685 = vst [vmem:[%s6701_s30 + $0xc0] sm:$0xff] %v4605_v59   ;;  %v3533_v30 = vadd.f32 %v5340_v0, %v2787_v3  ;;  %v2785_v31 = vadd.f32 %v2656_v53, %v7056_v50  ;;  %v3609_v29 = vadd.f32 %v6691_v28, %v3530_v14  ;;  %v7064_v59 = vld [vmem:[#allocation18_spill] sm:$0xff] }
 0x234   : > { %v5255_v45 = vpop.f32.mrf.mxu1  ;;  %v5343_v36 = vpop.f32.mrf.mxu0 }
 0x235   : > { %v3612_v17 = vadd.f32 %v6691_v28, %v3533_v30  ;;  %v3531_v21 = vadd.f32 %v3402_v62, %v2785_v31  ;;  %v2790_v27 = vadd.f32 %v5255_v45, %v7057_v18  ;;  %v7065_v30 = vld [vmem:[#allocation20_spill] sm:$0xff] }
 0x236   : > { %v2669_v43 = vpop.f32.mrf.mxu1  ;;  %v3415_v16 = vpop.f32.mrf.mxu0 }
 0x237   : > { %v4620_v15 = vpack.c.bf16 %v3612_v17, %v3611_v1  ;;  %v3610_v61 = vadd.f32 %v6691_v28, %v3531_v21  ;;  %v2788_v33 = vadd.f32 %v2669_v43, %v7058_v37  ;;  %v3536_v55 = vadd.f32 %v5343_v36, %v2790_v27  ;;  %v7066_v21 = vld [vmem:[#allocation21_spill] sm:$0xff] }
 0x238   : > { %v5256_v11 = vpop.f32.mrf.mxu1  ;;  %v5344_v26 = vpop.f32.mrf.mxu0 }
 0x239   : > { %4688 = vst [vmem:[%s6701_s30 + $0xd8] sm:$0xff] %v4620_v15   ;;  %v4615_v51 = vpack.c.bf16 %v3610_v61, %v3609_v29  ;;  %v2791_v44 = vadd.f32 %v5256_v11, %v7059_v20  ;;  %v3534_v32 = vadd.f32 %v3415_v16, %v2788_v33  ;;  %v3615_v63 = vadd.f32 %v6691_v28, %v3536_v55  ;;  %v7067_v15 = vld [vmem:[#allocation22_spill] sm:$0xff] }
 0x23a   : > { %v2672_v4 = vpop.f32.mrf.mxu1  ;;  %v3418_v10 = vpop.f32.mrf.mxu0 }
 0x23b   : > { %4687 = vst [vmem:[%s6701_s30 + $0xd0] sm:$0xff] %v4615_v51   ;;  %v3537_v6 = vadd.f32 %v5344_v26, %v2791_v44  ;;  %v2789_v60 = vadd.f32 %v2672_v4, %v7060_v47  ;;  %v3613_v25 = vadd.f32 %v6691_v28, %v3534_v32  ;;  %v7068_v51 = vld [vmem:[#allocation23_spill] sm:$0xff] }
 0x23c   : > { %v5259_v8 = vpop.f32.mrf.mxu1  ;;  %v5347_v2 = vpop.f32.mrf.mxu0 }
 0x23d   : > { %v3616_v34 = vadd.f32 %v6691_v28, %v3537_v6  ;;  %v3535_v54 = vadd.f32 %v3418_v10, %v2789_v60  ;;  %v2794_v49 = vadd.f32 %v5259_v8, %v7061_v46 }
 0x23e   : > { %v2685_v24 = vpop.f32.mrf.mxu1  ;;  %v3431_v48 = vpop.f32.mrf.mxu0 }
 0x23f   : > { %v4630_v35 = vpack.c.bf16 %v3616_v34, %v3615_v63  ;;  %v3614_v38 = vadd.f32 %v6691_v28, %v3535_v54  ;;  %v2792_v56 = vadd.f32 %v2685_v24, %v7062_v5  ;;  %v3540_v41 = vadd.f32 %v5347_v2, %v2794_v49 }
 0x240   : > { %v5260_v13 = vpop.f32.mrf.mxu1  ;;  %v5348_v42 = vpop.f32.mrf.mxu0 }
 0x241   : > { %4690 = vst [vmem:[%s6701_s30 + $0xe8] sm:$0xff] %v4630_v35   ;;  %v4625_v39 = vpack.c.bf16 %v3614_v38, %v3613_v25  ;;  %v2795_v7 = vadd.f32 %v5260_v13, %v7063_v58  ;;  %v3538_v23 = vadd.f32 %v3431_v48, %v2792_v56  ;;  %v3619_v53 = vadd.f32 %v6691_v28, %v3540_v41  ;;  %v7069_v38 = vld [vmem:[#allocation24_spill] sm:$0xff] }
 0x242   : > { %v2688_v9 = vpop.f32.mrf.mxu1  ;;  %v3434_v19 = vpop.f32.mrf.mxu0 }
 0x243   : > { %4689 = vst [vmem:[%s6701_s30 + $0xe0] sm:$0xff] %v4625_v39   ;;  %v3541_v0 = vadd.f32 %v5348_v42, %v2795_v7  ;;  %v2793_v12 = vadd.f32 %v2688_v9, %v7064_v59  ;;  %v3617_v36 = vadd.f32 %v6691_v28, %v3538_v23 }
 0x244   : > { %v5263_v40 = vpop.f32.mrf.mxu1  ;;  %v5351_v3 = vpop.f32.mrf.mxu0 }
 0x245   : > { %v3620_v62 = vadd.f32 %v6691_v28, %v3541_v0  ;;  %v3539_v14 = vadd.f32 %v3434_v19, %v2793_v12  ;;  %v2798_v50 = vadd.f32 %v5263_v40, %v7065_v30 }
 0x246   : > { %v2701_v31 = vpop.f32.mrf.mxu1  ;;  %v3447_v45 = vpop.f32.mrf.mxu0 }
 0x247   : > { %v4640_v1 = vpack.c.bf16 %v3620_v62, %v3619_v53  ;;  %v3618_v17 = vadd.f32 %v6691_v28, %v3539_v14  ;;  %v2796_v18 = vadd.f32 %v2701_v31, %v7066_v21  ;;  %v3544_v29 = vadd.f32 %v5351_v3, %v2798_v50 }
 0x248   : > { %v5264_v27 = vpop.f32.mrf.mxu1  ;;  %v5352_v43 = vpop.f32.mrf.mxu0 }
 0x249   : > { %4692 = vst [vmem:[%s6701_s30 + $0xf8] sm:$0xff] %v4640_v1   ;;  %v4635_v16 = vpack.c.bf16 %v3618_v17, %v3617_v36  ;;  %v2799_v61 = vadd.f32 %v5264_v27, %v7067_v15  ;;  %v3542_v11 = vadd.f32 %v3447_v45, %v2796_v18  ;;  %v3623_v4 = vadd.f32 %v6691_v28, %v3544_v29 }
 0x24a   : > { %v2704_v37 = vpop.f32.mrf.mxu1  ;;  %v3450_v33 = vpop.f32.mrf.mxu0 }
 0x24b   : > { %4691 = vst [vmem:[%s6701_s30 + $0xf0] sm:$0xff] %v4635_v16   ;;  %v3545_v26 = vadd.f32 %v5352_v43, %v2799_v61  ;;  %v2797_v55 = vadd.f32 %v2704_v37, %v7068_v51  ;;  %v3621_v8 = vadd.f32 %v6691_v28, %v3542_v11 }
 0x24c   : > { %v5267_v20 = vpop.f32.mrf.mxu1  ;;  %v5355_v44 = vpop.f32.mrf.mxu0 }
 0x24d   : > { %v3624_v10 = vadd.f32 %v6691_v28, %v3545_v26  ;;  %v3543_v32 = vadd.f32 %v3450_v33, %v2797_v55  ;;  %v2802_v6 = vadd.f32 %v5267_v20, %v6674_v52 }
 0x24e   : > { %v2717_v47 = vpop.f32.mrf.mxu1  ;;  %v3463_v60 = vpop.f32.mrf.mxu0 }
 0x24f   : > { %v4650_v2 = vpack.c.bf16 %v3624_v10, %v3623_v4  ;;  %v3622_v63 = vadd.f32 %v6691_v28, %v3543_v32  ;;  %v2800_v34 = vadd.f32 %v2717_v47, %v6677_v57  ;;  %v3548_v24 = vadd.f32 %v5355_v44, %v2802_v6 }
 0x250   : > { %v5268_v54 = vpop.f32.mrf.mxu1  ;;  %v5356_v46 = vpop.f32.mrf.mxu0 }
 0x251   : > { %4694 = vst [vmem:[%s6701_s30 + $0x108] sm:$0xff] %v4650_v2   ;;  %v4645_v49 = vpack.c.bf16 %v3622_v63, %v3621_v8  ;;  %v2803_v48 = vadd.f32 %v5268_v54, %v6680_v22  ;;  %v3546_v52 = vadd.f32 %v3463_v60, %v2800_v34  ;;  %v3627_v13 = vadd.f32 %v6691_v28, %v3548_v24 }
 0x252   : > { %v2720_v25 = vpop.f32.mrf.mxu1  ;;  %v3466_v56 = vpop.f32.mrf.mxu0 }
 0x253   : > { %4693 = vst [vmem:[%s6701_s30 + $0x100] sm:$0xff] %v4645_v49   ;;  %v3549_v35 = vadd.f32 %v5356_v46, %v2803_v48  ;;  %v2801_v5 = vadd.f32 %v2720_v25, %v7069_v38  ;;  %v3625_v39 = vadd.f32 %v6691_v28, %v3546_v52 }
 0x255   : > { %v3628_v57 = vadd.f32 %v6691_v28, %v3549_v35  ;;  %v3547_v42 = vadd.f32 %v3466_v56, %v2801_v5 }
 0x257   : > { %v4660_v41 = vpack.c.bf16 %v3628_v57, %v3627_v13  ;;  %v3626_v58 = vadd.f32 %v6691_v28, %v3547_v42 }
 0x259   : > { %4696 = vst [vmem:[%s6701_s30 + $0x118] sm:$0xff] %v4660_v41   ;;  %v4655_v7 = vpack.c.bf16 %v3626_v58, %v3625_v39 }
 0x25b   : > { %4695 = vst [vmem:[%s6701_s30 + $0x110] sm:$0xff] %v4655_v7  }
 0x25c PF: > { %s13_s12 = sadd.s32 1, %s5609_s12  }
 0x25d   : > { %p10_p4 = scmp.ge.s32.totalorder %s13_s12, 4  }
 0x25f   :  { %12 = sbr.rel (!%p10_p4) target bundleno = 1 (0x1), region = 66 }

// kernel: forward.7
= control target key start
LH: loop header
LB: loop body
LE: loop exit
PB: predicated region body
PF: predicated region fallthrough
CT: control target
= control target key end

     0   :  { %s5040_s12 = smov 0   ;;  %s6079_s0 = inlined_call_operand.vmem [shape: bf16[2,96,640], index: 0, kind: input, shape index: {}]   ;;  %s6080_s1 = inlined_call_operand.vmem [shape: bf16[5,640,128], index: 1, kind: input, shape index: {}]   ;;  %s6081_s2 = inlined_call_operand.vmem [shape: f32[1,128], index: 2, kind: input, shape index: {}]   ;;  %s6082_s3 = inlined_call_operand.vmem [shape: bf16[2,64,128], index: 3, kind: output, shape index: {}]  }
   0x1 LB: > { %s3448_s13 = sadd.s32 4294967295, %s5018_s12   ;;  %p3452_p0 = scmp.ge.s32.totalorder %s5018_s12, 1  ;;  %s5018_s12 = sphi %s5040_s12, %s13_s12  }
   0x2   : > { %p137_p1 = scmp.lt.s32.totalorder %s5018_s12, 3 }
   0x4   : > { %p138_p2 = pnand %p3452_p0, %p137_p1 }
   0x5   : > { %p161_p3 = scmp.lt.s32.totalorder (!%p138_p2), %s3448_s13, 1 }
   0x6   : > { %141 = sbr.rel (%p138_p2) target bundleno = 478 (0x1de), region = 32 }
   0xb   : > { %v4724_v0 = vld [vmem:[%s6080_s1 + $0x1b8] sm:$0xff]   ;;  %v4728_v4 = vld [vmem:[%s6080_s1 + $0x1b0] sm:$0xff]   ;;  %v4732_v8 = vld [vmem:[%s6080_s1 + $0x1a8] sm:$0xff]   ;;  %s6084_s13 = smov (!%p161_p3, %s3448_s13), 1 }
   0xc   : > { %v4725_v1 = vld [vmem:[%s6080_s1 + $0x238] sm:$0xff]   ;;  %4119 = vmatprep.subr.bf16.mxu0 %v4724_v0  ;;  %v4729_v5 = vld [vmem:[%s6080_s1 + $0x230] sm:$0xff]   ;;  %v4733_v9 = vld [vmem:[%s6080_s1 + $0x228] sm:$0xff]   ;;  %s4715_s16 = smul.u32 240, %s6084_s13  ;;  %s4087_s6 = sshll.u32 %s6084_s13, 5 }
   0xd   : > { %v4726_v2 = vld [vmem:[%s6080_s1 + $0x178] sm:$0xff]   ;;  %4159 = vmatprep.subr.bf16.mxu1 %v4725_v1  ;;  %v4730_v6 = vld [vmem:[%s6080_s1 + $0x170] sm:$0xff]   ;;  %v4734_v10 = vld [vmem:[%s6080_s1 + $0x168] sm:$0xff]   ;;  %s170_s9 = scalar_lea.vmem %s6082_s3, %s4087_s6 }
   0xe   : > { %v4727_v3 = vld [vmem:[%s6080_s1 + $0x1f8] sm:$0xff]   ;;  %4120 = vmatpush3.bf16.msra.mxu0 %v4726_v2  ;;  %v4731_v7 = vld [vmem:[%s6080_s1 + $0x1f0] sm:$0xff]   ;;  %v4735_v11 = vld [vmem:[%s6080_s1 + $0x1e8] sm:$0xff]   ;;  %s5148_s27 = scalar_lea.vmem %s6079_s0, %s4715_s16 }
   0xf   : > { %4160 = vmatpush3.bf16.msra.mxu1 %v4727_v3  ;;  %4121 = vmatprep.subr.bf16.mxu0 %v4728_v4  ;;  %v4736_v12 = vld [vmem:[%s6080_s1 + $0x1a0] sm:$0xff]   ;;  %v4740_v16 = vld [vmem:[%s6080_s1 + $0x198] sm:$0xff]   ;;  %v4744_v20 = vld [vmem:[%s6080_s1 + $0x190] sm:$0xff]  }
  0x10   : > { %4161 = vmatprep.subr.bf16.mxu1 %v4729_v5  ;;  %v4737_v13 = vld [vmem:[%s6080_s1 + $0x220] sm:$0xff]   ;;  %v4741_v17 = vld [vmem:[%s6080_s1 + $0x218] sm:$0xff]   ;;  %v4745_v21 = vld [vmem:[%s6080_s1 + $0x210] sm:$0xff]  }
  0x11   : > { %v4738_v14 = vld [vmem:[%s6080_s1 + $0x160] sm:$0xff]   ;;  %v4742_v18 = vld [vmem:[%s6080_s1 + $0x158] sm:$0xff]   ;;  %v4746_v22 = vld [vmem:[%s6080_s1 + $0x150] sm:$0xff]  }
  0x12   : > { %4122 = vmatpush3.bf16.msra.mxu0 %v4730_v6  ;;  %v4739_v15 = vld [vmem:[%s6080_s1 + $0x1e0] sm:$0xff]   ;;  %v4743_v19 = vld [vmem:[%s6080_s1 + $0x1d8] sm:$0xff]   ;;  %v4747_v23 = vld [vmem:[%s6080_s1 + $0x1d0] sm:$0xff]  }
  0x13   : > { %4162 = vmatpush3.bf16.msra.mxu1 %v4731_v7  ;;  %4123 = vmatprep.subr.bf16.mxu0 %v4732_v8  ;;  %v4748_v24 = vld [vmem:[%s6080_s1 + $0x188] sm:$0xff]   ;;  %v4752_v28 = vld [vmem:[%s6080_s1 + $0x180] sm:$0xff]   ;;  %v5157_v32 = vld [vmem:[%s5148_s27 + $0x14] sm:$0xff] }
  0x14   : > { %4163 = vmatprep.subr.bf16.mxu1 %v4733_v9  ;;  %v4749_v25 = vld [vmem:[%s6080_s1 + $0x208] sm:$0xff]   ;;  %v4753_v29 = vld [vmem:[%s6080_s1 + $0x200] sm:$0xff]   ;;  %v5168_v36 = vld [vmem:[%s5148_s27 + $0x30] sm:$0xff] }
  0x15   : > { %v4750_v26 = vld [vmem:[%s6080_s1 + $0x148] sm:$0xff]   ;;  %v4754_v30 = vld [vmem:[%s6080_s1 + $0x140] sm:$0xff]   ;;  %v4760_v40 = vld [vmem:[%s6080_s1 + $0x278] sm:$0xff]  }
  0x16   : > { %4124 = vmatpush3.bf16.msra.mxu0 %v4734_v10  ;;  %v4751_v27 = vld [vmem:[%s6080_s1 + $0x1c8] sm:$0xff]   ;;  %v4755_v31 = vld [vmem:[%s6080_s1 + $0x1c0] sm:$0xff]   ;;  %v4761_v41 = vld [vmem:[%s6080_s1 + $0x78] sm:$0xff]  }
  0x17   : > { %4164 = vmatpush3.bf16.msra.mxu1 %v4735_v11  ;;  %4125 = vmatprep.subr.bf16.mxu0 %v4736_v12  ;;  %v5160_v33 = vld [vmem:[%s5148_s27 + $0x28] sm:$0xff]  ;;  %v5163_v34 = vld [vmem:[%s5148_s27 + $0x1c] sm:$0xff]  ;;  %v4763_v43 = vld [vmem:[%s6080_s1 + $0x270] sm:$0xff]  }
  0x18   : > { %4165 = vmatprep.subr.bf16.mxu1 %v4737_v13  ;;  %v3537_v35 = vcombine.high %v5157_v32, %v5160_v33  ;;  %v3536_v37 = vcombine.low %v5157_v32, %v5160_v33  ;;  %v3539_v38 = vcombine.high %v5163_v34, %v5168_v36  ;;  %v3538_v39 = vcombine.low %v5163_v34, %v5168_v36  ;;  %v4762_v42 = vld [vmem:[%s6080_s1 + $0x38] sm:$0xff]   ;;  %v4764_v44 = vld [vmem:[%s6080_s1 + $0x70] sm:$0xff]   ;;  %v5203_v49 = vld [vmem:[%s5148_s27 + $0x44] sm:$0xff] }
  0x19   : > { %v4765_v45 = vld [vmem:[%s6080_s1 + $0x30] sm:$0xff]   ;;  %v5195_v46 = vld [vmem:[%s5148_s27 + $0x3c] sm:$0xff]  ;;  %v4770_v54 = vld [vmem:[%s6080_s1 + $0x268] sm:$0xff]   ;;  %v5219_v55 = vcombine.low %v5168_v36, %v5203_v49 }
  0x1a   : > { %4126 = vmatpush3.bf16.msra.mxu0 %v4738_v14  ;;  %736 = vmatprep.mubr.bf16.mxu0 %v3537_v35  ;;  %v5198_v47 = vld [vmem:[%s5148_s27 + $0x50] sm:$0xff]  ;;  %v5206_v50 = vld [vmem:[%s5148_s27 + $0x58] sm:$0xff]  ;;  %v4771_v56 = vld [vmem:[%s6080_s1 + $0x68] sm:$0xff]  }
  0x1b   : > { %4166 = vmatpush3.bf16.msra.mxu1 %v4739_v15  ;;  %4127 = vmatprep.subr.bf16.mxu0 %v4740_v16  ;;  %v3542_v48 = vcombine.high %v5195_v46, %v5198_v47  ;;  %v3541_v51 = vcombine.low %v5195_v46, %v5198_v47  ;;  %v3544_v52 = vcombine.high %v5203_v49, %v5206_v50  ;;  %v4772_v57 = vld [vmem:[%s6080_s1 + $0x28] sm:$0xff]   ;;  %v4773_v58 = vld [vmem:[%s6080_s1 + $0x260] sm:$0xff]   ;;  %v5240_v62 = vld [vmem:[%s5148_s27 + $0x78] sm:$0xff] }
  0x1c   : > { %4167 = vmatprep.subr.bf16.mxu1 %v4741_v17  ;;  %801 = vmatprep.mubr.bf16.mxu1 %v3539_v38  ;;  %v3543_v53 = vcombine.low %v5203_v49, %v5206_v50  ;;  %v4774_v59 = vld [vmem:[%s6080_s1 + $0x60] sm:$0xff]   ;;  %v5243_v63 = vld [vmem:[%s5148_s27 + $0x6c] sm:$0xff]  ;;  %v4780_v4 = vld [vmem:[%s6080_s1 + $0x258] sm:$0xff]  }
  0x1d   : > { %v4775_v60 = vld [vmem:[%s6080_s1 + $0x20] sm:$0xff]   ;;  %v4781_v6 = vld [vmem:[%s6080_s1 + $0x58] sm:$0xff]   ;;  %v5264_v7 = vcombine.low %v5206_v50, %v5243_v63  ;;  %v4783_v9 = vld [vmem:[%s6080_s1 + $0x250] sm:$0xff]  }
  0x1e   : > { %4128 = vmatpush3.bf16.msra.mxu0 %v4742_v18  ;;  %v5237_v61 = vld [vmem:[%s5148_s27 + $0x64] sm:$0xff]  ;;  %v4782_v8 = vld [vmem:[%s6080_s1 + $0x18] sm:$0xff]   ;;  %v4784_v10 = vld [vmem:[%s6080_s1 + $0x50] sm:$0xff]  }
  0x1f   : > { %4168 = vmatpush3.bf16.msra.mxu1 %v4743_v19  ;;  %4129 = vmatprep.subr.bf16.mxu0 %v4744_v20  ;;  %v5246_v0 = vld [vmem:[%s5148_s27 + $0x80] sm:$0xff]  ;;  %v3547_v1 = vcombine.high %v5237_v61, %v5240_v62  ;;  %v3546_v3 = vcombine.low %v5237_v61, %v5240_v62  ;;  %v4785_v11 = vld [vmem:[%s6080_s1 + $0x10] sm:$0xff]   ;;  %v5290_v16 = vld [vmem:[%s5148_s27 + $0xa8] sm:$0xff] }
  0x20   : > { %4169 = vmatprep.subr.bf16.mxu1 %v4745_v21  ;;  %v3549_v2 = vcombine.high %v5243_v63, %v5246_v0  ;;  %v3548_v5 = vcombine.low %v5243_v63, %v5246_v0  ;;  %v5279_v12 = vld [vmem:[%s5148_s27 + $0x8c] sm:$0xff]  ;;  %v5282_v13 = vld [vmem:[%s5148_s27 + $0xa0] sm:$0xff]  ;;  %v5285_v14 = vld [vmem:[%s5148_s27 + $0x94] sm:$0xff] }
  0x21   : > { %v3552_v15 = vcombine.high %v5279_v12, %v5282_v13  ;;  %v3554_v17 = vcombine.high %v5285_v14, %v5290_v16  ;;  %v3551_v18 = vcombine.low %v5279_v12, %v5282_v13  ;;  %v4790_v19 = vld [vmem:[%s6080_s1 + $0x248] sm:$0xff]   ;;  %v3553_v20 = vcombine.low %v5285_v14, %v5290_v16  ;;  %v172_v35 = vld [vmem:[%s5148_s27] sm:$0xff] }
  0x22   : > { %4130 = vmatpush3.bf16.msra.mxu0 %v4746_v22  ;;  %v4791_v21 = vld [vmem:[%s6080_s1 + $0x48] sm:$0xff]   ;;  %v5306_v22 = vcombine.low %v5246_v0, %v5285_v14  ;;  %v3597_v38 = vcombine.high %v172_v35, %v5157_v32 }
  0x23   : > { %4170 = vmatpush3.bf16.msra.mxu1 %v4747_v23  ;;  %4131 = vmatprep.subr.bf16.mxu0 %v4748_v24  ;;  %v4792_v23 = vld [vmem:[%s6080_s1 + $0x8] sm:$0xff]   ;;  %v4793_v24 = vld [vmem:[%s6080_s1 + $0x240] sm:$0xff]  }
  0x24   : > { %4171 = vmatprep.subr.bf16.mxu1 %v4749_v25  ;;  %v4794_v25 = vld [vmem:[%s6080_s1 + $0x40] sm:$0xff]  }
  0x26   : > { %4132 = vmatpush3.bf16.msra.mxu0 %v4750_v26  ;;  %v4795_v26 = vld [vmem:[%s6080_s1] sm:$0xff]  }
  0x27   : > { %4172 = vmatpush3.bf16.msra.mxu1 %v4751_v27  ;;  %4133 = vmatprep.subr.bf16.mxu0 %v4752_v28  ;;  %v5321_v27 = vld [vmem:[%s5148_s27 + $0x24] sm:$0xf]  ;;  %v5324_v28 = vld [vmem:[%s5148_s27 + $0x38] sm:$0xf] }
  0x28   : > { %4173 = vmatprep.subr.bf16.mxu1 %v4753_v29  ;;  %v5327_v29 = vld [vmem:[%s5148_s27 + $0x4c] sm:$0xf] }
  0x2a   : > { %4134 = vmatpush3.bf16.msra.mxu0 %v4754_v30  ;;  %v5330_v30 = vld [vmem:[%s5148_s27 + $0x60] sm:$0xf] }
  0x2b   : > { %4174 = vmatpush3.bf16.msra.mxu1 %v4755_v31  ;;  %4579 = vmatprep.subr.bf16.mxu0 %v4760_v40  ;;  %v3540_v31 = vcombine.low %v5321_v27, %v5324_v28 }
  0x2c   : > { %4211 = vmatprep.subr.bf16.mxu1 %v4761_v41  ;;  %v4803_v41 = vld [vmem:[%s6080_s1 + $0xb8] sm:$0xff]  }
  0x2d   : > { %737 = vmatmul.mubr.bf16.vlgmr.msra.gmra.mxu0 %v3536_v37  ;;  %v4801_v37 = vld [vmem:[%s6080_s1 + $0xf8] sm:$0xff]  }
  0x2e   : > { %802 = vmatmul.mubr.bf16.vlgmr.msra.gmra.mxu1 %v3538_v39  ;;  %4580 = vmatpush3.bf16.msra.mxu0 %v4760_v40  ;;  %v4802_v39 = vld [vmem:[%s6080_s1 + $0x138] sm:$0xff]   ;;  %v3545_v40 = vcombine.low %v5327_v29, %v5330_v30 }
  0x2f   : > { %4212 = vmatpush3.bf16.msra.mxu1 %v4762_v42  ;;  %4581 = vmatprep.subr.bf16.mxu0 %v4763_v43  ;;  %v3596_v42 = vcombine.low %v172_v35, %v5157_v32  ;;  %v5361_v32 = vld [vmem:[%s5148_s27 + $0x88] sm:$0xf]  ;;  %v4839_v35 = vld [vmem:[%s6080_s1 + $0x338] sm:$0xff]  }
  0x30   : > { %4213 = vmatprep.subr.bf16.mxu1 %v4764_v44  ;;  %744 = vmatprep.mubr.bf16.mxu0 %v3542_v48  ;;  %v4805_v44 = vld [vmem:[%s6080_s1 + $0x130] sm:$0xff]  }
  0x31   : > { %809 = vmatprep.mubr.bf16.mxu1 %v3544_v52  ;;  %v5358_v48 = vld [vmem:[%s5148_s27 + $0x74] sm:$0xf]  ;;  %v5368_v52 = vld [vmem:[%s5148_s27 + $0x9c] sm:$0xf] }
  0x32   : > { %4582 = vmatpush3.bf16.msra.mxu0 %v4763_v43  ;;  %v4804_v43 = vld [vmem:[%s6080_s1 + $0xf0] sm:$0xff]  }
  0x33   : > { %4214 = vmatpush3.bf16.msra.mxu1 %v4765_v45  ;;  %4583 = vmatprep.subr.bf16.mxu0 %v4770_v54  ;;  %v4806_v45 = vld [vmem:[%s6080_s1 + $0xb0] sm:$0xff]  }
  0x34   : > { %4215 = vmatprep.subr.bf16.mxu1 %v4771_v56  ;;  %v4811_v56 = vld [vmem:[%s6080_s1 + $0xe8] sm:$0xff]  }
  0x35   : > { %745 = vmatmul.mubr.bf16.gmra.mxu0 %v3541_v51  ;;  %v5365_v51 = vcombine.high %v5160_v33, %v5195_v46 }
  0x36   : > { %810 = vmatmul.mubr.bf16.gmra.mxu1 %v3543_v53  ;;  %4584 = vmatpush3.bf16.msra.mxu0 %v4770_v54  ;;  %v3550_v53 = vcombine.low %v5358_v48, %v5361_v32  ;;  %v278_v54 = vld [vmem:[%s5148_s27 + $0xb0] sm:$0xf] }
  0x37   : > { %4216 = vmatpush3.bf16.msra.mxu1 %v4772_v57  ;;  %4585 = vmatprep.subr.bf16.mxu0 %v4773_v58  ;;  %v4812_v57 = vld [vmem:[%s6080_s1 + $0x128] sm:$0xff]  }
  0x38   : > { %4217 = vmatprep.subr.bf16.mxu1 %v4774_v59  ;;  %752 = vmatprep.mubr.bf16.mxu0 %v3547_v1  ;;  %v5383_v59 = vcombine.low %v5160_v33, %v5195_v46  ;;  %v4814_v1 = vld [vmem:[%s6080_s1 + $0xe0] sm:$0xff]   ;;  %v4819_v46 = vld [vmem:[%s6080_s1 + $0xd8] sm:$0xff]  }
  0x39   : > { %817 = vmatprep.mubr.bf16.mxu1 %v3549_v2  ;;  %v4815_v2 = vld [vmem:[%s6080_s1 + $0x120] sm:$0xff]  }
  0x3a   : > { %4586 = vmatpush3.bf16.msra.mxu0 %v4773_v58  ;;  %v3555_v58 = vcombine.low %v5368_v52, %v278_v54  ;;  %v4816_v33 = vld [vmem:[%s6080_s1 + $0xa0] sm:$0xff]   ;;  %v4862_v54 = vld [vmem:[%s6080_s1 + $0x2d0] sm:$0xff]  }
  0x3b   : > { %4218 = vmatpush3.bf16.msra.mxu1 %v4775_v60  ;;  %4587 = vmatprep.subr.bf16.mxu0 %v4780_v4  ;;  %v4813_v60 = vld [vmem:[%s6080_s1 + $0xa8] sm:$0xff]  }
  0x3c   : > { %4219 = vmatprep.subr.bf16.mxu1 %v4781_v6  ;;  %v4821_v6 = vld [vmem:[%s6080_s1 + $0x98] sm:$0xff]  }
  0x3d   : > { %753 = vmatmul.mubr.bf16.gmra.mxu0 %v3546_v3  ;;  %v5396_v3 = vcombine.high %v5198_v47, %v5237_v61 }
  0x3e   : > { %818 = vmatmul.mubr.bf16.gmra.mxu1 %v3548_v5  ;;  %4588 = vmatpush3.bf16.msra.mxu0 %v4780_v4  ;;  %v4820_v4 = vld [vmem:[%s6080_s1 + $0x118] sm:$0xff]   ;;  %v5411_v5 = vcombine.low %v5198_v47, %v5237_v61  ;;  %v5424_v47 = vcombine.high %v5240_v62, %v5279_v12  ;;  %v4824_v61 = vld [vmem:[%s6080_s1 + $0x90] sm:$0xff]  }
  0x3f   : > { %4220 = vmatpush3.bf16.msra.mxu1 %v4782_v8  ;;  %4589 = vmatprep.subr.bf16.mxu0 %v4783_v9  ;;  %v4822_v8 = vld [vmem:[%s6080_s1 + $0xd0] sm:$0xff]  }
  0x40   : > { %4221 = vmatprep.subr.bf16.mxu1 %v4784_v10  ;;  %760 = vmatprep.mubr.bf16.mxu0 %v3552_v15  ;;  %v4827_v10 = vld [vmem:[%s6080_s1 + $0xc8] sm:$0xff]  }
  0x41   : > { %825 = vmatprep.mubr.bf16.mxu1 %v3554_v17  ;;  %v173_v15 = vld [vmem:[%s5148_s27 + $0x8] sm:$0xff] }
  0x42   : > { %4590 = vmatpush3.bf16.msra.mxu0 %v4783_v9  ;;  %v4823_v9 = vld [vmem:[%s6080_s1 + $0x110] sm:$0xff]   ;;  %v3599_v17 = vcombine.high %v173_v15, %v5163_v34 }
  0x43   : > { %4222 = vmatpush3.bf16.msra.mxu1 %v4785_v11  ;;  %4591 = vmatprep.subr.bf16.mxu0 %v4790_v19  ;;  %v4828_v11 = vld [vmem:[%s6080_s1 + $0x108] sm:$0xff]  }
  0x44   : > { %4223 = vmatprep.subr.bf16.mxu1 %v4791_v21  ;;  %v4830_v21 = vld [vmem:[%s6080_s1 + $0xc0] sm:$0xff]  }
  0x45   : > { %761 = vmatmul.mubr.bf16.gmra.mxu0 %v3551_v18  ;;  %v174_v18 = vld [vmem:[%s5148_s27 + $0x10] sm:$0xf] }
  0x46   : > { %826 = vmatmul.mubr.bf16.gmra.mxu1 %v3553_v20  ;;  %4592 = vmatpush3.bf16.msra.mxu0 %v4790_v19  ;;  %v5442_v19 = vcombine.low %v5240_v62, %v5279_v12  ;;  %v4829_v20 = vld [vmem:[%s6080_s1 + $0x88] sm:$0xff]   ;;  %v4832_v62 = vld [vmem:[%s6080_s1 + $0x80] sm:$0xff]   ;;  %v4836_v12 = vld [vmem:[%s6080_s1 + $0x2f8] sm:$0xff]  }
  0x47   : > { %4224 = vmatpush3.bf16.msra.mxu1 %v4792_v23  ;;  %4593 = vmatprep.subr.bf16.mxu0 %v4793_v24  ;;  %v4831_v23 = vld [vmem:[%s6080_s1 + $0x100] sm:$0xff]  }
  0x48   : > { %4225 = vmatprep.subr.bf16.mxu1 %v4794_v25  ;;  %4595 = vmatprep.mubr.bf16.mxu0 %v3540_v31  ;;  %v4837_v25 = vld [vmem:[%s6080_s1 + $0x378] sm:$0xff]   ;;  %v3605_v31 = vcombine.low %v5324_v28, %v5327_v29  ;;  %v4842_v28 = vld [vmem:[%s6080_s1 + $0x2b0] sm:$0xff]   ;;  %v3610_v29 = vcombine.low %v5330_v30, %v5358_v48  ;;  %v4848_v30 = vld [vmem:[%s6080_s1 + $0x2a8] sm:$0xff]  }
  0x49   : > { %1219 = vmatprep.mubr.bf16.mxu1 %v3597_v38  ;;  %v3604_v38 = vcombine.high %v5168_v36, %v5203_v49  ;;  %v4846_v36 = vld [vmem:[%s6080_s1 + $0x2e8] sm:$0xff]   ;;  %v4857_v48 = vld [vmem:[%s6080_s1 + $0x358] sm:$0xff]  }
  0x4a   : > { %4594 = vmatpush3.bf16.msra.mxu0 %v4793_v24  ;;  %v3600_v24 = vcombine.low %v174_v18, %v5321_v27  ;;  %v4838_v27 = vld [vmem:[%s6080_s1 + $0x2b8] sm:$0xff]   ;;  %v4847_v49 = vld [vmem:[%s6080_s1 + $0x368] sm:$0xff]  }
  0x4b   : > { %4226 = vmatpush3.bf16.msra.mxu1 %v4795_v26  ;;  %4251 = vmatprep.subr.bf16.mxu0 %v4801_v37  ;;  %v3598_v26 = vcombine.low %v173_v15, %v5163_v34  ;;  %v4840_v37 = vld [vmem:[%s6080_s1 + $0x2f0] sm:$0xff]   ;;  %v4885_v15 = vld [vmem:[%s6080_s1 + $0x3a0] sm:$0xff]   ;;  %v4888_v18 = vld [vmem:[%s6080_s1 + $0x398] sm:$0xff]  }
  0x4c   : > { %4603 = vmatprep.subr.bf16.mxu1 %v4802_v39  ;;  %v4841_v34 = vld [vmem:[%s6080_s1 + $0x370] sm:$0xff]  }
  0x4d   : > { %4596 = vmatmul.mubr.bf16.vlgmr.msra.gmra.mxu0 %v3545_v40  ;;  %v4849_v40 = vld [vmem:[%s6080_s1 + $0x328] sm:$0xff]  }
  0x4e   : > { %1220 = vmatmul.mubr.bf16.vlgmr.msra.gmra.mxu1 %v3596_v42  ;;  %4252 = vmatpush3.bf16.msra.mxu0 %v4803_v41  ;;  %v5503_v41 = vcombine.high %v5206_v50, %v5243_v63  ;;  %v4850_v42 = vld [vmem:[%s6080_s1 + $0x2e0] sm:$0xff]  }
  0x4f   : > { %4604 = vmatpush3.bf16.msra.mxu1 %v4802_v39  ;;  %4253 = vmatprep.subr.bf16.mxu0 %v4804_v43  ;;  %v4843_v39 = vld [vmem:[%s6080_s1 + $0x330] sm:$0xff]   ;;  %v4851_v43 = vld [vmem:[%s6080_s1 + $0x360] sm:$0xff]  }
  0x50   : > { %4605 = vmatprep.subr.bf16.mxu1 %v4805_v44  ;;  %4599 = vmatprep.mubr.bf16.mxu0 %v3550_v53  ;;  %v4852_v50 = vld [vmem:[%s6080_s1 + $0x2a0] sm:$0xff]   ;;  %v5535_v53 = vcombine.high %v5246_v0, %v5285_v14  ;;  %v4865_v0 = vld [vmem:[%s6080_s1 + $0x310] sm:$0xff]   ;;  %v4868_v14 = vld [vmem:[%s6080_s1 + $0x2c8] sm:$0xff]  }
  0x51   : > { %1227 = vmatprep.mubr.bf16.mxu1 %v5365_v51  ;;  %v4853_v63 = vld [vmem:[%s6080_s1 + $0x320] sm:$0xff]  }
  0x52   : > { %4254 = vmatpush3.bf16.msra.mxu0 %v4806_v45  ;;  %v4856_v45 = vld [vmem:[%s6080_s1 + $0x2d8] sm:$0xff]  }
  0x53   : > { %4606 = vmatpush3.bf16.msra.mxu1 %v4805_v44  ;;  %4255 = vmatprep.subr.bf16.mxu0 %v4811_v56  ;;  %v3615_v44 = vcombine.low %v5361_v32, %v5368_v52  ;;  %v4858_v32 = vld [vmem:[%s6080_s1 + $0x298] sm:$0xff]   ;;  %v4863_v56 = vld [vmem:[%s6080_s1 + $0x350] sm:$0xff]  }
  0x54   : > { %4607 = vmatprep.subr.bf16.mxu1 %v4812_v57  ;;  %v4859_v52 = vld [vmem:[%s6080_s1 + $0x318] sm:$0xff]  }
  0x55   : > { %4600 = vmatmul.mubr.bf16.gmra.mxu0 %v3555_v58  ;;  %v4869_v58 = vld [vmem:[%s6080_s1 + $0x348] sm:$0xff]  }
  0x56   : > { %1228 = vmatmul.mubr.bf16.gmra.mxu1 %v5383_v59  ;;  %4256 = vmatpush3.bf16.msra.mxu0 %v4813_v60  ;;  %v4870_v60 = vld [vmem:[%s6080_s1 + $0x288] sm:$0xff]  }
  0x57   : > { %4608 = vmatpush3.bf16.msra.mxu1 %v4812_v57  ;;  %4257 = vmatprep.subr.bf16.mxu0 %v4814_v1  ;;  %v4864_v57 = vld [vmem:[%s6080_s1 + $0x290] sm:$0xff]   ;;  %v4871_v1 = vld [vmem:[%s6080_s1 + $0x308] sm:$0xff]  }
  0x58   : > { %4609 = vmatprep.subr.bf16.mxu1 %v4815_v2  ;;  %1235 = vmatprep.mubr.bf16.mxu1 %v5396_v3 }
  0x59   : > { %1284 = vmatprep.mubr.bf16.mxu0 %v3599_v17  ;;  %v4887_v17 = vld [vmem:[%s6080_s1 + $0x3e0] sm:$0xff]  }
  0x5a   : > { %4258 = vmatpush3.bf16.msra.mxu0 %v4816_v33  ;;  %v4873_v33 = vld [vmem:[%s6080_s1 + $0x340] sm:$0xff]  }
  0x5b   : > { %4610 = vmatpush3.bf16.msra.mxu1 %v4815_v2  ;;  %4259 = vmatprep.subr.bf16.mxu0 %v4819_v46  ;;  %v4872_v2 = vld [vmem:[%s6080_s1 + $0x2c0] sm:$0xff]  }
  0x5c   : > { %4611 = vmatprep.subr.bf16.mxu1 %v4820_v4  ;;  %v4874_v46 = vld [vmem:[%s6080_s1 + $0x280] sm:$0xff]  }
  0x5e   : > { %1236 = vmatmul.mubr.bf16.gmra.mxu1 %v5411_v5  ;;  %4260 = vmatpush3.bf16.msra.mxu0 %v4821_v6  ;;  %v4876_v6 = vld [vmem:[%s6080_s1 + $0x3b8] sm:$0xff]  }
  0x5f   : > { %4612 = vmatpush3.bf16.msra.mxu1 %v4820_v4  ;;  %4261 = vmatprep.subr.bf16.mxu0 %v4822_v8  ;;  %v4875_v4 = vld [vmem:[%s6080_s1 + $0x300] sm:$0xff]   ;;  %v4877_v8 = vld [vmem:[%s6080_s1 + $0x438] sm:$0xff]  }
  0x60   : > { %4613 = vmatprep.subr.bf16.mxu1 %v4823_v9  ;;  %1243 = vmatprep.mubr.bf16.mxu1 %v5424_v47 }
  0x62   : > { %4262 = vmatpush3.bf16.msra.mxu0 %v4824_v61  ;;  %v4880_v61 = vld [vmem:[%s6080_s1 + $0x430] sm:$0xff]  }
  0x63   : > { %4614 = vmatpush3.bf16.msra.mxu1 %v4823_v9  ;;  %4263 = vmatprep.subr.bf16.mxu0 %v4827_v10  ;;  %v4878_v9 = vld [vmem:[%s6080_s1 + $0x3f8] sm:$0xff]   ;;  %v4881_v10 = vld [vmem:[%s6080_s1 + $0x3f0] sm:$0xff]  }
  0x64   : > { %4615 = vmatprep.subr.bf16.mxu1 %v4828_v11 }
  0x66   : > { %1244 = vmatmul.mubr.bf16.gmra.mxu1 %v5442_v19  ;;  %4264 = vmatpush3.bf16.msra.mxu0 %v4829_v20  ;;  %v4890_v20 = vld [vmem:[%s6080_s1 + $0x3d8] sm:$0xff]  }
  0x67   : > { %4616 = vmatpush3.bf16.msra.mxu1 %v4828_v11  ;;  %4265 = vmatprep.subr.bf16.mxu0 %v4830_v21  ;;  %v4882_v11 = vld [vmem:[%s6080_s1 + $0x3a8] sm:$0xff]   ;;  %v5634_v21 = vld [vmem:[%s5148_s27 + $0xbc] sm:$0xff] }
  0x68   : > { %4617 = vmatprep.subr.bf16.mxu1 %v4831_v23  ;;  %4619 = vmatprep.mubr.bf16.mxu1 %v3600_v24 }
  0x6a   : > { %4266 = vmatpush3.bf16.msra.mxu0 %v4832_v62  ;;  %v3754_v62 = vcombine.high %v5290_v16, %v5634_v21 }
  0x6b   : > { %4618 = vmatpush3.bf16.msra.mxu1 %v4831_v23  ;;  %4303 = vmatprep.subr.bf16.mxu0 %v4836_v12  ;;  %v4892_v23 = vld [vmem:[%s6080_s1 + $0x410] sm:$0xff]  }
  0x6c   : > { %4343 = vmatprep.subr.bf16.mxu1 %v4837_v25  ;;  %v4893_v12 = vld [vmem:[%s6080_s1 + $0x3d0] sm:$0xff]   ;;  %v4898_v25 = vld [vmem:[%s6080_s1 + $0x388] sm:$0xff]  }
  0x6d   : > { %1285 = vmatmul.mubr.bf16.vlgmr.msra.gmra.mxu0 %v3598_v26  ;;  %v2034_v26 = vld [vmem:[%s5148_s27 + $0x3c] sm:$0xff] }
  0x6e   : > { %4620 = vmatmul.mubr.bf16.vlgmr.msra.gmra.mxu1 %v3605_v31  ;;  %4304 = vmatpush3.bf16.msra.mxu0 %v4838_v27  ;;  %v3753_v27 = vcombine.low %v5290_v16, %v5634_v21  ;;  %v5663_v31 = vld [vmem:[%s5148_s27 + $0x50] sm:$0xff]  ;;  %v4903_v16 = vld [vmem:[%s6080_s1 + $0x3c0] sm:$0xff]  }
  0x6f   : > { %4344 = vmatpush3.bf16.msra.mxu1 %v4839_v35  ;;  %4305 = vmatprep.subr.bf16.mxu0 %v4840_v37  ;;  %v4900_v35 = vld [vmem:[%s6080_s1 + $0x3c8] sm:$0xff]   ;;  %v4901_v37 = vld [vmem:[%s6080_s1 + $0x380] sm:$0xff]  }
  0x70   : > { %4345 = vmatprep.subr.bf16.mxu1 %v4841_v34  ;;  %1292 = vmatprep.mubr.bf16.mxu0 %v3604_v38  ;;  %v4904_v34 = vld [vmem:[%s5148_s27 + $0x38] ss:$20 sps:$4 sm:$0xff]  }
  0x71   : > { %4623 = vmatprep.mubr.bf16.mxu1 %v3610_v29  ;;  %v4907_v29 = vld [vmem:[%s5148_s27 + $0x60] ss:$20 sps:$4 sm:$0xff]  }
  0x72   : > { %4306 = vmatpush3.bf16.msra.mxu0 %v4842_v28  ;;  %v4908_v28 = vld [vmem:[%s6080_s1 + $0x4b8] sm:$0xff]  }
  0x73   : > { %4346 = vmatpush3.bf16.msra.mxu1 %v4843_v39  ;;  %4307 = vmatprep.subr.bf16.mxu0 %v4846_v36  ;;  %v4909_v39 = vld [vmem:[%s6080_s1 + $0x4f8] sm:$0xff]  }
  0x74   : > { %4347 = vmatprep.subr.bf16.mxu1 %v4847_v49  ;;  %v4910_v36 = vld [vmem:[%s6080_s1 + $0x478] sm:$0xff]   ;;  %v4911_v49 = vld [vmem:[%s6080_s1 + $0x4b0] sm:$0xff]  }
  0x75   : > { %1293 = vmatmul.mubr.bf16.gmra.mxu0 %v5219_v55 }
  0x76   : > { %4308 = vmatpush3.bf16.msra.mxu0 %v4848_v30  ;;  %1300 = vmatprep.mubr.bf16.mxu0 %v5503_v41  ;;  %v5693_v30 = vld [vmem:[%s5148_s27 + $0x64] sm:$0xff] }
  0x77   : > { %4348 = vmatpush3.bf16.msra.mxu1 %v4849_v40  ;;  %4309 = vmatprep.subr.bf16.mxu0 %v4850_v42  ;;  %v3876_v40 = vcombine.low %v2034_v26, %v5663_v31  ;;  %v4912_v42 = vld [vmem:[%s6080_s1 + $0x4f0] sm:$0xff]  }
  0x78   : > { %4349 = vmatprep.subr.bf16.mxu1 %v4851_v43  ;;  %4624 = vmatmul.mubr.bf16.gmra.mxu1 %v3615_v44  ;;  %v4914_v43 = vld [vmem:[%s5148_s27 + $0x88] ss:$20 sps:$4 sm:$0xff]   ;;  %v5704_v44 = vld [vmem:[%s5148_s27 + $0xa0] sm:$0xff] }
  0x79   : > { %1928 = vmatprep.mubr.bf16.mxu1 %v3604_v38  ;;  %v3877_v38 = vcombine.high %v2034_v26, %v5663_v31  ;;  %v4948_v26 = vld [vmem:[%s6080_s1 + $0x570] sm:$0xff]  }
  0x7a   : > { %4310 = vmatpush3.bf16.msra.mxu0 %v4852_v50 }
  0x7b   : > { %4350 = vmatpush3.bf16.msra.mxu1 %v4853_v63  ;;  %4311 = vmatprep.subr.bf16.mxu0 %v4856_v45 }
  0x7c   : > { %4351 = vmatprep.subr.bf16.mxu1 %v4857_v48  ;;  %v4913_v48 = vld [vmem:[%s6080_s1 + $0x470] sm:$0xff]  }
  0x7d   : > { %1301 = vmatmul.mubr.bf16.gmra.mxu0 %v5264_v7 }
  0x7e   : > { %4312 = vmatpush3.bf16.msra.mxu0 %v4858_v32  ;;  %1308 = vmatprep.mubr.bf16.mxu0 %v5535_v53  ;;  %v4918_v32 = vld [vmem:[%s6080_s1 + $0x4a8] sm:$0xff]  }
  0x7f   : > { %4352 = vmatpush3.bf16.msra.mxu1 %v4859_v52  ;;  %4313 = vmatprep.subr.bf16.mxu0 %v4862_v54  ;;  %v4919_v52 = vld [vmem:[%s6080_s1 + $0x4e8] sm:$0xff]  }
  0x80   : > { %4353 = vmatprep.subr.bf16.mxu1 %v4863_v56  ;;  %v5723_v54 = vld [vmem:[%s5148_s27 + $0x8c] sm:$0xff] }
  0x82   : > { %4314 = vmatpush3.bf16.msra.mxu0 %v4864_v57  ;;  %v4920_v57 = vld [vmem:[%s6080_s1 + $0x468] sm:$0xff]  }
  0x83   : > { %4354 = vmatpush3.bf16.msra.mxu1 %v4865_v0  ;;  %4315 = vmatprep.subr.bf16.mxu0 %v4868_v14  ;;  %v4921_v0 = vld [vmem:[%s6080_s1 + $0x4a0] sm:$0xff]  }
  0x84   : > { %4355 = vmatprep.subr.bf16.mxu1 %v4869_v58  ;;  %v4922_v14 = vld [vmem:[%s6080_s1 + $0x4e0] sm:$0xff]   ;;  %v3887_v58 = vcombine.high %v5723_v54, %v5704_v44 }
  0x85   : > { %1309 = vmatmul.mubr.bf16.gmra.mxu0 %v5306_v22 }
  0x86   : > { %4316 = vmatpush3.bf16.msra.mxu0 %v4870_v60  ;;  %1863 = vmatprep.mubr.bf16.mxu0 %v5365_v51  ;;  %v4879_v51 = vld [vmem:[%s6080_s1 + $0x3b0] sm:$0xff]   ;;  %v4923_v60 = vld [vmem:[%s6080_s1 + $0x460] sm:$0xff]  }
  0x87   : > { %4356 = vmatpush3.bf16.msra.mxu1 %v4871_v1  ;;  %4317 = vmatprep.subr.bf16.mxu0 %v4872_v2  ;;  %v4926_v1 = vld [vmem:[%s6080_s1 + $0x498] sm:$0xff]  }
  0x88   : > { %4357 = vmatprep.subr.bf16.mxu1 %v4873_v33  ;;  %v4927_v2 = vld [vmem:[%s6080_s1 + $0x4d8] sm:$0xff]   ;;  %v2035_v33 = vld [vmem:[%s5148_s27 + $0x44] sm:$0xff] }
  0x8a   : > { %4318 = vmatpush3.bf16.msra.mxu0 %v4874_v46  ;;  %v5749_v46 = vld [vmem:[%s5148_s27 + $0x58] sm:$0xff] }
  0x8b   : > { %4358 = vmatpush3.bf16.msra.mxu1 %v4875_v4  ;;  %4627 = vmatprep.subr.bf16.mxu0 %v4876_v6  ;;  %v5752_v4 = vld [vmem:[%s5148_s27 + $0xc8] sm:$0xff] }
  0x8c   : > { %4395 = vmatprep.subr.bf16.mxu1 %v4877_v8  ;;  %v3886_v8 = vcombine.low %v5723_v54, %v5704_v44 }
  0x8d   : > { %1864 = vmatmul.mubr.bf16.vlgmr.msra.gmra.mxu0 %v5383_v59  ;;  %v4883_v59 = vld [vmem:[%s6080_s1 + $0x428] sm:$0xff]  }
  0x8e   : > { %1929 = vmatmul.mubr.bf16.vlgmr.msra.gmra.mxu1 %v5219_v55  ;;  %4628 = vmatpush3.bf16.msra.mxu0 %v4876_v6  ;;  %v4884_v55 = vld [vmem:[%s6080_s1 + $0x3e8] sm:$0xff]   ;;  %v3879_v6 = vcombine.high %v2035_v33, %v5749_v46 }
  0x8f   : > { %4396 = vmatpush3.bf16.msra.mxu1 %v4878_v9  ;;  %4629 = vmatprep.subr.bf16.mxu0 %v4879_v51  ;;  %v4928_v9 = vld [vmem:[%s6080_s1 + $0x458] sm:$0xff]  }
  0x90   : > { %4397 = vmatprep.subr.bf16.mxu1 %v4880_v61  ;;  %1871 = vmatprep.mubr.bf16.mxu0 %v5396_v3  ;;  %v4886_v3 = vld [vmem:[%s6080_s1 + $0x420] sm:$0xff]   ;;  %v4930_v61 = vld [vmem:[%s6080_s1 + $0x4d0] sm:$0xff]  }
  0x91   : > { %1936 = vmatprep.mubr.bf16.mxu1 %v5503_v41  ;;  %v5697_v41 = vld [vmem:[%s5148_s27 + $0x78] sm:$0xff] }
  0x92   : > { %4630 = vmatpush3.bf16.msra.mxu0 %v4879_v51  ;;  %v3882_v50 = vcombine.high %v5693_v30, %v5697_v41  ;;  %v3881_v56 = vcombine.low %v5693_v30, %v5697_v41  ;;  %v4929_v51 = vld [vmem:[%s6080_s1 + $0x490] sm:$0xff]  }
  0x93   : > { %4398 = vmatpush3.bf16.msra.mxu1 %v4881_v10  ;;  %4631 = vmatprep.subr.bf16.mxu0 %v4882_v11 }
  0x94   : > { %4399 = vmatprep.subr.bf16.mxu1 %v4883_v59  ;;  %v4934_v59 = vld [vmem:[%s6080_s1 + $0x488] sm:$0xff]  }
  0x95   : > { %1872 = vmatmul.mubr.bf16.gmra.mxu0 %v5411_v5  ;;  %v4889_v5 = vld [vmem:[%s6080_s1 + $0x418] sm:$0xff]  }
  0x96   : > { %1937 = vmatmul.mubr.bf16.gmra.mxu1 %v5264_v7  ;;  %4632 = vmatpush3.bf16.msra.mxu0 %v4882_v11  ;;  %v5628_v7 = vld [vmem:[%s5148_s27 + $0xb4] sm:$0xff] }
  0x97   : > { %4400 = vmatpush3.bf16.msra.mxu1 %v4884_v55  ;;  %4633 = vmatprep.subr.bf16.mxu0 %v4885_v15  ;;  %v3752_v24 = vcombine.high %v5282_v13, %v5628_v7  ;;  %v4027_v63 = vcombine.high %v5704_v44, %v5628_v7  ;;  %v4026_v45 = vcombine.low %v5704_v44, %v5628_v7  ;;  %v4931_v11 = vld [vmem:[%s6080_s1 + $0x450] sm:$0xff]   ;;  %v4935_v55 = vld [vmem:[%s6080_s1 + $0x4c8] sm:$0xff]  }
  0x98   : > { %4401 = vmatprep.subr.bf16.mxu1 %v4886_v3  ;;  %1879 = vmatprep.mubr.bf16.mxu0 %v5424_v47  ;;  %v4891_v47 = vld [vmem:[%s6080_s1 + $0x390] sm:$0xff]   ;;  %v3892_v10 = vcombine.high %v5628_v7, %v5752_v4  ;;  %v4936_v3 = vld [vmem:[%s6080_s1 + $0x448] sm:$0xff]  }
  0x99   : > { %1944 = vmatprep.mubr.bf16.mxu1 %v5535_v53  ;;  %v4916_v53 = vld [vmem:[%s5148_s27 + $0xb0] ss:$20 sps:$4 sm:$0xff]  }
  0x9a   : > { %4634 = vmatpush3.bf16.msra.mxu0 %v4885_v15  ;;  %v3891_v15 = vcombine.low %v5628_v7, %v5752_v4 }
  0x9b   : > { %4402 = vmatpush3.bf16.msra.mxu1 %v4887_v17  ;;  %4635 = vmatprep.subr.bf16.mxu0 %v4888_v18  ;;  %v4937_v17 = vld [vmem:[%s6080_s1 + $0x480] sm:$0xff]  }
  0x9c   : > { %4403 = vmatprep.subr.bf16.mxu1 %v4889_v5  ;;  %v4942_v5 = vld [vmem:[%s5148_s27 + $0x4c] ss:$20 sps:$4 sm:$0xff]  }
  0x9d   : > { %1880 = vmatmul.mubr.bf16.gmra.mxu0 %v5442_v19  ;;  %v4899_v19 = vld [vmem:[%s6080_s1 + $0x408] sm:$0xff]  }
  0x9e   : > { %1945 = vmatmul.mubr.bf16.gmra.mxu1 %v5306_v22  ;;  %4636 = vmatpush3.bf16.msra.mxu0 %v4888_v18  ;;  %v3751_v22 = vcombine.low %v5282_v13, %v5628_v7  ;;  %v4902_v13 = vld [vmem:[%s6080_s1 + $0x400] sm:$0xff]  }
  0x9f   : > { %4404 = vmatpush3.bf16.msra.mxu1 %v4890_v20  ;;  %4637 = vmatprep.subr.bf16.mxu0 %v4891_v47  ;;  %v4938_v18 = vld [vmem:[%s6080_s1 + $0x4c0] sm:$0xff]  }
  0xa0   : > { %4405 = vmatprep.subr.bf16.mxu1 %v4892_v23  ;;  %1887 = vmatprep.mubr.bf16.mxu0 %v3752_v24  ;;  %v4939_v20 = vld [vmem:[%s6080_s1 + $0x440] sm:$0xff]   ;;  %v4945_v23 = vld [vmem:[%s6080_s1 + $0x5f8] sm:$0xff]   ;;  %v4943_v24 = vld [vmem:[%s5148_s27 + $0x74] ss:$20 sps:$4 sm:$0xff]  }
  0xa1   : > { %1952 = vmatprep.mubr.bf16.mxu1 %v3754_v62  ;;  %v5800_v62 = vld [vmem:[%s5148_s27 + $0x6c] sm:$0xff] }
  0xa2   : > { %4638 = vmatpush3.bf16.msra.mxu0 %v4891_v47  ;;  %v4944_v47 = vld [vmem:[%s6080_s1 + $0x578] sm:$0xff]  }
  0xa3   : > { %4406 = vmatpush3.bf16.msra.mxu1 %v4893_v12  ;;  %4639 = vmatprep.subr.bf16.mxu0 %v4898_v25  ;;  %v3878_v12 = vcombine.low %v2035_v33, %v5749_v46  ;;  %v4972_v33 = vld [vmem:[%s6080_s1 + $0x510] sm:$0xff]  }
  0xa4   : > { %4407 = vmatprep.subr.bf16.mxu1 %v4899_v19  ;;  %v4946_v19 = vld [vmem:[%s6080_s1 + $0x538] sm:$0xff]  }
  0xa5   : > { %1888 = vmatmul.mubr.bf16.gmra.mxu0 %v3751_v22  ;;  %v4947_v22 = vld [vmem:[%s6080_s1 + $0x5b8] sm:$0xff]  }
  0xa6   : > { %1953 = vmatmul.mubr.bf16.gmra.mxu1 %v3753_v27  ;;  %4640 = vmatpush3.bf16.msra.mxu0 %v4898_v25  ;;  %v5804_v25 = vld [vmem:[%s5148_s27 + $0x80] sm:$0xff]  ;;  %v4949_v27 = vld [vmem:[%s6080_s1 + $0x5f0] sm:$0xff]  }
  0xa7   : > { %4408 = vmatpush3.bf16.msra.mxu1 %v4900_v35  ;;  %4641 = vmatprep.subr.bf16.mxu0 %v4901_v37  ;;  %v4950_v35 = vld [vmem:[%s6080_s1 + $0x530] sm:$0xff]  }
  0xa8   : > { %4409 = vmatprep.subr.bf16.mxu1 %v4902_v13  ;;  %4643 = vmatprep.mubr.bf16.mxu0 %v4904_v34  ;;  %v4951_v13 = vld [vmem:[%s6080_s1 + $0x5b0] sm:$0xff]   ;;  %v4954_v34 = vld [vmem:[%s6080_s1 + $0x568] sm:$0xff]  }
  0xa9   : > { %2515 = vmatprep.mubr.bf16.mxu1 %v3877_v38  ;;  %v5833_v38 = vld [vmem:[%s5148_s27 + $0x94] sm:$0xff] }
  0xaa   : > { %4642 = vmatpush3.bf16.msra.mxu0 %v4901_v37  ;;  %v3884_v37 = vcombine.high %v5800_v62, %v5804_v25 }
  0xab   : > { %4410 = vmatpush3.bf16.msra.mxu1 %v4903_v16  ;;  %4435 = vmatprep.subr.bf16.mxu0 %v4908_v28  ;;  %v4955_v16 = vld [vmem:[%s6080_s1 + $0x5e8] sm:$0xff]  }
  0xac   : > { %4651 = vmatprep.subr.bf16.mxu1 %v4909_v39  ;;  %v5836_v28 = vld [vmem:[%s5148_s27 + $0xa8] sm:$0xff] }
  0xad   : > { %4644 = vmatmul.mubr.bf16.vlgmr.msra.gmra.mxu0 %v4907_v29  ;;  %v4956_v29 = vld [vmem:[%s6080_s1 + $0x528] sm:$0xff]  }
  0xae   : > { %2516 = vmatmul.mubr.bf16.vlgmr.msra.gmra.mxu1 %v3876_v40  ;;  %4436 = vmatpush3.bf16.msra.mxu0 %v4910_v36  ;;  %v3883_v36 = vcombine.low %v5800_v62, %v5804_v25  ;;  %v4958_v40 = vld [vmem:[%s6080_s1 + $0x560] sm:$0xff]  }
  0xaf   : > { %4652 = vmatpush3.bf16.msra.mxu1 %v4909_v39  ;;  %4437 = vmatprep.subr.bf16.mxu0 %v4911_v49  ;;  %v4968_v39 = vld [vmem:[%s5148_s27 + $0x9c] ss:$20 sps:$4 sm:$0xff]   ;;  %v4957_v49 = vld [vmem:[%s6080_s1 + $0x5a8] sm:$0xff]  }
  0xb0   : > { %4653 = vmatprep.subr.bf16.mxu1 %v4912_v42  ;;  %4647 = vmatprep.mubr.bf16.mxu0 %v4914_v43  ;;  %v4959_v43 = vld [vmem:[%s6080_s1 + $0x5e0] sm:$0xff]  }
  0xb1   : > { %2523 = vmatprep.mubr.bf16.mxu1 %v3882_v50  ;;  %v4960_v50 = vld [vmem:[%s6080_s1 + $0x520] sm:$0xff]  }
  0xb2   : > { %4438 = vmatpush3.bf16.msra.mxu0 %v4913_v48  ;;  %v4969_v48 = vld [vmem:[%s5148_s27 + $0xc4] ss:$20 sps:$4 sm:$0xff]  }
  0xb3   : > { %4654 = vmatpush3.bf16.msra.mxu1 %v4912_v42  ;;  %4439 = vmatprep.subr.bf16.mxu0 %v4918_v32  ;;  %v3889_v42 = vcombine.high %v5833_v38, %v5836_v28  ;;  %v4961_v32 = vld [vmem:[%s6080_s1 + $0x5a0] sm:$0xff]  }
  0xb4   : > { %4655 = vmatprep.subr.bf16.mxu1 %v4919_v52 }
  0xb5   : > { %4648 = vmatmul.mubr.bf16.gmra.mxu0 %v4916_v53  ;;  %v4964_v53 = vld [vmem:[%s6080_s1 + $0x558] sm:$0xff]  }
  0xb6   : > { %2524 = vmatmul.mubr.bf16.gmra.mxu1 %v3881_v56  ;;  %4440 = vmatpush3.bf16.msra.mxu0 %v4920_v57  ;;  %v5868_v56 = vld [vmem:[%s5148_s27 + $0xd0] sm:$0xff]  ;;  %v4965_v57 = vld [vmem:[%s6080_s1 + $0x5d8] sm:$0xff]  }
  0xb7   : > { %4656 = vmatpush3.bf16.msra.mxu1 %v4919_v52  ;;  %4441 = vmatprep.subr.bf16.mxu0 %v4921_v0  ;;  %v4019_v52 = vcombine.high %v5749_v46, %v5800_v62  ;;  %v3888_v0 = vcombine.low %v5833_v38, %v5836_v28 }
  0xb8   : > { %4657 = vmatprep.subr.bf16.mxu1 %v4922_v14  ;;  %2531 = vmatprep.mubr.bf16.mxu1 %v3887_v58  ;;  %v4967_v58 = vld [vmem:[%s6080_s1 + $0x598] sm:$0xff]  }
  0xb9   : > { %2580 = vmatprep.mubr.bf16.mxu0 %v3879_v6  ;;  %v4973_v6 = vld [vmem:[%s6080_s1 + $0x590] sm:$0xff]  }
  0xba   : > { %4442 = vmatpush3.bf16.msra.mxu0 %v4923_v60  ;;  %v3894_v60 = vcombine.high %v5634_v21, %v5868_v56 }
  0xbb   : > { %4658 = vmatpush3.bf16.msra.mxu1 %v4922_v14  ;;  %4443 = vmatprep.subr.bf16.mxu0 %v4926_v1  ;;  %v4966_v14 = vld [vmem:[%s6080_s1 + $0x518] sm:$0xff]   ;;  %v4970_v1 = vld [vmem:[%s6080_s1 + $0x550] sm:$0xff]  }
  0xbc   : > { %4659 = vmatprep.subr.bf16.mxu1 %v4927_v2 }
  0xbe   : > { %2532 = vmatmul.mubr.bf16.gmra.mxu1 %v3886_v8  ;;  %4444 = vmatpush3.bf16.msra.mxu0 %v4928_v9  ;;  %v4976_v8 = vld [vmem:[%s6080_s1 + $0x548] sm:$0xff]  }
  0xbf   : > { %4660 = vmatpush3.bf16.msra.mxu1 %v4927_v2  ;;  %4445 = vmatprep.subr.bf16.mxu0 %v4929_v51  ;;  %v4971_v2 = vld [vmem:[%s6080_s1 + $0x5d0] sm:$0xff]   ;;  %v4977_v9 = vld [vmem:[%s6080_s1 + $0x5c8] sm:$0xff]   ;;  %v3893_v51 = vcombine.low %v5634_v21, %v5868_v56 }
  0xc0   : > { %4661 = vmatprep.subr.bf16.mxu1 %v4930_v61  ;;  %2539 = vmatprep.mubr.bf16.mxu1 %v3892_v10  ;;  %v4979_v10 = vld [vmem:[%s6080_s1 + $0x588] sm:$0xff]  }
  0xc2   : > { %4446 = vmatpush3.bf16.msra.mxu0 %v4931_v11  ;;  %v4017_v11 = vcombine.high %v5663_v31, %v5693_v30 }
  0xc3   : > { %4662 = vmatpush3.bf16.msra.mxu1 %v4930_v61  ;;  %4447 = vmatprep.subr.bf16.mxu0 %v4934_v59  ;;  %v4978_v61 = vld [vmem:[%s6080_s1 + $0x508] sm:$0xff]   ;;  %v4980_v59 = vld [vmem:[%s6080_s1 + $0x540] sm:$0xff]  }
  0xc4   : > { %4663 = vmatprep.subr.bf16.mxu1 %v4935_v55 }
  0xc6   : > { %2540 = vmatmul.mubr.bf16.gmra.mxu1 %v3891_v15  ;;  %4448 = vmatpush3.bf16.msra.mxu0 %v4936_v3  ;;  %v4982_v15 = vld [vmem:[%s6080_s1 + $0x500] sm:$0xff]  }
  0xc7   : > { %4664 = vmatpush3.bf16.msra.mxu1 %v4935_v55  ;;  %4449 = vmatprep.subr.bf16.mxu0 %v4937_v17  ;;  %v4981_v55 = vld [vmem:[%s6080_s1 + $0x5c0] sm:$0xff]   ;;  %v4988_v17 = vld [vmem:[%s6080_s1 + $0x638] sm:$0xff]  }
  0xc8   : > { %4665 = vmatprep.subr.bf16.mxu1 %v4938_v18  ;;  %4667 = vmatprep.mubr.bf16.mxu1 %v4942_v5  ;;  %v4983_v3 = vld [vmem:[%s6080_s1 + $0x580] sm:$0xff]   ;;  %v4018_v5 = vcombine.low %v5749_v46, %v5800_v62 }
  0xca   : > { %4450 = vmatpush3.bf16.msra.mxu0 %v4939_v20  ;;  %v4989_v20 = vld [vmem:[%s6080_s1 + $0x630] sm:$0xff]  }
  0xcb   : > { %4666 = vmatpush3.bf16.msra.mxu1 %v4938_v18  ;;  %4487 = vmatprep.subr.bf16.mxu0 %v4944_v47  ;;  %v4016_v18 = vcombine.low %v5663_v31, %v5693_v30  ;;  %v4024_v31 = vcombine.high %v5804_v25, %v5833_v38 }
  0xcc   : > { %4527 = vmatprep.subr.bf16.mxu1 %v4945_v23  ;;  %v4022_v23 = vcombine.high %v5697_v41, %v5723_v54 }
  0xcd   : > { %2581 = vmatmul.mubr.bf16.vlgmr.msra.gmra.mxu0 %v3878_v12  ;;  %v4994_v12 = vld [vmem:[%s6080_s1 + $0x628] sm:$0xff]  }
  0xce   : > { %4668 = vmatmul.mubr.bf16.vlgmr.msra.gmra.mxu1 %v4943_v24  ;;  %4488 = vmatpush3.bf16.msra.mxu0 %v4946_v19 }
  0xcf   : > { %4528 = vmatpush3.bf16.msra.mxu1 %v4947_v22  ;;  %4489 = vmatprep.subr.bf16.mxu0 %v4948_v26 }
  0xd0   : > { %4529 = vmatprep.subr.bf16.mxu1 %v4949_v27  ;;  %2588 = vmatprep.mubr.bf16.mxu0 %v3884_v37  ;;  %v4021_v27 = vcombine.low %v5697_v41, %v5723_v54  ;;  %v4023_v37 = vcombine.low %v5804_v25, %v5833_v38  ;;  %v4029_v41 = vcombine.high %v5836_v28, %v5634_v21 }
  0xd1   : > { %4671 = vmatprep.mubr.bf16.mxu1 %v4968_v39 }
  0xd2   : > { %4490 = vmatpush3.bf16.msra.mxu0 %v4950_v35 }
  0xd3   : > { %4530 = vmatpush3.bf16.msra.mxu1 %v4951_v13  ;;  %4491 = vmatprep.subr.bf16.mxu0 %v4954_v34 }
  0xd4   : > { %4531 = vmatprep.subr.bf16.mxu1 %v4955_v16 }
  0xd5   : > { %2589 = vmatmul.mubr.bf16.gmra.mxu0 %v3883_v36 }
  0xd6   : > { %4492 = vmatpush3.bf16.msra.mxu0 %v4956_v29  ;;  %2596 = vmatprep.mubr.bf16.mxu0 %v3889_v42  ;;  %v4995_v29 = vld [vmem:[%s6080_s1 + $0x620] sm:$0xff]   ;;  %v5000_v42 = vld [vmem:[%s6080_s1 + $0x618] sm:$0xff]  }
  0xd7   : > { %4532 = vmatpush3.bf16.msra.mxu1 %v4957_v49  ;;  %4493 = vmatprep.subr.bf16.mxu0 %v4958_v40 }
  0xd8   : > { %4533 = vmatprep.subr.bf16.mxu1 %v4959_v43  ;;  %4672 = vmatmul.mubr.bf16.gmra.mxu1 %v4969_v48 }
  0xd9   : > { %3232 = vmatprep.mubr.bf16.mxu1 %v4019_v52 }
  0xda   : > { %4494 = vmatpush3.bf16.msra.mxu0 %v4960_v50 }
  0xdb   : > { %4534 = vmatpush3.bf16.msra.mxu1 %v4961_v32  ;;  %4495 = vmatprep.subr.bf16.mxu0 %v4964_v53  ;;  %v2707_v32 = vld [vmem:[%s5148_s27 + $0xdc] sm:$0xff]  ;;  %v4028_v53 = vcombine.low %v5836_v28, %v5634_v21 }
  0xdc   : > { %4535 = vmatprep.subr.bf16.mxu1 %v4965_v57  ;;  %v2708_v57 = vld [vmem:[%s5148_s27 + $0xe4] sm:$0xff]  ;;  %v4031_v44 = vcombine.low %v5752_v4, %v2707_v32 }
  0xdd   : > { %2597 = vmatmul.mubr.bf16.gmra.mxu0 %v3888_v0  ;;  %v4034_v21 = vcombine.high %v5868_v56, %v2708_v57 }
  0xde   : > { %4496 = vmatpush3.bf16.msra.mxu0 %v4966_v14  ;;  %2604 = vmatprep.mubr.bf16.mxu0 %v3894_v60  ;;  %v5001_v60 = vld [vmem:[%s6080_s1 + $0x610] sm:$0xff]  }
  0xdf   : > { %4536 = vmatpush3.bf16.msra.mxu1 %v4967_v58  ;;  %4497 = vmatprep.subr.bf16.mxu0 %v4970_v1 }
  0xe0   : > { %4537 = vmatprep.subr.bf16.mxu1 %v4971_v2  ;;  %v4032_v2 = vcombine.high %v5752_v4, %v2707_v32  ;;  %v5009_v4 = vld [vmem:[%s5148_s27 + $0xb0] ss:$20 sps:$4 sm:$0xff]  }
  0xe2   : > { %4498 = vmatpush3.bf16.msra.mxu0 %v4972_v33 }
  0xe3   : > { %4538 = vmatpush3.bf16.msra.mxu1 %v4973_v6  ;;  %4499 = vmatprep.subr.bf16.mxu0 %v4976_v8 }
  0xe4   : > { %4539 = vmatprep.subr.bf16.mxu1 %v4977_v9 }
  0xe5   : > { %2605 = vmatmul.mubr.bf16.gmra.mxu0 %v3893_v51  ;;  %v5006_v51 = vld [vmem:[%s6080_s1 + $0x608] sm:$0xff]  }
  0xe6   : > { %4500 = vmatpush3.bf16.msra.mxu0 %v4978_v61  ;;  %3167 = vmatprep.mubr.bf16.mxu0 %v4017_v11  ;;  %v4033_v11 = vcombine.low %v5868_v56, %v2708_v57 }
  0xe7   : > { %4540 = vmatpush3.bf16.msra.mxu1 %v4979_v10  ;;  %4501 = vmatprep.subr.bf16.mxu0 %v4980_v59 }
  0xe8   : > { %4541 = vmatprep.subr.bf16.mxu1 %v4981_v55 }
  0xea   : > { %4502 = vmatpush3.bf16.msra.mxu0 %v4982_v15 }
  0xeb   : > { %4542 = vmatpush3.bf16.msra.mxu1 %v4983_v3  ;;  %4675 = vmatprep.subr.bf16.mxu0 %v4988_v17  ;;  %v5007_v3 = vld [vmem:[%s6080_s1 + $0x600] sm:$0xff]  }
  0xec   : > { %4699 = vmatprep.subr.bf16.mxu1 %v4988_v17 }
  0xed   : > { %v4135_v47 = vpop.f32.mrf.mxu0  ;;  %3168 = vmatmul.mubr.bf16.vlgmr.msra.gmra.mxu0 %v4016_v18 }
  0xee   : > { %v4175_v24 = vpop.f32.mrf.mxu1  ;;  %3233 = vmatmul.mubr.bf16.vlgmr.msra.gmra.mxu1 %v4018_v5  ;;  %4676 = vmatpush3.bf16.msra.mxu0 %v4988_v17  ;;  %v5008_v5 = vld [vmem:[%s5148_s27 + $0x60] ss:$20 sps:$4 sm:$0xff]  }
  0xef   : > { %v4136_v30 = vpop.f32.mrf.mxu0  ;;  %4707 = vmatpush3.bf16.msra.mxu1 %v4988_v17  ;;  %4677 = vmatprep.subr.bf16.mxu0 %v4989_v20 }
  0xf0   : > { %v4137_v46 = vadd.f32 %v4136_v30, %v4135_v47  ;;  %v4176_v62 = vpop.f32.mrf.mxu1  ;;  %4700 = vmatprep.subr.bf16.mxu1 %v4989_v20  ;;  %3175 = vmatprep.mubr.bf16.mxu0 %v4022_v23 }
  0xf1   : > { %v4177_v19 = vadd.f32 %v4176_v62, %v4175_v24  ;;  %v4138_v22 = vpop.f32.mrf.mxu0  ;;  %3240 = vmatprep.mubr.bf16.mxu1 %v4024_v31  ;;  %v5010_v62 = vld [vmem:[%s5148_s27 + $0x88] ss:$20 sps:$4 sm:$0xff]  }
  0xf2   : > { %v4178_v26 = vpop.f32.mrf.mxu1  ;;  %4678 = vmatpush3.bf16.msra.mxu0 %v4989_v20 }
  0xf3   : > { %v4139_v35 = vpop.f32.mrf.mxu0  ;;  %v5944_v13 = vadd.f32 %v4177_v19, %v4137_v46  ;;  %4708 = vmatpush3.bf16.msra.mxu1 %v4989_v20  ;;  %4679 = vmatprep.subr.bf16.mxu0 %v4994_v12  ;;  %v5011_v19 = vld [vmem:[%s5148_s27 + $0xd8] ss:$20 sps:$4 sm:$0xff]  }
  0xf4   : > { %v4140_v34 = vadd.f32 %v4139_v35, %v4138_v22  ;;  %v4179_v16 = vpop.f32.mrf.mxu1  ;;  %4701 = vmatprep.subr.bf16.mxu1 %v4994_v12 }
  0xf5   : > { %v4180_v39 = vadd.f32 %v4179_v16, %v4178_v26  ;;  %v4141_v36 = vpop.f32.mrf.mxu0  ;;  %3176 = vmatmul.mubr.bf16.gmra.mxu0 %v4021_v27 }
  0xf6   : > { %v4181_v49 = vpop.f32.mrf.mxu1  ;;  %3241 = vmatmul.mubr.bf16.gmra.mxu1 %v4023_v37  ;;  %4680 = vmatpush3.bf16.msra.mxu0 %v4994_v12 }
  0xf7   : > { %v4142_v54 = vpop.f32.mrf.mxu0  ;;  %v5951_v25 = vadd.f32 %v4180_v39, %v4140_v34  ;;  %4709 = vmatpush3.bf16.msra.mxu1 %v4994_v12  ;;  %4681 = vmatprep.subr.bf16.mxu0 %v4995_v29 }
  0xf8   : > { %v4143_v38 = vadd.f32 %v4142_v54, %v4141_v36  ;;  %v4182_v40 = vpop.f32.mrf.mxu1  ;;  %4702 = vmatprep.subr.bf16.mxu1 %v4995_v29  ;;  %3183 = vmatprep.mubr.bf16.mxu0 %v4027_v63 }
  0xf9   : > { %v4183_v43 = vadd.f32 %v4182_v40, %v4181_v49  ;;  %v4144_v50 = vpop.f32.mrf.mxu0  ;;  %3248 = vmatprep.mubr.bf16.mxu1 %v4029_v41 }
  0xfa   : > { %v4184_v48 = vpop.f32.mrf.mxu1  ;;  %4682 = vmatpush3.bf16.msra.mxu0 %v4995_v29 }
  0xfb   : > { %v4145_v52 = vpop.f32.mrf.mxu0  ;;  %v5963_v0 = vadd.f32 %v4183_v43, %v4143_v38  ;;  %4710 = vmatpush3.bf16.msra.mxu1 %v4995_v29  ;;  %4683 = vmatprep.subr.bf16.mxu0 %v5000_v42 }
  0xfc   : > { %v4146_v14 = vadd.f32 %v4145_v52, %v4144_v50  ;;  %v4185_v58 = vpop.f32.mrf.mxu1  ;;  %4703 = vmatprep.subr.bf16.mxu1 %v5000_v42 }
  0xfd   : > { %v4186_v63 = vadd.f32 %v4185_v58, %v4184_v48  ;;  %v4147_v1 = vpop.f32.mrf.mxu0  ;;  %3184 = vmatmul.mubr.bf16.gmra.mxu0 %v4026_v45 }
  0xfe   : > { %v4187_v33 = vpop.f32.mrf.mxu1  ;;  %3249 = vmatmul.mubr.bf16.gmra.mxu1 %v4028_v53  ;;  %4684 = vmatpush3.bf16.msra.mxu0 %v5000_v42 }
  0xff   : > { %v4148_v28 = vpop.f32.mrf.mxu0  ;;  %v5973_v6 = vadd.f32 %v4186_v63, %v4146_v14  ;;  %4711 = vmatpush3.bf16.msra.mxu1 %v5000_v42  ;;  %4685 = vmatprep.subr.bf16.mxu0 %v5001_v60 }
 0x100   : > { %v4149_v8 = vadd.f32 %v4148_v28, %v4147_v1  ;;  %v4188_v9 = vpop.f32.mrf.mxu1  ;;  %4704 = vmatprep.subr.bf16.mxu1 %v5001_v60  ;;  %3191 = vmatprep.mubr.bf16.mxu0 %v4032_v2 }
 0x101   : > { %v4189_v61 = vadd.f32 %v4188_v9, %v4187_v33  ;;  %v4150_v10 = vpop.f32.mrf.mxu0  ;;  %3256 = vmatprep.mubr.bf16.mxu1 %v4034_v21 }
 0x102   : > { %v4190_v7 = vpop.f32.mrf.mxu1  ;;  %4686 = vmatpush3.bf16.msra.mxu0 %v5001_v60 }
 0x103   : > { %v4151_v45 = vpop.f32.mrf.mxu0  ;;  %v820_v59 = vadd.f32 %v4189_v61, %v4149_v8  ;;  %4712 = vmatpush3.bf16.msra.mxu1 %v5001_v60  ;;  %4687 = vmatprep.subr.bf16.mxu0 %v5006_v51 }
 0x104   : > { %v4152_v55 = vadd.f32 %v4151_v45, %v4150_v10  ;;  %v4191_v15 = vpop.f32.mrf.mxu1  ;;  %4705 = vmatprep.subr.bf16.mxu1 %v5006_v51 }
 0x105   : > { %v4192_v17 = vadd.f32 %v4191_v15, %v4190_v7  ;;  %v4153_v18 = vpop.f32.mrf.mxu0  ;;  %3192 = vmatmul.mubr.bf16.gmra.mxu0 %v4031_v44 }
 0x106   : > { %v4193_v20 = vpop.f32.mrf.mxu1  ;;  %3257 = vmatmul.mubr.bf16.gmra.mxu1 %v4033_v11  ;;  %4688 = vmatpush3.bf16.msra.mxu0 %v5006_v51 }
 0x107   : > { %v4154_v56 = vpop.f32.mrf.mxu0  ;;  %v823_v47 = vadd.f32 %v4192_v17, %v4152_v55  ;;  %4713 = vmatpush3.bf16.msra.mxu1 %v5006_v51  ;;  %4689 = vmatprep.subr.bf16.mxu0 %v5007_v3 }
 0x108   : > { %v4155_v23 = vadd.f32 %v4154_v56, %v4153_v18  ;;  %v4194_v24 = vpop.f32.mrf.mxu1  ;;  %4706 = vmatprep.subr.bf16.mxu1 %v5007_v3  ;;  %4691 = vmatprep.mubr.bf16.mxu0 %v5008_v5 }
 0x109   : > { %v4195_v31 = vadd.f32 %v4194_v24, %v4193_v20  ;;  %v4156_v30 = vpop.f32.mrf.mxu0  ;;  %4695 = vmatprep.mubr.bf16.mxu1 %v5009_v4 }
 0x10a   : > { %v4196_v46 = vpop.f32.mrf.mxu1  ;;  %4690 = vmatpush3.bf16.msra.mxu0 %v5007_v3 }
 0x10b   : > { %v4157_v12 = vpop.f32.mrf.mxu0  ;;  %v828_v22 = vadd.f32 %v4195_v31, %v4155_v23  ;;  %4714 = vmatpush3.bf16.msra.mxu1 %v5007_v3 }
 0x10c   : > { %v4158_v26 = vadd.f32 %v4157_v12, %v4156_v30  ;;  %v4197_v27 = vpop.f32.mrf.mxu1 }
 0x10d   : > { %v4198_v35 = vadd.f32 %v4197_v27, %v4196_v46  ;;  %v4597_v37 = vpop.f32.mrf.mxu0  ;;  %4692 = vmatmul.mubr.bf16.vlgmr.msra.gmra.mxu0 %v5010_v62 }
 0x10e   : > { %v877_v34 = vadd.f32 %v4597_v37, %v5963_v0  ;;  %v4227_v16 = vpop.f32.mrf.mxu1  ;;  %4696 = vmatmul.mubr.bf16.vlgmr.msra.gmra.mxu1 %v5011_v19 }
 0x10f   : > { %v831_v29 = vadd.f32 %v4198_v35, %v4158_v26  ;;  %v868_v39 = vpop.f32.mrf.mxu0 }
 0x110   : > { %v869_v36 = vadd.f32 %v868_v39, %v5944_v13  ;;  %v4228_v49 = vpop.f32.mrf.mxu1 }
 0x111   : > { %v4229_v41 = vadd.f32 %v4228_v49, %v4227_v16  ;;  %v4598_v54 = vpop.f32.mrf.mxu0 }
 0x112   : > { %v880_v38 = vadd.f32 %v4598_v54, %v5973_v6  ;;  %v4230_v40 = vpop.f32.mrf.mxu1 }
 0x113   : > { %v1222_v42 = vadd.f32 %v4229_v41, %v869_v36  ;;  %v871_v43 = vpop.f32.mrf.mxu0 }
 0x114   : > { %v872_v50 = vadd.f32 %v871_v43, %v5951_v25  ;;  %v4231_v48 = vpop.f32.mrf.mxu1 }
 0x115   : > { %v4232_v32 = vadd.f32 %v4231_v48, %v4230_v40  ;;  %v4601_v52 = vpop.f32.mrf.mxu0 }
 0x116   : > { %v893_v53 = vadd.f32 %v4601_v52, %v828_v22  ;;  %v4233_v57 = vpop.f32.mrf.mxu1 }
 0x117   : > { %v1225_v0 = vadd.f32 %v4232_v32, %v872_v50  ;;  %v884_v14 = vpop.f32.mrf.mxu0 }
 0x118   : > { %v885_v58 = vadd.f32 %v884_v14, %v820_v59  ;;  %v4234_v60 = vpop.f32.mrf.mxu1 }
 0x119   : > { %v4235_v13 = vadd.f32 %v4234_v60, %v4233_v57  ;;  %v4602_v63 = vpop.f32.mrf.mxu0 }
 0x11a   : > { %v896_v1 = vadd.f32 %v4602_v63, %v831_v29  ;;  %v4236_v2 = vpop.f32.mrf.mxu1 }
 0x11b   : > { %v1230_v33 = vadd.f32 %v4235_v13, %v877_v34  ;;  %v887_v21 = vpop.f32.mrf.mxu0 }
 0x11c   : > { %v888_v28 = vadd.f32 %v887_v21, %v823_v47  ;;  %v4237_v6 = vpop.f32.mrf.mxu1 }
 0x11d   : > { %v4238_v8 = vadd.f32 %v4237_v6, %v4236_v2 }
 0x11e   : > { %v4239_v9 = vpop.f32.mrf.mxu1 }
 0x11f   : > { %v1233_v25 = vadd.f32 %v4238_v8, %v880_v38 }
 0x120   : > { %v4240_v51 = vpop.f32.mrf.mxu1 }
 0x121   : > { %v4241_v61 = vadd.f32 %v4240_v51, %v4239_v9 }
 0x122   : > { %v4242_v10 = vpop.f32.mrf.mxu1 }
 0x123   : > { %v1238_v7 = vadd.f32 %v4241_v61, %v885_v58 }
 0x124   : > { %v4243_v44 = vpop.f32.mrf.mxu1 }
 0x125   : > { %v4244_v45 = vadd.f32 %v4243_v44, %v4242_v10 }
 0x126   : > { %v4245_v11 = vpop.f32.mrf.mxu1 }
 0x127   : > { %v1241_v59 = vadd.f32 %v4244_v45, %v888_v28 }
 0x128   : > { %v4246_v55 = vpop.f32.mrf.mxu1 }
 0x129   : > { %v4247_v15 = vadd.f32 %v4246_v55, %v4245_v11 }
 0x12a   : > { %v4248_v3 = vpop.f32.mrf.mxu1 }
 0x12b   : > { %v1246_v17 = vadd.f32 %v4247_v15, %v893_v53 }
 0x12c   : > { %v4249_v18 = vpop.f32.mrf.mxu1 }
 0x12d   : > { %v4250_v5 = vadd.f32 %v4249_v18, %v4248_v3  ;;  %v4267_v20 = vpop.f32.mrf.mxu0 }
 0x12e   : > { %v4621_v4 = vpop.f32.mrf.mxu1 }
 0x12f   : > { %v1249_v56 = vadd.f32 %v4250_v5, %v896_v1  ;;  %v4268_v47 = vpop.f32.mrf.mxu0 }
 0x130   : > { %v4269_v23 = vadd.f32 %v4268_v47, %v4267_v20  ;;  %v1351_v24 = vpop.f32.mrf.mxu1 }
 0x131   : > { %v4270_v31 = vpop.f32.mrf.mxu0 }
 0x132   : > { %v1287_v30 = vadd.f32 %v4269_v23, %v1222_v42  ;;  %v4622_v46 = vpop.f32.mrf.mxu1 }
 0x133   : > { %v4271_v62 = vpop.f32.mrf.mxu0 }
 0x134   : > { %v5991_v12 = vadd.f32 %v1351_v24, %v1287_v30  ;;  %v4272_v19 = vadd.f32 %v4271_v62, %v4270_v31  ;;  %v1354_v27 = vpop.f32.mrf.mxu1 }
 0x135   : > { %v4273_v22 = vpop.f32.mrf.mxu0 }
 0x136   : > { %v1290_v26 = vadd.f32 %v4272_v19, %v1225_v0 }
 0x137   : > { %v4274_v35 = vpop.f32.mrf.mxu0 }
 0x138   : > { %v5993_v37 = vadd.f32 %v1354_v27, %v1290_v26  ;;  %v4275_v34 = vadd.f32 %v4274_v35, %v4273_v22  ;;  %v4625_v29 = vpop.f32.mrf.mxu1 }
 0x139   : > { %v4276_v16 = vpop.f32.mrf.mxu0 }
 0x13a   : > { %v1295_v39 = vadd.f32 %v4275_v34, %v1230_v33  ;;  %v1367_v38 = vpop.f32.mrf.mxu1 }
 0x13b   : > { %v4277_v36 = vpop.f32.mrf.mxu0 }
 0x13c   : > { %v4278_v49 = vadd.f32 %v4277_v36, %v4276_v16  ;;  %v5995_v41 = vadd.f32 %v4621_v4, %v1295_v39  ;;  %v4626_v32 = vpop.f32.mrf.mxu1 }
 0x13d   : > { %v4279_v54 = vpop.f32.mrf.mxu0 }
 0x13e   : > { %v1298_v40 = vadd.f32 %v4278_v49, %v1233_v25  ;;  %v1370_v58 = vpop.f32.mrf.mxu1 }
 0x13f   : > { %v4280_v42 = vpop.f32.mrf.mxu0 }
 0x140   : > { %v4281_v43 = vadd.f32 %v4280_v42, %v4279_v54  ;;  %v5997_v50 = vadd.f32 %v4622_v46, %v1298_v40 }
 0x141   : > { %v4282_v48 = vpop.f32.mrf.mxu0 }
 0x142   : > { %v1303_v52 = vadd.f32 %v4281_v43, %v1238_v7 }
 0x143   : > { %v4283_v53 = vpop.f32.mrf.mxu0 }
 0x144   : > { %v5999_v57 = vadd.f32 %v1367_v38, %v1303_v52  ;;  %v4284_v0 = vadd.f32 %v4283_v53, %v4282_v48 }
 0x145   : > { %v4285_v14 = vpop.f32.mrf.mxu0 }
 0x146   : > { %v1306_v60 = vadd.f32 %v4284_v0, %v1241_v59 }
 0x147   : > { %v4286_v13 = vpop.f32.mrf.mxu0 }
 0x148   : > { %v6001_v63 = vadd.f32 %v1370_v58, %v1306_v60  ;;  %v4287_v1 = vadd.f32 %v4286_v13, %v4285_v14 }
 0x149   : > { %v4288_v2 = vpop.f32.mrf.mxu0 }
 0x14a   : > { %v1311_v33 = vadd.f32 %v4287_v1, %v1246_v17 }
 0x14b   : > { %v4289_v21 = vpop.f32.mrf.mxu0 }
 0x14c   : > { %v4290_v28 = vadd.f32 %v4289_v21, %v4288_v2  ;;  %v6003_v6 = vadd.f32 %v4625_v29, %v1311_v33 }
 0x14d   : > { %v4319_v8 = vpop.f32.mrf.mxu0 }
 0x14e   : > { %v1314_v9 = vadd.f32 %v4290_v28, %v1249_v56  ;;  %v4359_v25 = vpop.f32.mrf.mxu1 }
 0x14f   : > { %v4320_v51 = vpop.f32.mrf.mxu0 }
 0x150   : > { %v4321_v61 = vadd.f32 %v4320_v51, %v4319_v8  ;;  %v4360_v10 = vpop.f32.mrf.mxu1  ;;  %v6005_v7 = vadd.f32 %v4626_v32, %v1314_v9 }
 0x151   : > { %v4361_v44 = vadd.f32 %v4360_v10, %v4359_v25  ;;  %v4322_v45 = vpop.f32.mrf.mxu0 }
 0x152   : > { %v4362_v11 = vpop.f32.mrf.mxu1 }
 0x153   : > { %v4323_v59 = vpop.f32.mrf.mxu0  ;;  %v1931_v55 = vadd.f32 %v4361_v44, %v4321_v61 }
 0x154   : > { %v4324_v15 = vadd.f32 %v4323_v59, %v4322_v45  ;;  %v4363_v3 = vpop.f32.mrf.mxu1 }
 0x155   : > { %v4364_v17 = vadd.f32 %v4363_v3, %v4362_v11  ;;  %v4325_v18 = vpop.f32.mrf.mxu0 }
 0x156   : > { %v4365_v5 = vpop.f32.mrf.mxu1 }
 0x157   : > { %v4326_v20 = vpop.f32.mrf.mxu0  ;;  %v1934_v4 = vadd.f32 %v4364_v17, %v4324_v15 }
 0x158   : > { %v4327_v47 = vadd.f32 %v4326_v20, %v4325_v18  ;;  %v4366_v56 = vpop.f32.mrf.mxu1 }
 0x159   : > { %v4367_v23 = vadd.f32 %v4366_v56, %v4365_v5  ;;  %v4328_v24 = vpop.f32.mrf.mxu0 }
 0x15a   : > { %v4368_v31 = vpop.f32.mrf.mxu1 }
 0x15b   : > { %v4329_v30 = vpop.f32.mrf.mxu0  ;;  %v1939_v46 = vadd.f32 %v4367_v23, %v4327_v47 }
 0x15c   : > { %v4330_v62 = vadd.f32 %v4329_v30, %v4328_v24  ;;  %v4369_v19 = vpop.f32.mrf.mxu1 }
 0x15d   : > { %v4370_v22 = vadd.f32 %v4369_v19, %v4368_v31  ;;  %v4331_v26 = vpop.f32.mrf.mxu0 }
 0x15e   : > { %v4371_v27 = vpop.f32.mrf.mxu1 }
 0x15f   : > { %v4332_v35 = vpop.f32.mrf.mxu0  ;;  %v1942_v34 = vadd.f32 %v4370_v22, %v4330_v62 }
 0x160   : > { %v4333_v16 = vadd.f32 %v4332_v35, %v4331_v26  ;;  %v4372_v29 = vpop.f32.mrf.mxu1 }
 0x161   : > { %v4373_v39 = vadd.f32 %v4372_v29, %v4371_v27  ;;  %v4334_v36 = vpop.f32.mrf.mxu0 }
 0x162   : > { %v4374_v49 = vpop.f32.mrf.mxu1 }
 0x163   : > { %v4335_v54 = vpop.f32.mrf.mxu0  ;;  %v1947_v38 = vadd.f32 %v4373_v39, %v4333_v16 }
 0x164   : > { %v4336_v40 = vadd.f32 %v4335_v54, %v4334_v36  ;;  %v4375_v42 = vpop.f32.mrf.mxu1 }
 0x165   : > { %v4376_v43 = vadd.f32 %v4375_v42, %v4374_v49  ;;  %v4337_v48 = vpop.f32.mrf.mxu0 }
 0x166   : > { %v4377_v32 = vpop.f32.mrf.mxu1 }
 0x167   : > { %v4338_v52 = vpop.f32.mrf.mxu0  ;;  %v1950_v53 = vadd.f32 %v4376_v43, %v4336_v40 }
 0x168   : > { %v4339_v0 = vadd.f32 %v4338_v52, %v4337_v48  ;;  %v4378_v14 = vpop.f32.mrf.mxu1 }
 0x169   : > { %v4379_v58 = vadd.f32 %v4378_v14, %v4377_v32  ;;  %v4340_v60 = vpop.f32.mrf.mxu0 }
 0x16a   : > { %v4380_v13 = vpop.f32.mrf.mxu1 }
 0x16b   : > { %v4341_v1 = vpop.f32.mrf.mxu0  ;;  %v1955_v2 = vadd.f32 %v4379_v58, %v4339_v0 }
 0x16c   : > { %v4342_v33 = vadd.f32 %v4341_v1, %v4340_v60  ;;  %v4381_v21 = vpop.f32.mrf.mxu1 }
 0x16d   : > { %v4382_v28 = vadd.f32 %v4381_v21, %v4380_v13  ;;  %v4645_v8 = vpop.f32.mrf.mxu0 }
 0x16e   : > { %v2004_v9 = vadd.f32 %v4645_v8, %v1939_v46  ;;  %v4411_v25 = vpop.f32.mrf.mxu1 }
 0x16f   : > { %v1995_v51 = vpop.f32.mrf.mxu0  ;;  %v1958_v61 = vadd.f32 %v4382_v28, %v4342_v33 }
 0x170   : > { %v6008_v10 = vadd.f32 %v2004_v9, %v5995_v41  ;;  %v1996_v44 = vadd.f32 %v1995_v51, %v1931_v55  ;;  %v4412_v45 = vpop.f32.mrf.mxu1 }
 0x171   : > { %v4413_v11 = vadd.f32 %v4412_v45, %v4411_v25  ;;  %v4646_v59 = vpop.f32.mrf.mxu0 }
 0x172   : > { %v2026_v15 = vadd.f32 %v1996_v44, %v5991_v12  ;;  %v2007_v3 = vadd.f32 %v4646_v59, %v1942_v34  ;;  %v4414_v17 = vpop.f32.mrf.mxu1 }
 0x173   : > { %v1998_v18 = vpop.f32.mrf.mxu0 }
 0x174   : > { %v6012_v5 = vadd.f32 %v2007_v3, %v5997_v50  ;;  %v1999_v20 = vadd.f32 %v1998_v18, %v1934_v4  ;;  %v4415_v47 = vpop.f32.mrf.mxu1 }
 0x175   : > { %v4416_v56 = vadd.f32 %v4415_v47, %v4414_v17  ;;  %v4649_v23 = vpop.f32.mrf.mxu0 }
 0x176   : > { %v2027_v24 = vadd.f32 %v1999_v20, %v5993_v37  ;;  %v2020_v41 = vadd.f32 %v4649_v23, %v1955_v2  ;;  %v4417_v31 = vpop.f32.mrf.mxu1 }
 0x177   : > { %v2011_v55 = vpop.f32.mrf.mxu0 }
 0x178   : > { %v6016_v30 = vadd.f32 %v2020_v41, %v6003_v6  ;;  %v2012_v46 = vadd.f32 %v2011_v55, %v1947_v38  ;;  %v4418_v12 = vpop.f32.mrf.mxu1 }
 0x179   : > { %v4419_v62 = vadd.f32 %v4418_v12, %v4417_v31  ;;  %v4650_v19 = vpop.f32.mrf.mxu0 }
 0x17a   : > { %v2030_v22 = vadd.f32 %v2012_v46, %v5999_v57  ;;  %v2023_v50 = vadd.f32 %v4650_v19, %v1958_v61  ;;  %v4420_v26 = vpop.f32.mrf.mxu1 }
 0x17b   : > { %v2014_v4 = vpop.f32.mrf.mxu0 }
 0x17c   : > { %v6020_v27 = vadd.f32 %v2023_v50, %v6005_v7  ;;  %v2015_v35 = vadd.f32 %v2014_v4, %v1950_v53  ;;  %v4421_v37 = vpop.f32.mrf.mxu1 }
 0x17d   : > { %v4422_v25 = vadd.f32 %v4421_v37, %v4420_v26 }
 0x17e   : > { %v6023_v34 = vadd.f32 %v2015_v35, %v6001_v63  ;;  %v4423_v16 = vpop.f32.mrf.mxu1 }
 0x180   : > { %v4424_v6 = vpop.f32.mrf.mxu1 }
 0x181   : > { %v4425_v3 = vadd.f32 %v4424_v6, %v4423_v16 }
 0x182   : > { %v6025_v29 = vpop.f32.mrf.mxu1 }
 0x184   : > { %v6027_v39 = vpop.f32.mrf.mxu1 }
 0x186   : > { %v6029_v36 = vpop.f32.mrf.mxu1 }
 0x188   : > { %v6031_v57 = vpop.f32.mrf.mxu1 }
 0x18a   : > { %v6033_v49 = vpop.f32.mrf.mxu1 }
 0x18c   : > { %v6035_v54 = vpop.f32.mrf.mxu1 }
 0x18d   : > { %v4451_v7 = vpop.f32.mrf.mxu0 }
 0x18e   : > { %v4669_v38 = vpop.f32.mrf.mxu1 }
 0x18f   : > { %v4452_v40 = vpop.f32.mrf.mxu0 }
 0x190   : > { %v4453_v42 = vadd.f32 %v4452_v40, %v4451_v7  ;;  %v2647_v63 = vpop.f32.mrf.mxu1 }
 0x191   : > { %v4454_v43 = vpop.f32.mrf.mxu0 }
 0x192   : > { %v2583_v48 = vadd.f32 %v4453_v42, %v4413_v11  ;;  %v4670_v32 = vpop.f32.mrf.mxu1 }
 0x193   : > { %v4455_v52 = vpop.f32.mrf.mxu0 }
 0x194   : > { %v2648_v53 = vadd.f32 %v2647_v63, %v2583_v48  ;;  %v4456_v0 = vadd.f32 %v4455_v52, %v4454_v43  ;;  %v2650_v13 = vpop.f32.mrf.mxu1 }
 0x195   : > { %v4457_v14 = vpop.f32.mrf.mxu0 }
 0x196   : > { %v6037_v58 = vadd.f32 %v2648_v53, %v2026_v15  ;;  %v2586_v60 = vadd.f32 %v4456_v0, %v4416_v56 }
 0x197   : > { %v4458_v1 = vpop.f32.mrf.mxu0 }
 0x198   : > { %v2651_v2 = vadd.f32 %v2650_v13, %v2586_v60  ;;  %v4459_v33 = vadd.f32 %v4458_v1, %v4457_v14  ;;  %v6044_v15 = vpop.f32.mrf.mxu1 }
 0x199   : > { %v4460_v21 = vpop.f32.mrf.mxu0 }
 0x19a   : > { %v6039_v28 = vadd.f32 %v2651_v2, %v2027_v24  ;;  %v2591_v8 = vadd.f32 %v4459_v33, %v4419_v62  ;;  %v2663_v23 = vpop.f32.mrf.mxu1 }
 0x19b   : > { %v4461_v9 = vpop.f32.mrf.mxu0 }
 0x19c   : > { %v2656_v51 = vadd.f32 %v4669_v38, %v2591_v8  ;;  %v4462_v61 = vadd.f32 %v4461_v9, %v4460_v21  ;;  %v4431_v8 = vadd.f32 %v6031_v57, %v6029_v36 }
 0x19d   : > { %v4463_v44 = vpop.f32.mrf.mxu0 }
 0x19e   : > { %v2594_v45 = vadd.f32 %v4462_v61, %v4422_v25  ;;  %v6042_v11 = vadd.f32 %v2656_v51, %v6008_v10  ;;  %v4674_v10 = vpop.f32.mrf.mxu1  ;;  %v4434_v25 = vadd.f32 %v6035_v54, %v6033_v49 }
 0x19f   : > { %v4464_v59 = vpop.f32.mrf.mxu0 }
 0x1a0   : > { %v2659_v17 = vadd.f32 %v4670_v32, %v2594_v45  ;;  %v4465_v18 = vadd.f32 %v4464_v59, %v4463_v44  ;;  %v6051_v19 = vpop.f32.mrf.mxu1 }
 0x1a1   : > { %v4466_v20 = vpop.f32.mrf.mxu0 }
 0x1a2   : > { %v2599_v47 = vadd.f32 %v4465_v18, %v4425_v3  ;;  %v6047_v56 = vadd.f32 %v2659_v17, %v6012_v5  ;;  %v4428_v17 = vadd.f32 %v6027_v39, %v6025_v29 }
 0x1a3   : > { %v4467_v24 = vpop.f32.mrf.mxu0 }
 0x1a4   : > { %v2664_v41 = vadd.f32 %v2663_v23, %v2599_v47  ;;  %v4468_v51 = vadd.f32 %v4467_v24, %v4466_v20 }
 0x1a5   : > { %v4469_v31 = vpop.f32.mrf.mxu0 }
 0x1a6   : > { %v6049_v55 = vadd.f32 %v2664_v41, %v2030_v22  ;;  %v2602_v57 = vadd.f32 %v4468_v51, %v4428_v17 }
 0x1a7   : > { %v4470_v46 = vpop.f32.mrf.mxu0 }
 0x1a8   : > { %v4471_v1 = vadd.f32 %v4470_v46, %v4469_v31 }
 0x1a9   : > { %v4472_v12 = vpop.f32.mrf.mxu0 }
 0x1aa   : > { %v2607_v44 = vadd.f32 %v4471_v1, %v4431_v8 }
 0x1ab   : > { %v4473_v62 = vpop.f32.mrf.mxu0 }
 0x1ac   : > { %v4474_v33 = vadd.f32 %v4473_v62, %v4472_v12  ;;  %v2672_v54 = vadd.f32 %v6044_v15, %v2607_v44 }
 0x1ad   : > { %v4503_v50 = vpop.f32.mrf.mxu0 }
 0x1ae   : > { %v4543_v26 = vpop.f32.mrf.mxu1  ;;  %v2610_v18 = vadd.f32 %v4474_v33, %v4434_v25 }
 0x1af   : > { %v4504_v4 = vpop.f32.mrf.mxu0 }
 0x1b0   : > { %v4544_v35 = vpop.f32.mrf.mxu1  ;;  %v4505_v31 = vadd.f32 %v4504_v4, %v4503_v50 }
 0x1b1   : > { %v4506_v37 = vpop.f32.mrf.mxu0  ;;  %v4545_v46 = vadd.f32 %v4544_v35, %v4543_v26 }
 0x1b2   : > { %v4546_v16 = vpop.f32.mrf.mxu1 }
 0x1b3   : > { %v4507_v5 = vpop.f32.mrf.mxu0  ;;  %v3235_v4 = vadd.f32 %v4545_v46, %v4505_v31 }
 0x1b4   : > { %v4547_v6 = vpop.f32.mrf.mxu1  ;;  %v4508_v33 = vadd.f32 %v4507_v5, %v4506_v37 }
 0x1b5   : > { %v4509_v7 = vpop.f32.mrf.mxu0 }
 0x1b6   : > { %v4549_v38 = vpop.f32.mrf.mxu1 }
 0x1b7   : > { %v4510_v40 = vpop.f32.mrf.mxu0 }
 0x1b8   : > { %v4550_v42 = vpop.f32.mrf.mxu1  ;;  %v4511_v45 = vadd.f32 %v4510_v40, %v4509_v7  ;;  %v2675_v40 = vadd.f32 %v4674_v10, %v2610_v18  ;;  %v2684_v10 = vadd.f32 %v2672_v54, %v6016_v30 }
 0x1b9   : > { %v4512_v22 = vpop.f32.mrf.mxu0  ;;  %v4551_v59 = vadd.f32 %v4550_v42, %v4549_v38 }
 0x1ba   : > { %v4552_v63 = vpop.f32.mrf.mxu1 }
 0x1bb   : > { %v4513_v43 = vpop.f32.mrf.mxu0  ;;  %v3243_v38 = vadd.f32 %v4551_v59, %v4511_v45 }
 0x1bc   : > { %v4553_v48 = vpop.f32.mrf.mxu1  ;;  %v4514_v20 = vadd.f32 %v4513_v43, %v4512_v22  ;;  %v2667_v43 = vadd.f32 %v6051_v19, %v2602_v57 }
 0x1bd   : > { %v4515_v32 = vpop.f32.mrf.mxu0  ;;  %v4554_v24 = vadd.f32 %v4553_v48, %v4552_v63 }
 0x1be   : > { %v4555_v52 = vpop.f32.mrf.mxu1  ;;  %v2683_v44 = vadd.f32 %v2667_v43, %v6023_v34 }
 0x1bf   : > { %v4516_v53 = vpop.f32.mrf.mxu0  ;;  %v3246_v63 = vadd.f32 %v4554_v24, %v4514_v20 }
 0x1c0   : > { %v4556_v0 = vpop.f32.mrf.mxu1  ;;  %v4517_v12 = vadd.f32 %v4516_v53, %v4515_v32 }
 0x1c1   : > { %v4518_v14 = vpop.f32.mrf.mxu0  ;;  %v4557_v62 = vadd.f32 %v4556_v0, %v4555_v52 }
 0x1c2   : > { %v4558_v60 = vpop.f32.mrf.mxu1 }
 0x1c3   : > { %v4519_v13 = vpop.f32.mrf.mxu0  ;;  %v3251_v0 = vadd.f32 %v4557_v62, %v4517_v12 }
 0x1c4   : > { %v4559_v2 = vpop.f32.mrf.mxu1  ;;  %v4520_v35 = vadd.f32 %v4519_v13, %v4518_v14 }
 0x1c5   : > { %v4521_v21 = vpop.f32.mrf.mxu0  ;;  %v4560_v32 = vadd.f32 %v4559_v2, %v4558_v60  ;;  %v4076_v60 = vld [vmem:[%s6081_s2] ss:$0 sm:$0xff]  ;;  %v2685_v2 = vadd.f32 %v2675_v40, %v6020_v27 }
 0x1c6   : > { %v4561_v9 = vpop.f32.mrf.mxu1 }
 0x1c7   : > { %v4522_v61 = vpop.f32.mrf.mxu0  ;;  %v3254_v25 = vadd.f32 %v4560_v32, %v4520_v35 }
 0x1c8   : > { %v4562_v3 = vpop.f32.mrf.mxu1  ;;  %v4523_v47 = vadd.f32 %v4522_v61, %v4521_v21  ;;  %v4548_v21 = vadd.f32 %v4547_v6, %v4546_v16 }
 0x1c9   : > { %v4563_v23 = vadd.f32 %v4562_v3, %v4561_v9  ;;  %v4524_v41 = vpop.f32.mrf.mxu0 }
 0x1ca   : > { %v4564_v36 = vpop.f32.mrf.mxu1  ;;  %v3238_v14 = vadd.f32 %v4548_v21, %v4508_v33 }
 0x1cb   : > { %v4525_v49 = vpop.f32.mrf.mxu0  ;;  %v3259_v1 = vadd.f32 %v4563_v23, %v4523_v47 }
 0x1cc   : > { %v4565_v7 = vpop.f32.mrf.mxu1  ;;  %v4526_v42 = vadd.f32 %v4525_v49, %v4524_v41 }
 0x1cd   : > { %v4566_v29 = vadd.f32 %v4565_v7, %v4564_v36  ;;  %v4693_v39 = vpop.f32.mrf.mxu0 }
 0x1ce   : > { %v3308_v50 = vadd.f32 %v4693_v39, %v3243_v38  ;;  %v4697_v26 = vpop.f32.mrf.mxu1 }
 0x1cf   : > { %v3324_v52 = vadd.f32 %v4697_v26, %v3259_v1  ;;  %v3299_v53 = vpop.f32.mrf.mxu0  ;;  %v3262_v37 = vadd.f32 %v4566_v29, %v4526_v42 }
 0x1d0   : > { %v3300_v15 = vadd.f32 %v3299_v53, %v3235_v4  ;;  %v3315_v22 = vpop.f32.mrf.mxu1  ;;  %v3332_v16 = vadd.f32 %v3308_v50, %v6042_v11 }
 0x1d1   : > { %v3316_v48 = vadd.f32 %v3315_v22, %v3251_v0  ;;  %v4694_v8 = vpop.f32.mrf.mxu0  ;;  %v3336_v13 = vadd.f32 %v3324_v52, %v2684_v10 }
 0x1d2   : > { %v3311_v5 = vadd.f32 %v4694_v8, %v3246_v63  ;;  %v4698_v6 = vpop.f32.mrf.mxu1  ;;  %v3330_v30 = vadd.f32 %v3300_v15, %v6037_v58  ;;  %v3347_v17 = vadd.f32 %v4076_v60, %v3332_v16 }
 0x1d3   : > { %v3327_v9 = vadd.f32 %v4698_v6, %v3262_v37  ;;  %v3302_v19 = vpop.f32.mrf.mxu0  ;;  %v3334_v45 = vadd.f32 %v3316_v48, %v6049_v55  ;;  %v3351_v47 = vadd.f32 %v4076_v60, %v3336_v13 }
 0x1d4   : > { %v3333_v51 = vadd.f32 %v3311_v5, %v6047_v56  ;;  %v3303_v61 = vadd.f32 %v3302_v19, %v3238_v14  ;;  %v3318_v11 = vpop.f32.mrf.mxu1  ;;  %v3345_v56 = vadd.f32 %v4076_v60, %v3330_v30 }
 0x1d5   : > { %v3337_v59 = vadd.f32 %v3327_v9, %v2685_v2  ;;  %v3319_v3 = vadd.f32 %v3318_v11, %v3254_v25  ;;  %v3349_v46 = vadd.f32 %v4076_v60, %v3334_v45 }
 0x1d6   : > { %v3348_v18 = vadd.f32 %v4076_v60, %v3333_v51  ;;  %v3331_v27 = vadd.f32 %v3303_v61, %v6039_v28 }
 0x1d7   : > { %v3352_v58 = vadd.f32 %v4076_v60, %v3337_v59  ;;  %v3335_v23 = vadd.f32 %v3319_v3, %v2683_v44 }
 0x1d8   : > { %v4104_v41 = vpack.c.bf16 %v3348_v18, %v3347_v17  ;;  %v3346_v31 = vadd.f32 %v4076_v60, %v3331_v27 }
 0x1d9   : > { %v4114_v34 = vpack.c.bf16 %v3352_v58, %v3351_v47  ;;  %v3350_v36 = vadd.f32 %v4076_v60, %v3335_v23 }
 0x1da   : > { %4116 = vst [vmem:[%s170_s9 + $0x8] sm:$0xff] %v4104_v41   ;;  %v4099_v55 = vpack.c.bf16 %v3346_v31, %v3345_v56 }
 0x1db   : > { %4118 = vst [vmem:[%s170_s9 + $0x18] sm:$0xff] %v4114_v34   ;;  %v4109_v57 = vpack.c.bf16 %v3350_v36, %v3349_v46 }
 0x1dc   : > { %4100 = vst [vmem:[%s170_s9] sm:$0xff] %v4099_v55  }
 0x1dd   : > { %4117 = vst [vmem:[%s170_s9 + $0x10] sm:$0xff] %v4109_v57  }
 0x1de PF: > { %s13_s12 = sadd.s32 1, %s5018_s12  }
 0x1df   : > { %p10_p4 = scmp.ge.s32.totalorder %s13_s12, 4  }
 0x1e1   :  { %12 = sbr.rel (!%p10_p4) target bundleno = 1 (0x1), region = 66 }

// kernel: forward.9
= control target key start
LH: loop header
LB: loop body
LE: loop exit
PB: predicated region body
PF: predicated region fallthrough
CT: control target
= control target key end

     0   :  { %vm3172_vm0 = vmmov 0   ;;  %s4178_s1 = inlined_call_operand.vmem [shape: bf16[2048,256], index: 1, kind: input, shape index: {}]   ;;  %s4179_s0 = inlined_call_operand.vmem [shape: bf16[8,2048], index: 0, kind: input, shape index: {}]   ;;  %s4180_s2 = inlined_call_operand.vmem [shape: f32[1,256], index: 2, kind: input, shape index: {}]   ;;  %s4181_s3 = inlined_call_operand.vmem [shape: bf16[128,128], index: 3, kind: input, shape index: {}]   ;;  %s4182_s7 = inlined_call_operand.vmem [shape: bf16[128,128], index: 7, kind: input, shape index: {}]   ;;  %s4183_s5 = inlined_call_operand.vmem [shape: bf16[128,128], index: 5, kind: input, shape index: {}]   ;;  %s4184_s4 = inlined_call_operand.vmem [shape: f32[1,128], index: 4, kind: input, shape index: {}]   ;;  %s4185_s6 = inlined_call_operand.vmem [shape: f32[1,128], index: 6, kind: input, shape index: {}]   ;;  %s4186_s8 = inlined_call_operand.vmem [shape: f32[1,128], index: 8, kind: input, shape index: {}]   ;;  %s4187_s9 = inlined_call_operand.vmem [shape: f32[8,128], index: 9, kind: output, shape index: {0}]   ;;  %s4188_s10 = inlined_call_operand.vmem [shape: f32[8,128], index: 10, kind: output, shape index: {1}]  }
   0x1   :  { %v2739_v0 = vld [vmem:[%s4178_s1 + $0x74] ss:$8 sps:$4 sm:$0xff]   ;;  %v2743_v2 = vld [vmem:[%s4178_s1 + $0x70] ss:$8 sps:$4 sm:$0xff]   ;;  %v2745_v4 = vld [vmem:[%s4178_s1 + $0x64] ss:$8 sps:$4 sm:$0xff]  }
   0x2   :  { %v2741_v1 = vld [vmem:[%s4178_s1 + $0x174] ss:$8 sps:$4 sm:$0xff]   ;;  %1647 = vmatprep.subr.bf16.mxu0 %v2739_v0  ;;  %v2744_v3 = vld [vmem:[%s4178_s1 + $0x170] ss:$8 sps:$4 sm:$0xff]   ;;  %v2747_v5 = vld [vmem:[%s4178_s1 + $0x164] ss:$8 sps:$4 sm:$0xff]  }
   0x3   :  { %1688 = vmatprep.subr.bf16.mxu1 %v2741_v1  ;;  %1648 = vmatpush1.bf16.msra.mxu0 %v2743_v2  ;;  %v2749_v6 = vld [vmem:[%s4178_s1 + $0x60] ss:$8 sps:$4 sm:$0xff]   ;;  %v2751_v8 = vld [vmem:[%s4178_s1 + $0x54] ss:$8 sps:$4 sm:$0xff]   ;;  %v2755_v10 = vld [vmem:[%s4178_s1 + $0x50] ss:$8 sps:$4 sm:$0xff]  }
   0x4   :  { %1689 = vmatpush1.bf16.msra.mxu1 %v2744_v3  ;;  %1649 = vmatprep.subr.bf16.mxu0 %v2745_v4  ;;  %v2750_v7 = vld [vmem:[%s4178_s1 + $0x160] ss:$8 sps:$4 sm:$0xff]   ;;  %v2753_v9 = vld [vmem:[%s4178_s1 + $0x154] ss:$8 sps:$4 sm:$0xff]   ;;  %v2756_v11 = vld [vmem:[%s4178_s1 + $0x150] ss:$8 sps:$4 sm:$0xff]  }
   0x5   :  { %1690 = vmatprep.subr.bf16.mxu1 %v2747_v5  ;;  %v2757_v12 = vld [vmem:[%s4178_s1 + $0x44] ss:$8 sps:$4 sm:$0xff]   ;;  %v2761_v14 = vld [vmem:[%s4178_s1 + $0x40] ss:$8 sps:$4 sm:$0xff]   ;;  %v2763_v16 = vld [vmem:[%s4178_s1 + $0x34] ss:$8 sps:$4 sm:$0xff]  }
   0x6   :  { %v2759_v13 = vld [vmem:[%s4178_s1 + $0x144] ss:$8 sps:$4 sm:$0xff]   ;;  %v2762_v15 = vld [vmem:[%s4178_s1 + $0x140] ss:$8 sps:$4 sm:$0xff]   ;;  %v2765_v17 = vld [vmem:[%s4178_s1 + $0x134] ss:$8 sps:$4 sm:$0xff]  }
   0x7   :  { %1650 = vmatpush1.bf16.msra.mxu0 %v2749_v6  ;;  %v2767_v18 = vld [vmem:[%s4178_s1 + $0x30] ss:$8 sps:$4 sm:$0xff]   ;;  %v2769_v20 = vld [vmem:[%s4178_s1 + $0x24] ss:$8 sps:$4 sm:$0xff]   ;;  %v2773_v22 = vld [vmem:[%s4178_s1 + $0x20] ss:$8 sps:$4 sm:$0xff]  }
   0x8   :  { %1691 = vmatpush1.bf16.msra.mxu1 %v2750_v7  ;;  %1651 = vmatprep.subr.bf16.mxu0 %v2751_v8  ;;  %v2768_v19 = vld [vmem:[%s4178_s1 + $0x130] ss:$8 sps:$4 sm:$0xff]   ;;  %v2771_v21 = vld [vmem:[%s4178_s1 + $0x124] ss:$8 sps:$4 sm:$0xff]   ;;  %v2774_v23 = vld [vmem:[%s4178_s1 + $0x120] ss:$8 sps:$4 sm:$0xff]  }
   0x9   :  { %1692 = vmatprep.subr.bf16.mxu1 %v2753_v9  ;;  %v2775_v24 = vld [vmem:[%s4178_s1 + $0x14] ss:$8 sps:$4 sm:$0xff]   ;;  %v2779_v26 = vld [vmem:[%s4178_s1 + $0x10] ss:$8 sps:$4 sm:$0xff]   ;;  %v2781_v28 = vld [vmem:[%s4178_s1 + $0x4] ss:$8 sps:$4 sm:$0xff]  }
   0xa   :  { %v2777_v25 = vld [vmem:[%s4178_s1 + $0x114] ss:$8 sps:$4 sm:$0xff]   ;;  %v2780_v27 = vld [vmem:[%s4178_s1 + $0x110] ss:$8 sps:$4 sm:$0xff]   ;;  %v2783_v29 = vld [vmem:[%s4178_s1 + $0x104] ss:$8 sps:$4 sm:$0xff]  }
   0xb   :  { %1652 = vmatpush1.bf16.msra.mxu0 %v2755_v10  ;;  %v2785_v30 = vld [vmem:[%s4178_s1] ss:$8 sps:$4 sm:$0xff]   ;;  %v2787_v32 = vld [vmem:[%s4178_s1 + $0xf4] ss:$8 sps:$4 sm:$0xff]   ;;  %v2791_v34 = vld [vmem:[%s4178_s1 + $0xf0] ss:$8 sps:$4 sm:$0xff]  }
   0xc   :  { %1693 = vmatpush1.bf16.msra.mxu1 %v2756_v11  ;;  %1653 = vmatprep.subr.bf16.mxu0 %v2757_v12  ;;  %v2786_v31 = vld [vmem:[%s4178_s1 + $0x100] ss:$8 sps:$4 sm:$0xff]   ;;  %v2789_v33 = vld [vmem:[%s4178_s1 + $0x1f4] ss:$8 sps:$4 sm:$0xff]   ;;  %v2792_v35 = vld [vmem:[%s4178_s1 + $0x1f0] ss:$8 sps:$4 sm:$0xff]  }
   0xd   :  { %1694 = vmatprep.subr.bf16.mxu1 %v2759_v13  ;;  %v2793_v36 = vld [vmem:[%s4178_s1 + $0xe4] ss:$8 sps:$4 sm:$0xff]   ;;  %v2797_v38 = vld [vmem:[%s4178_s1 + $0xe0] ss:$8 sps:$4 sm:$0xff]   ;;  %v2799_v40 = vld [vmem:[%s4178_s1 + $0xd4] ss:$8 sps:$4 sm:$0xff]  }
   0xe   :  { %v2795_v37 = vld [vmem:[%s4178_s1 + $0x1e4] ss:$8 sps:$4 sm:$0xff]   ;;  %v2798_v39 = vld [vmem:[%s4178_s1 + $0x1e0] ss:$8 sps:$4 sm:$0xff]   ;;  %v2801_v41 = vld [vmem:[%s4178_s1 + $0x1d4] ss:$8 sps:$4 sm:$0xff]  }
   0xf   :  { %1654 = vmatpush1.bf16.msra.mxu0 %v2761_v14  ;;  %v2803_v42 = vld [vmem:[%s4178_s1 + $0xd0] ss:$8 sps:$4 sm:$0xff]   ;;  %v2805_v44 = vld [vmem:[%s4178_s1 + $0xc4] ss:$8 sps:$4 sm:$0xff]   ;;  %v2809_v49 = vld [vmem:[%s4178_s1 + $0xc0] ss:$8 sps:$4 sm:$0xff]  }
  0x10   :  { %1695 = vmatpush1.bf16.msra.mxu1 %v2762_v15  ;;  %1655 = vmatprep.subr.bf16.mxu0 %v2763_v16  ;;  %v2804_v43 = vld [vmem:[%s4178_s1 + $0x1d0] ss:$8 sps:$4 sm:$0xff]   ;;  %v2807_v45 = vld [vmem:[%s4178_s1 + $0x1c4] ss:$8 sps:$4 sm:$0xff]   ;;  %v2810_v50 = vld [vmem:[%s4178_s1 + $0x1c0] ss:$8 sps:$4 sm:$0xff]  }
  0x11   :  { %1696 = vmatprep.subr.bf16.mxu1 %v2765_v17  ;;  %v35_v46 = vld [vmem:[%s4179_s0] sm:$0xff]  ;;  %v36_v48 = vld [vmem:[%s4179_s0 + $0x8] sm:$0xff]  ;;  %v2811_v52 = vld [vmem:[%s4178_s1 + $0xb4] ss:$8 sps:$4 sm:$0xff]  }
  0x12   :  { %v2352_v47 = vcombine.high %v35_v46, %v35_v46  ;;  %v2354_v51 = vcombine.high %v36_v48, %v36_v48  ;;  %v2813_v53 = vld [vmem:[%s4178_s1 + $0x1b4] ss:$8 sps:$4 sm:$0xff]   ;;  %v2815_v54 = vld [vmem:[%s4178_s1 + $0xb0] ss:$8 sps:$4 sm:$0xff]   ;;  %v2817_v56 = vld [vmem:[%s4178_s1 + $0xa4] ss:$8 sps:$4 sm:$0xff]   ;;  %v2351_v6 = vcombine.low %v35_v46, %v35_v46  ;;  %v2353_v7 = vcombine.low %v36_v48, %v36_v48 }
  0x13   :  { %1656 = vmatpush1.bf16.msra.mxu0 %v2767_v18  ;;  %v2816_v55 = vld [vmem:[%s4178_s1 + $0x1b0] ss:$8 sps:$4 sm:$0xff]   ;;  %v2819_v57 = vld [vmem:[%s4178_s1 + $0x1a4] ss:$8 sps:$4 sm:$0xff]   ;;  %v2821_v58 = vld [vmem:[%s4178_s1 + $0xa0] ss:$8 sps:$4 sm:$0xff]  }
  0x14   :  { %1697 = vmatpush1.bf16.msra.mxu1 %v2768_v19  ;;  %1657 = vmatprep.subr.bf16.mxu0 %v2769_v20  ;;  %v2822_v59 = vld [vmem:[%s4178_s1 + $0x1a0] ss:$8 sps:$4 sm:$0xff]   ;;  %v2823_v60 = vld [vmem:[%s4178_s1 + $0x94] ss:$8 sps:$4 sm:$0xff]   ;;  %v2827_v62 = vld [vmem:[%s4178_s1 + $0x90] ss:$8 sps:$4 sm:$0xff]  }
  0x15   :  { %1698 = vmatprep.subr.bf16.mxu1 %v2771_v21  ;;  %1679 = vmatprep.mubr.bf16.mxu0 %v2352_v47  ;;  %v2825_v61 = vld [vmem:[%s4178_s1 + $0x194] ss:$8 sps:$4 sm:$0xff]   ;;  %v2828_v63 = vld [vmem:[%s4178_s1 + $0x190] ss:$8 sps:$4 sm:$0xff]   ;;  %v2829_v0 = vld [vmem:[%s4178_s1 + $0x84] ss:$8 sps:$4 sm:$0xff]  }
  0x16   :  { %1720 = vmatprep.mubr.bf16.mxu1 %v2354_v51  ;;  %v2831_v1 = vld [vmem:[%s4178_s1 + $0x184] ss:$8 sps:$4 sm:$0xff]   ;;  %v2833_v2 = vld [vmem:[%s4178_s1 + $0x80] ss:$8 sps:$4 sm:$0xff]   ;;  %v2841_v4 = vld [vmem:[%s4178_s1 + $0x274] ss:$8 sps:$4 sm:$0xff]  }
  0x17   :  { %1658 = vmatpush1.bf16.msra.mxu0 %v2773_v22  ;;  %v2834_v3 = vld [vmem:[%s4178_s1 + $0x180] ss:$8 sps:$4 sm:$0xff]   ;;  %v2844_v5 = vld [vmem:[%s4178_s1 + $0x374] ss:$8 sps:$4 sm:$0xff]   ;;  %v2839_v8 = vld [vmem:[%s4178_s1 + $0x270] ss:$8 sps:$4 sm:$0xff]  }
  0x18   :  { %1699 = vmatpush1.bf16.msra.mxu1 %v2774_v23  ;;  %1659 = vmatprep.subr.bf16.mxu0 %v2775_v24  ;;  %v2842_v9 = vld [vmem:[%s4178_s1 + $0x370] ss:$8 sps:$4 sm:$0xff]   ;;  %v2847_v10 = vld [vmem:[%s4178_s1 + $0x264] ss:$8 sps:$4 sm:$0xff]   ;;  %v2845_v12 = vld [vmem:[%s4178_s1 + $0x260] ss:$8 sps:$4 sm:$0xff]  }
  0x19   :  { %1700 = vmatprep.subr.bf16.mxu1 %v2777_v25  ;;  %v2850_v11 = vld [vmem:[%s4178_s1 + $0x364] ss:$8 sps:$4 sm:$0xff]   ;;  %v2848_v13 = vld [vmem:[%s4178_s1 + $0x360] ss:$8 sps:$4 sm:$0xff]   ;;  %v2853_v14 = vld [vmem:[%s4178_s1 + $0x254] ss:$8 sps:$4 sm:$0xff]  }
  0x1a   :  { %v2856_v15 = vld [vmem:[%s4178_s1 + $0x354] ss:$8 sps:$4 sm:$0xff]   ;;  %v2851_v16 = vld [vmem:[%s4178_s1 + $0x250] ss:$8 sps:$4 sm:$0xff]   ;;  %v2859_v18 = vld [vmem:[%s4178_s1 + $0x244] ss:$8 sps:$4 sm:$0xff]  }
  0x1b   :  { %1660 = vmatpush1.bf16.msra.mxu0 %v2779_v26  ;;  %v2854_v17 = vld [vmem:[%s4178_s1 + $0x350] ss:$8 sps:$4 sm:$0xff]   ;;  %v2862_v19 = vld [vmem:[%s4178_s1 + $0x344] ss:$8 sps:$4 sm:$0xff]   ;;  %v2857_v20 = vld [vmem:[%s4178_s1 + $0x240] ss:$8 sps:$4 sm:$0xff]  }
  0x1c   :  { %1701 = vmatpush1.bf16.msra.mxu1 %v2780_v27  ;;  %1661 = vmatprep.subr.bf16.mxu0 %v2781_v28  ;;  %v2860_v21 = vld [vmem:[%s4178_s1 + $0x340] ss:$8 sps:$4 sm:$0xff]   ;;  %v2865_v22 = vld [vmem:[%s4178_s1 + $0x234] ss:$8 sps:$4 sm:$0xff]   ;;  %v2863_v24 = vld [vmem:[%s4178_s1 + $0x230] ss:$8 sps:$4 sm:$0xff]  }
  0x1d   :  { %1702 = vmatprep.subr.bf16.mxu1 %v2783_v29  ;;  %v2868_v23 = vld [vmem:[%s4178_s1 + $0x334] ss:$8 sps:$4 sm:$0xff]   ;;  %v2866_v25 = vld [vmem:[%s4178_s1 + $0x330] ss:$8 sps:$4 sm:$0xff]   ;;  %v2871_v26 = vld [vmem:[%s4178_s1 + $0x224] ss:$8 sps:$4 sm:$0xff]  }
  0x1e   :  { %v2874_v27 = vld [vmem:[%s4178_s1 + $0x324] ss:$8 sps:$4 sm:$0xff]   ;;  %v2869_v28 = vld [vmem:[%s4178_s1 + $0x220] ss:$8 sps:$4 sm:$0xff]   ;;  %v2904_v51 = vld [vmem:[%s4178_s1 + $0x3d4] ss:$8 sps:$4 sm:$0xff]  }
  0x1f   :  { %1662 = vmatpush1.bf16.msra.mxu0 %v2785_v30  ;;  %v2872_v29 = vld [vmem:[%s4178_s1 + $0x320] ss:$8 sps:$4 sm:$0xff]   ;;  %v2877_v30 = vld [vmem:[%s4178_s1 + $0x214] ss:$8 sps:$4 sm:$0xff]   ;;  %v2895_v46 = vld [vmem:[%s4178_s1 + $0x2e4] ss:$8 sps:$4 sm:$0xff]  }
  0x20   :  { %1703 = vmatpush1.bf16.msra.mxu1 %v2786_v31  ;;  %1663 = vmatprep.subr.bf16.mxu0 %v2787_v32  ;;  %v2880_v31 = vld [vmem:[%s4178_s1 + $0x314] ss:$8 sps:$4 sm:$0xff]   ;;  %v2898_v47 = vld [vmem:[%s4178_s1 + $0x3e4] ss:$8 sps:$4 sm:$0xff]   ;;  %v2893_v48 = vld [vmem:[%s4178_s1 + $0x2e0] ss:$8 sps:$4 sm:$0xff]  }
  0x21   :  { %1704 = vmatprep.subr.bf16.mxu1 %v2789_v33  ;;  %v3507_v32 = vld [vmem:[%s4179_s0 + $0x10] sm:$0xff]  ;;  %v3512_v33 = vld [vmem:[%s4179_s0 + $0x18] sm:$0xff] }
  0x23   :  { %1664 = vmatpush2.bf16.msra.mxu0 %v2791_v34  ;;  %v2875_v34 = vld [vmem:[%s4178_s1 + $0x210] ss:$8 sps:$4 sm:$0xff]  }
  0x24   :  { %1705 = vmatpush2.bf16.msra.mxu1 %v2792_v35  ;;  %1665 = vmatprep.subr.bf16.mxu0 %v2793_v36  ;;  %v2878_v35 = vld [vmem:[%s4178_s1 + $0x310] ss:$8 sps:$4 sm:$0xff]   ;;  %v2356_v36 = vcombine.high %v3507_v32, %v3507_v32 }
  0x25   :  { %1706 = vmatprep.subr.bf16.mxu1 %v2795_v37  ;;  %v2358_v37 = vcombine.high %v3512_v33, %v3512_v33 }
  0x27   :  { %1666 = vmatpush2.bf16.msra.mxu0 %v2797_v38  ;;  %v2883_v38 = vld [vmem:[%s4178_s1 + $0x204] ss:$8 sps:$4 sm:$0xff]  }
  0x28   :  { %1707 = vmatpush2.bf16.msra.mxu1 %v2798_v39  ;;  %1667 = vmatprep.subr.bf16.mxu0 %v2799_v40  ;;  %v2886_v39 = vld [vmem:[%s4178_s1 + $0x304] ss:$8 sps:$4 sm:$0xff]   ;;  %v2881_v40 = vld [vmem:[%s4178_s1 + $0x200] ss:$8 sps:$4 sm:$0xff]  }
  0x29   :  { %1708 = vmatprep.subr.bf16.mxu1 %v2801_v41  ;;  %v2884_v41 = vld [vmem:[%s4178_s1 + $0x300] ss:$8 sps:$4 sm:$0xff]  }
  0x2b   :  { %1668 = vmatpush2.bf16.msra.mxu0 %v2803_v42  ;;  %v2889_v42 = vld [vmem:[%s4178_s1 + $0x2f4] ss:$8 sps:$4 sm:$0xff]  }
  0x2c   :  { %1709 = vmatpush2.bf16.msra.mxu1 %v2804_v43  ;;  %1669 = vmatprep.subr.bf16.mxu0 %v2805_v44  ;;  %v2892_v43 = vld [vmem:[%s4178_s1 + $0x3f4] ss:$8 sps:$4 sm:$0xff]   ;;  %v2887_v44 = vld [vmem:[%s4178_s1 + $0x2f0] ss:$8 sps:$4 sm:$0xff]  }
  0x2d   :  { %1710 = vmatprep.subr.bf16.mxu1 %v2807_v45  ;;  %v2890_v45 = vld [vmem:[%s4178_s1 + $0x3f0] ss:$8 sps:$4 sm:$0xff]  }
  0x2f   :  { %1670 = vmatpush2.bf16.msra.mxu0 %v2809_v49  ;;  %v2896_v49 = vld [vmem:[%s4178_s1 + $0x3e0] ss:$8 sps:$4 sm:$0xff]  }
  0x30   :  { %1711 = vmatpush2.bf16.msra.mxu1 %v2810_v50  ;;  %1671 = vmatprep.subr.bf16.mxu0 %v2811_v52  ;;  %v2901_v50 = vld [vmem:[%s4178_s1 + $0x2d4] ss:$8 sps:$4 sm:$0xff]   ;;  %v2899_v52 = vld [vmem:[%s4178_s1 + $0x2d0] ss:$8 sps:$4 sm:$0xff]  }
  0x31   :  { %1712 = vmatprep.subr.bf16.mxu1 %v2813_v53  ;;  %v2902_v53 = vld [vmem:[%s4178_s1 + $0x3d0] ss:$8 sps:$4 sm:$0xff]  }
  0x33   :  { %1672 = vmatpush2.bf16.msra.mxu0 %v2815_v54  ;;  %v2907_v54 = vld [vmem:[%s4178_s1 + $0x2c4] ss:$8 sps:$4 sm:$0xff]  }
  0x34   :  { %1713 = vmatpush2.bf16.msra.mxu1 %v2816_v55  ;;  %1673 = vmatprep.subr.bf16.mxu0 %v2817_v56  ;;  %v2910_v55 = vld [vmem:[%s4178_s1 + $0x3c4] ss:$8 sps:$4 sm:$0xff]   ;;  %v2905_v56 = vld [vmem:[%s4178_s1 + $0x2c0] ss:$8 sps:$4 sm:$0xff]  }
  0x35   :  { %1714 = vmatprep.subr.bf16.mxu1 %v2819_v57  ;;  %v2908_v57 = vld [vmem:[%s4178_s1 + $0x3c0] ss:$8 sps:$4 sm:$0xff]  }
  0x37   :  { %1674 = vmatpush2.bf16.msra.mxu0 %v2821_v58  ;;  %v2913_v58 = vld [vmem:[%s4178_s1 + $0x2b4] ss:$8 sps:$4 sm:$0xff]  }
  0x38   :  { %1715 = vmatpush2.bf16.msra.mxu1 %v2822_v59  ;;  %1675 = vmatprep.subr.bf16.mxu0 %v2823_v60  ;;  %v2916_v59 = vld [vmem:[%s4178_s1 + $0x3b4] ss:$8 sps:$4 sm:$0xff]   ;;  %v2911_v60 = vld [vmem:[%s4178_s1 + $0x2b0] ss:$8 sps:$4 sm:$0xff]  }
  0x39   :  { %1716 = vmatprep.subr.bf16.mxu1 %v2825_v61  ;;  %v2914_v61 = vld [vmem:[%s4178_s1 + $0x3b0] ss:$8 sps:$4 sm:$0xff]  }
  0x3b   :  { %1676 = vmatpush2.bf16.msra.mxu0 %v2827_v62  ;;  %v2919_v62 = vld [vmem:[%s4178_s1 + $0x2a4] ss:$8 sps:$4 sm:$0xff]  }
  0x3c   :  { %1717 = vmatpush2.bf16.msra.mxu1 %v2828_v63  ;;  %1677 = vmatprep.subr.bf16.mxu0 %v2829_v0  ;;  %v2922_v63 = vld [vmem:[%s4178_s1 + $0x3a4] ss:$8 sps:$4 sm:$0xff]   ;;  %v2917_v0 = vld [vmem:[%s4178_s1 + $0x2a0] ss:$8 sps:$4 sm:$0xff]  }
  0x3d   :  { %1718 = vmatprep.subr.bf16.mxu1 %v2831_v1  ;;  %v2920_v1 = vld [vmem:[%s4178_s1 + $0x3a0] ss:$8 sps:$4 sm:$0xff]  }
  0x3f   :  { %1678 = vmatpush2.bf16.msra.mxu0 %v2833_v2  ;;  %v2925_v2 = vld [vmem:[%s4178_s1 + $0x294] ss:$8 sps:$4 sm:$0xff]  }
  0x40   :  { %1719 = vmatpush2.bf16.msra.mxu1 %v2834_v3  ;;  %1729 = vmatprep.subr.bf16.mxu0 %v2841_v4  ;;  %v2928_v3 = vld [vmem:[%s4178_s1 + $0x394] ss:$8 sps:$4 sm:$0xff]   ;;  %v2923_v4 = vld [vmem:[%s4178_s1 + $0x290] ss:$8 sps:$4 sm:$0xff]  }
  0x41   :  { %1770 = vmatprep.subr.bf16.mxu1 %v2844_v5  ;;  %v2926_v5 = vld [vmem:[%s4178_s1 + $0x390] ss:$8 sps:$4 sm:$0xff]  }
  0x42   :  { %1680 = vmatmul.mubr.bf16.vlgmr.msra.gmra.mxu0 %v2351_v6  ;;  %v2931_v6 = vld [vmem:[%s4178_s1 + $0x284] ss:$8 sps:$4 sm:$0xff]  }
  0x43   :  { %1721 = vmatmul.mubr.bf16.vlgmr.msra.gmra.mxu1 %v2353_v7  ;;  %1730 = vmatpush1.bf16.msra.mxu0 %v2839_v8  ;;  %v2934_v7 = vld [vmem:[%s4178_s1 + $0x384] ss:$8 sps:$4 sm:$0xff]   ;;  %v2929_v8 = vld [vmem:[%s4178_s1 + $0x280] ss:$8 sps:$4 sm:$0xff]  }
  0x44   :  { %1771 = vmatpush1.bf16.msra.mxu1 %v2842_v9  ;;  %1731 = vmatprep.subr.bf16.mxu0 %v2847_v10  ;;  %v2932_v9 = vld [vmem:[%s4178_s1 + $0x380] ss:$8 sps:$4 sm:$0xff]   ;;  %v2941_v10 = vld [vmem:[%s4178_s1 + $0x474] ss:$8 sps:$4 sm:$0xff]  }
  0x45   :  { %1772 = vmatprep.subr.bf16.mxu1 %v2850_v11  ;;  %1761 = vmatprep.mubr.bf16.mxu0 %v2356_v36  ;;  %v2944_v11 = vld [vmem:[%s4178_s1 + $0x574] ss:$8 sps:$4 sm:$0xff]   ;;  %v2971_v36 = vld [vmem:[%s4178_s1 + $0x424] ss:$8 sps:$4 sm:$0xff]  }
  0x46   :  { %1802 = vmatprep.mubr.bf16.mxu1 %v2358_v37  ;;  %v2974_v37 = vld [vmem:[%s4178_s1 + $0x524] ss:$8 sps:$4 sm:$0xff]  }
  0x47   :  { %1732 = vmatpush1.bf16.msra.mxu0 %v2845_v12  ;;  %v2355_v12 = vcombine.low %v3507_v32, %v3507_v32  ;;  %v2965_v32 = vld [vmem:[%s4178_s1 + $0x434] ss:$8 sps:$4 sm:$0xff]  }
  0x48   :  { %1773 = vmatpush1.bf16.msra.mxu1 %v2848_v13  ;;  %1733 = vmatprep.subr.bf16.mxu0 %v2853_v14  ;;  %v2357_v13 = vcombine.low %v3512_v33, %v3512_v33  ;;  %v2939_v14 = vld [vmem:[%s4178_s1 + $0x470] ss:$8 sps:$4 sm:$0xff]   ;;  %v2968_v33 = vld [vmem:[%s4178_s1 + $0x534] ss:$8 sps:$4 sm:$0xff]  }
  0x49   :  { %1774 = vmatprep.subr.bf16.mxu1 %v2856_v15  ;;  %v2942_v15 = vld [vmem:[%s4178_s1 + $0x570] ss:$8 sps:$4 sm:$0xff]  }
  0x4b   :  { %1734 = vmatpush1.bf16.msra.mxu0 %v2851_v16  ;;  %v2947_v16 = vld [vmem:[%s4178_s1 + $0x464] ss:$8 sps:$4 sm:$0xff]  }
  0x4c   :  { %1775 = vmatpush1.bf16.msra.mxu1 %v2854_v17  ;;  %1735 = vmatprep.subr.bf16.mxu0 %v2859_v18  ;;  %v2950_v17 = vld [vmem:[%s4178_s1 + $0x564] ss:$8 sps:$4 sm:$0xff]  }
  0x4d   :  { %1776 = vmatprep.subr.bf16.mxu1 %v2862_v19  ;;  %v3657_v18 = vld [vmem:[%s4179_s0 + $0x20] sm:$0xff]  ;;  %v3662_v19 = vld [vmem:[%s4179_s0 + $0x28] sm:$0xff] }
  0x4f   :  { %1736 = vmatpush1.bf16.msra.mxu0 %v2857_v20  ;;  %v2360_v20 = vcombine.high %v3657_v18, %v3657_v18 }
  0x50   :  { %1777 = vmatpush1.bf16.msra.mxu1 %v2860_v21  ;;  %1737 = vmatprep.subr.bf16.mxu0 %v2865_v22  ;;  %v2362_v21 = vcombine.high %v3662_v19, %v3662_v19  ;;  %v2945_v22 = vld [vmem:[%s4178_s1 + $0x460] ss:$8 sps:$4 sm:$0xff]  }
  0x51   :  { %1778 = vmatprep.subr.bf16.mxu1 %v2868_v23  ;;  %v2948_v23 = vld [vmem:[%s4178_s1 + $0x560] ss:$8 sps:$4 sm:$0xff]  }
  0x53   :  { %1738 = vmatpush1.bf16.msra.mxu0 %v2863_v24  ;;  %v2953_v24 = vld [vmem:[%s4178_s1 + $0x454] ss:$8 sps:$4 sm:$0xff]  }
  0x54   :  { %1779 = vmatpush1.bf16.msra.mxu1 %v2866_v25  ;;  %1739 = vmatprep.subr.bf16.mxu0 %v2871_v26  ;;  %v2956_v25 = vld [vmem:[%s4178_s1 + $0x554] ss:$8 sps:$4 sm:$0xff]   ;;  %v2951_v26 = vld [vmem:[%s4178_s1 + $0x450] ss:$8 sps:$4 sm:$0xff]  }
  0x55   :  { %1780 = vmatprep.subr.bf16.mxu1 %v2874_v27  ;;  %v2954_v27 = vld [vmem:[%s4178_s1 + $0x550] ss:$8 sps:$4 sm:$0xff]  }
  0x57   :  { %1740 = vmatpush1.bf16.msra.mxu0 %v2869_v28  ;;  %v2959_v28 = vld [vmem:[%s4178_s1 + $0x444] ss:$8 sps:$4 sm:$0xff]  }
  0x58   :  { %1781 = vmatpush1.bf16.msra.mxu1 %v2872_v29  ;;  %1741 = vmatprep.subr.bf16.mxu0 %v2877_v30  ;;  %v2962_v29 = vld [vmem:[%s4178_s1 + $0x544] ss:$8 sps:$4 sm:$0xff]   ;;  %v2957_v30 = vld [vmem:[%s4178_s1 + $0x440] ss:$8 sps:$4 sm:$0xff]  }
  0x59   :  { %1782 = vmatprep.subr.bf16.mxu1 %v2880_v31  ;;  %v2960_v31 = vld [vmem:[%s4178_s1 + $0x540] ss:$8 sps:$4 sm:$0xff]  }
  0x5b   :  { %1742 = vmatpush1.bf16.msra.mxu0 %v2875_v34  ;;  %v2963_v34 = vld [vmem:[%s4178_s1 + $0x430] ss:$8 sps:$4 sm:$0xff]  }
  0x5c   :  { %1783 = vmatpush1.bf16.msra.mxu1 %v2878_v35  ;;  %1743 = vmatprep.subr.bf16.mxu0 %v2883_v38  ;;  %v2966_v35 = vld [vmem:[%s4178_s1 + $0x530] ss:$8 sps:$4 sm:$0xff]   ;;  %v2969_v38 = vld [vmem:[%s4178_s1 + $0x420] ss:$8 sps:$4 sm:$0xff]  }
  0x5d   :  { %1784 = vmatprep.subr.bf16.mxu1 %v2886_v39  ;;  %v2972_v39 = vld [vmem:[%s4178_s1 + $0x520] ss:$8 sps:$4 sm:$0xff]  }
  0x5f   :  { %1744 = vmatpush1.bf16.msra.mxu0 %v2881_v40  ;;  %v2977_v40 = vld [vmem:[%s4178_s1 + $0x414] ss:$8 sps:$4 sm:$0xff]  }
  0x60   :  { %1785 = vmatpush1.bf16.msra.mxu1 %v2884_v41  ;;  %1745 = vmatprep.subr.bf16.mxu0 %v2889_v42  ;;  %v2980_v41 = vld [vmem:[%s4178_s1 + $0x514] ss:$8 sps:$4 sm:$0xff]   ;;  %v2975_v42 = vld [vmem:[%s4178_s1 + $0x410] ss:$8 sps:$4 sm:$0xff]  }
  0x61   :  { %1786 = vmatprep.subr.bf16.mxu1 %v2892_v43  ;;  %v2978_v43 = vld [vmem:[%s4178_s1 + $0x510] ss:$8 sps:$4 sm:$0xff]  }
  0x63   :  { %1746 = vmatpush2.bf16.msra.mxu0 %v2887_v44  ;;  %v2983_v44 = vld [vmem:[%s4178_s1 + $0x404] ss:$8 sps:$4 sm:$0xff]  }
  0x64   :  { %1787 = vmatpush2.bf16.msra.mxu1 %v2890_v45  ;;  %1747 = vmatprep.subr.bf16.mxu0 %v2895_v46  ;;  %v2986_v45 = vld [vmem:[%s4178_s1 + $0x504] ss:$8 sps:$4 sm:$0xff]   ;;  %v2981_v46 = vld [vmem:[%s4178_s1 + $0x400] ss:$8 sps:$4 sm:$0xff]  }
  0x65   :  { %1788 = vmatprep.subr.bf16.mxu1 %v2898_v47  ;;  %v2984_v47 = vld [vmem:[%s4178_s1 + $0x500] ss:$8 sps:$4 sm:$0xff]  }
  0x67   :  { %1748 = vmatpush2.bf16.msra.mxu0 %v2893_v48  ;;  %v2989_v48 = vld [vmem:[%s4178_s1 + $0x4f4] ss:$8 sps:$4 sm:$0xff]  }
  0x68   :  { %1789 = vmatpush2.bf16.msra.mxu1 %v2896_v49  ;;  %1749 = vmatprep.subr.bf16.mxu0 %v2901_v50  ;;  %v2992_v49 = vld [vmem:[%s4178_s1 + $0x5f4] ss:$8 sps:$4 sm:$0xff]   ;;  %v2987_v50 = vld [vmem:[%s4178_s1 + $0x4f0] ss:$8 sps:$4 sm:$0xff]  }
  0x69   :  { %1790 = vmatprep.subr.bf16.mxu1 %v2904_v51  ;;  %v2990_v51 = vld [vmem:[%s4178_s1 + $0x5f0] ss:$8 sps:$4 sm:$0xff]  }
  0x6b   :  { %1750 = vmatpush2.bf16.msra.mxu0 %v2899_v52  ;;  %v2995_v52 = vld [vmem:[%s4178_s1 + $0x4e4] ss:$8 sps:$4 sm:$0xff]  }
  0x6c   :  { %1791 = vmatpush2.bf16.msra.mxu1 %v2902_v53  ;;  %1751 = vmatprep.subr.bf16.mxu0 %v2907_v54  ;;  %v2998_v53 = vld [vmem:[%s4178_s1 + $0x5e4] ss:$8 sps:$4 sm:$0xff]   ;;  %v2993_v54 = vld [vmem:[%s4178_s1 + $0x4e0] ss:$8 sps:$4 sm:$0xff]  }
  0x6d   :  { %1792 = vmatprep.subr.bf16.mxu1 %v2910_v55  ;;  %v2996_v55 = vld [vmem:[%s4178_s1 + $0x5e0] ss:$8 sps:$4 sm:$0xff]  }
  0x6f   :  { %1752 = vmatpush2.bf16.msra.mxu0 %v2905_v56  ;;  %v3001_v56 = vld [vmem:[%s4178_s1 + $0x4d4] ss:$8 sps:$4 sm:$0xff]  }
  0x70   :  { %1793 = vmatpush2.bf16.msra.mxu1 %v2908_v57  ;;  %1753 = vmatprep.subr.bf16.mxu0 %v2913_v58  ;;  %v3004_v57 = vld [vmem:[%s4178_s1 + $0x5d4] ss:$8 sps:$4 sm:$0xff]   ;;  %v2999_v58 = vld [vmem:[%s4178_s1 + $0x4d0] ss:$8 sps:$4 sm:$0xff]  }
  0x71   :  { %1794 = vmatprep.subr.bf16.mxu1 %v2916_v59  ;;  %v3002_v59 = vld [vmem:[%s4178_s1 + $0x5d0] ss:$8 sps:$4 sm:$0xff]  }
  0x73   :  { %1754 = vmatpush2.bf16.msra.mxu0 %v2911_v60  ;;  %v3007_v60 = vld [vmem:[%s4178_s1 + $0x4c4] ss:$8 sps:$4 sm:$0xff]  }
  0x74   :  { %1795 = vmatpush2.bf16.msra.mxu1 %v2914_v61  ;;  %1755 = vmatprep.subr.bf16.mxu0 %v2919_v62  ;;  %v3010_v61 = vld [vmem:[%s4178_s1 + $0x5c4] ss:$8 sps:$4 sm:$0xff]   ;;  %v3005_v62 = vld [vmem:[%s4178_s1 + $0x4c0] ss:$8 sps:$4 sm:$0xff]  }
  0x75   :  { %1796 = vmatprep.subr.bf16.mxu1 %v2922_v63  ;;  %v3008_v63 = vld [vmem:[%s4178_s1 + $0x5c0] ss:$8 sps:$4 sm:$0xff]  }
  0x77   :  { %1756 = vmatpush2.bf16.msra.mxu0 %v2917_v0  ;;  %v3013_v0 = vld [vmem:[%s4178_s1 + $0x4b4] ss:$8 sps:$4 sm:$0xff]  }
  0x78   :  { %1797 = vmatpush2.bf16.msra.mxu1 %v2920_v1  ;;  %1757 = vmatprep.subr.bf16.mxu0 %v2925_v2  ;;  %v3016_v1 = vld [vmem:[%s4178_s1 + $0x5b4] ss:$8 sps:$4 sm:$0xff]   ;;  %v3011_v2 = vld [vmem:[%s4178_s1 + $0x4b0] ss:$8 sps:$4 sm:$0xff]  }
  0x79   :  { %1798 = vmatprep.subr.bf16.mxu1 %v2928_v3  ;;  %v3014_v3 = vld [vmem:[%s4178_s1 + $0x5b0] ss:$8 sps:$4 sm:$0xff]  }
  0x7b   :  { %1758 = vmatpush2.bf16.msra.mxu0 %v2923_v4  ;;  %v3019_v4 = vld [vmem:[%s4178_s1 + $0x4a4] ss:$8 sps:$4 sm:$0xff]  }
  0x7c   :  { %1799 = vmatpush2.bf16.msra.mxu1 %v2926_v5  ;;  %1759 = vmatprep.subr.bf16.mxu0 %v2931_v6  ;;  %v3022_v5 = vld [vmem:[%s4178_s1 + $0x5a4] ss:$8 sps:$4 sm:$0xff]   ;;  %v3017_v6 = vld [vmem:[%s4178_s1 + $0x4a0] ss:$8 sps:$4 sm:$0xff]  }
  0x7d   :  { %1800 = vmatprep.subr.bf16.mxu1 %v2934_v7  ;;  %v3020_v7 = vld [vmem:[%s4178_s1 + $0x5a0] ss:$8 sps:$4 sm:$0xff]  }
  0x7f   :  { %1760 = vmatpush2.bf16.msra.mxu0 %v2929_v8  ;;  %v3025_v8 = vld [vmem:[%s4178_s1 + $0x494] ss:$8 sps:$4 sm:$0xff]  }
  0x80   :  { %1801 = vmatpush2.bf16.msra.mxu1 %v2932_v9  ;;  %1811 = vmatprep.subr.bf16.mxu0 %v2941_v10  ;;  %v3028_v9 = vld [vmem:[%s4178_s1 + $0x594] ss:$8 sps:$4 sm:$0xff]   ;;  %v3023_v10 = vld [vmem:[%s4178_s1 + $0x490] ss:$8 sps:$4 sm:$0xff]  }
  0x81   :  { %1852 = vmatprep.subr.bf16.mxu1 %v2944_v11  ;;  %v3026_v11 = vld [vmem:[%s4178_s1 + $0x590] ss:$8 sps:$4 sm:$0xff]  }
  0x82   :  { %1762 = vmatmul.mubr.bf16.vlgmr.msra.gmra.mxu0 %v2355_v12  ;;  %v3031_v12 = vld [vmem:[%s4178_s1 + $0x484] ss:$8 sps:$4 sm:$0xff]  }
  0x83   :  { %1803 = vmatmul.mubr.bf16.vlgmr.msra.gmra.mxu1 %v2357_v13  ;;  %1812 = vmatpush1.bf16.msra.mxu0 %v2939_v14  ;;  %v3034_v13 = vld [vmem:[%s4178_s1 + $0x584] ss:$8 sps:$4 sm:$0xff]   ;;  %v3029_v14 = vld [vmem:[%s4178_s1 + $0x480] ss:$8 sps:$4 sm:$0xff]  }
  0x84   :  { %1853 = vmatpush1.bf16.msra.mxu1 %v2942_v15  ;;  %1813 = vmatprep.subr.bf16.mxu0 %v2947_v16  ;;  %v3032_v15 = vld [vmem:[%s4178_s1 + $0x580] ss:$8 sps:$4 sm:$0xff]   ;;  %v3041_v16 = vld [vmem:[%s4178_s1 + $0x674] ss:$8 sps:$4 sm:$0xff]  }
  0x85   :  { %1854 = vmatprep.subr.bf16.mxu1 %v2950_v17  ;;  %1843 = vmatprep.mubr.bf16.mxu0 %v2360_v20  ;;  %v3044_v17 = vld [vmem:[%s4178_s1 + $0x774] ss:$8 sps:$4 sm:$0xff]   ;;  %v2359_v20 = vcombine.low %v3657_v18, %v3657_v18  ;;  %v3042_v18 = vld [vmem:[%s4178_s1 + $0x770] ss:$8 sps:$4 sm:$0xff]  }
  0x86   :  { %1884 = vmatprep.mubr.bf16.mxu1 %v2362_v21  ;;  %v2361_v21 = vcombine.low %v3662_v19, %v3662_v19  ;;  %v3047_v19 = vld [vmem:[%s4178_s1 + $0x664] ss:$8 sps:$4 sm:$0xff]  }
  0x87   :  { %1814 = vmatpush1.bf16.msra.mxu0 %v2945_v22  ;;  %v3855_v22 = vld [vmem:[%s4179_s0 + $0x30] sm:$0xff] }
  0x88   :  { %1855 = vmatpush1.bf16.msra.mxu1 %v2948_v23  ;;  %1815 = vmatprep.subr.bf16.mxu0 %v2953_v24  ;;  %v3860_v23 = vld [vmem:[%s4179_s0 + $0x38] sm:$0xff] }
  0x89   :  { %1856 = vmatprep.subr.bf16.mxu1 %v2956_v25  ;;  %v3039_v24 = vld [vmem:[%s4178_s1 + $0x670] ss:$8 sps:$4 sm:$0xff]   ;;  %v3050_v25 = vld [vmem:[%s4178_s1 + $0x764] ss:$8 sps:$4 sm:$0xff]  }
  0x8b   :  { %1816 = vmatpush1.bf16.msra.mxu0 %v2951_v26  ;;  %v2364_v26 = vcombine.high %v3855_v22, %v3855_v22 }
  0x8c   :  { %1857 = vmatpush1.bf16.msra.mxu1 %v2954_v27  ;;  %1817 = vmatprep.subr.bf16.mxu0 %v2959_v28  ;;  %v2366_v27 = vcombine.high %v3860_v23, %v3860_v23  ;;  %v3045_v28 = vld [vmem:[%s4178_s1 + $0x660] ss:$8 sps:$4 sm:$0xff]  }
  0x8d   :  { %1858 = vmatprep.subr.bf16.mxu1 %v2962_v29  ;;  %v3048_v29 = vld [vmem:[%s4178_s1 + $0x760] ss:$8 sps:$4 sm:$0xff]  }
  0x8f   :  { %1818 = vmatpush1.bf16.msra.mxu0 %v2957_v30  ;;  %v3053_v30 = vld [vmem:[%s4178_s1 + $0x654] ss:$8 sps:$4 sm:$0xff]  }
  0x90   :  { %1859 = vmatpush1.bf16.msra.mxu1 %v2960_v31  ;;  %1819 = vmatprep.subr.bf16.mxu0 %v2965_v32  ;;  %v3056_v31 = vld [vmem:[%s4178_s1 + $0x754] ss:$8 sps:$4 sm:$0xff]   ;;  %v3051_v32 = vld [vmem:[%s4178_s1 + $0x650] ss:$8 sps:$4 sm:$0xff]  }
  0x91   :  { %1860 = vmatprep.subr.bf16.mxu1 %v2968_v33  ;;  %v3054_v33 = vld [vmem:[%s4178_s1 + $0x750] ss:$8 sps:$4 sm:$0xff]  }
  0x93   :  { %1820 = vmatpush1.bf16.msra.mxu0 %v2963_v34  ;;  %v3059_v34 = vld [vmem:[%s4178_s1 + $0x644] ss:$8 sps:$4 sm:$0xff]  }
  0x94   :  { %1861 = vmatpush1.bf16.msra.mxu1 %v2966_v35  ;;  %1821 = vmatprep.subr.bf16.mxu0 %v2971_v36  ;;  %v3062_v35 = vld [vmem:[%s4178_s1 + $0x744] ss:$8 sps:$4 sm:$0xff]   ;;  %v3057_v36 = vld [vmem:[%s4178_s1 + $0x640] ss:$8 sps:$4 sm:$0xff]  }
  0x95   :  { %1862 = vmatprep.subr.bf16.mxu1 %v2974_v37  ;;  %v3060_v37 = vld [vmem:[%s4178_s1 + $0x740] ss:$8 sps:$4 sm:$0xff]  }
  0x97   :  { %1822 = vmatpush1.bf16.msra.mxu0 %v2969_v38  ;;  %v3065_v38 = vld [vmem:[%s4178_s1 + $0x634] ss:$8 sps:$4 sm:$0xff]  }
  0x98   :  { %1863 = vmatpush1.bf16.msra.mxu1 %v2972_v39  ;;  %1823 = vmatprep.subr.bf16.mxu0 %v2977_v40  ;;  %v3068_v39 = vld [vmem:[%s4178_s1 + $0x734] ss:$8 sps:$4 sm:$0xff]   ;;  %v3063_v40 = vld [vmem:[%s4178_s1 + $0x630] ss:$8 sps:$4 sm:$0xff]  }
  0x99   :  { %1864 = vmatprep.subr.bf16.mxu1 %v2980_v41  ;;  %v3066_v41 = vld [vmem:[%s4178_s1 + $0x730] ss:$8 sps:$4 sm:$0xff]  }
  0x9b   :  { %1824 = vmatpush1.bf16.msra.mxu0 %v2975_v42  ;;  %v3071_v42 = vld [vmem:[%s4178_s1 + $0x624] ss:$8 sps:$4 sm:$0xff]  }
  0x9c   :  { %1865 = vmatpush1.bf16.msra.mxu1 %v2978_v43  ;;  %1825 = vmatprep.subr.bf16.mxu0 %v2983_v44  ;;  %v3074_v43 = vld [vmem:[%s4178_s1 + $0x724] ss:$8 sps:$4 sm:$0xff]   ;;  %v3069_v44 = vld [vmem:[%s4178_s1 + $0x620] ss:$8 sps:$4 sm:$0xff]  }
  0x9d   :  { %1866 = vmatprep.subr.bf16.mxu1 %v2986_v45  ;;  %v3072_v45 = vld [vmem:[%s4178_s1 + $0x720] ss:$8 sps:$4 sm:$0xff]  }
  0x9f   :  { %1826 = vmatpush1.bf16.msra.mxu0 %v2981_v46  ;;  %v3077_v46 = vld [vmem:[%s4178_s1 + $0x614] ss:$8 sps:$4 sm:$0xff]  }
  0xa0   :  { %1867 = vmatpush1.bf16.msra.mxu1 %v2984_v47  ;;  %1827 = vmatprep.subr.bf16.mxu0 %v2989_v48  ;;  %v3080_v47 = vld [vmem:[%s4178_s1 + $0x714] ss:$8 sps:$4 sm:$0xff]   ;;  %v3075_v48 = vld [vmem:[%s4178_s1 + $0x610] ss:$8 sps:$4 sm:$0xff]  }
  0xa1   :  { %1868 = vmatprep.subr.bf16.mxu1 %v2992_v49  ;;  %v3078_v49 = vld [vmem:[%s4178_s1 + $0x710] ss:$8 sps:$4 sm:$0xff]  }
  0xa3   :  { %1828 = vmatpush2.bf16.msra.mxu0 %v2987_v50  ;;  %v3083_v50 = vld [vmem:[%s4178_s1 + $0x604] ss:$8 sps:$4 sm:$0xff]  }
  0xa4   :  { %1869 = vmatpush2.bf16.msra.mxu1 %v2990_v51  ;;  %1829 = vmatprep.subr.bf16.mxu0 %v2995_v52  ;;  %v3086_v51 = vld [vmem:[%s4178_s1 + $0x704] ss:$8 sps:$4 sm:$0xff]   ;;  %v3081_v52 = vld [vmem:[%s4178_s1 + $0x600] ss:$8 sps:$4 sm:$0xff]  }
  0xa5   :  { %1870 = vmatprep.subr.bf16.mxu1 %v2998_v53  ;;  %v3084_v53 = vld [vmem:[%s4178_s1 + $0x700] ss:$8 sps:$4 sm:$0xff]  }
  0xa7   :  { %1830 = vmatpush2.bf16.msra.mxu0 %v2993_v54  ;;  %v3089_v54 = vld [vmem:[%s4178_s1 + $0x6f4] ss:$8 sps:$4 sm:$0xff]  }
  0xa8   :  { %1871 = vmatpush2.bf16.msra.mxu1 %v2996_v55  ;;  %1831 = vmatprep.subr.bf16.mxu0 %v3001_v56  ;;  %v3092_v55 = vld [vmem:[%s4178_s1 + $0x7f4] ss:$8 sps:$4 sm:$0xff]   ;;  %v3087_v56 = vld [vmem:[%s4178_s1 + $0x6f0] ss:$8 sps:$4 sm:$0xff]  }
  0xa9   :  { %1872 = vmatprep.subr.bf16.mxu1 %v3004_v57  ;;  %v3090_v57 = vld [vmem:[%s4178_s1 + $0x7f0] ss:$8 sps:$4 sm:$0xff]  }
  0xab   :  { %1832 = vmatpush2.bf16.msra.mxu0 %v2999_v58  ;;  %v3095_v58 = vld [vmem:[%s4178_s1 + $0x6e4] ss:$8 sps:$4 sm:$0xff]  }
  0xac   :  { %1873 = vmatpush2.bf16.msra.mxu1 %v3002_v59  ;;  %1833 = vmatprep.subr.bf16.mxu0 %v3007_v60  ;;  %v3098_v59 = vld [vmem:[%s4178_s1 + $0x7e4] ss:$8 sps:$4 sm:$0xff]   ;;  %v3093_v60 = vld [vmem:[%s4178_s1 + $0x6e0] ss:$8 sps:$4 sm:$0xff]  }
  0xad   :  { %1874 = vmatprep.subr.bf16.mxu1 %v3010_v61  ;;  %v3096_v61 = vld [vmem:[%s4178_s1 + $0x7e0] ss:$8 sps:$4 sm:$0xff]  }
  0xaf   :  { %1834 = vmatpush2.bf16.msra.mxu0 %v3005_v62  ;;  %v3101_v62 = vld [vmem:[%s4178_s1 + $0x6d4] ss:$8 sps:$4 sm:$0xff]  }
  0xb0   :  { %1875 = vmatpush2.bf16.msra.mxu1 %v3008_v63  ;;  %1835 = vmatprep.subr.bf16.mxu0 %v3013_v0  ;;  %v3104_v63 = vld [vmem:[%s4178_s1 + $0x7d4] ss:$8 sps:$4 sm:$0xff]   ;;  %v3099_v0 = vld [vmem:[%s4178_s1 + $0x6d0] ss:$8 sps:$4 sm:$0xff]  }
  0xb1   :  { %1876 = vmatprep.subr.bf16.mxu1 %v3016_v1  ;;  %v3102_v1 = vld [vmem:[%s4178_s1 + $0x7d0] ss:$8 sps:$4 sm:$0xff]  }
  0xb3   :  { %1836 = vmatpush2.bf16.msra.mxu0 %v3011_v2  ;;  %v3107_v2 = vld [vmem:[%s4178_s1 + $0x6c4] ss:$8 sps:$4 sm:$0xff]  }
  0xb4   :  { %1877 = vmatpush2.bf16.msra.mxu1 %v3014_v3  ;;  %1837 = vmatprep.subr.bf16.mxu0 %v3019_v4  ;;  %v3110_v3 = vld [vmem:[%s4178_s1 + $0x7c4] ss:$8 sps:$4 sm:$0xff]   ;;  %v3105_v4 = vld [vmem:[%s4178_s1 + $0x6c0] ss:$8 sps:$4 sm:$0xff]  }
  0xb5   :  { %1878 = vmatprep.subr.bf16.mxu1 %v3022_v5  ;;  %v3108_v5 = vld [vmem:[%s4178_s1 + $0x7c0] ss:$8 sps:$4 sm:$0xff]  }
  0xb7   :  { %1838 = vmatpush2.bf16.msra.mxu0 %v3017_v6  ;;  %v3113_v6 = vld [vmem:[%s4178_s1 + $0x6b4] ss:$8 sps:$4 sm:$0xff]  }
  0xb8   :  { %1879 = vmatpush2.bf16.msra.mxu1 %v3020_v7  ;;  %1839 = vmatprep.subr.bf16.mxu0 %v3025_v8  ;;  %v3116_v7 = vld [vmem:[%s4178_s1 + $0x7b4] ss:$8 sps:$4 sm:$0xff]   ;;  %v3111_v8 = vld [vmem:[%s4178_s1 + $0x6b0] ss:$8 sps:$4 sm:$0xff]  }
  0xb9   :  { %1880 = vmatprep.subr.bf16.mxu1 %v3028_v9  ;;  %v3114_v9 = vld [vmem:[%s4178_s1 + $0x7b0] ss:$8 sps:$4 sm:$0xff]  }
  0xbb   :  { %1840 = vmatpush2.bf16.msra.mxu0 %v3023_v10  ;;  %v3119_v10 = vld [vmem:[%s4178_s1 + $0x6a4] ss:$8 sps:$4 sm:$0xff]  }
  0xbc   :  { %1881 = vmatpush2.bf16.msra.mxu1 %v3026_v11  ;;  %1841 = vmatprep.subr.bf16.mxu0 %v3031_v12  ;;  %v3122_v11 = vld [vmem:[%s4178_s1 + $0x7a4] ss:$8 sps:$4 sm:$0xff]   ;;  %v3117_v12 = vld [vmem:[%s4178_s1 + $0x6a0] ss:$8 sps:$4 sm:$0xff]  }
  0xbd   :  { %1882 = vmatprep.subr.bf16.mxu1 %v3034_v13  ;;  %v3120_v13 = vld [vmem:[%s4178_s1 + $0x7a0] ss:$8 sps:$4 sm:$0xff]  }
  0xbf   :  { %1842 = vmatpush2.bf16.msra.mxu0 %v3029_v14  ;;  %v301_v14 = vlaneseq }
  0xc0   :  { %1883 = vmatpush2.bf16.msra.mxu1 %v3032_v15  ;;  %1893 = vmatprep.subr.bf16.mxu0 %v3041_v16  ;;  %v3125_v15 = vld [vmem:[%s4178_s1 + $0x694] ss:$8 sps:$4 sm:$0xff]  }
  0xc1   :  { %1934 = vmatprep.subr.bf16.mxu1 %v3044_v17  ;;  %v3128_v16 = vld [vmem:[%s4178_s1 + $0x794] ss:$8 sps:$4 sm:$0xff]   ;;  %v3123_v17 = vld [vmem:[%s4178_s1 + $0x690] ss:$8 sps:$4 sm:$0xff]  }
  0xc2   :  { %1844 = vmatmul.mubr.bf16.vlgmr.msra.gmra.mxu0 %v2359_v20  ;;  %v3126_v20 = vld [vmem:[%s4178_s1 + $0x790] ss:$8 sps:$4 sm:$0xff]  }
  0xc3   :  { %1885 = vmatmul.mubr.bf16.vlgmr.msra.gmra.mxu1 %v2361_v21  ;;  %1894 = vmatpush1.bf16.msra.mxu0 %v3039_v24  ;;  %v302_v21 = vshrl.u32 %v301_v14, 7  ;;  %v3131_v24 = vld [vmem:[%s4178_s1 + $0x684] ss:$8 sps:$4 sm:$0xff]  }
  0xc4   :  { %1935 = vmatpush1.bf16.msra.mxu1 %v3042_v18  ;;  %1895 = vmatprep.subr.bf16.mxu0 %v3047_v19  ;;  %v3134_v18 = vld [vmem:[%s4178_s1 + $0x784] ss:$8 sps:$4 sm:$0xff]   ;;  %v3129_v19 = vld [vmem:[%s4178_s1 + $0x680] ss:$8 sps:$4 sm:$0xff]  }
  0xc5   :  { %1936 = vmatprep.subr.bf16.mxu1 %v3050_v25  ;;  %1925 = vmatprep.mubr.bf16.mxu0 %v2364_v26  ;;  %v3132_v25 = vld [vmem:[%s4178_s1 + $0x780] ss:$8 sps:$4 sm:$0xff]   ;;  %v303_v26 = vsub.s32 0, %v302_v21 }
  0xc6   :  { %1966 = vmatprep.mubr.bf16.mxu1 %v2366_v27  ;;  %v299_v27 = vld [vmem:[%s4180_s2] sm:$0x3] }
  0xc7   :  { %1896 = vmatpush1.bf16.msra.mxu0 %v3045_v28  ;;  %v307_v28 = vsub.s32 1, %v302_v21 }
  0xc8   :  { %1937 = vmatpush1.bf16.msra.mxu1 %v3048_v29  ;;  %1897 = vmatprep.subr.bf16.mxu0 %v3053_v30  ;;  %v2363_v29 = vcombine.low %v3855_v22, %v3855_v22  ;;  %v2365_v30 = vcombine.low %v3860_v23, %v3860_v23  ;;  %v3139_v23 = vld [vmem:[%s4181_s3 + $0x38] sm:$0xff]  }
  0xc9   :  { %1938 = vmatprep.subr.bf16.mxu1 %v3056_v31  ;;  %v304_v31 = vrot.slane %v299_v27, %v303_v26 }
  0xcb   :  { %1898 = vmatpush1.bf16.msra.mxu0 %v3051_v32  ;;  %v308_v32 = vrot.slane %v299_v27, %v307_v28 }
  0xcc   :  { %1939 = vmatpush1.bf16.msra.mxu1 %v3054_v33  ;;  %1899 = vmatprep.subr.bf16.mxu0 %v3059_v34 }
  0xcd   :  { %1940 = vmatprep.subr.bf16.mxu1 %v3062_v35 }
  0xcf   :  { %1900 = vmatpush1.bf16.msra.mxu0 %v3057_v36 }
  0xd0   :  { %1941 = vmatpush1.bf16.msra.mxu1 %v3060_v37  ;;  %1901 = vmatprep.subr.bf16.mxu0 %v3065_v38 }
  0xd1   :  { %1942 = vmatprep.subr.bf16.mxu1 %v3068_v39 }
  0xd3   :  { %1902 = vmatpush1.bf16.msra.mxu0 %v3063_v40 }
  0xd4   :  { %1943 = vmatpush1.bf16.msra.mxu1 %v3066_v41  ;;  %1903 = vmatprep.subr.bf16.mxu0 %v3071_v42 }
  0xd5   :  { %1944 = vmatprep.subr.bf16.mxu1 %v3074_v43 }
  0xd7   :  { %1904 = vmatpush1.bf16.msra.mxu0 %v3069_v44  ;;  %v3171_v44 = vmov 0.0  }
  0xd8   :  { %1945 = vmatpush1.bf16.msra.mxu1 %v3072_v45  ;;  %1905 = vmatprep.subr.bf16.mxu0 %v3077_v46  ;;  %v3140_v45 = vld [vmem:[%s4181_s3 + $0x30] sm:$0xff]   ;;  %v3141_v46 = vld [vmem:[%s4181_s3 + $0x28] sm:$0xff]  }
  0xd9   :  { %1946 = vmatprep.subr.bf16.mxu1 %v3080_v47  ;;  %v3142_v47 = vld [vmem:[%s4181_s3 + $0x20] sm:$0xff]  }
  0xdb   :  { %1906 = vmatpush1.bf16.msra.mxu0 %v3075_v48  ;;  %v3143_v48 = vld [vmem:[%s4181_s3 + $0x18] sm:$0xff]  }
  0xdc   :  { %1947 = vmatpush1.bf16.msra.mxu1 %v3078_v49  ;;  %1907 = vmatprep.subr.bf16.mxu0 %v3083_v50  ;;  %v3144_v49 = vld [vmem:[%s4181_s3 + $0x10] sm:$0xff]   ;;  %v3145_v50 = vld [vmem:[%s4181_s3 + $0x8] sm:$0xff]  }
  0xdd   :  { %1948 = vmatprep.subr.bf16.mxu1 %v3086_v51 }
  0xdf   :  { %1908 = vmatpush1.bf16.msra.mxu0 %v3081_v52 }
  0xe0   :  { %1949 = vmatpush1.bf16.msra.mxu1 %v3084_v53  ;;  %1909 = vmatprep.subr.bf16.mxu0 %v3089_v54 }
  0xe1   :  { %1950 = vmatprep.subr.bf16.mxu1 %v3092_v55 }
  0xe3   :  { %1910 = vmatpush2.bf16.msra.mxu0 %v3087_v56 }
  0xe4   :  { %1951 = vmatpush2.bf16.msra.mxu1 %v3090_v57  ;;  %1911 = vmatprep.subr.bf16.mxu0 %v3095_v58  ;;  %v3146_v58 = vld [vmem:[%s4181_s3] sm:$0xff]  }
  0xe5   :  { %1952 = vmatprep.subr.bf16.mxu1 %v3098_v59 }
  0xe7   :  { %1912 = vmatpush2.bf16.msra.mxu0 %v3093_v60 }
  0xe8   :  { %1953 = vmatpush2.bf16.msra.mxu1 %v3096_v61  ;;  %1913 = vmatprep.subr.bf16.mxu0 %v3101_v62 }
  0xe9   :  { %1954 = vmatprep.subr.bf16.mxu1 %v3104_v63 }
  0xeb   :  { %1914 = vmatpush2.bf16.msra.mxu0 %v3099_v0  ;;  %v3155_v0 = vld [vmem:[%s4183_s5 + $0x38] sm:$0xff]  }
  0xec   :  { %1955 = vmatpush2.bf16.msra.mxu1 %v3102_v1  ;;  %1915 = vmatprep.subr.bf16.mxu0 %v3107_v2  ;;  %v3156_v1 = vld [vmem:[%s4183_s5 + $0x30] sm:$0xff]   ;;  %v3157_v2 = vld [vmem:[%s4183_s5 + $0x28] sm:$0xff]  }
  0xed   :  { %1956 = vmatprep.subr.bf16.mxu1 %v3110_v3  ;;  %v3158_v3 = vld [vmem:[%s4183_s5 + $0x20] sm:$0xff]  }
  0xef   :  { %1916 = vmatpush2.bf16.msra.mxu0 %v3105_v4  ;;  %v3159_v4 = vld [vmem:[%s4183_s5 + $0x18] sm:$0xff]  }
  0xf0   :  { %1957 = vmatpush2.bf16.msra.mxu1 %v3108_v5  ;;  %1917 = vmatprep.subr.bf16.mxu0 %v3113_v6  ;;  %v3160_v5 = vld [vmem:[%s4183_s5 + $0x10] sm:$0xff]  }
  0xf1   :  { %1958 = vmatprep.subr.bf16.mxu1 %v3116_v7 }
  0xf3   :  { %1918 = vmatpush2.bf16.msra.mxu0 %v3111_v8 }
  0xf4   :  { %1959 = vmatpush2.bf16.msra.mxu1 %v3114_v9  ;;  %1919 = vmatprep.subr.bf16.mxu0 %v3119_v10 }
  0xf5   :  { %1960 = vmatprep.subr.bf16.mxu1 %v3122_v11 }
  0xf7   :  { %1920 = vmatpush2.bf16.msra.mxu0 %v3117_v12 }
  0xf8   :  { %1961 = vmatpush2.bf16.msra.mxu1 %v3120_v13  ;;  %1921 = vmatprep.subr.bf16.mxu0 %v3125_v15 }
  0xf9   :  { %1962 = vmatprep.subr.bf16.mxu1 %v3128_v16 }
  0xfb   :  { %1922 = vmatpush2.bf16.msra.mxu0 %v3123_v17 }
  0xfc   :  { %1963 = vmatpush2.bf16.msra.mxu1 %v3126_v20  ;;  %1923 = vmatprep.subr.bf16.mxu0 %v3131_v24 }
  0xfd   :  { %1964 = vmatprep.subr.bf16.mxu1 %v3134_v18 }
  0xff   :  { %1924 = vmatpush2.bf16.msra.mxu0 %v3129_v19 }
 0x100   :  { %1965 = vmatpush2.bf16.msra.mxu1 %v3132_v25  ;;  %2677 = vmatprep.subr.bf16.mxu0 %v3171_v44 }
 0x101   :  { %2697 = vmatprep.subr.bf16.mxu1 %v3171_v44 }
 0x102   :  { %v1681_v33 = vpop.f32.mrf.mxu0  ;;  %1926 = vmatmul.mubr.bf16.vlgmr.msra.gmra.mxu0 %v2363_v29 }
 0x103   :  { %v1722_v34 = vpop.f32.mrf.mxu1  ;;  %1967 = vmatmul.mubr.bf16.vlgmr.msra.gmra.mxu1 %v2365_v30  ;;  %v1682_v35 = vadd.f32 %v1681_v33, %v304_v31  ;;  %2678 = vmatpush3.bf16.msra.mxu0 %v3139_v23  ;;  %v3161_v23 = vld [vmem:[%s4183_s5 + $0x8] sm:$0xff]  }
 0x104   :  { %v1683_v36 = vpop.f32.mrf.mxu0  ;;  %2679 = vmatprep.subr.bf16.mxu0 %v3171_v44  ;;  %2693 = vmatprep.mubr.msk.bf16.mxu0 %vm3172_vm0, %v3171_v44 }
 0x105   :  { %v1724_v37 = vpop.f32.mrf.mxu1  ;;  %v1723_v38 = vadd.f32 %v1722_v34, %v1682_v35  ;;  %v1684_v39 = vadd.f32 %v1683_v36, %v308_v32  ;;  %2713 = vmatprep.mubr.msk.bf16.mxu1 %vm3172_vm0, %v3171_v44  ;;  %2698 = vmatpush3.bf16.msra.mxu1 %v3155_v0  ;;  %v3147_v32 = vld [vmem:[%s4182_s7 + $0x38] sm:$0xff]   ;;  %v3148_v34 = vld [vmem:[%s4182_s7 + $0x30] sm:$0xff]   ;;  %v3149_v35 = vld [vmem:[%s4182_s7 + $0x28] sm:$0xff]  }
 0x106   :  { %v1685_v40 = vpop.f32.mrf.mxu0  ;;  %2699 = vmatprep.subr.bf16.mxu1 %v3171_v44  ;;  %v3150_v36 = vld [vmem:[%s4182_s7 + $0x20] sm:$0xff]  }
 0x107   :  { %v1726_v41 = vpop.f32.mrf.mxu1  ;;  %v1725_v42 = vadd.f32 %v1724_v37, %v1684_v39  ;;  %2680 = vmatpush3.bf16.msra.mxu0 %v3140_v45  ;;  %v3151_v37 = vld [vmem:[%s4182_s7 + $0x18] sm:$0xff]   ;;  %v3153_v40 = vld [vmem:[%s4182_s7 + $0x8] sm:$0xff]   ;;  %v3162_v45 = vld [vmem:[%s4183_s5] sm:$0xff]  }
 0x108   :  { %v1686_v22 = vpop.f32.mrf.mxu0  ;;  %2681 = vmatprep.subr.bf16.mxu0 %v3171_v44 }
 0x109   :  { %v1727_v43 = vpop.f32.mrf.mxu1  ;;  %2700 = vmatpush3.bf16.msra.mxu1 %v3156_v1 }
 0x10a   :  { %2701 = vmatprep.subr.bf16.mxu1 %v3171_v44 }
 0x10b   :  { %2682 = vmatpush3.bf16.msra.mxu0 %v3141_v46  ;;  %v2623_v46 = vld [vmem:[%s4184_s4] ss:$0 sm:$0xff] }
 0x10c   :  { %2683 = vmatprep.subr.bf16.mxu0 %v3171_v44 }
 0x10d   :  { %2702 = vmatpush3.bf16.msra.mxu1 %v3157_v2 }
 0x10e   :  { %2703 = vmatprep.subr.bf16.mxu1 %v3171_v44 }
 0x10f   :  { %2684 = vmatpush3.bf16.msra.mxu0 %v3142_v47 }
 0x110   :  { %2685 = vmatprep.subr.bf16.mxu0 %v3171_v44 }
 0x111   :  { %2704 = vmatpush3.bf16.msra.mxu1 %v3158_v3 }
 0x112   :  { %2705 = vmatprep.subr.bf16.mxu1 %v3171_v44 }
 0x113   :  { %2686 = vmatpush3.bf16.msra.mxu0 %v3143_v48 }
 0x114   :  { %2687 = vmatprep.subr.bf16.mxu0 %v3171_v44 }
 0x115   :  { %2706 = vmatpush3.bf16.msra.mxu1 %v3159_v4 }
 0x116   :  { %2707 = vmatprep.subr.bf16.mxu1 %v3171_v44 }
 0x117   :  { %2688 = vmatpush3.bf16.msra.mxu0 %v3144_v49 }
 0x118   :  { %2689 = vmatprep.subr.bf16.mxu0 %v3171_v44 }
 0x119   :  { %2708 = vmatpush3.bf16.msra.mxu1 %v3160_v5 }
 0x11a   :  { %2709 = vmatprep.subr.bf16.mxu1 %v3171_v44 }
 0x11b   :  { %2690 = vmatpush3.bf16.msra.mxu0 %v3145_v50 }
 0x11c   :  { %2691 = vmatprep.subr.bf16.mxu0 %v3171_v44 }
 0x11d   :  { %2710 = vmatpush3.bf16.msra.mxu1 %v3161_v23 }
 0x11e   :  { %2711 = vmatprep.subr.bf16.mxu1 %v3171_v44 }
 0x11f   :  { %2692 = vmatpush3.bf16.msra.mxu0 %v3146_v58  ;;  %v2315_v58 = vand.u32 127, %v301_v14 }
 0x120   :  { %2717 = vmatprep.subr.bf16.mxu0 %v3171_v44 }
 0x121   :  { %2712 = vmatpush3.bf16.msra.mxu1 %v3162_v45  ;;  %vm2316_vm1 = vcmp.lt.s32.totalorder %v2315_v58, 2 }
 0x142   :  { %v1763_v51 = vpop.f32.mrf.mxu0 }
 0x143   :  { %v1804_v52 = vpop.f32.mrf.mxu1  ;;  %v1764_v53 = vadd.f32 %v1763_v51, %v1723_v38  ;;  %v3152_v38 = vld [vmem:[%s4182_s7 + $0x10] sm:$0xff]  }
 0x144   :  { %v1765_v54 = vpop.f32.mrf.mxu0 }
 0x145   :  { %v1806_v55 = vpop.f32.mrf.mxu1  ;;  %v1805_v56 = vadd.f32 %v1804_v52, %v1764_v53  ;;  %v1766_v57 = vadd.f32 %v1765_v54, %v1725_v42  ;;  %v3154_v42 = vld [vmem:[%s4182_s7] sm:$0xff]  }
 0x146   :  { %v1767_v59 = vpop.f32.mrf.mxu0 }
 0x147   :  { %v1808_v60 = vpop.f32.mrf.mxu1  ;;  %v1807_v61 = vadd.f32 %v1806_v55, %v1766_v57  ;;  %v2632_v57 = vld [vmem:[%s4185_s6] ss:$0 sm:$0xff] }
 0x148   :  { %v1768_v62 = vpop.f32.mrf.mxu0  ;;  %v2641_v59 = vld [vmem:[%s4186_s8] ss:$0 sm:$0xff] }
 0x149   :  { %v1809_v63 = vpop.f32.mrf.mxu1 }
 0x182   :  { %v1845_v6 = vpop.f32.mrf.mxu0 }
 0x183   :  { %v1886_v7 = vpop.f32.mrf.mxu1  ;;  %v1846_v17 = vadd.f32 %v1845_v6, %v1805_v56 }
 0x184   :  { %v1847_v8 = vpop.f32.mrf.mxu0 }
 0x185   :  { %v1888_v9 = vpop.f32.mrf.mxu1  ;;  %v1848_v10 = vadd.f32 %v1847_v8, %v1807_v61  ;;  %v1887_v20 = vadd.f32 %v1886_v7, %v1846_v17 }
 0x186   :  { %v1849_v11 = vpop.f32.mrf.mxu0 }
 0x187   :  { %v1890_v12 = vpop.f32.mrf.mxu1  ;;  %v1889_v13 = vadd.f32 %v1888_v9, %v1848_v10 }
 0x188   :  { %v1850_v15 = vpop.f32.mrf.mxu0 }
 0x189   :  { %v1891_v16 = vpop.f32.mrf.mxu1 }
 0x1c2   :  { %v1927_v21 = vpop.f32.mrf.mxu0 }
 0x1c3   :  { %v1968_v24 = vpop.f32.mrf.mxu1  ;;  %v1928_v18 = vadd.f32 %v1927_v21, %v1887_v20 }
 0x1c4   :  { %v1929_v19 = vpop.f32.mrf.mxu0 }
 0x1c5   :  { %v1970_v25 = vpop.f32.mrf.mxu1  ;;  %v1969_v26 = vadd.f32 %v1968_v24, %v1928_v18  ;;  %v1930_v39 = vadd.f32 %v1929_v19, %v1889_v13 }
 0x1c6   :  { %v1931_v27 = vpop.f32.mrf.mxu0 }
 0x1c7   :  { %v1972_v28 = vpop.f32.mrf.mxu1  ;;  %v1975_v29 = vmax.f32 %v1969_v26, 0.0  ;;  %v1971_v41 = vadd.f32 %v1970_v25, %v1930_v39 }
 0x1c8   :  { %v1932_v30 = vpop.f32.mrf.mxu0 }
 0x1c9   :  { %v1973_v31 = vpop.f32.mrf.mxu1  ;;  %v1977_v33 = vpack.c.bf16 %v1975_v29, %v1975_v29  ;;  %v1976_v22 = vmax.f32 %v1971_v41, 0.0 }
 0x1cb   :  { %2694 = vmatmul.mubr.bf16.vlgmr.msra.gmra.mxu0 %v1977_v33  ;;  %v1978_v43 = vpack.c.bf16 %v1976_v22, %v1976_v22 }
 0x1cc   :  { %2718 = vmatpush3.bf16.msra.mxu0 %v3147_v32  ;;  %2733 = vmatprep.mubr.msk.bf16.mxu0 %vm3172_vm0, %v3171_v44 }
 0x1cd   :  { %2719 = vmatprep.subr.bf16.mxu0 %v3171_v44 }
 0x1d0   :  { %2720 = vmatpush3.bf16.msra.mxu0 %v3148_v34 }
 0x1d1   :  { %2721 = vmatprep.subr.bf16.mxu0 %v3171_v44 }
 0x1d4   :  { %2722 = vmatpush3.bf16.msra.mxu0 %v3149_v35 }
 0x1d5   :  { %2723 = vmatprep.subr.bf16.mxu0 %v3171_v44 }
 0x1d8   :  { %2724 = vmatpush3.bf16.msra.mxu0 %v3150_v36 }
 0x1d9   :  { %2725 = vmatprep.subr.bf16.mxu0 %v3171_v44 }
 0x1dc   :  { %2726 = vmatpush3.bf16.msra.mxu0 %v3151_v37 }
 0x1dd   :  { %2727 = vmatprep.subr.bf16.mxu0 %v3171_v44 }
 0x1e0   :  { %2728 = vmatpush3.bf16.msra.mxu0 %v3152_v38 }
 0x1e1   :  { %2729 = vmatprep.subr.bf16.mxu0 %v3171_v44 }
 0x1e4   :  { %2730 = vmatpush3.bf16.msra.mxu0 %v3153_v40 }
 0x1e5   :  { %2731 = vmatprep.subr.bf16.mxu0 %v3171_v44 }
 0x1e8   :  { %2732 = vmatpush3.bf16.msra.mxu0 %v3154_v42 }
 0x1eb   :  { %2734 = vmatmul.mubr.bf16.vlgmr.msra.gmra.mxu0 %v1978_v43 }
 0x28b   :  { %v2084_v47 = vpop.f32.mrf.mxu0 }
 0x28c   :  { %v2085_v48 = vadd.f32 %v2623_v46, %v2084_v47 }
 0x28d   :  { %v2695_v49 = vpop.f32.mrf.mxu0 }
 0x28e   :  { %v2090_v50 = vmax.f32 %v2085_v48, 0.0 }
 0x28f   :  { %v2087_v51 = vpop.f32.mrf.mxu0 }
 0x290   :  { %v2091_v52 = vpack.c.bf16 %v2090_v50, %v2090_v50 }
 0x291   :  { %v2696_v53 = vpop.f32.mrf.mxu0 }
 0x292   :  { %2714 = vmatmul.mubr.bf16.vlgmr.msra.gmra.mxu1 %v2091_v52 }
 0x2ab   :  { %v2308_v54 = vpop.f32.mrf.mxu0 }
 0x2ac   :  { %v2309_v63 = vadd.f32 %v2641_v59, %v2308_v54 }
 0x2ad   :  { %v2735_v55 = vpop.f32.mrf.mxu0 }
 0x2ae   :  { %v2330_v3 = vsel %vm2316_vm1, %v2309_v63, -3e+38 }
 0x2af   :  { %v2311_v44 = vpop.f32.mrf.mxu0 }
 0x2b1   :  { %v2736_v56 = vpop.f32.mrf.mxu0 }
 0x352   :  { %v2197_v60 = vpop.f32.mrf.mxu1 }
 0x353   :  { %v2198_v61 = vadd.f32 %v2632_v57, %v2197_v60 }
 0x354   :  { %v2715_v62 = vpop.f32.mrf.mxu1 }
 0x355   :  { %v2317_v0 = vsel %vm2316_vm1, %v2198_v61, -3e+38 }
 0x356   :  { %2318 = vmax.xlane.f32.xlu0 %v2317_v0  ;;  %v2200_v1 = vpop.f32.mrf.mxu1 }
 0x358   :  { %v2716_v2 = vpop.f32.mrf.mxu1 }
 0x35a   :  { %2331 = vmax.xlane.f32.xlu0 %v2330_v3 }
 0x3df   :  { %v2319_v4 = vpop.xlane.xlu0 %2318 }
 0x3e0   :  { %v2320_v5 = vsub.f32 %v2317_v0, %v2319_v4  ;;  %v2327_v15 = vsub.f32 %v2198_v61, %v2319_v4 }
 0x3e2   :  { %v2321_v6 = vmul.f32 1.442695, %v2320_v5 }
 0x3e3   :  { %v2332_v7 = vpop.xlane.xlu0 %2331 }
 0x3e4   :  { %3163 = vpow2.f32 %v2321_v6  ;;  %v2333_v14 = vsub.f32 %v2330_v3, %v2332_v7  ;;  %v2340_v21 = vsub.f32 %v2309_v63, %v2332_v7 }
 0x3e6   :  { %v2334_v8 = vmul.f32 1.442695, %v2333_v14 }
 0x3e8   :  { %3165 = vpow2.f32 %v2334_v8 }
 0x3f1   :  { %v3164_v9 = vpop.eup %3163 }
 0x3f2   :  { %2323 = vadd.xlane.f32.xlu1 %v3164_v9 }
 0x3f5   :  { %v3166_v10 = vpop.eup %3165 }
 0x3f6   :  { %2336 = vadd.xlane.f32.xlu1 %v3166_v10 }
 0x47b   :  { %v2324_v11 = vpop.xlane.xlu1 %2323 }
 0x47c   :  { %3167 = vlog2.f32 %v2324_v11 }
 0x47f   :  { %v2337_v12 = vpop.xlane.xlu1 %2336 }
 0x480   :  { %3169 = vlog2.f32 %v2337_v12 }
 0x489   :  { %v3168_v13 = vpop.eup %3167 }
 0x48a   :  { %v2326_v16 = vmul.f32 0.6931472, %v3168_v13 }
 0x48c   :  { %v2328_v17 = vsub.f32 %v2327_v15, %v2326_v16 }
 0x48d   :  { %v3170_v20 = vpop.eup %3169 }
 0x48e   :  { %2329 = vst [vmem:[%s4187_s9] sm:$0xff] %v2328_v17  ;;  %v2339_v24 = vmul.f32 0.6931472, %v3170_v20 }
 0x490   :  { %v2341_v18 = vsub.f32 %v2340_v21, %v2339_v24 }
 0x492   :  { %2342 = vst [vmem:[%s4188_s10] sm:$0xff] %v2341_v18 }

</bundles_post_ra>
